<compile_context>
chip_gen: v5e
topology: v5e:2x2
jax: 0.10.0
libtpu: 0.0.40
codegen_flags: <defaults>
</compile_context>

<pallas_src>
import functools

import jax
import jax.numpy as jnp
from jax.experimental import pallas as pl
from jax.experimental.pallas import tpu as pltpu


def _linear_kernel(x_ref, w_ref, b_ref, o_ref):
    """One N-tile of y = x @ W.T + b, full-K reduction in a single MXU dot.

    x_ref: (B, K)   resident activations
    w_ref: (tn, K)  weight slab in PyTorch (out, in) layout
    b_ref: (1, tn)  bias tile
    o_ref: (B, tn)  output tile
    """
    x = x_ref[...].astype(w_ref.dtype)  # no-op for f32 weights; tiny VPU cast for bf16
    y = jax.lax.dot_general(
        x,
        w_ref[...],
        dimension_numbers=(((1,), (1,)), ((), ())),  # contract K on W's last dim
        preferred_element_type=jnp.float32,
    )
    o_ref[...] = (y + b_ref[...]).astype(o_ref.dtype)


def _pick_tn(n: int, weight_itemsize: int) -> int:
    """Per-generation N tile.

    bf16 weights: v6e -> full-N single step; v7x -> 2048 (one tile per TC, even
    split across the 2 TensorCores); v5e/unknown -> 2048 (4 MiB tiles fit the
    16 MiB scoped VMEM default).
    f32 weights: 2048 everywhere (8 MiB tiles; vmem_limit is bumped to cover it).

    Always returns a multiple-of-128 divisor of n, or n itself as a fallback.
    """
    try:
        kind = jax.devices()[0].device_kind.lower()
    except Exception:  # pragma: no cover - defensive
        kind = ""
    if weight_itemsize <= 2:  # bf16 (or narrower) streaming
        want = 4096 if "v6" in kind else 2048
    else:  # f32 streaming
        want = 2048
    want = min(want, n)
    tn = (want // 128) * 128
    while tn >= 128 and n % tn != 0:
        tn -= 128
    if tn < 128:
        tn = n  # full-array block is always legal (block dim == array dim)
    return tn


@functools.partial(jax.jit, static_argnames=("tn",))
def _clip_to_vae_pallas(x, w, b2d, *, tn):
    """y = x @ w.T + b  via a 1-D (over N) Pallas grid, full-K tiles.

    x:   (B, K)  activations (resident in VMEM, fetched once)
    w:   (N, K)  weight in PyTorch (out, in) layout -- streamed as-is, no transpose
    b2d: (1, N)  bias (f32)
    """
    B, K = x.shape
    N = w.shape[0]
    assert w.shape == (N, K)
    assert N % tn == 0, f"tn={tn} must divide N={N}"

    n_steps = N // tn
    w_itemsize = jnp.dtype(w.dtype).itemsize
    x_itemsize = jnp.dtype(x.dtype).itemsize

    # Extra in-flight weight buffer only helps when the grid is long enough
    # (v5e fallback tilings); at 1-2 steps it is pure VMEM cost.
    n_w_bufs = 3 if n_steps >= 4 else 2
    if n_w_bufs == 3:
        w_spec = pl.BlockSpec((tn, K), lambda j: (j, 0), pipeline_mode=pl.Buffered(3))
    else:
        w_spec = pl.BlockSpec((tn, K), lambda j: (j, 0))

    # Scoped-VMEM budget derived from the real footprint (covers the f32
    # 8 MiB-tile case on v5e, whose scoped default is only 16 MiB).
    w_tile_bytes = tn * K * w_itemsize
    x_bytes = B * K * x_itemsize
    b_bytes = N * 4
    out_tile_bytes = B * tn * x_itemsize
    vmem_need = (
        n_w_bufs * w_tile_bytes
        + 2 * x_bytes
        + 2 * (tn * 4)
        + 2 * out_tile_bytes
    )
    vmem_limit = int(max(vmem_need + (4 << 20), 16 << 20))

    cost = pl.CostEstimate(
        flops=2 * B * K * N,
        bytes_accessed=x_bytes + N * K * w_itemsize + b_bytes + B * N * x_itemsize,
        transcendentals=0,
    )

    return pl.pallas_call(
        _linear_kernel,
        out_shape=jax.ShapeDtypeStruct((B, N), x.dtype),
        grid_spec=pltpu.PrefetchScalarGridSpec(
            num_scalar_prefetch=0,
            grid=(n_steps,),
            in_specs=[
                # x: constant block index -> loaded once, stays resident.
                pl.BlockSpec((B, K), lambda j: (0, 0)),
                # weight: (tn, K) row slab per N tile, native (out, in) layout.
                w_spec,
                # bias: matching N tile (tiny DMA; grid is only 1-2 steps).
                pl.BlockSpec((1, tn), lambda j: (0, j)),
            ],
            out_specs=pl.BlockSpec((B, tn), lambda j: (0, j)),
        ),
        compiler_params=pltpu.CompilerParams(
            dimension_semantics=("parallel",),
            vmem_limit_bytes=vmem_limit,
        ),
        cost_estimate=cost,
    )(x, w, b2d)


class ClipToVaeMapper:
    """Pallas-TPU forward of ClipToVaeMapper (nn.Linear(clip_dim, vae_latent_dim)).

    Weight preparation (optional bf16 down-cast) happens ONCE at construction,
    never per forward call, and the PyTorch (out, in) layout is kept as-is.
    """

    def __init__(self, w, b, *, weight_dtype=jnp.bfloat16, tn=None):
        w = jnp.asarray(w)
        b = jnp.asarray(b)
        assert w.ndim == 2 and b.shape == (w.shape[0],)
        self.w = w.astype(weight_dtype)              # (N, K), streamed as-is
        self.b2d = b.astype(jnp.float32).reshape(1, -1)  # f32 bias epilogue
        if tn is None:
            tn = _pick_tn(w.shape[0], jnp.dtype(weight_dtype).itemsize)
        self.tn = tn

    def __call__(self, x):
        return _clip_to_vae_pallas(x, self.w, self.b2d, tn=self.tn)


if __name__ == "__main__":
    # Module defaults: clip_dim=1024, vae_latent_dim=4096; small batch of 2.
    B, CLIP_DIM, VAE_DIM = 2, 1024, 4096

    key = jax.random.PRNGKey(0)
    k_x, k_w, k_b = jax.random.split(key, 3)

    # Deterministic PyTorch-Linear-style init: U(-1/sqrt(in), 1/sqrt(in)).
    bound = 1.0 / (CLIP_DIM ** 0.5)
    w = jax.random.uniform(
        k_w, (VAE_DIM, CLIP_DIM), jnp.float32, minval=-bound, maxval=bound
    )  # PyTorch layout (out, in)
    b = jax.random.uniform(
        k_b, (VAE_DIM,), jnp.float32, minval=-bound, maxval=bound
    )
    x = jax.random.normal(k_x, (B, CLIP_DIM), jnp.float32)

    y_ref = x @ w.T + b  # plain-JAX reference (== nn.Linear forward)

    # Bit-exact f32 weight path.
    mapper_f32 = ClipToVaeMapper(w, b, weight_dtype=jnp.float32)
    y_f32 = jax.block_until_ready(mapper_f32(x))
    assert y_f32.shape == (B, VAE_DIM)
    assert jnp.allclose(y_f32, y_ref, atol=1e-4, rtol=1e-4), "f32 path mismatch"

    # Default bf16 weight-streaming path (f32 accumulation): ~2x less HBM traffic.
    mapper_bf16 = ClipToVaeMapper(w, b)
    y_bf16 = jax.block_until_ready(mapper_bf16(x))
    assert y_bf16.shape == (B, VAE_DIM)
    assert jnp.allclose(y_bf16, y_ref, atol=5e-2, rtol=5e-2), "bf16 path mismatch"

    print("KERNEL_OK")
</pallas_src>

<mosaic_0001>
module attributes {stable_mosaic.version = 11 : i64} {
  func.func @_linear_kernel(%arg0: i32, %arg1: memref<2x1024xf32, #tpu.memory_space<vmem>>, %arg2: memref<2048x1024xf32, #tpu.memory_space<vmem>>, %arg3: memref<1x2048xf32, #tpu.memory_space<vmem>>, %arg4: memref<2x2048xf32, #tpu.memory_space<vmem>>) attributes {dimension_semantics = [#tpu.dimension_semantics<parallel>], iteration_bounds = array<i64: 2>, scalar_prefetch = 0 : i64, scratch_operands = 0 : i64, tpu.core_type = #tpu.core_type<tc>, window_params = [{pipeline_mode = #tpu.pipeline_mode<synchronous>, transform_indices = @transform_0, window_bounds = array<i64: 2, 1024>}, {transform_indices = @transform_1, window_bounds = array<i64: 2048, 1024>}, {transform_indices = @transform_2, window_bounds = array<i64: 1, 2048>}, {transform_indices = @transform_3, window_bounds = array<i64: 2, 2048>}]} {
    %c0 = arith.constant 0 : index
    %c0_0 = arith.constant 0 : index
    %0 = vector.load %arg1[%c0, %c0_0] : memref<2x1024xf32, #tpu.memory_space<vmem>>, vector<2x1024xf32>
    %c0_1 = arith.constant 0 : index
    %c0_2 = arith.constant 0 : index
    %1 = vector.load %arg2[%c0_1, %c0_2] : memref<2048x1024xf32, #tpu.memory_space<vmem>>, vector<2048x1024xf32>
    %cst = arith.constant dense<0.000000e+00> : vector<2x2048xf32>
    %2 = tpu.matmul %0, %1, %cst {dimension_numbers = #tpu.dot_dimension_numbers<[1], [1], [0], [0], [0, 0, 1, 0], [], []>} : vector<2x1024xf32>, vector<2048x1024xf32>, vector<2x2048xf32> -> vector<2x2048xf32>
    %c0_3 = arith.constant 0 : index
    %c0_4 = arith.constant 0 : index
    %3 = vector.load %arg3[%c0_3, %c0_4] : memref<1x2048xf32, #tpu.memory_space<vmem>>, vector<1x2048xf32>
    %4 = vector.broadcast %3 : vector<1x2048xf32> to vector<2x2048xf32>
    %5 = arith.addf %2, %4 : vector<2x2048xf32>
    %c0_5 = arith.constant 0 : index
    %c0_6 = arith.constant 0 : index
    %6 = vector.load %arg4[%c0_5, %c0_6] : memref<2x2048xf32, #tpu.memory_space<vmem>>, vector<2x2048xf32>
    tpu.vector_store %arg4[%c0_5, %c0_6], %5 {strides = array<i32>} : memref<2x2048xf32, #tpu.memory_space<vmem>>, vector<2x2048xf32>,
    return
  }
  func.func @transform_0(%arg0: i32) -> (i32, i32) {
    %c0_i32 = arith.constant 0 : i32
    %c0_i32_0 = arith.constant 0 : i32
    %c0_i32_1 = arith.constant 0 : i32
    return %c0_i32, %c0_i32_0 : i32, i32
  }
  func.func @transform_1(%arg0: i32) -> (i32, i32) {
    %c0_i32 = arith.constant 0 : i32
    %c0_i32_0 = arith.constant 0 : i32
    return %arg0, %c0_i32 : i32, i32
  }
  func.func @transform_2(%arg0: i32) -> (i32, i32) {
    %c0_i32 = arith.constant 0 : i32
    %c0_i32_0 = arith.constant 0 : i32
    return %c0_i32, %arg0 : i32, i32
  }
  func.func @transform_3(%arg0: i32) -> (i32, i32) {
    %c0_i32 = arith.constant 0 : i32
    %c0_i32_0 = arith.constant 0 : i32
    return %c0_i32, %arg0 : i32, i32
  }
}

</mosaic_0001>

<bundles_post_ra>
// kernel: _clip_to_vae_pallas.1
= control target key start
LH: loop header
LB: loop body
LE: loop exit
PB: predicated region body
PF: predicated region fallthrough
CT: control target
= control target key end

     0   :  { %s8088_s0 = inlined_call_operand.hbm [shape: f32[2,1024], index: 0, kind: input, shape index: {}]   ;;  %s8089_s1 = inlined_call_operand.hbm [shape: f32[4096,1024], index: 1, kind: input, shape index: {}]   ;;  %s8090_s2 = inlined_call_operand.hbm [shape: f32[1,4096], index: 2, kind: input, shape index: {}]   ;;  %s8091_s3 = inlined_call_operand.hbm [shape: f32[2,4096], index: 3, kind: output, shape index: {}]  }
   0x1   :  { %8092 = sst [smem:[#allocation12_spill]] %s8088_s0 }
   0x2   :  { %8 = vsyncpa [#allocation3], 0 }
   0x3   :  { %9 = vsyncpa [#allocation6], 0 }
   0x4   :  { %11 = vsyncpa [#allocation6 + $0x1], 0 }
   0x5   :  { %12 = vsyncpa [#allocation4], 0 }
   0x6   :  { %14 = vsyncpa [#allocation4 + $0x1], 0  ;;  %s5413_s12 = smov 0   ;;  %s5415_s13 = smov 0  }
   0x7   :  { %s5417_s14 = smov 0   ;;  %s5419_s15 = smov 0  }
   0x8 LB: > { %s5434_s16 = sadd.s32 1, %s5388_s15   ;;  %s48_s17 = sadd.s32 1, %s5384_s14  ;;  %s5388_s15 = sphi %s5419_s15, %s8103_s15   ;;  %s5384_s14 = sphi %s5417_s14, %s8102_s14   ;;  %s5380_s13 = sphi %s5415_s13, %s8101_s13   ;;  %s5376_s12 = sphi %s5413_s12, %s8100_s12  }
   0x9   : > { %s45_s18 = ssub.s32 %s5388_s15, %s5434_s16  ;;  %p55_p0 = scmp.ne.s32.totalorder %s5384_s14, %s5380_s13 }
   0xa   : > { %p46_p1 = scmp.eq.s32.totalorder %s45_s18, 0  ;;  %p56_p2 = scmp.eq.s32.totalorder %s5388_s15, 0 }
   0xb   : > { %p5132_p4 = scmp.lt.s32.totalorder %s5388_s15, 2  ;;  %s149_s20 = sand.u32 1, %s5388_s15  }
   0xc   : > { %s5445_s19 = scalar_select %p46_p1, %s5384_s14, %s48_s17  }
   0xd   : > { %p57_p5 = por %p56_p2, %p55_p0  ;;  %s151_s21 = sand.u32 1, %s5384_s14  }
   0xe   : > { %s5087_s22 = sshll.u32 %s151_s21, 14  ;;  %s5104_s23 = sshll.u32 %s5388_s15, 14 }
   0xf   : > { %s159_s26 = scalar_lea.hbm %s8089_s1, %s5104_s23  ;;  %s153_s28 = scalar_lea.vmem [#allocation5], %s5087_s22 }
  0x10   : > { %s160_s27 = sshll.u32 %s159_s26, 4  ;;  %s162_s29 = sshll.u32 %s153_s28, 4  ;;  %s161_s27 = int_to_ptr.hbm [resolvable:$true] %s160_s27  ;;  %s163_s29 = int_to_ptr.vmem [resolvable:$true] %s162_s29 }
  0x11   : > { %p5460_p6 = pnand %p5132_p4, %p57_p5  ;;  %s5464_s4 = scalar_lea.sflag [#allocation6], %s149_s20 }
  0x12   : > { %s5228_s5 = sshra.s32 %s161_s27, 4  ;;  %s5235_s9 = scalar_lea.hbm %s8089_s1, 32768  ;;  %s5229_s5 = int_to_ptr.hbm [resolvable:$true] %s5228_s5 }
  0x13   : > { %s5230_s6 = scalar_lea.hbm %s5229_s5, 16384  ;;  %p5232_p8 = pneg %p5460_p6 }
  0x14   : > { %p5231_p7 = scmp.ne.s32.totalorder %s5229_s5, %s5230_s6  ;;  %p5236_p11 = scmp.lt.s32.totalorder %s5229_s5, %s8089_s1 }
  0x15   : > { %p5237_p12 = scmp.lt.s32.totalorder %s5235_s9, %s5230_s6 }
  0x16   : > { %p5233_p9 = pnand %p5232_p8, %p5231_p7 }
  0x17   : > { %p5238_p13 = por %p5237_p12, %p5236_p11 }
  0x18   : > { %p5234_p10 = pneg %p5233_p9 }
  0x1a   : > { %p5239_p1 = pnand %p5238_p13, %p5234_p10 }
  0x1c   : > { %5242 = shalt.err (!%p5239_p1)
}
  0x1d   : > { %s5390_s17 = smov 1024   ;;  %s5391_s18 = smov 64  }
  0x1e   : > { %5123 = dma.hbm_to_vmem [thread:$0]  (!%p5460_p6), %s161_s27, 262144, %s163_s29, %s5464_s4, %s5390_s17, %s5390_s17, %s5391_s18  }
  0x1f   : > { %s5481_s20 = sadd.s32 4294967295, %s5388_s15   ;;  %s5083_s22 = sadd.s32 4294967294, %s5388_s15  }
  0x20   : > { %p61_p2 = scmp.ne.s32.totalorder %s5380_s13, %s5376_s12  ;;  %p62_p4 = scmp.eq.s32.totalorder %s5481_s20, 0 }
  0x21   : > { %p111_p5 = scmp.eq.s32.totalorder %s5481_s20, 1  ;;  %p117_p7 = scmp.eq.s32.totalorder %s5083_s22, 1 }
  0x22   : > { %p5490_p9 = por %p62_p4, %p61_p2  ;;  %p5084_p10 = scmp.ge.s32.totalorder %s5388_s15, 1 }
  0x23   : > { %p5498_p11 = por %p111_p5, %p55_p0  ;;  %p5502_p12 = por %p117_p7, %p61_p2 }
  0x24   : > { %p124_p13 = scmp.lt.s32.totalorder %s5388_s15, 3  ;;  %s8097_s0 = sld [smem:[#allocation12_spill]] }
  0x25   : > { %s5392_s5 = smov [#allocation2]   ;;  %s5091_s7 = sshll.u32 %s151_s21, 4 }
  0x26   : > { %p5510_p1 = pnand %p5084_p10, %p124_p13  ;;  %s138_s6 = sshll.u32 %s5392_s5, 4  ;;  %s139_s6 = int_to_ptr.vmem [resolvable:$true] %s138_s6 }
  0x27   : > { %s5092_s8 = sshll.u32 %s5388_s15, 4  ;;  %s176_s18 = scalar_lea.vmem [#allocation7], %s5091_s7 }
  0x28   : > { %p5116_p0 = pneg %p5510_p1  ;;  %s180_s11 = scalar_lea.hbm %s8090_s2, %s5092_s8 }
  0x29   : > { %s182_s17 = sshll.u32 %s180_s11, 4  ;;  %s184_s22 = sshll.u32 %s176_s18, 4  ;;  %s183_s17 = int_to_ptr.hbm [resolvable:$true] %s182_s17  ;;  %s185_s22 = int_to_ptr.vmem [resolvable:$true] %s184_s22 }
  0x2a   : > { %s136_s28 = sshll.u32 %s8097_s0, 4  ;;  %p5117_p2 = pnand %p5116_p0, %p62_p4  ;;  %s137_s28 = int_to_ptr.hbm [resolvable:$true] %s136_s28 }
  0x2b   : > { %s5288_s26 = sshra.s32 %s183_s17, 4  ;;  %s5295_s0 = scalar_lea.hbm %s8090_s2, 32  ;;  %s5289_s26 = int_to_ptr.hbm [resolvable:$true] %s5288_s26 }
  0x2c   : > { %5119 = dma.hbm_to_vmem [thread:$0]  (!%p5117_p2), %s137_s28, 256, %s139_s6, [#allocation3]  }
  0x2d   : > { %s5290_s21 = scalar_lea.hbm %s5289_s26, 16  ;;  %p5296_p13 = scmp.lt.s32.totalorder %s5289_s26, %s8090_s2 }
  0x2e   : > { %p5291_p5 = scmp.ne.s32.totalorder %s5289_s26, %s5290_s21  ;;  %p5297_p0 = scmp.lt.s32.totalorder %s5295_s0, %s5290_s21 }
  0x30   : > { %p5293_p7 = pnand %p5291_p5, %p5232_p8  ;;  %p5298_p3 = por %p5297_p0, %p5296_p13 }
  0x32   : > { %p5294_p10 = pneg %p5293_p7 }
  0x34   : > { %p5299_p2 = pnand %p5298_p3, %p5294_p10 }
  0x36   : > { %5302 = shalt.err (!%p5299_p2)
}
  0x37   : > { %5126 = dma.hbm_to_vmem [thread:$0]  (!%p5460_p6), %s183_s17, 256, %s185_s22, %s5464_s4  }
  0x38   : > { %193 = sbr.rel (%p5510_p1) target bundleno = 2257 (0x8d1), region = 32 }
  0x3d   : > { %5363 = dma.done.wait (%p62_p4), [#allocation3], 256  }
  0x3e   : > { %5365 = vsyncadd (%p62_p4), [#allocation3], 4294967040  ;;  %s200_s0 = sand.u32 1, %s5481_s20   ;;  %s5544_s28 = sand.u32 1, %s5380_s13  }
  0x3f   : > { %s5095_s6 = sshll.u32 %s5544_s28, 14  ;;  %s201_s30 = scalar_lea.sflag [#allocation6], %s200_s0 }
  0x40   : > { %s5547_s7 = scalar_lea.vmem [#allocation5], %s5095_s6 }
  0x41   : > { %5367 = dma.done.wait (%p5490_p9), %s201_s30, 262400  }
  0x42   : > { %5369 = vsyncadd (%p5490_p9), %s201_s30, 4294704896  ;;  %v370_v0 = vld [vmem:[%s5547_s7 + $0x3d0] sm:$0xff]  ;;  %v368_v1 = vld [vmem:[%s5547_s7 + $0x3c0] sm:$0xff]  ;;  %s5096_s4 = sshll.u32 %s5544_s28, 4  ;;  %s5097_s29 = sshll.u32 %s5544_s28, 5  ;;  %vm4941_vm0 = vcmask 1041408  }
  0x43   : > { %v371_v2 = vld [vmem:[%s5547_s7 + $0x3d8] sm:$0xff]  ;;  %2393 = vmatpush.xpose.msra.mxu2 %v370_v0  ;;  %2353 = vmatpush.xpose.msra.mxu0 %v368_v1  ;;  %v369_v3 = vld [vmem:[%s5547_s7 + $0x3c8] sm:$0xff]  ;;  %v362_v4 = vld [vmem:[%s5547_s7 + $0x390] sm:$0xff]  ;;  %s6270_s23 = scalar_lea.vmem [#allocation7], %s5096_s4  ;;  %vm4943_vm1 = vcmask 1045508   ;;  %vm4945_vm2 = vcmask 1043456  }
  0x44   : > { %2413 = vmatpush.xpose.msra.mxu3 %v371_v2  ;;  %2373 = vmatpush.xpose.msra.mxu1 %v369_v3  ;;  %v360_v5 = vld [vmem:[%s5547_s7 + $0x380] sm:$0xff]  ;;  %v363_v6 = vld [vmem:[%s5547_s7 + $0x398] sm:$0xff]  ;;  %v361_v7 = vld [vmem:[%s5547_s7 + $0x388] sm:$0xff]  ;;  %s6363_s10 = scalar_lea.vmem [#allocation8], %s5097_s29  ;;  %s5105_s11 = sshll.u32 %s5481_s20, 5 }
  0x45   : > { %v354_v8 = vld [vmem:[%s5547_s7 + $0x350] sm:$0xff]  ;;  %v352_v9 = vld [vmem:[%s5547_s7 + $0x340] sm:$0xff]  ;;  %v355_v10 = vld [vmem:[%s5547_s7 + $0x358] sm:$0xff]  ;;  %s4976_s22 = scalar_lea.hbm %s8091_s3, %s5105_s11  ;;  %s4978_s26 = sshll.u32 %s6363_s10, 4  ;;  %s4979_s26 = int_to_ptr.vmem [resolvable:$true] %s4978_s26 }
  0x46   : > { %v353_v11 = vld [vmem:[%s5547_s7 + $0x348] sm:$0xff]  ;;  %v346_v12 = vld [vmem:[%s5547_s7 + $0x310] sm:$0xff]  ;;  %v344_v13 = vld [vmem:[%s5547_s7 + $0x300] sm:$0xff]  ;;  %s4980_s21 = sshll.u32 %s4976_s22, 4  ;;  %s4965_s20 = scalar_lea.sflag [#allocation4], %s5544_s28  ;;  %s4981_s21 = int_to_ptr.hbm [resolvable:$true] %s4980_s21 }
  0x47   : > { %2394 = vmatpush.xpose.msra.mxu2 %v362_v4  ;;  %2354 = vmatpush.xpose.msra.mxu0 %v360_v5  ;;  %v347_v14 = vld [vmem:[%s5547_s7 + $0x318] sm:$0xff]  ;;  %v345_v15 = vld [vmem:[%s5547_s7 + $0x308] sm:$0xff]  ;;  %v338_v16 = vld [vmem:[%s5547_s7 + $0x2d0] sm:$0xff]  ;;  %s5332_s27 = sshra.s32 %s4981_s21, 4  ;;  %s5338_s0 = scalar_lea.hbm %s8091_s3, 64  ;;  %s5333_s27 = int_to_ptr.hbm [resolvable:$true] %s5332_s27 }
  0x48   : > { %2414 = vmatpush.xpose.msra.mxu3 %v363_v6  ;;  %2374 = vmatpush.xpose.msra.mxu1 %v361_v7  ;;  %v336_v17 = vld [vmem:[%s5547_s7 + $0x2c0] sm:$0xff]  ;;  %v339_v18 = vld [vmem:[%s5547_s7 + $0x2d8] sm:$0xff]  ;;  %v337_v19 = vld [vmem:[%s5547_s7 + $0x2c8] sm:$0xff]  ;;  %s5334_s5 = scalar_lea.hbm %s5333_s27, 32  ;;  %p5339_p4 = scmp.lt.s32.totalorder %s5333_s27, %s8091_s3 }
  0x49   : > { %v330_v20 = vld [vmem:[%s5547_s7 + $0x290] sm:$0xff]  ;;  %v328_v21 = vld [vmem:[%s5547_s7 + $0x280] sm:$0xff]  ;;  %v331_v22 = vld [vmem:[%s5547_s7 + $0x298] sm:$0xff]  ;;  %p5335_p3 = scmp.ne.s32.totalorder %s5333_s27, %s5334_s5  ;;  %p5340_p9 = scmp.lt.s32.totalorder %s5338_s0, %s5334_s5 }
  0x4a   : > { %v329_v23 = vld [vmem:[%s5547_s7 + $0x288] sm:$0xff]  ;;  %v322_v24 = vld [vmem:[%s5547_s7 + $0x250] sm:$0xff]  ;;  %v320_v25 = vld [vmem:[%s5547_s7 + $0x240] sm:$0xff] }
  0x4b   : > { %2395 = vmatpush.xpose.msra.mxu2 %v354_v8  ;;  %2355 = vmatpush.xpose.msra.mxu0 %v352_v9  ;;  %v323_v26 = vld [vmem:[%s5547_s7 + $0x258] sm:$0xff]  ;;  %v321_v27 = vld [vmem:[%s5547_s7 + $0x248] sm:$0xff]  ;;  %v314_v28 = vld [vmem:[%s5547_s7 + $0x210] sm:$0xff]  ;;  %p5336_p6 = pnand %p5335_p3, %p5498_p11  ;;  %p5341_p1 = por %p5340_p9, %p5339_p4 }
  0x4c   : > { %2415 = vmatpush.xpose.msra.mxu3 %v355_v10  ;;  %2375 = vmatpush.xpose.msra.mxu1 %v353_v11  ;;  %v312_v29 = vld [vmem:[%s5547_s7 + $0x200] sm:$0xff]  ;;  %v315_v30 = vld [vmem:[%s5547_s7 + $0x218] sm:$0xff]  ;;  %v313_v31 = vld [vmem:[%s5547_s7 + $0x208] sm:$0xff] }
  0x4d   : > { %v306_v32 = vld [vmem:[%s5547_s7 + $0x1d0] sm:$0xff]  ;;  %v304_v33 = vld [vmem:[%s5547_s7 + $0x1c0] sm:$0xff]  ;;  %v307_v34 = vld [vmem:[%s5547_s7 + $0x1d8] sm:$0xff]  ;;  %p5337_p8 = pneg %p5336_p6 }
  0x4e   : > { %v305_v35 = vld [vmem:[%s5547_s7 + $0x1c8] sm:$0xff]  ;;  %v298_v36 = vld [vmem:[%s5547_s7 + $0x190] sm:$0xff]  ;;  %v296_v37 = vld [vmem:[%s5547_s7 + $0x180] sm:$0xff] }
  0x4f   : > { %2396 = vmatpush.xpose.msra.mxu2 %v346_v12  ;;  %2356 = vmatpush.xpose.msra.mxu0 %v344_v13  ;;  %v299_v38 = vld [vmem:[%s5547_s7 + $0x198] sm:$0xff]  ;;  %v297_v39 = vld [vmem:[%s5547_s7 + $0x188] sm:$0xff]  ;;  %v290_v40 = vld [vmem:[%s5547_s7 + $0x150] sm:$0xff]  ;;  %p5342_p5 = pnand %p5341_p1, %p5337_p8 }
  0x50   : > { %2416 = vmatpush.xpose.msra.mxu3 %v347_v14  ;;  %2376 = vmatpush.xpose.msra.mxu1 %v345_v15  ;;  %v288_v41 = vld [vmem:[%s5547_s7 + $0x140] sm:$0xff]  ;;  %v291_v42 = vld [vmem:[%s5547_s7 + $0x158] sm:$0xff]  ;;  %v289_v43 = vld [vmem:[%s5547_s7 + $0x148] sm:$0xff] }
  0x51   : > { %v282_v44 = vld [vmem:[%s5547_s7 + $0x110] sm:$0xff]  ;;  %v280_v45 = vld [vmem:[%s5547_s7 + $0x100] sm:$0xff]  ;;  %v283_v46 = vld [vmem:[%s5547_s7 + $0x118] sm:$0xff] }
  0x52   : > { %v281_v47 = vld [vmem:[%s5547_s7 + $0x108] sm:$0xff]  ;;  %v274_v48 = vld [vmem:[%s5547_s7 + $0xd0] sm:$0xff]  ;;  %v272_v49 = vld [vmem:[%s5547_s7 + $0xc0] sm:$0xff] }
  0x53   : > { %2397 = vmatpush.xpose.msra.mxu2 %v338_v16  ;;  %2357 = vmatpush.xpose.msra.mxu0 %v336_v17  ;;  %v275_v50 = vld [vmem:[%s5547_s7 + $0xd8] sm:$0xff]  ;;  %v273_v51 = vld [vmem:[%s5547_s7 + $0xc8] sm:$0xff]  ;;  %v266_v52 = vld [vmem:[%s5547_s7 + $0x90] sm:$0xff] }
  0x54   : > { %2417 = vmatpush.xpose.msra.mxu3 %v339_v18  ;;  %2377 = vmatpush.xpose.msra.mxu1 %v337_v19  ;;  %v264_v53 = vld [vmem:[%s5547_s7 + $0x80] sm:$0xff]  ;;  %v267_v54 = vld [vmem:[%s5547_s7 + $0x98] sm:$0xff]  ;;  %v265_v55 = vld [vmem:[%s5547_s7 + $0x88] sm:$0xff] }
  0x55   : > { %v258_v56 = vld [vmem:[%s5547_s7 + $0x50] sm:$0xff]  ;;  %v256_v57 = vld [vmem:[%s5547_s7 + $0x40] sm:$0xff]  ;;  %v259_v58 = vld [vmem:[%s5547_s7 + $0x58] sm:$0xff] }
  0x56   : > { %v257_v59 = vld [vmem:[%s5547_s7 + $0x48] sm:$0xff]  ;;  %v250_v60 = vld [vmem:[%s5547_s7 + $0x10] sm:$0xff]  ;;  %v248_v61 = vld [vmem:[%s5547_s7] sm:$0xff] }
  0x57   : > { %2398 = vmatpush.xpose.msra.mxu2 %v330_v20  ;;  %2358 = vmatpush.xpose.msra.mxu0 %v328_v21  ;;  %v374_v62 = vld [vmem:[%s5547_s7 + $0x3f0] sm:$0xff]  ;;  %v251_v63 = vld [vmem:[%s5547_s7 + $0x18] sm:$0xff]  ;;  %v372_v0 = vld [vmem:[%s5547_s7 + $0x3e0] sm:$0xff] }
  0x58   : > { %2418 = vmatpush.xpose.msra.mxu3 %v331_v22  ;;  %2378 = vmatpush.xpose.msra.mxu1 %v329_v23  ;;  %v375_v1 = vld [vmem:[%s5547_s7 + $0x3f8] sm:$0xff]  ;;  %v249_v2 = vld [vmem:[%s5547_s7 + $0x8] sm:$0xff]  ;;  %v366_v4 = vld [vmem:[%s5547_s7 + $0x3b0] sm:$0xff] }
  0x59   : > { %v373_v3 = vld [vmem:[%s5547_s7 + $0x3e8] sm:$0xff]  ;;  %v364_v5 = vld [vmem:[%s5547_s7 + $0x3a0] sm:$0xff]  ;;  %v367_v6 = vld [vmem:[%s5547_s7 + $0x3b8] sm:$0xff] }
  0x5a   : > { %v365_v7 = vld [vmem:[%s5547_s7 + $0x3a8] sm:$0xff]  ;;  %v358_v8 = vld [vmem:[%s5547_s7 + $0x370] sm:$0xff]  ;;  %v356_v9 = vld [vmem:[%s5547_s7 + $0x360] sm:$0xff] }
  0x5b   : > { %2399 = vmatpush.xpose.msra.mxu2 %v322_v24  ;;  %2359 = vmatpush.xpose.msra.mxu0 %v320_v25  ;;  %v359_v10 = vld [vmem:[%s5547_s7 + $0x378] sm:$0xff]  ;;  %v357_v11 = vld [vmem:[%s5547_s7 + $0x368] sm:$0xff]  ;;  %v350_v12 = vld [vmem:[%s5547_s7 + $0x330] sm:$0xff] }
  0x5c   : > { %2419 = vmatpush.xpose.msra.mxu3 %v323_v26  ;;  %2379 = vmatpush.xpose.msra.mxu1 %v321_v27  ;;  %v348_v13 = vld [vmem:[%s5547_s7 + $0x320] sm:$0xff]  ;;  %v351_v14 = vld [vmem:[%s5547_s7 + $0x338] sm:$0xff]  ;;  %v349_v15 = vld [vmem:[%s5547_s7 + $0x328] sm:$0xff] }
  0x5d   : > { %v342_v16 = vld [vmem:[%s5547_s7 + $0x2f0] sm:$0xff]  ;;  %v340_v17 = vld [vmem:[%s5547_s7 + $0x2e0] sm:$0xff]  ;;  %v343_v18 = vld [vmem:[%s5547_s7 + $0x2f8] sm:$0xff] }
  0x5e   : > { %v341_v19 = vld [vmem:[%s5547_s7 + $0x2e8] sm:$0xff]  ;;  %v334_v20 = vld [vmem:[%s5547_s7 + $0x2b0] sm:$0xff]  ;;  %v332_v21 = vld [vmem:[%s5547_s7 + $0x2a0] sm:$0xff] }
  0x5f   : > { %2400 = vmatpush.xpose.msra.mxu2 %v314_v28  ;;  %2360 = vmatpush.xpose.msra.mxu0 %v312_v29  ;;  %v335_v22 = vld [vmem:[%s5547_s7 + $0x2b8] sm:$0xff]  ;;  %v333_v23 = vld [vmem:[%s5547_s7 + $0x2a8] sm:$0xff]  ;;  %v246_v24 = vld [vmem:[#allocation2] sm:$0xff] }
  0x60   : > { %2420 = vmatpush.xpose.msra.mxu3 %v315_v30  ;;  %2380 = vmatpush.xpose.msra.mxu1 %v313_v31  ;;  %v326_v25 = vld [vmem:[%s5547_s7 + $0x270] sm:$0xff]  ;;  %2334 = vst [vmem:[#allocation1] ss:$4 sm:$0xff] %v246_v24  ;;  %v324_v26 = vld [vmem:[%s5547_s7 + $0x260] sm:$0xff]  ;;  %v327_v27 = vld [vmem:[%s5547_s7 + $0x278] sm:$0xff] }
  0x61   : > { %v325_v28 = vld [vmem:[%s5547_s7 + $0x268] sm:$0xff]  ;;  %v318_v29 = vld [vmem:[%s5547_s7 + $0x230] sm:$0xff]  ;;  %v316_v30 = vld [vmem:[%s5547_s7 + $0x220] sm:$0xff] }
  0x62   : > { %v319_v31 = vld [vmem:[%s5547_s7 + $0x238] sm:$0xff] }
  0x63   : > { %2401 = vmatpush.xpose.msra.mxu2 %v306_v32  ;;  %2361 = vmatpush.xpose.msra.mxu0 %v304_v33  ;;  %v317_v32 = vld [vmem:[%s5547_s7 + $0x228] sm:$0xff]  ;;  %v475_v24 = vld [vmem:[%s5547_s7 + $0x718] sm:$0xff] }
  0x64   : > { %2421 = vmatpush.xpose.msra.mxu3 %v307_v34  ;;  %2381 = vmatpush.xpose.msra.mxu1 %v305_v35  ;;  %v247_v34 = vld [vmem:[#allocation2 + $0x8] sm:$0xff]  ;;  %v310_v35 = vld [vmem:[%s5547_s7 + $0x1f0] sm:$0xff] }
  0x65   : > { %2336 = vst [vmem:[#allocation1 + $0x20] ss:$4 sm:$0xff] %v247_v34  ;;  %v457_v34 = vld [vmem:[%s5547_s7 + $0x688] sm:$0xff] }
  0x67   : > { %2402 = vmatpush.xpose.msra.mxu2 %v298_v36  ;;  %2362 = vmatpush.xpose.msra.mxu0 %v296_v37  ;;  %v5649_v33 = vld.sshfl [vmem:[#allocation1 + $0x10] sm:$0xff pattern:$0x73625140]  ;;  %v308_v36 = vld [vmem:[%s5547_s7 + $0x1e0] sm:$0xff] }
  0x68   : > { %2422 = vmatpush.xpose.msra.mxu3 %v299_v38  ;;  %2382 = vmatpush.xpose.msra.mxu1 %v297_v39  ;;  %v311_v37 = vld [vmem:[%s5547_s7 + $0x1f8] sm:$0xff]  ;;  %v5655_v38 = vld.sshfl [vmem:[#allocation1] sm:$0xff pattern:$0x73625140] }
  0x69   : > { %v5657_v39 = vld.sshfl [vmem:[#allocation1 + $0x18] sm:$0xff pattern:$0x73625140] }
  0x6b   : > { %2403 = vmatpush.xpose.msra.mxu2 %v290_v40  ;;  %2363 = vmatpush.xpose.msra.mxu0 %v288_v41  ;;  %v309_v40 = vld [vmem:[%s5547_s7 + $0x1e8] sm:$0xff]  ;;  %v5662_v41 = vld.sshfl [vmem:[#allocation1 + $0x8] sm:$0xff pattern:$0x73625140] }
  0x6c   : > { %2423 = vmatpush.xpose.msra.mxu3 %v291_v42  ;;  %2383 = vmatpush.xpose.msra.mxu1 %v289_v43  ;;  %v302_v42 = vld [vmem:[%s5547_s7 + $0x1b0] sm:$0xff]  ;;  %v300_v43 = vld [vmem:[%s5547_s7 + $0x1a0] sm:$0xff] }
  0x6f   : > { %2404 = vmatpush.xpose.msra.mxu2 %v282_v44  ;;  %2364 = vmatpush.xpose.msra.mxu0 %v280_v45  ;;  %v303_v44 = vld [vmem:[%s5547_s7 + $0x1b8] sm:$0xff]  ;;  %v301_v45 = vld [vmem:[%s5547_s7 + $0x1a8] sm:$0xff] }
  0x70   : > { %2424 = vmatpush.xpose.msra.mxu3 %v283_v46  ;;  %2384 = vmatpush.xpose.msra.mxu1 %v281_v47  ;;  %v294_v46 = vld [vmem:[%s5547_s7 + $0x170] sm:$0xff]  ;;  %v292_v47 = vld [vmem:[%s5547_s7 + $0x160] sm:$0xff] }
  0x73   : > { %2405 = vmatpush.xpose.msra.mxu2 %v274_v48  ;;  %2365 = vmatpush.xpose.msra.mxu0 %v272_v49  ;;  %v295_v48 = vld [vmem:[%s5547_s7 + $0x178] sm:$0xff]  ;;  %v293_v49 = vld [vmem:[%s5547_s7 + $0x168] sm:$0xff] }
  0x74   : > { %2425 = vmatpush.xpose.msra.mxu3 %v275_v50  ;;  %2385 = vmatpush.xpose.msra.mxu1 %v273_v51  ;;  %v286_v50 = vld [vmem:[%s5547_s7 + $0x130] sm:$0xff]  ;;  %v284_v51 = vld [vmem:[%s5547_s7 + $0x120] sm:$0xff] }
  0x77   : > { %2406 = vmatpush.xpose.msra.mxu2 %v266_v52  ;;  %2366 = vmatpush.xpose.msra.mxu0 %v264_v53  ;;  %v287_v52 = vld [vmem:[%s5547_s7 + $0x138] sm:$0xff]  ;;  %v285_v53 = vld [vmem:[%s5547_s7 + $0x128] sm:$0xff] }
  0x78   : > { %2426 = vmatpush.xpose.msra.mxu3 %v267_v54  ;;  %2386 = vmatpush.xpose.msra.mxu1 %v265_v55  ;;  %v278_v54 = vld [vmem:[%s5547_s7 + $0xf0] sm:$0xff]  ;;  %v276_v55 = vld [vmem:[%s5547_s7 + $0xe0] sm:$0xff] }
  0x7b   : > { %2407 = vmatpush.xpose.msra.mxu2 %v258_v56  ;;  %2367 = vmatpush.xpose.msra.mxu0 %v256_v57  ;;  %v279_v56 = vld [vmem:[%s5547_s7 + $0xf8] sm:$0xff]  ;;  %v277_v57 = vld [vmem:[%s5547_s7 + $0xe8] sm:$0xff] }
  0x7c   : > { %2427 = vmatpush.xpose.msra.mxu3 %v259_v58  ;;  %2387 = vmatpush.xpose.msra.mxu1 %v257_v59  ;;  %v270_v58 = vld [vmem:[%s5547_s7 + $0xb0] sm:$0xff]  ;;  %v268_v59 = vld [vmem:[%s5547_s7 + $0xa0] sm:$0xff] }
  0x7f   : > { %2408 = vmatpush.xpose.msra.mxu2 %v250_v60  ;;  %2368 = vmatpush.xpose.msra.mxu0 %v248_v61  ;;  %v271_v60 = vld [vmem:[%s5547_s7 + $0xb8] sm:$0xff]  ;;  %v269_v61 = vld [vmem:[%s5547_s7 + $0xa8] sm:$0xff] }
  0x80   : > { %2428 = vmatpush.xpose.msra.mxu3 %v251_v63  ;;  %2388 = vmatpush.xpose.msra.mxu1 %v249_v2  ;;  %v260_v63 = vld [vmem:[%s5547_s7 + $0x60] sm:$0xff]  ;;  %v254_v2 = vld [vmem:[%s5547_s7 + $0x30] sm:$0xff] }
  0x82   : > { %2409 = vmatmul.f32.vlgmr.msra.gmra.mxu2 %v5649_v33  ;;  %2369 = vmatmul.f32.vlgmr.msra.gmra.mxu0 %v5655_v38 }
  0x83   : > { %2473 = vmatpush.xpose.msrb.mxu2 %v374_v62  ;;  %2433 = vmatpush.xpose.msrb.mxu0 %v372_v0  ;;  %v262_v62 = vld [vmem:[%s5547_s7 + $0x70] sm:$0xff]  ;;  %v263_v0 = vld [vmem:[%s5547_s7 + $0x78] sm:$0xff] }
  0x84   : > { %2493 = vmatpush.xpose.msrb.mxu3 %v375_v1  ;;  %2453 = vmatpush.xpose.msrb.mxu1 %v373_v3  ;;  %v261_v1 = vld [vmem:[%s5547_s7 + $0x68] sm:$0xff]  ;;  %v498_v3 = vld [vmem:[%s5547_s7 + $0x7d0] sm:$0xff] }
  0x85   : > { %2429 = vmatmul.f32.vlgmr.msra.gmra.mxu3 %v5657_v39  ;;  %2389 = vmatmul.f32.vlgmr.msra.gmra.mxu1 %v5662_v41 }
  0x87   : > { %2474 = vmatpush.xpose.msrb.mxu2 %v366_v4  ;;  %2434 = vmatpush.xpose.msrb.mxu0 %v364_v5  ;;  %v252_v4 = vld [vmem:[%s5547_s7 + $0x20] sm:$0xff]  ;;  %v255_v5 = vld [vmem:[%s5547_s7 + $0x38] sm:$0xff] }
  0x88   : > { %2494 = vmatpush.xpose.msrb.mxu3 %v367_v6  ;;  %2454 = vmatpush.xpose.msrb.mxu1 %v365_v7  ;;  %v496_v6 = vld [vmem:[%s5547_s7 + $0x7c0] sm:$0xff]  ;;  %v499_v7 = vld [vmem:[%s5547_s7 + $0x7d8] sm:$0xff] }
  0x8b   : > { %2475 = vmatpush.xpose.msrb.mxu2 %v358_v8  ;;  %2435 = vmatpush.xpose.msrb.mxu0 %v356_v9  ;;  %v253_v8 = vld [vmem:[%s5547_s7 + $0x28] sm:$0xff] }
  0x8c   : > { %2495 = vmatpush.xpose.msrb.mxu3 %v359_v10  ;;  %2455 = vmatpush.xpose.msrb.mxu1 %v357_v11  ;;  %v497_v9 = vld [vmem:[%s5547_s7 + $0x7c8] sm:$0xff]  ;;  %v5697_v10 = vld.sshfl [vmem:[#allocation1 + $0x30] sm:$0xff pattern:$0x73625140]  ;;  %v490_v11 = vld [vmem:[%s5547_s7 + $0x790] sm:$0xff] }
  0x8f   : > { %2476 = vmatpush.xpose.msrb.mxu2 %v350_v12  ;;  %2436 = vmatpush.xpose.msrb.mxu0 %v348_v13  ;;  %v5700_v12 = vld.sshfl [vmem:[#allocation1 + $0x20] sm:$0xff pattern:$0x73625140]  ;;  %v488_v13 = vld [vmem:[%s5547_s7 + $0x780] sm:$0xff] }
  0x90   : > { %2496 = vmatpush.xpose.msrb.mxu3 %v351_v14  ;;  %2456 = vmatpush.xpose.msrb.mxu1 %v349_v15  ;;  %v5703_v14 = vld.sshfl [vmem:[#allocation1 + $0x38] sm:$0xff pattern:$0x73625140]  ;;  %v491_v15 = vld [vmem:[%s5547_s7 + $0x798] sm:$0xff] }
  0x93   : > { %2477 = vmatpush.xpose.msrb.mxu2 %v342_v16  ;;  %2437 = vmatpush.xpose.msrb.mxu0 %v340_v17  ;;  %v5707_v16 = vld.sshfl [vmem:[#allocation1 + $0x28] sm:$0xff pattern:$0x73625140]  ;;  %v489_v17 = vld [vmem:[%s5547_s7 + $0x788] sm:$0xff] }
  0x94   : > { %2497 = vmatpush.xpose.msrb.mxu3 %v343_v18  ;;  %2457 = vmatpush.xpose.msrb.mxu1 %v341_v19  ;;  %v482_v18 = vld [vmem:[%s5547_s7 + $0x750] sm:$0xff]  ;;  %v480_v19 = vld [vmem:[%s5547_s7 + $0x740] sm:$0xff] }
  0x97   : > { %2478 = vmatpush.xpose.msrb.mxu2 %v334_v20  ;;  %2438 = vmatpush.xpose.msrb.mxu0 %v332_v21  ;;  %v483_v20 = vld [vmem:[%s5547_s7 + $0x758] sm:$0xff]  ;;  %v481_v21 = vld [vmem:[%s5547_s7 + $0x748] sm:$0xff] }
  0x98   : > { %2498 = vmatpush.xpose.msrb.mxu3 %v335_v22  ;;  %2458 = vmatpush.xpose.msrb.mxu1 %v333_v23  ;;  %v474_v22 = vld [vmem:[%s5547_s7 + $0x710] sm:$0xff]  ;;  %v472_v23 = vld [vmem:[%s5547_s7 + $0x700] sm:$0xff] }
  0x9b   : > { %2479 = vmatpush.xpose.msrb.mxu2 %v326_v25  ;;  %2439 = vmatpush.xpose.msrb.mxu0 %v324_v26  ;;  %v473_v25 = vld [vmem:[%s5547_s7 + $0x708] sm:$0xff]  ;;  %v466_v26 = vld [vmem:[%s5547_s7 + $0x6d0] sm:$0xff] }
  0x9c   : > { %2499 = vmatpush.xpose.msrb.mxu3 %v327_v27  ;;  %2459 = vmatpush.xpose.msrb.mxu1 %v325_v28  ;;  %v464_v27 = vld [vmem:[%s5547_s7 + $0x6c0] sm:$0xff]  ;;  %v467_v28 = vld [vmem:[%s5547_s7 + $0x6d8] sm:$0xff] }
  0x9f   : > { %2480 = vmatpush.xpose.msrb.mxu2 %v318_v29  ;;  %2440 = vmatpush.xpose.msrb.mxu0 %v316_v30  ;;  %v465_v29 = vld [vmem:[%s5547_s7 + $0x6c8] sm:$0xff]  ;;  %v458_v30 = vld [vmem:[%s5547_s7 + $0x690] sm:$0xff] }
  0xa0   : > { %2500 = vmatpush.xpose.msrb.mxu3 %v319_v31  ;;  %2460 = vmatpush.xpose.msrb.mxu1 %v317_v32  ;;  %v456_v31 = vld [vmem:[%s5547_s7 + $0x680] sm:$0xff]  ;;  %v459_v32 = vld [vmem:[%s5547_s7 + $0x698] sm:$0xff] }
  0xa3   : > { %2481 = vmatpush.xpose.msrb.mxu2 %v310_v35  ;;  %2441 = vmatpush.xpose.msrb.mxu0 %v308_v36  ;;  %v450_v35 = vld [vmem:[%s5547_s7 + $0x650] sm:$0xff]  ;;  %v448_v36 = vld [vmem:[%s5547_s7 + $0x640] sm:$0xff] }
  0xa4   : > { %2501 = vmatpush.xpose.msrb.mxu3 %v311_v37  ;;  %2461 = vmatpush.xpose.msrb.mxu1 %v309_v40  ;;  %v451_v37 = vld [vmem:[%s5547_s7 + $0x658] sm:$0xff]  ;;  %v449_v40 = vld [vmem:[%s5547_s7 + $0x648] sm:$0xff] }
  0xa7   : > { %2482 = vmatpush.xpose.msrb.mxu2 %v302_v42  ;;  %2442 = vmatpush.xpose.msrb.mxu0 %v300_v43  ;;  %v442_v42 = vld [vmem:[%s5547_s7 + $0x610] sm:$0xff]  ;;  %v440_v43 = vld [vmem:[%s5547_s7 + $0x600] sm:$0xff] }
  0xa8   : > { %2502 = vmatpush.xpose.msrb.mxu3 %v303_v44  ;;  %2462 = vmatpush.xpose.msrb.mxu1 %v301_v45  ;;  %v443_v44 = vld [vmem:[%s5547_s7 + $0x618] sm:$0xff]  ;;  %v441_v45 = vld [vmem:[%s5547_s7 + $0x608] sm:$0xff] }
  0xab   : > { %2483 = vmatpush.xpose.msrb.mxu2 %v294_v46  ;;  %2443 = vmatpush.xpose.msrb.mxu0 %v292_v47  ;;  %v434_v46 = vld [vmem:[%s5547_s7 + $0x5d0] sm:$0xff]  ;;  %v432_v47 = vld [vmem:[%s5547_s7 + $0x5c0] sm:$0xff] }
  0xac   : > { %2503 = vmatpush.xpose.msrb.mxu3 %v295_v48  ;;  %2463 = vmatpush.xpose.msrb.mxu1 %v293_v49  ;;  %v435_v48 = vld [vmem:[%s5547_s7 + $0x5d8] sm:$0xff]  ;;  %v433_v49 = vld [vmem:[%s5547_s7 + $0x5c8] sm:$0xff] }
  0xaf   : > { %2484 = vmatpush.xpose.msrb.mxu2 %v286_v50  ;;  %2444 = vmatpush.xpose.msrb.mxu0 %v284_v51  ;;  %v426_v50 = vld [vmem:[%s5547_s7 + $0x590] sm:$0xff]  ;;  %v424_v51 = vld [vmem:[%s5547_s7 + $0x580] sm:$0xff] }
  0xb0   : > { %2504 = vmatpush.xpose.msrb.mxu3 %v287_v52  ;;  %2464 = vmatpush.xpose.msrb.mxu1 %v285_v53  ;;  %v427_v52 = vld [vmem:[%s5547_s7 + $0x598] sm:$0xff]  ;;  %v425_v53 = vld [vmem:[%s5547_s7 + $0x588] sm:$0xff] }
  0xb3   : > { %2485 = vmatpush.xpose.msrb.mxu2 %v278_v54  ;;  %2445 = vmatpush.xpose.msrb.mxu0 %v276_v55  ;;  %v418_v54 = vld [vmem:[%s5547_s7 + $0x550] sm:$0xff]  ;;  %v416_v55 = vld [vmem:[%s5547_s7 + $0x540] sm:$0xff] }
  0xb4   : > { %2505 = vmatpush.xpose.msrb.mxu3 %v279_v56  ;;  %2465 = vmatpush.xpose.msrb.mxu1 %v277_v57  ;;  %v419_v56 = vld [vmem:[%s5547_s7 + $0x558] sm:$0xff]  ;;  %v417_v57 = vld [vmem:[%s5547_s7 + $0x548] sm:$0xff] }
  0xb7   : > { %2486 = vmatpush.xpose.msrb.mxu2 %v270_v58  ;;  %2446 = vmatpush.xpose.msrb.mxu0 %v268_v59  ;;  %v410_v58 = vld [vmem:[%s5547_s7 + $0x510] sm:$0xff]  ;;  %v408_v59 = vld [vmem:[%s5547_s7 + $0x500] sm:$0xff] }
  0xb8   : > { %2506 = vmatpush.xpose.msrb.mxu3 %v271_v60  ;;  %2466 = vmatpush.xpose.msrb.mxu1 %v269_v61  ;;  %v411_v60 = vld [vmem:[%s5547_s7 + $0x518] sm:$0xff]  ;;  %v409_v61 = vld [vmem:[%s5547_s7 + $0x508] sm:$0xff] }
  0xbb   : > { %2487 = vmatpush.xpose.msrb.mxu2 %v262_v62  ;;  %2447 = vmatpush.xpose.msrb.mxu0 %v260_v63  ;;  %v402_v62 = vld [vmem:[%s5547_s7 + $0x4d0] sm:$0xff]  ;;  %v400_v63 = vld [vmem:[%s5547_s7 + $0x4c0] sm:$0xff] }
  0xbc   : > { %2507 = vmatpush.xpose.msrb.mxu3 %v263_v0  ;;  %2467 = vmatpush.xpose.msrb.mxu1 %v261_v1  ;;  %v403_v0 = vld [vmem:[%s5547_s7 + $0x4d8] sm:$0xff]  ;;  %v401_v1 = vld [vmem:[%s5547_s7 + $0x4c8] sm:$0xff] }
  0xbf   : > { %2488 = vmatpush.xpose.msrb.mxu2 %v254_v2  ;;  %2448 = vmatpush.xpose.msrb.mxu0 %v252_v4  ;;  %v394_v2 = vld [vmem:[%s5547_s7 + $0x490] sm:$0xff]  ;;  %v395_v4 = vld [vmem:[%s5547_s7 + $0x498] sm:$0xff] }
  0xc0   : > { %2508 = vmatpush.xpose.msrb.mxu3 %v255_v5  ;;  %2468 = vmatpush.xpose.msrb.mxu1 %v253_v8  ;;  %v393_v5 = vld [vmem:[%s5547_s7 + $0x488] sm:$0xff]  ;;  %v387_v8 = vld [vmem:[%s5547_s7 + $0x458] sm:$0xff] }
  0xc2   : > { %2489 = vmatmul.f32.vlgmr.msrb.gmra.mxu2 %v5697_v10  ;;  %2449 = vmatmul.f32.vlgmr.msrb.gmra.mxu0 %v5700_v12 }
  0xc3   : > { %2553 = vmatpush.xpose.msra.mxu2 %v498_v3  ;;  %2513 = vmatpush.xpose.msra.mxu0 %v496_v6  ;;  %v392_v3 = vld [vmem:[%s5547_s7 + $0x480] sm:$0xff]  ;;  %v386_v6 = vld [vmem:[%s5547_s7 + $0x450] sm:$0xff] }
  0xc4   : > { %2573 = vmatpush.xpose.msra.mxu3 %v499_v7  ;;  %2533 = vmatpush.xpose.msra.mxu1 %v497_v9  ;;  %v384_v7 = vld [vmem:[%s5547_s7 + $0x440] sm:$0xff]  ;;  %v385_v9 = vld [vmem:[%s5547_s7 + $0x448] sm:$0xff] }
  0xc5   : > { %2509 = vmatmul.f32.vlgmr.msrb.gmra.mxu3 %v5703_v14  ;;  %2469 = vmatmul.f32.vlgmr.msrb.gmra.mxu1 %v5707_v16 }
  0xc7   : > { %2554 = vmatpush.xpose.msra.mxu2 %v490_v11  ;;  %2514 = vmatpush.xpose.msra.mxu0 %v488_v13  ;;  %v378_v11 = vld [vmem:[%s5547_s7 + $0x410] sm:$0xff] }
  0xc8   : > { %2574 = vmatpush.xpose.msra.mxu3 %v491_v15  ;;  %2534 = vmatpush.xpose.msra.mxu1 %v489_v17  ;;  %v502_v13 = vld [vmem:[%s5547_s7 + $0x7f0] sm:$0xff]  ;;  %v376_v15 = vld [vmem:[%s5547_s7 + $0x400] sm:$0xff]  ;;  %v379_v17 = vld [vmem:[%s5547_s7 + $0x418] sm:$0xff] }
  0xcb   : > { %2555 = vmatpush.xpose.msra.mxu2 %v482_v18  ;;  %2515 = vmatpush.xpose.msra.mxu0 %v480_v19  ;;  %v500_v18 = vld [vmem:[%s5547_s7 + $0x7e0] sm:$0xff]  ;;  %v503_v19 = vld [vmem:[%s5547_s7 + $0x7f8] sm:$0xff] }
  0xcc   : > { %2575 = vmatpush.xpose.msra.mxu3 %v483_v20  ;;  %2535 = vmatpush.xpose.msra.mxu1 %v481_v21  ;;  %v377_v20 = vld [vmem:[%s5547_s7 + $0x408] sm:$0xff] }
  0xcd   : > { %v501_v21 = vld [vmem:[%s5547_s7 + $0x7e8] sm:$0xff] }
  0xcf   : > { %2556 = vmatpush.xpose.msra.mxu2 %v474_v22  ;;  %2516 = vmatpush.xpose.msra.mxu0 %v472_v23  ;;  %v494_v22 = vld [vmem:[%s5547_s7 + $0x7b0] sm:$0xff]  ;;  %v492_v23 = vld [vmem:[%s5547_s7 + $0x7a0] sm:$0xff] }
  0xd0   : > { %2576 = vmatpush.xpose.msra.mxu3 %v475_v24  ;;  %2536 = vmatpush.xpose.msra.mxu1 %v473_v25  ;;  %v495_v24 = vld [vmem:[%s5547_s7 + $0x7b8] sm:$0xff]  ;;  %v493_v25 = vld [vmem:[%s5547_s7 + $0x7a8] sm:$0xff] }
  0xd3   : > { %2557 = vmatpush.xpose.msra.mxu2 %v466_v26  ;;  %2517 = vmatpush.xpose.msra.mxu0 %v464_v27  ;;  %v486_v26 = vld [vmem:[%s5547_s7 + $0x770] sm:$0xff]  ;;  %v484_v27 = vld [vmem:[%s5547_s7 + $0x760] sm:$0xff] }
  0xd4   : > { %2577 = vmatpush.xpose.msra.mxu3 %v467_v28  ;;  %2537 = vmatpush.xpose.msra.mxu1 %v465_v29  ;;  %v487_v28 = vld [vmem:[%s5547_s7 + $0x778] sm:$0xff]  ;;  %v485_v29 = vld [vmem:[%s5547_s7 + $0x768] sm:$0xff] }
  0xd7   : > { %2558 = vmatpush.xpose.msra.mxu2 %v458_v30  ;;  %2518 = vmatpush.xpose.msra.mxu0 %v456_v31  ;;  %v478_v30 = vld [vmem:[%s5547_s7 + $0x730] sm:$0xff]  ;;  %v476_v31 = vld [vmem:[%s5547_s7 + $0x720] sm:$0xff] }
  0xd8   : > { %2578 = vmatpush.xpose.msra.mxu3 %v459_v32  ;;  %2538 = vmatpush.xpose.msra.mxu1 %v457_v34  ;;  %v479_v32 = vld [vmem:[%s5547_s7 + $0x738] sm:$0xff]  ;;  %v477_v34 = vld [vmem:[%s5547_s7 + $0x728] sm:$0xff] }
  0xdb   : > { %2559 = vmatpush.xpose.msra.mxu2 %v450_v35  ;;  %2519 = vmatpush.xpose.msra.mxu0 %v448_v36  ;;  %v470_v35 = vld [vmem:[%s5547_s7 + $0x6f0] sm:$0xff]  ;;  %v468_v36 = vld [vmem:[%s5547_s7 + $0x6e0] sm:$0xff] }
  0xdc   : > { %2579 = vmatpush.xpose.msra.mxu3 %v451_v37  ;;  %2539 = vmatpush.xpose.msra.mxu1 %v449_v40  ;;  %v471_v37 = vld [vmem:[%s5547_s7 + $0x6f8] sm:$0xff]  ;;  %v469_v40 = vld [vmem:[%s5547_s7 + $0x6e8] sm:$0xff] }
  0xdf   : > { %2560 = vmatpush.xpose.msra.mxu2 %v442_v42  ;;  %2520 = vmatpush.xpose.msra.mxu0 %v440_v43  ;;  %v462_v42 = vld [vmem:[%s5547_s7 + $0x6b0] sm:$0xff]  ;;  %v460_v43 = vld [vmem:[%s5547_s7 + $0x6a0] sm:$0xff] }
  0xe0   : > { %2580 = vmatpush.xpose.msra.mxu3 %v443_v44  ;;  %2540 = vmatpush.xpose.msra.mxu1 %v441_v45  ;;  %v463_v44 = vld [vmem:[%s5547_s7 + $0x6b8] sm:$0xff]  ;;  %v461_v45 = vld [vmem:[%s5547_s7 + $0x6a8] sm:$0xff] }
  0xe3   : > { %2561 = vmatpush.xpose.msra.mxu2 %v434_v46  ;;  %2521 = vmatpush.xpose.msra.mxu0 %v432_v47  ;;  %v454_v46 = vld [vmem:[%s5547_s7 + $0x670] sm:$0xff]  ;;  %v452_v47 = vld [vmem:[%s5547_s7 + $0x660] sm:$0xff] }
  0xe4   : > { %2581 = vmatpush.xpose.msra.mxu3 %v435_v48  ;;  %2541 = vmatpush.xpose.msra.mxu1 %v433_v49  ;;  %v455_v48 = vld [vmem:[%s5547_s7 + $0x678] sm:$0xff]  ;;  %v453_v49 = vld [vmem:[%s5547_s7 + $0x668] sm:$0xff] }
  0xe7   : > { %2562 = vmatpush.xpose.msra.mxu2 %v426_v50  ;;  %2522 = vmatpush.xpose.msra.mxu0 %v424_v51  ;;  %v446_v50 = vld [vmem:[%s5547_s7 + $0x630] sm:$0xff]  ;;  %v444_v51 = vld [vmem:[%s5547_s7 + $0x620] sm:$0xff] }
  0xe8   : > { %2582 = vmatpush.xpose.msra.mxu3 %v427_v52  ;;  %2542 = vmatpush.xpose.msra.mxu1 %v425_v53  ;;  %v447_v52 = vld [vmem:[%s5547_s7 + $0x638] sm:$0xff]  ;;  %v445_v53 = vld [vmem:[%s5547_s7 + $0x628] sm:$0xff] }
  0xeb   : > { %2563 = vmatpush.xpose.msra.mxu2 %v418_v54  ;;  %2523 = vmatpush.xpose.msra.mxu0 %v416_v55  ;;  %v438_v54 = vld [vmem:[%s5547_s7 + $0x5f0] sm:$0xff]  ;;  %v436_v55 = vld [vmem:[%s5547_s7 + $0x5e0] sm:$0xff] }
  0xec   : > { %2583 = vmatpush.xpose.msra.mxu3 %v419_v56  ;;  %2543 = vmatpush.xpose.msra.mxu1 %v417_v57  ;;  %v439_v56 = vld [vmem:[%s5547_s7 + $0x5f8] sm:$0xff]  ;;  %v437_v57 = vld [vmem:[%s5547_s7 + $0x5e8] sm:$0xff] }
  0xef   : > { %2564 = vmatpush.xpose.msra.mxu2 %v410_v58  ;;  %2524 = vmatpush.xpose.msra.mxu0 %v408_v59  ;;  %v430_v58 = vld [vmem:[%s5547_s7 + $0x5b0] sm:$0xff]  ;;  %v428_v59 = vld [vmem:[%s5547_s7 + $0x5a0] sm:$0xff] }
  0xf0   : > { %2584 = vmatpush.xpose.msra.mxu3 %v411_v60  ;;  %2544 = vmatpush.xpose.msra.mxu1 %v409_v61  ;;  %v431_v60 = vld [vmem:[%s5547_s7 + $0x5b8] sm:$0xff]  ;;  %v429_v61 = vld [vmem:[%s5547_s7 + $0x5a8] sm:$0xff] }
  0xf3   : > { %2565 = vmatpush.xpose.msra.mxu2 %v402_v62  ;;  %2525 = vmatpush.xpose.msra.mxu0 %v400_v63  ;;  %v422_v62 = vld [vmem:[%s5547_s7 + $0x570] sm:$0xff]  ;;  %v420_v63 = vld [vmem:[%s5547_s7 + $0x560] sm:$0xff] }
  0xf4   : > { %2585 = vmatpush.xpose.msra.mxu3 %v403_v0  ;;  %2545 = vmatpush.xpose.msra.mxu1 %v401_v1  ;;  %v423_v0 = vld [vmem:[%s5547_s7 + $0x578] sm:$0xff]  ;;  %v421_v1 = vld [vmem:[%s5547_s7 + $0x568] sm:$0xff] }
  0xf7   : > { %2566 = vmatpush.xpose.msra.mxu2 %v394_v2  ;;  %2526 = vmatpush.xpose.msra.mxu0 %v392_v3  ;;  %v414_v2 = vld [vmem:[%s5547_s7 + $0x530] sm:$0xff]  ;;  %v412_v3 = vld [vmem:[%s5547_s7 + $0x520] sm:$0xff] }
  0xf8   : > { %2586 = vmatpush.xpose.msra.mxu3 %v395_v4  ;;  %2546 = vmatpush.xpose.msra.mxu1 %v393_v5  ;;  %v415_v4 = vld [vmem:[%s5547_s7 + $0x538] sm:$0xff]  ;;  %v413_v5 = vld [vmem:[%s5547_s7 + $0x528] sm:$0xff] }
  0xfb   : > { %2567 = vmatpush.xpose.msra.mxu2 %v386_v6  ;;  %2527 = vmatpush.xpose.msra.mxu0 %v384_v7  ;;  %v406_v6 = vld [vmem:[%s5547_s7 + $0x4f0] sm:$0xff]  ;;  %v404_v7 = vld [vmem:[%s5547_s7 + $0x4e0] sm:$0xff] }
  0xfc   : > { %2587 = vmatpush.xpose.msra.mxu3 %v387_v8  ;;  %2547 = vmatpush.xpose.msra.mxu1 %v385_v9  ;;  %v407_v8 = vld [vmem:[%s5547_s7 + $0x4f8] sm:$0xff]  ;;  %v405_v9 = vld [vmem:[%s5547_s7 + $0x4e8] sm:$0xff] }
  0xff   : > { %2568 = vmatpush.xpose.msra.mxu2 %v378_v11  ;;  %2528 = vmatpush.xpose.msra.mxu0 %v376_v15  ;;  %v398_v11 = vld [vmem:[%s5547_s7 + $0x4b0] sm:$0xff]  ;;  %v399_v15 = vld [vmem:[%s5547_s7 + $0x4b8] sm:$0xff] }
 0x100   : > { %2588 = vmatpush.xpose.msra.mxu3 %v379_v17  ;;  %2548 = vmatpush.xpose.msra.mxu1 %v377_v20  ;;  %v397_v17 = vld [vmem:[%s5547_s7 + $0x4a8] sm:$0xff]  ;;  %v391_v20 = vld [vmem:[%s5547_s7 + $0x478] sm:$0xff] }
 0x102   : > { %2569 = vmatmul.f32.vlgmr.msra.gmra.mxu2 %v5649_v33  ;;  %2529 = vmatmul.f32.vlgmr.msra.gmra.mxu0 %v5655_v38 }
 0x103   : > { %2633 = vmatpush.xpose.msrb.mxu2 %v502_v13  ;;  %2593 = vmatpush.xpose.msrb.mxu0 %v500_v18  ;;  %v396_v13 = vld [vmem:[%s5547_s7 + $0x4a0] sm:$0xff]  ;;  %v390_v18 = vld [vmem:[%s5547_s7 + $0x470] sm:$0xff] }
 0x104   : > { %2653 = vmatpush.xpose.msrb.mxu3 %v503_v19  ;;  %2613 = vmatpush.xpose.msrb.mxu1 %v501_v21  ;;  %v388_v19 = vld [vmem:[%s5547_s7 + $0x460] sm:$0xff]  ;;  %v389_v21 = vld [vmem:[%s5547_s7 + $0x468] sm:$0xff] }
 0x105   : > { %2589 = vmatmul.f32.vlgmr.msra.gmra.mxu3 %v5657_v39  ;;  %2549 = vmatmul.f32.vlgmr.msra.gmra.mxu1 %v5662_v41 }
 0x107   : > { %2634 = vmatpush.xpose.msrb.mxu2 %v494_v22  ;;  %2594 = vmatpush.xpose.msrb.mxu0 %v492_v23  ;;  %v382_v22 = vld [vmem:[%s5547_s7 + $0x430] sm:$0xff] }
 0x108   : > { %2654 = vmatpush.xpose.msrb.mxu3 %v495_v24  ;;  %2614 = vmatpush.xpose.msrb.mxu1 %v493_v25  ;;  %v626_v23 = vld [vmem:[%s5547_s7 + $0xbd0] sm:$0xff]  ;;  %v380_v24 = vld [vmem:[%s5547_s7 + $0x420] sm:$0xff]  ;;  %v383_v25 = vld [vmem:[%s5547_s7 + $0x438] sm:$0xff] }
 0x10b   : > { %2635 = vmatpush.xpose.msrb.mxu2 %v486_v26  ;;  %2595 = vmatpush.xpose.msrb.mxu0 %v484_v27  ;;  %v624_v26 = vld [vmem:[%s5547_s7 + $0xbc0] sm:$0xff]  ;;  %v627_v27 = vld [vmem:[%s5547_s7 + $0xbd8] sm:$0xff] }
 0x10c   : > { %2655 = vmatpush.xpose.msrb.mxu3 %v487_v28  ;;  %2615 = vmatpush.xpose.msrb.mxu1 %v485_v29  ;;  %v381_v28 = vld [vmem:[%s5547_s7 + $0x428] sm:$0xff] }
 0x10d   : > { %v625_v29 = vld [vmem:[%s5547_s7 + $0xbc8] sm:$0xff] }
 0x10f   : > { %2636 = vmatpush.xpose.msrb.mxu2 %v478_v30  ;;  %2596 = vmatpush.xpose.msrb.mxu0 %v476_v31  ;;  %v618_v30 = vld [vmem:[%s5547_s7 + $0xb90] sm:$0xff]  ;;  %v616_v31 = vld [vmem:[%s5547_s7 + $0xb80] sm:$0xff] }
 0x110   : > { %2656 = vmatpush.xpose.msrb.mxu3 %v479_v32  ;;  %2616 = vmatpush.xpose.msrb.mxu1 %v477_v34  ;;  %v619_v32 = vld [vmem:[%s5547_s7 + $0xb98] sm:$0xff]  ;;  %v617_v34 = vld [vmem:[%s5547_s7 + $0xb88] sm:$0xff] }
 0x113   : > { %2637 = vmatpush.xpose.msrb.mxu2 %v470_v35  ;;  %2597 = vmatpush.xpose.msrb.mxu0 %v468_v36  ;;  %v608_v35 = vld [vmem:[%s5547_s7 + $0xb40] sm:$0xff]  ;;  %v611_v36 = vld [vmem:[%s5547_s7 + $0xb58] sm:$0xff] }
 0x114   : > { %2657 = vmatpush.xpose.msrb.mxu3 %v471_v37  ;;  %2617 = vmatpush.xpose.msrb.mxu1 %v469_v40  ;;  %v600_v37 = vld [vmem:[%s5547_s7 + $0xb00] sm:$0xff]  ;;  %v603_v40 = vld [vmem:[%s5547_s7 + $0xb18] sm:$0xff] }
 0x117   : > { %2638 = vmatpush.xpose.msrb.mxu2 %v462_v42  ;;  %2598 = vmatpush.xpose.msrb.mxu0 %v460_v43  ;;  %v594_v42 = vld [vmem:[%s5547_s7 + $0xad0] sm:$0xff]  ;;  %v592_v43 = vld [vmem:[%s5547_s7 + $0xac0] sm:$0xff] }
 0x118   : > { %2658 = vmatpush.xpose.msrb.mxu3 %v463_v44  ;;  %2618 = vmatpush.xpose.msrb.mxu1 %v461_v45  ;;  %v595_v44 = vld [vmem:[%s5547_s7 + $0xad8] sm:$0xff]  ;;  %v593_v45 = vld [vmem:[%s5547_s7 + $0xac8] sm:$0xff] }
 0x11b   : > { %2639 = vmatpush.xpose.msrb.mxu2 %v454_v46  ;;  %2599 = vmatpush.xpose.msrb.mxu0 %v452_v47  ;;  %v586_v46 = vld [vmem:[%s5547_s7 + $0xa90] sm:$0xff]  ;;  %v584_v47 = vld [vmem:[%s5547_s7 + $0xa80] sm:$0xff] }
 0x11c   : > { %2659 = vmatpush.xpose.msrb.mxu3 %v455_v48  ;;  %2619 = vmatpush.xpose.msrb.mxu1 %v453_v49  ;;  %v587_v48 = vld [vmem:[%s5547_s7 + $0xa98] sm:$0xff]  ;;  %v585_v49 = vld [vmem:[%s5547_s7 + $0xa88] sm:$0xff] }
 0x11f   : > { %2640 = vmatpush.xpose.msrb.mxu2 %v446_v50  ;;  %2600 = vmatpush.xpose.msrb.mxu0 %v444_v51  ;;  %v578_v50 = vld [vmem:[%s5547_s7 + $0xa50] sm:$0xff]  ;;  %v576_v51 = vld [vmem:[%s5547_s7 + $0xa40] sm:$0xff] }
 0x120   : > { %2660 = vmatpush.xpose.msrb.mxu3 %v447_v52  ;;  %2620 = vmatpush.xpose.msrb.mxu1 %v445_v53  ;;  %v579_v52 = vld [vmem:[%s5547_s7 + $0xa58] sm:$0xff]  ;;  %v577_v53 = vld [vmem:[%s5547_s7 + $0xa48] sm:$0xff] }
 0x123   : > { %2641 = vmatpush.xpose.msrb.mxu2 %v438_v54  ;;  %2601 = vmatpush.xpose.msrb.mxu0 %v436_v55  ;;  %v570_v54 = vld [vmem:[%s5547_s7 + $0xa10] sm:$0xff]  ;;  %v568_v55 = vld [vmem:[%s5547_s7 + $0xa00] sm:$0xff] }
 0x124   : > { %2661 = vmatpush.xpose.msrb.mxu3 %v439_v56  ;;  %2621 = vmatpush.xpose.msrb.mxu1 %v437_v57  ;;  %v571_v56 = vld [vmem:[%s5547_s7 + $0xa18] sm:$0xff]  ;;  %v569_v57 = vld [vmem:[%s5547_s7 + $0xa08] sm:$0xff] }
 0x127   : > { %2642 = vmatpush.xpose.msrb.mxu2 %v430_v58  ;;  %2602 = vmatpush.xpose.msrb.mxu0 %v428_v59  ;;  %v562_v58 = vld [vmem:[%s5547_s7 + $0x9d0] sm:$0xff]  ;;  %v560_v59 = vld [vmem:[%s5547_s7 + $0x9c0] sm:$0xff] }
 0x128   : > { %2662 = vmatpush.xpose.msrb.mxu3 %v431_v60  ;;  %2622 = vmatpush.xpose.msrb.mxu1 %v429_v61  ;;  %v563_v60 = vld [vmem:[%s5547_s7 + $0x9d8] sm:$0xff]  ;;  %v561_v61 = vld [vmem:[%s5547_s7 + $0x9c8] sm:$0xff] }
 0x12b   : > { %2643 = vmatpush.xpose.msrb.mxu2 %v422_v62  ;;  %2603 = vmatpush.xpose.msrb.mxu0 %v420_v63  ;;  %v554_v62 = vld [vmem:[%s5547_s7 + $0x990] sm:$0xff]  ;;  %v552_v63 = vld [vmem:[%s5547_s7 + $0x980] sm:$0xff] }
 0x12c   : > { %2663 = vmatpush.xpose.msrb.mxu3 %v423_v0  ;;  %2623 = vmatpush.xpose.msrb.mxu1 %v421_v1  ;;  %v555_v0 = vld [vmem:[%s5547_s7 + $0x998] sm:$0xff]  ;;  %v553_v1 = vld [vmem:[%s5547_s7 + $0x988] sm:$0xff] }
 0x12f   : > { %2644 = vmatpush.xpose.msrb.mxu2 %v414_v2  ;;  %2604 = vmatpush.xpose.msrb.mxu0 %v412_v3  ;;  %v546_v2 = vld [vmem:[%s5547_s7 + $0x950] sm:$0xff]  ;;  %v544_v3 = vld [vmem:[%s5547_s7 + $0x940] sm:$0xff] }
 0x130   : > { %2664 = vmatpush.xpose.msrb.mxu3 %v415_v4  ;;  %2624 = vmatpush.xpose.msrb.mxu1 %v413_v5  ;;  %v547_v4 = vld [vmem:[%s5547_s7 + $0x958] sm:$0xff]  ;;  %v545_v5 = vld [vmem:[%s5547_s7 + $0x948] sm:$0xff] }
 0x133   : > { %2645 = vmatpush.xpose.msrb.mxu2 %v406_v6  ;;  %2605 = vmatpush.xpose.msrb.mxu0 %v404_v7  ;;  %v538_v6 = vld [vmem:[%s5547_s7 + $0x910] sm:$0xff]  ;;  %v536_v7 = vld [vmem:[%s5547_s7 + $0x900] sm:$0xff] }
 0x134   : > { %2665 = vmatpush.xpose.msrb.mxu3 %v407_v8  ;;  %2625 = vmatpush.xpose.msrb.mxu1 %v405_v9  ;;  %v539_v8 = vld [vmem:[%s5547_s7 + $0x918] sm:$0xff]  ;;  %v537_v9 = vld [vmem:[%s5547_s7 + $0x908] sm:$0xff] }
 0x137   : > { %2646 = vmatpush.xpose.msrb.mxu2 %v398_v11  ;;  %2606 = vmatpush.xpose.msrb.mxu0 %v396_v13  ;;  %v530_v11 = vld [vmem:[%s5547_s7 + $0x8d0] sm:$0xff]  ;;  %v528_v13 = vld [vmem:[%s5547_s7 + $0x8c0] sm:$0xff] }
 0x138   : > { %2666 = vmatpush.xpose.msrb.mxu3 %v399_v15  ;;  %2626 = vmatpush.xpose.msrb.mxu1 %v397_v17  ;;  %v531_v15 = vld [vmem:[%s5547_s7 + $0x8d8] sm:$0xff]  ;;  %v529_v17 = vld [vmem:[%s5547_s7 + $0x8c8] sm:$0xff] }
 0x13b   : > { %2647 = vmatpush.xpose.msrb.mxu2 %v390_v18  ;;  %2607 = vmatpush.xpose.msrb.mxu0 %v388_v19  ;;  %v522_v18 = vld [vmem:[%s5547_s7 + $0x890] sm:$0xff]  ;;  %v520_v19 = vld [vmem:[%s5547_s7 + $0x880] sm:$0xff] }
 0x13c   : > { %2667 = vmatpush.xpose.msrb.mxu3 %v391_v20  ;;  %2627 = vmatpush.xpose.msrb.mxu1 %v389_v21  ;;  %v523_v20 = vld [vmem:[%s5547_s7 + $0x898] sm:$0xff]  ;;  %v521_v21 = vld [vmem:[%s5547_s7 + $0x888] sm:$0xff] }
 0x13f   : > { %2648 = vmatpush.xpose.msrb.mxu2 %v382_v22  ;;  %2608 = vmatpush.xpose.msrb.mxu0 %v380_v24  ;;  %v514_v22 = vld [vmem:[%s5547_s7 + $0x850] sm:$0xff]  ;;  %v515_v24 = vld [vmem:[%s5547_s7 + $0x858] sm:$0xff] }
 0x140   : > { %2668 = vmatpush.xpose.msrb.mxu3 %v383_v25  ;;  %2628 = vmatpush.xpose.msrb.mxu1 %v381_v28  ;;  %v513_v25 = vld [vmem:[%s5547_s7 + $0x848] sm:$0xff]  ;;  %v630_v28 = vld [vmem:[%s5547_s7 + $0xbf0] sm:$0xff] }
 0x142   : > { %2649 = vmatmul.f32.vlgmr.msrb.gmra.mxu2 %v5697_v10  ;;  %2609 = vmatmul.f32.vlgmr.msrb.gmra.mxu0 %v5700_v12  ;;  %v610_v10 = vld [vmem:[%s5547_s7 + $0xb50] sm:$0xff]  ;;  %v609_v12 = vld [vmem:[%s5547_s7 + $0xb48] sm:$0xff] }
 0x143   : > { %2713 = vmatpush.xpose.msra.mxu2 %v626_v23  ;;  %2673 = vmatpush.xpose.msra.mxu0 %v624_v26  ;;  %v512_v23 = vld [vmem:[%s5547_s7 + $0x840] sm:$0xff]  ;;  %v506_v26 = vld [vmem:[%s5547_s7 + $0x810] sm:$0xff] }
 0x144   : > { %2733 = vmatpush.xpose.msra.mxu3 %v627_v27  ;;  %2693 = vmatpush.xpose.msra.mxu1 %v625_v29  ;;  %v504_v27 = vld [vmem:[%s5547_s7 + $0x800] sm:$0xff]  ;;  %v507_v29 = vld [vmem:[%s5547_s7 + $0x818] sm:$0xff] }
 0x145   : > { %2669 = vmatmul.f32.vlgmr.msrb.gmra.mxu3 %v5703_v14  ;;  %2629 = vmatmul.f32.vlgmr.msrb.gmra.mxu1 %v5707_v16  ;;  %v602_v14 = vld [vmem:[%s5547_s7 + $0xb10] sm:$0xff]  ;;  %v601_v16 = vld [vmem:[%s5547_s7 + $0xb08] sm:$0xff] }
 0x147   : > { %2714 = vmatpush.xpose.msra.mxu2 %v618_v30  ;;  %2674 = vmatpush.xpose.msra.mxu0 %v616_v31  ;;  %v628_v30 = vld [vmem:[%s5547_s7 + $0xbe0] sm:$0xff]  ;;  %v631_v31 = vld [vmem:[%s5547_s7 + $0xbf8] sm:$0xff] }
 0x148   : > { %2734 = vmatpush.xpose.msra.mxu3 %v619_v32  ;;  %2694 = vmatpush.xpose.msra.mxu1 %v617_v34  ;;  %v505_v32 = vld [vmem:[%s5547_s7 + $0x808] sm:$0xff] }
 0x149   : > { %v629_v34 = vld [vmem:[%s5547_s7 + $0xbe8] sm:$0xff] }
 0x14b   : > { %2715 = vmatpush.xpose.msra.mxu2 %v610_v10  ;;  %2675 = vmatpush.xpose.msra.mxu0 %v608_v35  ;;  %v622_v10 = vld [vmem:[%s5547_s7 + $0xbb0] sm:$0xff]  ;;  %v620_v35 = vld [vmem:[%s5547_s7 + $0xba0] sm:$0xff] }
 0x14c   : > { %2735 = vmatpush.xpose.msra.mxu3 %v611_v36  ;;  %2695 = vmatpush.xpose.msra.mxu1 %v609_v12  ;;  %v623_v36 = vld [vmem:[%s5547_s7 + $0xbb8] sm:$0xff]  ;;  %v621_v12 = vld [vmem:[%s5547_s7 + $0xba8] sm:$0xff] }
 0x14f   : > { %2716 = vmatpush.xpose.msra.mxu2 %v602_v14  ;;  %2676 = vmatpush.xpose.msra.mxu0 %v600_v37  ;;  %v614_v14 = vld [vmem:[%s5547_s7 + $0xb70] sm:$0xff]  ;;  %v612_v37 = vld [vmem:[%s5547_s7 + $0xb60] sm:$0xff] }
 0x150   : > { %2736 = vmatpush.xpose.msra.mxu3 %v603_v40  ;;  %2696 = vmatpush.xpose.msra.mxu1 %v601_v16  ;;  %v615_v40 = vld [vmem:[%s5547_s7 + $0xb78] sm:$0xff] }
 0x151   : > { %v607_v16 = vld [vmem:[%s5547_s7 + $0xb38] sm:$0xff] }
 0x153   : > { %2717 = vmatpush.xpose.msra.mxu2 %v594_v42  ;;  %2677 = vmatpush.xpose.msra.mxu0 %v592_v43  ;;  %v605_v42 = vld [vmem:[%s5547_s7 + $0xb28] sm:$0xff]  ;;  %v596_v43 = vld [vmem:[%s5547_s7 + $0xae0] sm:$0xff] }
 0x154   : > { %2737 = vmatpush.xpose.msra.mxu3 %v595_v44  ;;  %2697 = vmatpush.xpose.msra.mxu1 %v593_v45  ;;  %v599_v44 = vld [vmem:[%s5547_s7 + $0xaf8] sm:$0xff]  ;;  %v597_v45 = vld [vmem:[%s5547_s7 + $0xae8] sm:$0xff] }
 0x157   : > { %2718 = vmatpush.xpose.msra.mxu2 %v586_v46  ;;  %2678 = vmatpush.xpose.msra.mxu0 %v584_v47  ;;  %v590_v46 = vld [vmem:[%s5547_s7 + $0xab0] sm:$0xff]  ;;  %v588_v47 = vld [vmem:[%s5547_s7 + $0xaa0] sm:$0xff] }
 0x158   : > { %2738 = vmatpush.xpose.msra.mxu3 %v587_v48  ;;  %2698 = vmatpush.xpose.msra.mxu1 %v585_v49  ;;  %v591_v48 = vld [vmem:[%s5547_s7 + $0xab8] sm:$0xff]  ;;  %v589_v49 = vld [vmem:[%s5547_s7 + $0xaa8] sm:$0xff] }
 0x15b   : > { %2719 = vmatpush.xpose.msra.mxu2 %v578_v50  ;;  %2679 = vmatpush.xpose.msra.mxu0 %v576_v51  ;;  %v582_v50 = vld [vmem:[%s5547_s7 + $0xa70] sm:$0xff]  ;;  %v580_v51 = vld [vmem:[%s5547_s7 + $0xa60] sm:$0xff] }
 0x15c   : > { %2739 = vmatpush.xpose.msra.mxu3 %v579_v52  ;;  %2699 = vmatpush.xpose.msra.mxu1 %v577_v53  ;;  %v583_v52 = vld [vmem:[%s5547_s7 + $0xa78] sm:$0xff]  ;;  %v581_v53 = vld [vmem:[%s5547_s7 + $0xa68] sm:$0xff] }
 0x15f   : > { %2720 = vmatpush.xpose.msra.mxu2 %v570_v54  ;;  %2680 = vmatpush.xpose.msra.mxu0 %v568_v55  ;;  %v574_v54 = vld [vmem:[%s5547_s7 + $0xa30] sm:$0xff]  ;;  %v572_v55 = vld [vmem:[%s5547_s7 + $0xa20] sm:$0xff] }
 0x160   : > { %2740 = vmatpush.xpose.msra.mxu3 %v571_v56  ;;  %2700 = vmatpush.xpose.msra.mxu1 %v569_v57  ;;  %v575_v56 = vld [vmem:[%s5547_s7 + $0xa38] sm:$0xff]  ;;  %v573_v57 = vld [vmem:[%s5547_s7 + $0xa28] sm:$0xff] }
 0x163   : > { %2721 = vmatpush.xpose.msra.mxu2 %v562_v58  ;;  %2681 = vmatpush.xpose.msra.mxu0 %v560_v59  ;;  %v566_v58 = vld [vmem:[%s5547_s7 + $0x9f0] sm:$0xff]  ;;  %v564_v59 = vld [vmem:[%s5547_s7 + $0x9e0] sm:$0xff] }
 0x164   : > { %2741 = vmatpush.xpose.msra.mxu3 %v563_v60  ;;  %2701 = vmatpush.xpose.msra.mxu1 %v561_v61  ;;  %v567_v60 = vld [vmem:[%s5547_s7 + $0x9f8] sm:$0xff]  ;;  %v565_v61 = vld [vmem:[%s5547_s7 + $0x9e8] sm:$0xff] }
 0x167   : > { %2722 = vmatpush.xpose.msra.mxu2 %v554_v62  ;;  %2682 = vmatpush.xpose.msra.mxu0 %v552_v63  ;;  %v558_v62 = vld [vmem:[%s5547_s7 + $0x9b0] sm:$0xff]  ;;  %v556_v63 = vld [vmem:[%s5547_s7 + $0x9a0] sm:$0xff] }
 0x168   : > { %2742 = vmatpush.xpose.msra.mxu3 %v555_v0  ;;  %2702 = vmatpush.xpose.msra.mxu1 %v553_v1  ;;  %v559_v0 = vld [vmem:[%s5547_s7 + $0x9b8] sm:$0xff]  ;;  %v557_v1 = vld [vmem:[%s5547_s7 + $0x9a8] sm:$0xff] }
 0x16b   : > { %2723 = vmatpush.xpose.msra.mxu2 %v546_v2  ;;  %2683 = vmatpush.xpose.msra.mxu0 %v544_v3  ;;  %v550_v2 = vld [vmem:[%s5547_s7 + $0x970] sm:$0xff]  ;;  %v548_v3 = vld [vmem:[%s5547_s7 + $0x960] sm:$0xff] }
 0x16c   : > { %2743 = vmatpush.xpose.msra.mxu3 %v547_v4  ;;  %2703 = vmatpush.xpose.msra.mxu1 %v545_v5  ;;  %v551_v4 = vld [vmem:[%s5547_s7 + $0x978] sm:$0xff]  ;;  %v549_v5 = vld [vmem:[%s5547_s7 + $0x968] sm:$0xff] }
 0x16f   : > { %2724 = vmatpush.xpose.msra.mxu2 %v538_v6  ;;  %2684 = vmatpush.xpose.msra.mxu0 %v536_v7  ;;  %v542_v6 = vld [vmem:[%s5547_s7 + $0x930] sm:$0xff]  ;;  %v540_v7 = vld [vmem:[%s5547_s7 + $0x920] sm:$0xff] }
 0x170   : > { %2744 = vmatpush.xpose.msra.mxu3 %v539_v8  ;;  %2704 = vmatpush.xpose.msra.mxu1 %v537_v9  ;;  %v543_v8 = vld [vmem:[%s5547_s7 + $0x938] sm:$0xff]  ;;  %v541_v9 = vld [vmem:[%s5547_s7 + $0x928] sm:$0xff] }
 0x173   : > { %2725 = vmatpush.xpose.msra.mxu2 %v530_v11  ;;  %2685 = vmatpush.xpose.msra.mxu0 %v528_v13  ;;  %v534_v11 = vld [vmem:[%s5547_s7 + $0x8f0] sm:$0xff]  ;;  %v532_v13 = vld [vmem:[%s5547_s7 + $0x8e0] sm:$0xff] }
 0x174   : > { %2745 = vmatpush.xpose.msra.mxu3 %v531_v15  ;;  %2705 = vmatpush.xpose.msra.mxu1 %v529_v17  ;;  %v535_v15 = vld [vmem:[%s5547_s7 + $0x8f8] sm:$0xff]  ;;  %v533_v17 = vld [vmem:[%s5547_s7 + $0x8e8] sm:$0xff] }
 0x177   : > { %2726 = vmatpush.xpose.msra.mxu2 %v522_v18  ;;  %2686 = vmatpush.xpose.msra.mxu0 %v520_v19  ;;  %v526_v18 = vld [vmem:[%s5547_s7 + $0x8b0] sm:$0xff]  ;;  %v524_v19 = vld [vmem:[%s5547_s7 + $0x8a0] sm:$0xff] }
 0x178   : > { %2746 = vmatpush.xpose.msra.mxu3 %v523_v20  ;;  %2706 = vmatpush.xpose.msra.mxu1 %v521_v21  ;;  %v527_v20 = vld [vmem:[%s5547_s7 + $0x8b8] sm:$0xff]  ;;  %v525_v21 = vld [vmem:[%s5547_s7 + $0x8a8] sm:$0xff] }
 0x17b   : > { %2727 = vmatpush.xpose.msra.mxu2 %v514_v22  ;;  %2687 = vmatpush.xpose.msra.mxu0 %v512_v23  ;;  %v518_v22 = vld [vmem:[%s5547_s7 + $0x870] sm:$0xff]  ;;  %v516_v23 = vld [vmem:[%s5547_s7 + $0x860] sm:$0xff] }
 0x17c   : > { %2747 = vmatpush.xpose.msra.mxu3 %v515_v24  ;;  %2707 = vmatpush.xpose.msra.mxu1 %v513_v25  ;;  %v519_v24 = vld [vmem:[%s5547_s7 + $0x878] sm:$0xff]  ;;  %v517_v25 = vld [vmem:[%s5547_s7 + $0x868] sm:$0xff] }
 0x17f   : > { %2728 = vmatpush.xpose.msra.mxu2 %v506_v26  ;;  %2688 = vmatpush.xpose.msra.mxu0 %v504_v27  ;;  %v510_v26 = vld [vmem:[%s5547_s7 + $0x830] sm:$0xff] }
 0x180   : > { %2748 = vmatpush.xpose.msra.mxu3 %v507_v29  ;;  %2708 = vmatpush.xpose.msra.mxu1 %v505_v32  ;;  %v754_v27 = vld [vmem:[%s5547_s7 + $0xfd0] sm:$0xff]  ;;  %v511_v29 = vld [vmem:[%s5547_s7 + $0x838] sm:$0xff]  ;;  %v509_v32 = vld [vmem:[%s5547_s7 + $0x828] sm:$0xff] }
 0x182   : > { %2729 = vmatmul.f32.vlgmr.msra.gmra.mxu2 %v5649_v33  ;;  %2689 = vmatmul.f32.vlgmr.msra.gmra.mxu0 %v5655_v38  ;;  %v613_v33 = vld [vmem:[%s5547_s7 + $0xb68] sm:$0xff]  ;;  %v606_v38 = vld [vmem:[%s5547_s7 + $0xb30] sm:$0xff] }
 0x183   : > { %2793 = vmatpush.xpose.msrb.mxu2 %v630_v28  ;;  %2753 = vmatpush.xpose.msrb.mxu0 %v628_v30  ;;  %v508_v28 = vld [vmem:[%s5547_s7 + $0x820] sm:$0xff] }
 0x184   : > { %2813 = vmatpush.xpose.msrb.mxu3 %v631_v31  ;;  %2773 = vmatpush.xpose.msrb.mxu1 %v629_v34  ;;  %v752_v30 = vld [vmem:[%s5547_s7 + $0xfc0] sm:$0xff]  ;;  %v755_v31 = vld [vmem:[%s5547_s7 + $0xfd8] sm:$0xff]  ;;  %v753_v34 = vld [vmem:[%s5547_s7 + $0xfc8] sm:$0xff] }
 0x185   : > { %2749 = vmatmul.f32.vlgmr.msra.gmra.mxu3 %v5657_v39  ;;  %2709 = vmatmul.f32.vlgmr.msra.gmra.mxu1 %v5662_v41  ;;  %v604_v39 = vld [vmem:[%s5547_s7 + $0xb20] sm:$0xff]  ;;  %v598_v41 = vld [vmem:[%s5547_s7 + $0xaf0] sm:$0xff] }
 0x187   : > { %2794 = vmatpush.xpose.msrb.mxu2 %v622_v10  ;;  %2754 = vmatpush.xpose.msrb.mxu0 %v620_v35  ;;  %v746_v10 = vld [vmem:[%s5547_s7 + $0xf90] sm:$0xff]  ;;  %v744_v35 = vld [vmem:[%s5547_s7 + $0xf80] sm:$0xff] }
 0x188   : > { %2814 = vmatpush.xpose.msrb.mxu3 %v623_v36  ;;  %2774 = vmatpush.xpose.msrb.mxu1 %v621_v12  ;;  %v747_v36 = vld [vmem:[%s5547_s7 + $0xf98] sm:$0xff] }
 0x189   : > { %v5980_v12 = vld.sshfl [vmem:[#allocation1 + $0x30] sm:$0xff pattern:$0x73625140] }
 0x18b   : > { %2795 = vmatpush.xpose.msrb.mxu2 %v614_v14  ;;  %2755 = vmatpush.xpose.msrb.mxu0 %v612_v37  ;;  %v745_v14 = vld [vmem:[%s5547_s7 + $0xf88] sm:$0xff] }
 0x18c   : > { %2815 = vmatpush.xpose.msrb.mxu3 %v615_v40  ;;  %2775 = vmatpush.xpose.msrb.mxu1 %v613_v33  ;;  %v5984_v37 = vld.sshfl [vmem:[#allocation1 + $0x20] sm:$0xff pattern:$0x73625140]  ;;  %v738_v40 = vld [vmem:[%s5547_s7 + $0xf50] sm:$0xff] }
 0x18d   : > { %v5988_v33 = vld.sshfl [vmem:[#allocation1 + $0x38] sm:$0xff pattern:$0x73625140] }
 0x18f   : > { %2796 = vmatpush.xpose.msrb.mxu2 %v606_v38  ;;  %2756 = vmatpush.xpose.msrb.mxu0 %v604_v39  ;;  %v736_v38 = vld [vmem:[%s5547_s7 + $0xf40] sm:$0xff]  ;;  %v5992_v39 = vld.sshfl [vmem:[#allocation1 + $0x28] sm:$0xff pattern:$0x73625140] }
 0x190   : > { %2816 = vmatpush.xpose.msrb.mxu3 %v607_v16  ;;  %2776 = vmatpush.xpose.msrb.mxu1 %v605_v42  ;;  %v739_v16 = vld [vmem:[%s5547_s7 + $0xf58] sm:$0xff]  ;;  %v737_v42 = vld [vmem:[%s5547_s7 + $0xf48] sm:$0xff] }
 0x193   : > { %2797 = vmatpush.xpose.msrb.mxu2 %v598_v41  ;;  %2757 = vmatpush.xpose.msrb.mxu0 %v596_v43  ;;  %v730_v41 = vld [vmem:[%s5547_s7 + $0xf10] sm:$0xff]  ;;  %v728_v43 = vld [vmem:[%s5547_s7 + $0xf00] sm:$0xff] }
 0x194   : > { %2817 = vmatpush.xpose.msrb.mxu3 %v599_v44  ;;  %2777 = vmatpush.xpose.msrb.mxu1 %v597_v45  ;;  %v731_v44 = vld [vmem:[%s5547_s7 + $0xf18] sm:$0xff]  ;;  %v729_v45 = vld [vmem:[%s5547_s7 + $0xf08] sm:$0xff] }
 0x197   : > { %2798 = vmatpush.xpose.msrb.mxu2 %v590_v46  ;;  %2758 = vmatpush.xpose.msrb.mxu0 %v588_v47  ;;  %v722_v46 = vld [vmem:[%s5547_s7 + $0xed0] sm:$0xff]  ;;  %v720_v47 = vld [vmem:[%s5547_s7 + $0xec0] sm:$0xff] }
 0x198   : > { %2818 = vmatpush.xpose.msrb.mxu3 %v591_v48  ;;  %2778 = vmatpush.xpose.msrb.mxu1 %v589_v49  ;;  %v723_v48 = vld [vmem:[%s5547_s7 + $0xed8] sm:$0xff]  ;;  %v721_v49 = vld [vmem:[%s5547_s7 + $0xec8] sm:$0xff] }
 0x19b   : > { %2799 = vmatpush.xpose.msrb.mxu2 %v582_v50  ;;  %2759 = vmatpush.xpose.msrb.mxu0 %v580_v51  ;;  %v714_v50 = vld [vmem:[%s5547_s7 + $0xe90] sm:$0xff]  ;;  %v712_v51 = vld [vmem:[%s5547_s7 + $0xe80] sm:$0xff] }
 0x19c   : > { %2819 = vmatpush.xpose.msrb.mxu3 %v583_v52  ;;  %2779 = vmatpush.xpose.msrb.mxu1 %v581_v53  ;;  %v715_v52 = vld [vmem:[%s5547_s7 + $0xe98] sm:$0xff]  ;;  %v713_v53 = vld [vmem:[%s5547_s7 + $0xe88] sm:$0xff] }
 0x19f   : > { %2800 = vmatpush.xpose.msrb.mxu2 %v574_v54  ;;  %2760 = vmatpush.xpose.msrb.mxu0 %v572_v55  ;;  %v706_v54 = vld [vmem:[%s5547_s7 + $0xe50] sm:$0xff]  ;;  %v704_v55 = vld [vmem:[%s5547_s7 + $0xe40] sm:$0xff] }
 0x1a0   : > { %2820 = vmatpush.xpose.msrb.mxu3 %v575_v56  ;;  %2780 = vmatpush.xpose.msrb.mxu1 %v573_v57  ;;  %v707_v56 = vld [vmem:[%s5547_s7 + $0xe58] sm:$0xff]  ;;  %v705_v57 = vld [vmem:[%s5547_s7 + $0xe48] sm:$0xff] }
 0x1a3   : > { %2801 = vmatpush.xpose.msrb.mxu2 %v566_v58  ;;  %2761 = vmatpush.xpose.msrb.mxu0 %v564_v59  ;;  %v698_v58 = vld [vmem:[%s5547_s7 + $0xe10] sm:$0xff]  ;;  %v696_v59 = vld [vmem:[%s5547_s7 + $0xe00] sm:$0xff] }
 0x1a4   : > { %2821 = vmatpush.xpose.msrb.mxu3 %v567_v60  ;;  %2781 = vmatpush.xpose.msrb.mxu1 %v565_v61  ;;  %v699_v60 = vld [vmem:[%s5547_s7 + $0xe18] sm:$0xff]  ;;  %v697_v61 = vld [vmem:[%s5547_s7 + $0xe08] sm:$0xff] }
 0x1a7   : > { %2802 = vmatpush.xpose.msrb.mxu2 %v558_v62  ;;  %2762 = vmatpush.xpose.msrb.mxu0 %v556_v63  ;;  %v690_v62 = vld [vmem:[%s5547_s7 + $0xdd0] sm:$0xff]  ;;  %v688_v63 = vld [vmem:[%s5547_s7 + $0xdc0] sm:$0xff] }
 0x1a8   : > { %2822 = vmatpush.xpose.msrb.mxu3 %v559_v0  ;;  %2782 = vmatpush.xpose.msrb.mxu1 %v557_v1  ;;  %v691_v0 = vld [vmem:[%s5547_s7 + $0xdd8] sm:$0xff]  ;;  %v689_v1 = vld [vmem:[%s5547_s7 + $0xdc8] sm:$0xff] }
 0x1ab   : > { %2803 = vmatpush.xpose.msrb.mxu2 %v550_v2  ;;  %2763 = vmatpush.xpose.msrb.mxu0 %v548_v3  ;;  %v682_v2 = vld [vmem:[%s5547_s7 + $0xd90] sm:$0xff]  ;;  %v680_v3 = vld [vmem:[%s5547_s7 + $0xd80] sm:$0xff] }
 0x1ac   : > { %2823 = vmatpush.xpose.msrb.mxu3 %v551_v4  ;;  %2783 = vmatpush.xpose.msrb.mxu1 %v549_v5  ;;  %v683_v4 = vld [vmem:[%s5547_s7 + $0xd98] sm:$0xff]  ;;  %v681_v5 = vld [vmem:[%s5547_s7 + $0xd88] sm:$0xff] }
 0x1af   : > { %2804 = vmatpush.xpose.msrb.mxu2 %v542_v6  ;;  %2764 = vmatpush.xpose.msrb.mxu0 %v540_v7  ;;  %v674_v6 = vld [vmem:[%s5547_s7 + $0xd50] sm:$0xff]  ;;  %v672_v7 = vld [vmem:[%s5547_s7 + $0xd40] sm:$0xff] }
 0x1b0   : > { %2824 = vmatpush.xpose.msrb.mxu3 %v543_v8  ;;  %2784 = vmatpush.xpose.msrb.mxu1 %v541_v9  ;;  %v675_v8 = vld [vmem:[%s5547_s7 + $0xd58] sm:$0xff]  ;;  %v673_v9 = vld [vmem:[%s5547_s7 + $0xd48] sm:$0xff] }
 0x1b3   : > { %2805 = vmatpush.xpose.msrb.mxu2 %v534_v11  ;;  %2765 = vmatpush.xpose.msrb.mxu0 %v532_v13  ;;  %v666_v11 = vld [vmem:[%s5547_s7 + $0xd10] sm:$0xff]  ;;  %v664_v13 = vld [vmem:[%s5547_s7 + $0xd00] sm:$0xff] }
 0x1b4   : > { %2825 = vmatpush.xpose.msrb.mxu3 %v535_v15  ;;  %2785 = vmatpush.xpose.msrb.mxu1 %v533_v17  ;;  %v667_v15 = vld [vmem:[%s5547_s7 + $0xd18] sm:$0xff]  ;;  %v665_v17 = vld [vmem:[%s5547_s7 + $0xd08] sm:$0xff] }
 0x1b7   : > { %2806 = vmatpush.xpose.msrb.mxu2 %v526_v18  ;;  %2766 = vmatpush.xpose.msrb.mxu0 %v524_v19  ;;  %v658_v18 = vld [vmem:[%s5547_s7 + $0xcd0] sm:$0xff]  ;;  %v656_v19 = vld [vmem:[%s5547_s7 + $0xcc0] sm:$0xff] }
 0x1b8   : > { %2826 = vmatpush.xpose.msrb.mxu3 %v527_v20  ;;  %2786 = vmatpush.xpose.msrb.mxu1 %v525_v21  ;;  %v659_v20 = vld [vmem:[%s5547_s7 + $0xcd8] sm:$0xff]  ;;  %v657_v21 = vld [vmem:[%s5547_s7 + $0xcc8] sm:$0xff] }
 0x1bb   : > { %2807 = vmatpush.xpose.msrb.mxu2 %v518_v22  ;;  %2767 = vmatpush.xpose.msrb.mxu0 %v516_v23  ;;  %v650_v22 = vld [vmem:[%s5547_s7 + $0xc90] sm:$0xff]  ;;  %v648_v23 = vld [vmem:[%s5547_s7 + $0xc80] sm:$0xff] }
 0x1bc   : > { %2827 = vmatpush.xpose.msrb.mxu3 %v519_v24  ;;  %2787 = vmatpush.xpose.msrb.mxu1 %v517_v25  ;;  %v651_v24 = vld [vmem:[%s5547_s7 + $0xc98] sm:$0xff]  ;;  %v649_v25 = vld [vmem:[%s5547_s7 + $0xc88] sm:$0xff] }
 0x1bf   : > { %2808 = vmatpush.xpose.msrb.mxu2 %v510_v26  ;;  %2768 = vmatpush.xpose.msrb.mxu0 %v508_v28  ;;  %v642_v26 = vld [vmem:[%s5547_s7 + $0xc50] sm:$0xff]  ;;  %v643_v28 = vld [vmem:[%s5547_s7 + $0xc58] sm:$0xff] }
 0x1c0   : > { %2828 = vmatpush.xpose.msrb.mxu3 %v511_v29  ;;  %2788 = vmatpush.xpose.msrb.mxu1 %v509_v32  ;;  %v641_v29 = vld [vmem:[%s5547_s7 + $0xc48] sm:$0xff]  ;;  %v632_v32 = vld [vmem:[%s5547_s7 + $0xc00] sm:$0xff] }
 0x1c2   : > { %2809 = vmatmul.f32.vlgmr.msrb.gmra.mxu2 %v5980_v12  ;;  %2769 = vmatmul.f32.vlgmr.msrb.gmra.mxu0 %v5984_v37 }
 0x1c3   : > { %2873 = vmatpush.xpose.msra.mxu2 %v754_v27  ;;  %2833 = vmatpush.xpose.msra.mxu0 %v752_v30  ;;  %v640_v27 = vld [vmem:[%s5547_s7 + $0xc40] sm:$0xff]  ;;  %v634_v30 = vld [vmem:[%s5547_s7 + $0xc10] sm:$0xff] }
 0x1c4   : > { %2893 = vmatpush.xpose.msra.mxu3 %v755_v31  ;;  %2853 = vmatpush.xpose.msra.mxu1 %v753_v34  ;;  %v758_v31 = vld [vmem:[%s5547_s7 + $0xff0] sm:$0xff]  ;;  %v635_v34 = vld [vmem:[%s5547_s7 + $0xc18] sm:$0xff] }
 0x1c5   : > { %2829 = vmatmul.f32.vlgmr.msrb.gmra.mxu3 %v5988_v33  ;;  %2789 = vmatmul.f32.vlgmr.msrb.gmra.mxu1 %v5992_v39 }
 0x1c7   : > { %2874 = vmatpush.xpose.msra.mxu2 %v746_v10  ;;  %2834 = vmatpush.xpose.msra.mxu0 %v744_v35  ;;  %v756_v10 = vld [vmem:[%s5547_s7 + $0xfe0] sm:$0xff]  ;;  %v759_v35 = vld [vmem:[%s5547_s7 + $0xff8] sm:$0xff] }
 0x1c8   : > { %2894 = vmatpush.xpose.msra.mxu3 %v747_v36  ;;  %2854 = vmatpush.xpose.msra.mxu1 %v745_v14  ;;  %v633_v36 = vld [vmem:[%s5547_s7 + $0xc08] sm:$0xff] }
 0x1c9   : > { %v757_v14 = vld [vmem:[%s5547_s7 + $0xfe8] sm:$0xff] }
 0x1cb   : > { %2875 = vmatpush.xpose.msra.mxu2 %v738_v40  ;;  %2835 = vmatpush.xpose.msra.mxu0 %v736_v38  ;;  %v750_v40 = vld [vmem:[%s5547_s7 + $0xfb0] sm:$0xff]  ;;  %v748_v38 = vld [vmem:[%s5547_s7 + $0xfa0] sm:$0xff] }
 0x1cc   : > { %2895 = vmatpush.xpose.msra.mxu3 %v739_v16  ;;  %2855 = vmatpush.xpose.msra.mxu1 %v737_v42  ;;  %v751_v16 = vld [vmem:[%s5547_s7 + $0xfb8] sm:$0xff] }
 0x1cd   : > { %v6056_v42 = vld.sshfl [vmem:[#allocation1 + $0x10] sm:$0xff pattern:$0x73625140] }
 0x1cf   : > { %2876 = vmatpush.xpose.msra.mxu2 %v730_v41  ;;  %2836 = vmatpush.xpose.msra.mxu0 %v728_v43  ;;  %v749_v41 = vld [vmem:[%s5547_s7 + $0xfa8] sm:$0xff] }
 0x1d0   : > { %2896 = vmatpush.xpose.msra.mxu3 %v731_v44  ;;  %2856 = vmatpush.xpose.msra.mxu1 %v729_v45  ;;  %v6060_v43 = vld.sshfl [vmem:[#allocation1] sm:$0xff pattern:$0x73625140]  ;;  %v742_v44 = vld [vmem:[%s5547_s7 + $0xf70] sm:$0xff] }
 0x1d1   : > { %v6064_v45 = vld.sshfl [vmem:[#allocation1 + $0x18] sm:$0xff pattern:$0x73625140] }
 0x1d3   : > { %2877 = vmatpush.xpose.msra.mxu2 %v722_v46  ;;  %2837 = vmatpush.xpose.msra.mxu0 %v720_v47  ;;  %v740_v46 = vld [vmem:[%s5547_s7 + $0xf60] sm:$0xff]  ;;  %v6068_v47 = vld.sshfl [vmem:[#allocation1 + $0x8] sm:$0xff pattern:$0x73625140] }
 0x1d4   : > { %2897 = vmatpush.xpose.msra.mxu3 %v723_v48  ;;  %2857 = vmatpush.xpose.msra.mxu1 %v721_v49  ;;  %v743_v48 = vld [vmem:[%s5547_s7 + $0xf78] sm:$0xff]  ;;  %v741_v49 = vld [vmem:[%s5547_s7 + $0xf68] sm:$0xff] }
 0x1d7   : > { %2878 = vmatpush.xpose.msra.mxu2 %v714_v50  ;;  %2838 = vmatpush.xpose.msra.mxu0 %v712_v51  ;;  %v734_v50 = vld [vmem:[%s5547_s7 + $0xf30] sm:$0xff]  ;;  %v732_v51 = vld [vmem:[%s5547_s7 + $0xf20] sm:$0xff] }
 0x1d8   : > { %2898 = vmatpush.xpose.msra.mxu3 %v715_v52  ;;  %2858 = vmatpush.xpose.msra.mxu1 %v713_v53  ;;  %v735_v52 = vld [vmem:[%s5547_s7 + $0xf38] sm:$0xff]  ;;  %v733_v53 = vld [vmem:[%s5547_s7 + $0xf28] sm:$0xff] }
 0x1db   : > { %2879 = vmatpush.xpose.msra.mxu2 %v706_v54  ;;  %2839 = vmatpush.xpose.msra.mxu0 %v704_v55  ;;  %v726_v54 = vld [vmem:[%s5547_s7 + $0xef0] sm:$0xff]  ;;  %v724_v55 = vld [vmem:[%s5547_s7 + $0xee0] sm:$0xff] }
 0x1dc   : > { %2899 = vmatpush.xpose.msra.mxu3 %v707_v56  ;;  %2859 = vmatpush.xpose.msra.mxu1 %v705_v57  ;;  %v727_v56 = vld [vmem:[%s5547_s7 + $0xef8] sm:$0xff]  ;;  %v725_v57 = vld [vmem:[%s5547_s7 + $0xee8] sm:$0xff] }
 0x1df   : > { %2880 = vmatpush.xpose.msra.mxu2 %v698_v58  ;;  %2840 = vmatpush.xpose.msra.mxu0 %v696_v59  ;;  %v718_v58 = vld [vmem:[%s5547_s7 + $0xeb0] sm:$0xff]  ;;  %v716_v59 = vld [vmem:[%s5547_s7 + $0xea0] sm:$0xff] }
 0x1e0   : > { %2900 = vmatpush.xpose.msra.mxu3 %v699_v60  ;;  %2860 = vmatpush.xpose.msra.mxu1 %v697_v61  ;;  %v719_v60 = vld [vmem:[%s5547_s7 + $0xeb8] sm:$0xff]  ;;  %v717_v61 = vld [vmem:[%s5547_s7 + $0xea8] sm:$0xff] }
 0x1e3   : > { %2881 = vmatpush.xpose.msra.mxu2 %v690_v62  ;;  %2841 = vmatpush.xpose.msra.mxu0 %v688_v63  ;;  %v710_v62 = vld [vmem:[%s5547_s7 + $0xe70] sm:$0xff]  ;;  %v708_v63 = vld [vmem:[%s5547_s7 + $0xe60] sm:$0xff] }
 0x1e4   : > { %2901 = vmatpush.xpose.msra.mxu3 %v691_v0  ;;  %2861 = vmatpush.xpose.msra.mxu1 %v689_v1  ;;  %v711_v0 = vld [vmem:[%s5547_s7 + $0xe78] sm:$0xff]  ;;  %v709_v1 = vld [vmem:[%s5547_s7 + $0xe68] sm:$0xff] }
 0x1e7   : > { %2882 = vmatpush.xpose.msra.mxu2 %v682_v2  ;;  %2842 = vmatpush.xpose.msra.mxu0 %v680_v3  ;;  %v702_v2 = vld [vmem:[%s5547_s7 + $0xe30] sm:$0xff]  ;;  %v700_v3 = vld [vmem:[%s5547_s7 + $0xe20] sm:$0xff] }
 0x1e8   : > { %2902 = vmatpush.xpose.msra.mxu3 %v683_v4  ;;  %2862 = vmatpush.xpose.msra.mxu1 %v681_v5  ;;  %v703_v4 = vld [vmem:[%s5547_s7 + $0xe38] sm:$0xff]  ;;  %v701_v5 = vld [vmem:[%s5547_s7 + $0xe28] sm:$0xff] }
 0x1eb   : > { %2883 = vmatpush.xpose.msra.mxu2 %v674_v6  ;;  %2843 = vmatpush.xpose.msra.mxu0 %v672_v7  ;;  %v694_v6 = vld [vmem:[%s5547_s7 + $0xdf0] sm:$0xff]  ;;  %v692_v7 = vld [vmem:[%s5547_s7 + $0xde0] sm:$0xff] }
 0x1ec   : > { %2903 = vmatpush.xpose.msra.mxu3 %v675_v8  ;;  %2863 = vmatpush.xpose.msra.mxu1 %v673_v9  ;;  %v695_v8 = vld [vmem:[%s5547_s7 + $0xdf8] sm:$0xff]  ;;  %v693_v9 = vld [vmem:[%s5547_s7 + $0xde8] sm:$0xff] }
 0x1ef   : > { %2884 = vmatpush.xpose.msra.mxu2 %v666_v11  ;;  %2844 = vmatpush.xpose.msra.mxu0 %v664_v13  ;;  %v686_v11 = vld [vmem:[%s5547_s7 + $0xdb0] sm:$0xff]  ;;  %v684_v13 = vld [vmem:[%s5547_s7 + $0xda0] sm:$0xff] }
 0x1f0   : > { %2904 = vmatpush.xpose.msra.mxu3 %v667_v15  ;;  %2864 = vmatpush.xpose.msra.mxu1 %v665_v17  ;;  %v687_v15 = vld [vmem:[%s5547_s7 + $0xdb8] sm:$0xff]  ;;  %v685_v17 = vld [vmem:[%s5547_s7 + $0xda8] sm:$0xff] }
 0x1f3   : > { %2885 = vmatpush.xpose.msra.mxu2 %v658_v18  ;;  %2845 = vmatpush.xpose.msra.mxu0 %v656_v19  ;;  %v678_v18 = vld [vmem:[%s5547_s7 + $0xd70] sm:$0xff]  ;;  %v676_v19 = vld [vmem:[%s5547_s7 + $0xd60] sm:$0xff] }
 0x1f4   : > { %2905 = vmatpush.xpose.msra.mxu3 %v659_v20  ;;  %2865 = vmatpush.xpose.msra.mxu1 %v657_v21  ;;  %v679_v20 = vld [vmem:[%s5547_s7 + $0xd78] sm:$0xff]  ;;  %v677_v21 = vld [vmem:[%s5547_s7 + $0xd68] sm:$0xff] }
 0x1f7   : > { %2886 = vmatpush.xpose.msra.mxu2 %v650_v22  ;;  %2846 = vmatpush.xpose.msra.mxu0 %v648_v23  ;;  %v670_v22 = vld [vmem:[%s5547_s7 + $0xd30] sm:$0xff]  ;;  %v668_v23 = vld [vmem:[%s5547_s7 + $0xd20] sm:$0xff] }
 0x1f8   : > { %2906 = vmatpush.xpose.msra.mxu3 %v651_v24  ;;  %2866 = vmatpush.xpose.msra.mxu1 %v649_v25  ;;  %v671_v24 = vld [vmem:[%s5547_s7 + $0xd38] sm:$0xff]  ;;  %v669_v25 = vld [vmem:[%s5547_s7 + $0xd28] sm:$0xff] }
 0x1fb   : > { %2887 = vmatpush.xpose.msra.mxu2 %v642_v26  ;;  %2847 = vmatpush.xpose.msra.mxu0 %v640_v27  ;;  %v662_v26 = vld [vmem:[%s5547_s7 + $0xcf0] sm:$0xff]  ;;  %v660_v27 = vld [vmem:[%s5547_s7 + $0xce0] sm:$0xff] }
 0x1fc   : > { %2907 = vmatpush.xpose.msra.mxu3 %v643_v28  ;;  %2867 = vmatpush.xpose.msra.mxu1 %v641_v29  ;;  %v663_v28 = vld [vmem:[%s5547_s7 + $0xcf8] sm:$0xff]  ;;  %v661_v29 = vld [vmem:[%s5547_s7 + $0xce8] sm:$0xff] }
 0x1ff   : > { %2888 = vmatpush.xpose.msra.mxu2 %v634_v30  ;;  %2848 = vmatpush.xpose.msra.mxu0 %v632_v32  ;;  %v654_v30 = vld [vmem:[%s5547_s7 + $0xcb0] sm:$0xff]  ;;  %v655_v32 = vld [vmem:[%s5547_s7 + $0xcb8] sm:$0xff] }
 0x200   : > { %2908 = vmatpush.xpose.msra.mxu3 %v635_v34  ;;  %2868 = vmatpush.xpose.msra.mxu1 %v633_v36  ;;  %v653_v34 = vld [vmem:[%s5547_s7 + $0xca8] sm:$0xff]  ;;  %v647_v36 = vld [vmem:[%s5547_s7 + $0xc78] sm:$0xff] }
 0x202   : > { %2889 = vmatmul.f32.vlgmr.msra.gmra.mxu2 %v6056_v42  ;;  %2849 = vmatmul.f32.vlgmr.msra.gmra.mxu0 %v6060_v43 }
 0x203   : > { %2953 = vmatpush.xpose.msrb.mxu2 %v758_v31  ;;  %2913 = vmatpush.xpose.msrb.mxu0 %v756_v10  ;;  %v652_v31 = vld [vmem:[%s5547_s7 + $0xca0] sm:$0xff]  ;;  %v646_v10 = vld [vmem:[%s5547_s7 + $0xc70] sm:$0xff] }
 0x204   : > { %2973 = vmatpush.xpose.msrb.mxu3 %v759_v35  ;;  %2933 = vmatpush.xpose.msrb.mxu1 %v757_v14  ;;  %v644_v35 = vld [vmem:[%s5547_s7 + $0xc60] sm:$0xff]  ;;  %v645_v14 = vld [vmem:[%s5547_s7 + $0xc68] sm:$0xff] }
 0x205   : > { %2909 = vmatmul.f32.vlgmr.msra.gmra.mxu3 %v6064_v45  ;;  %2869 = vmatmul.f32.vlgmr.msra.gmra.mxu1 %v6068_v47 }
 0x207   : > { %2954 = vmatpush.xpose.msrb.mxu2 %v750_v40  ;;  %2914 = vmatpush.xpose.msrb.mxu0 %v748_v38  ;;  %v638_v40 = vld [vmem:[%s5547_s7 + $0xc30] sm:$0xff] }
 0x208   : > { %2974 = vmatpush.xpose.msrb.mxu3 %v751_v16  ;;  %2934 = vmatpush.xpose.msrb.mxu1 %v749_v41  ;;  %v882_v38 = vld [vmem:[%s5547_s7 + $0x13d0] sm:$0xff]  ;;  %v636_v16 = vld [vmem:[%s5547_s7 + $0xc20] sm:$0xff]  ;;  %v639_v41 = vld [vmem:[%s5547_s7 + $0xc38] sm:$0xff] }
 0x20b   : > { %2955 = vmatpush.xpose.msrb.mxu2 %v742_v44  ;;  %2915 = vmatpush.xpose.msrb.mxu0 %v740_v46  ;;  %v880_v44 = vld [vmem:[%s5547_s7 + $0x13c0] sm:$0xff]  ;;  %v883_v46 = vld [vmem:[%s5547_s7 + $0x13d8] sm:$0xff] }
 0x20c   : > { %2975 = vmatpush.xpose.msrb.mxu3 %v743_v48  ;;  %2935 = vmatpush.xpose.msrb.mxu1 %v741_v49  ;;  %v637_v48 = vld [vmem:[%s5547_s7 + $0xc28] sm:$0xff] }
 0x20d   : > { %v881_v49 = vld [vmem:[%s5547_s7 + $0x13c8] sm:$0xff] }
 0x20f   : > { %2956 = vmatpush.xpose.msrb.mxu2 %v734_v50  ;;  %2916 = vmatpush.xpose.msrb.mxu0 %v732_v51  ;;  %v874_v50 = vld [vmem:[%s5547_s7 + $0x1390] sm:$0xff]  ;;  %v872_v51 = vld [vmem:[%s5547_s7 + $0x1380] sm:$0xff] }
 0x210   : > { %2976 = vmatpush.xpose.msrb.mxu3 %v735_v52  ;;  %2936 = vmatpush.xpose.msrb.mxu1 %v733_v53  ;;  %v875_v52 = vld [vmem:[%s5547_s7 + $0x1398] sm:$0xff]  ;;  %v873_v53 = vld [vmem:[%s5547_s7 + $0x1388] sm:$0xff] }
 0x213   : > { %2957 = vmatpush.xpose.msrb.mxu2 %v726_v54  ;;  %2917 = vmatpush.xpose.msrb.mxu0 %v724_v55  ;;  %v864_v54 = vld [vmem:[%s5547_s7 + $0x1340] sm:$0xff]  ;;  %v867_v55 = vld [vmem:[%s5547_s7 + $0x1358] sm:$0xff] }
 0x214   : > { %2977 = vmatpush.xpose.msrb.mxu3 %v727_v56  ;;  %2937 = vmatpush.xpose.msrb.mxu1 %v725_v57  ;;  %v856_v56 = vld [vmem:[%s5547_s7 + $0x1300] sm:$0xff]  ;;  %v859_v57 = vld [vmem:[%s5547_s7 + $0x1318] sm:$0xff] }
 0x217   : > { %2958 = vmatpush.xpose.msrb.mxu2 %v718_v58  ;;  %2918 = vmatpush.xpose.msrb.mxu0 %v716_v59  ;;  %v850_v58 = vld [vmem:[%s5547_s7 + $0x12d0] sm:$0xff]  ;;  %v848_v59 = vld [vmem:[%s5547_s7 + $0x12c0] sm:$0xff] }
 0x218   : > { %2978 = vmatpush.xpose.msrb.mxu3 %v719_v60  ;;  %2938 = vmatpush.xpose.msrb.mxu1 %v717_v61  ;;  %v851_v60 = vld [vmem:[%s5547_s7 + $0x12d8] sm:$0xff]  ;;  %v849_v61 = vld [vmem:[%s5547_s7 + $0x12c8] sm:$0xff] }
 0x21b   : > { %2959 = vmatpush.xpose.msrb.mxu2 %v710_v62  ;;  %2919 = vmatpush.xpose.msrb.mxu0 %v708_v63  ;;  %v842_v62 = vld [vmem:[%s5547_s7 + $0x1290] sm:$0xff]  ;;  %v840_v63 = vld [vmem:[%s5547_s7 + $0x1280] sm:$0xff] }
 0x21c   : > { %2979 = vmatpush.xpose.msrb.mxu3 %v711_v0  ;;  %2939 = vmatpush.xpose.msrb.mxu1 %v709_v1  ;;  %v843_v0 = vld [vmem:[%s5547_s7 + $0x1298] sm:$0xff]  ;;  %v841_v1 = vld [vmem:[%s5547_s7 + $0x1288] sm:$0xff] }
 0x21f   : > { %2960 = vmatpush.xpose.msrb.mxu2 %v702_v2  ;;  %2920 = vmatpush.xpose.msrb.mxu0 %v700_v3  ;;  %v834_v2 = vld [vmem:[%s5547_s7 + $0x1250] sm:$0xff]  ;;  %v832_v3 = vld [vmem:[%s5547_s7 + $0x1240] sm:$0xff] }
 0x220   : > { %2980 = vmatpush.xpose.msrb.mxu3 %v703_v4  ;;  %2940 = vmatpush.xpose.msrb.mxu1 %v701_v5  ;;  %v835_v4 = vld [vmem:[%s5547_s7 + $0x1258] sm:$0xff]  ;;  %v833_v5 = vld [vmem:[%s5547_s7 + $0x1248] sm:$0xff] }
 0x223   : > { %2961 = vmatpush.xpose.msrb.mxu2 %v694_v6  ;;  %2921 = vmatpush.xpose.msrb.mxu0 %v692_v7  ;;  %v826_v6 = vld [vmem:[%s5547_s7 + $0x1210] sm:$0xff]  ;;  %v824_v7 = vld [vmem:[%s5547_s7 + $0x1200] sm:$0xff] }
 0x224   : > { %2981 = vmatpush.xpose.msrb.mxu3 %v695_v8  ;;  %2941 = vmatpush.xpose.msrb.mxu1 %v693_v9  ;;  %v827_v8 = vld [vmem:[%s5547_s7 + $0x1218] sm:$0xff]  ;;  %v825_v9 = vld [vmem:[%s5547_s7 + $0x1208] sm:$0xff] }
 0x227   : > { %2962 = vmatpush.xpose.msrb.mxu2 %v686_v11  ;;  %2922 = vmatpush.xpose.msrb.mxu0 %v684_v13  ;;  %v818_v11 = vld [vmem:[%s5547_s7 + $0x11d0] sm:$0xff]  ;;  %v816_v13 = vld [vmem:[%s5547_s7 + $0x11c0] sm:$0xff] }
 0x228   : > { %2982 = vmatpush.xpose.msrb.mxu3 %v687_v15  ;;  %2942 = vmatpush.xpose.msrb.mxu1 %v685_v17  ;;  %v819_v15 = vld [vmem:[%s5547_s7 + $0x11d8] sm:$0xff]  ;;  %v817_v17 = vld [vmem:[%s5547_s7 + $0x11c8] sm:$0xff] }
 0x22b   : > { %2963 = vmatpush.xpose.msrb.mxu2 %v678_v18  ;;  %2923 = vmatpush.xpose.msrb.mxu0 %v676_v19  ;;  %v810_v18 = vld [vmem:[%s5547_s7 + $0x1190] sm:$0xff]  ;;  %v808_v19 = vld [vmem:[%s5547_s7 + $0x1180] sm:$0xff] }
 0x22c   : > { %2983 = vmatpush.xpose.msrb.mxu3 %v679_v20  ;;  %2943 = vmatpush.xpose.msrb.mxu1 %v677_v21  ;;  %v811_v20 = vld [vmem:[%s5547_s7 + $0x1198] sm:$0xff]  ;;  %v809_v21 = vld [vmem:[%s5547_s7 + $0x1188] sm:$0xff] }
 0x22f   : > { %2964 = vmatpush.xpose.msrb.mxu2 %v670_v22  ;;  %2924 = vmatpush.xpose.msrb.mxu0 %v668_v23  ;;  %v802_v22 = vld [vmem:[%s5547_s7 + $0x1150] sm:$0xff]  ;;  %v800_v23 = vld [vmem:[%s5547_s7 + $0x1140] sm:$0xff] }
 0x230   : > { %2984 = vmatpush.xpose.msrb.mxu3 %v671_v24  ;;  %2944 = vmatpush.xpose.msrb.mxu1 %v669_v25  ;;  %v803_v24 = vld [vmem:[%s5547_s7 + $0x1158] sm:$0xff]  ;;  %v801_v25 = vld [vmem:[%s5547_s7 + $0x1148] sm:$0xff] }
 0x233   : > { %2965 = vmatpush.xpose.msrb.mxu2 %v662_v26  ;;  %2925 = vmatpush.xpose.msrb.mxu0 %v660_v27  ;;  %v794_v26 = vld [vmem:[%s5547_s7 + $0x1110] sm:$0xff]  ;;  %v792_v27 = vld [vmem:[%s5547_s7 + $0x1100] sm:$0xff] }
 0x234   : > { %2985 = vmatpush.xpose.msrb.mxu3 %v663_v28  ;;  %2945 = vmatpush.xpose.msrb.mxu1 %v661_v29  ;;  %v795_v28 = vld [vmem:[%s5547_s7 + $0x1118] sm:$0xff]  ;;  %v793_v29 = vld [vmem:[%s5547_s7 + $0x1108] sm:$0xff] }
 0x237   : > { %2966 = vmatpush.xpose.msrb.mxu2 %v654_v30  ;;  %2926 = vmatpush.xpose.msrb.mxu0 %v652_v31  ;;  %v786_v30 = vld [vmem:[%s5547_s7 + $0x10d0] sm:$0xff]  ;;  %v784_v31 = vld [vmem:[%s5547_s7 + $0x10c0] sm:$0xff] }
 0x238   : > { %2986 = vmatpush.xpose.msrb.mxu3 %v655_v32  ;;  %2946 = vmatpush.xpose.msrb.mxu1 %v653_v34  ;;  %v787_v32 = vld [vmem:[%s5547_s7 + $0x10d8] sm:$0xff]  ;;  %v785_v34 = vld [vmem:[%s5547_s7 + $0x10c8] sm:$0xff] }
 0x23b   : > { %2967 = vmatpush.xpose.msrb.mxu2 %v646_v10  ;;  %2927 = vmatpush.xpose.msrb.mxu0 %v644_v35  ;;  %v778_v10 = vld [vmem:[%s5547_s7 + $0x1090] sm:$0xff]  ;;  %v776_v35 = vld [vmem:[%s5547_s7 + $0x1080] sm:$0xff] }
 0x23c   : > { %2987 = vmatpush.xpose.msrb.mxu3 %v647_v36  ;;  %2947 = vmatpush.xpose.msrb.mxu1 %v645_v14  ;;  %v779_v36 = vld [vmem:[%s5547_s7 + $0x1098] sm:$0xff]  ;;  %v777_v14 = vld [vmem:[%s5547_s7 + $0x1088] sm:$0xff] }
 0x23f   : > { %2968 = vmatpush.xpose.msrb.mxu2 %v638_v40  ;;  %2928 = vmatpush.xpose.msrb.mxu0 %v636_v16  ;;  %v770_v40 = vld [vmem:[%s5547_s7 + $0x1050] sm:$0xff]  ;;  %v771_v16 = vld [vmem:[%s5547_s7 + $0x1058] sm:$0xff] }
 0x240   : > { %2988 = vmatpush.xpose.msrb.mxu3 %v639_v41  ;;  %2948 = vmatpush.xpose.msrb.mxu1 %v637_v48  ;;  %v6188_v41 = vpop.f32.mrf.mxu0  ;;  %v760_v48 = vld [vmem:[%s5547_s7 + $0x1000] sm:$0xff] }
 0x242   : > { %2969 = vmatmul.f32.vlgmr.msrb.gmra.mxu2 %v5980_v12  ;;  %2929 = vmatmul.f32.vlgmr.msrb.gmra.mxu0 %v5984_v37  ;;  %v866_v12 = vld [vmem:[%s5547_s7 + $0x1350] sm:$0xff]  ;;  %v865_v37 = vld [vmem:[%s5547_s7 + $0x1348] sm:$0xff] }
 0x243   : > { %3033 = vmatpush.xpose.msra.mxu2 %v882_v38  ;;  %2993 = vmatpush.xpose.msra.mxu0 %v880_v44  ;;  %v768_v38 = vld [vmem:[%s5547_s7 + $0x1040] sm:$0xff]  ;;  %v769_v44 = vld [vmem:[%s5547_s7 + $0x1048] sm:$0xff] }
 0x244   : > { %3053 = vmatpush.xpose.msra.mxu3 %v883_v46  ;;  %3013 = vmatpush.xpose.msra.mxu1 %v881_v49  ;;  %v762_v46 = vld [vmem:[%s5547_s7 + $0x1010] sm:$0xff] }
 0x245   : > { %2989 = vmatmul.f32.vlgmr.msrb.gmra.mxu3 %v5988_v33  ;;  %2949 = vmatmul.f32.vlgmr.msrb.gmra.mxu1 %v5992_v39  ;;  %v858_v33 = vld [vmem:[%s5547_s7 + $0x1310] sm:$0xff]  ;;  %v857_v39 = vld [vmem:[%s5547_s7 + $0x1308] sm:$0xff] }
 0x246   : > { %v886_v49 = vld [vmem:[%s5547_s7 + $0x13f0] sm:$0xff] }
 0x247   : > { %3034 = vmatpush.xpose.msra.mxu2 %v874_v50  ;;  %2994 = vmatpush.xpose.msra.mxu0 %v872_v51  ;;  %v763_v50 = vld [vmem:[%s5547_s7 + $0x1018] sm:$0xff]  ;;  %v6195_v51 = vpop.f32.mrf.mxu1 }
 0x248   : > { %3054 = vmatpush.xpose.msra.mxu3 %v875_v52  ;;  %3014 = vmatpush.xpose.msra.mxu1 %v873_v53  ;;  %v884_v52 = vld [vmem:[%s5547_s7 + $0x13e0] sm:$0xff]  ;;  %v887_v53 = vld [vmem:[%s5547_s7 + $0x13f8] sm:$0xff] }
 0x24b   : > { %3035 = vmatpush.xpose.msra.mxu2 %v866_v12  ;;  %2995 = vmatpush.xpose.msra.mxu0 %v864_v54  ;;  %v761_v12 = vld [vmem:[%s5547_s7 + $0x1008] sm:$0xff] }
 0x24c   : > { %3055 = vmatpush.xpose.msra.mxu3 %v867_v55  ;;  %3015 = vmatpush.xpose.msra.mxu1 %v865_v37  ;;  %v885_v54 = vld [vmem:[%s5547_s7 + $0x13e8] sm:$0xff]  ;;  %v878_v55 = vld [vmem:[%s5547_s7 + $0x13b0] sm:$0xff]  ;;  %v6202_v37 = vpop.f32.mrf.mxu2 }
 0x24f   : > { %3036 = vmatpush.xpose.msra.mxu2 %v858_v33  ;;  %2996 = vmatpush.xpose.msra.mxu0 %v856_v56  ;;  %v876_v33 = vld [vmem:[%s5547_s7 + $0x13a0] sm:$0xff]  ;;  %v879_v56 = vld [vmem:[%s5547_s7 + $0x13b8] sm:$0xff] }
 0x250   : > { %3056 = vmatpush.xpose.msra.mxu3 %v859_v57  ;;  %3016 = vmatpush.xpose.msra.mxu1 %v857_v39  ;;  %v6208_v57 = vpop.f32.mrf.mxu0  ;;  %v877_v39 = vld [vmem:[%s5547_s7 + $0x13a8] sm:$0xff] }
 0x253   : > { %3037 = vmatpush.xpose.msra.mxu2 %v850_v58  ;;  %2997 = vmatpush.xpose.msra.mxu0 %v848_v59  ;;  %v870_v58 = vld [vmem:[%s5547_s7 + $0x1370] sm:$0xff]  ;;  %v6213_v59 = vpop.f32.mrf.mxu3 }
 0x254   : > { %3057 = vmatpush.xpose.msra.mxu3 %v851_v60  ;;  %3017 = vmatpush.xpose.msra.mxu1 %v849_v61  ;;  %v868_v60 = vld [vmem:[%s5547_s7 + $0x1360] sm:$0xff]  ;;  %v869_v61 = vld [vmem:[%s5547_s7 + $0x1368] sm:$0xff] }
 0x257   : > { %3038 = vmatpush.xpose.msra.mxu2 %v842_v62  ;;  %2998 = vmatpush.xpose.msra.mxu0 %v840_v63  ;;  %v860_v62 = vld [vmem:[%s5547_s7 + $0x1320] sm:$0xff]  ;;  %v863_v63 = vld [vmem:[%s5547_s7 + $0x1338] sm:$0xff] }
 0x258   : > { %3058 = vmatpush.xpose.msra.mxu3 %v843_v0  ;;  %3018 = vmatpush.xpose.msra.mxu1 %v841_v1  ;;  %v6224_v0 = vpop.f32.mrf.mxu2  ;;  %v6226_v1 = vpop.f32.mrf.mxu0 }
 0x25b   : > { %3039 = vmatpush.xpose.msra.mxu2 %v834_v2  ;;  %2999 = vmatpush.xpose.msra.mxu0 %v832_v3  ;;  %v854_v2 = vld [vmem:[%s5547_s7 + $0x12f0] sm:$0xff]  ;;  %v852_v3 = vld [vmem:[%s5547_s7 + $0x12e0] sm:$0xff] }
 0x25c   : > { %3059 = vmatpush.xpose.msra.mxu3 %v835_v4  ;;  %3019 = vmatpush.xpose.msra.mxu1 %v833_v5  ;;  %v855_v4 = vld [vmem:[%s5547_s7 + $0x12f8] sm:$0xff]  ;;  %v6232_v5 = vpop.f32.mrf.mxu3 }
 0x25f   : > { %3040 = vmatpush.xpose.msra.mxu2 %v826_v6  ;;  %3000 = vmatpush.xpose.msra.mxu0 %v824_v7  ;;  %v853_v7 = vld [vmem:[%s5547_s7 + $0x12e8] sm:$0xff] }
 0x260   : > { %3060 = vmatpush.xpose.msra.mxu3 %v827_v8  ;;  %3020 = vmatpush.xpose.msra.mxu1 %v825_v9  ;;  %v846_v8 = vld [vmem:[%s5547_s7 + $0x12b0] sm:$0xff]  ;;  %v844_v9 = vld [vmem:[%s5547_s7 + $0x12a0] sm:$0xff] }
 0x263   : > { %3041 = vmatpush.xpose.msra.mxu2 %v818_v11  ;;  %3001 = vmatpush.xpose.msra.mxu0 %v816_v13  ;;  %v847_v11 = vld [vmem:[%s5547_s7 + $0x12b8] sm:$0xff]  ;;  %v6240_v13 = vpop.f32.mrf.mxu2 }
 0x264   : > { %3061 = vmatpush.xpose.msra.mxu3 %v819_v15  ;;  %3021 = vmatpush.xpose.msra.mxu1 %v817_v17  ;;  %v845_v15 = vld [vmem:[%s5547_s7 + $0x12a8] sm:$0xff]  ;;  %v838_v17 = vld [vmem:[%s5547_s7 + $0x1270] sm:$0xff] }
 0x267   : > { %3042 = vmatpush.xpose.msra.mxu2 %v810_v18  ;;  %3002 = vmatpush.xpose.msra.mxu0 %v808_v19  ;;  %v6244_v18 = vpop.f32.mrf.mxu0  ;;  %v836_v19 = vld [vmem:[%s5547_s7 + $0x1260] sm:$0xff] }
 0x268   : > { %3062 = vmatpush.xpose.msra.mxu3 %v811_v20  ;;  %3022 = vmatpush.xpose.msra.mxu1 %v809_v21  ;;  %v839_v20 = vld [vmem:[%s5547_s7 + $0x1278] sm:$0xff]  ;;  %v6248_v21 = vpop.f32.mrf.mxu3 }
 0x26b   : > { %3043 = vmatpush.xpose.msra.mxu2 %v802_v22  ;;  %3003 = vmatpush.xpose.msra.mxu0 %v800_v23  ;;  %v837_v22 = vld [vmem:[%s5547_s7 + $0x1268] sm:$0xff]  ;;  %v830_v23 = vld [vmem:[%s5547_s7 + $0x1230] sm:$0xff] }
 0x26c   : > { %3063 = vmatpush.xpose.msra.mxu3 %v803_v24  ;;  %3023 = vmatpush.xpose.msra.mxu1 %v801_v25  ;;  %v828_v25 = vld [vmem:[%s5547_s7 + $0x1220] sm:$0xff] }
 0x26f   : > { %3044 = vmatpush.xpose.msra.mxu2 %v794_v26  ;;  %3004 = vmatpush.xpose.msra.mxu0 %v792_v27  ;;  %v831_v26 = vld [vmem:[%s5547_s7 + $0x1238] sm:$0xff]  ;;  %v829_v27 = vld [vmem:[%s5547_s7 + $0x1228] sm:$0xff] }
 0x270   : > { %3064 = vmatpush.xpose.msra.mxu3 %v795_v28  ;;  %3024 = vmatpush.xpose.msra.mxu1 %v793_v29  ;;  %v822_v28 = vld [vmem:[%s5547_s7 + $0x11f0] sm:$0xff]  ;;  %v6258_v29 = vpop.f32.mrf.mxu2 }
 0x273   : > { %3045 = vmatpush.xpose.msra.mxu2 %v786_v30  ;;  %3005 = vmatpush.xpose.msra.mxu0 %v784_v31  ;;  %v2690_v30 = vpop.f32.mrf.mxu0  ;;  %v820_v31 = vld [vmem:[%s5547_s7 + $0x11e0] sm:$0xff] }
 0x274   : > { %3065 = vmatpush.xpose.msra.mxu3 %v787_v32  ;;  %3025 = vmatpush.xpose.msra.mxu1 %v785_v34  ;;  %v823_v32 = vld [vmem:[%s5547_s7 + $0x11f8] sm:$0xff]  ;;  %v821_v34 = vld [vmem:[%s5547_s7 + $0x11e8] sm:$0xff] }
 0x277   : > { %3046 = vmatpush.xpose.msra.mxu2 %v778_v10  ;;  %3006 = vmatpush.xpose.msra.mxu0 %v776_v35  ;;  %v814_v10 = vld [vmem:[%s5547_s7 + $0x11b0] sm:$0xff]  ;;  %v6265_v35 = vpop.f32.mrf.mxu3 }
 0x278   : > { %3066 = vmatpush.xpose.msra.mxu3 %v779_v36  ;;  %3026 = vmatpush.xpose.msra.mxu1 %v777_v14  ;;  %v812_v14 = vld [vmem:[%s5547_s7 + $0x11a0] sm:$0xff] }
 0x27b   : > { %3047 = vmatpush.xpose.msra.mxu2 %v770_v40  ;;  %3007 = vmatpush.xpose.msra.mxu0 %v768_v38  ;;  %v815_v40 = vld [vmem:[%s5547_s7 + $0x11b8] sm:$0xff]  ;;  %v813_v38 = vld [vmem:[%s5547_s7 + $0x11a8] sm:$0xff] }
 0x27c   : > { %3067 = vmatpush.xpose.msra.mxu3 %v771_v16  ;;  %3027 = vmatpush.xpose.msra.mxu1 %v769_v44  ;;  %v2296_v16 = vld [vmem:[%s6270_s23] sm:$0xff] }
 0x27d   : > { %v806_v44 = vld [vmem:[%s5547_s7 + $0x1170] sm:$0xff] }
 0x27f   : > { %3048 = vmatpush.xpose.msra.mxu2 %v762_v46  ;;  %3008 = vmatpush.xpose.msra.mxu0 %v760_v48  ;;  %v2301_v46 = vperm.slane %v2296_v16, 1  ;;  %v2730_v48 = vpop.f32.mrf.mxu2 }
 0x280   : > { %3068 = vmatpush.xpose.msra.mxu3 %v763_v50  ;;  %3028 = vmatpush.xpose.msra.mxu1 %v761_v12  ;;  %v807_v50 = vld [vmem:[%s5547_s7 + $0x1178] sm:$0xff]  ;;  %v805_v12 = vld [vmem:[%s5547_s7 + $0x1168] sm:$0xff] }
 0x282   : > { %3049 = vmatmul.f32.vlgmr.msra.gmra.mxu2 %v6056_v42  ;;  %3009 = vmatmul.f32.vlgmr.msra.gmra.mxu0 %v6060_v43  ;;  %v871_v42 = vld [vmem:[%s5547_s7 + $0x1378] sm:$0xff]  ;;  %v6218_v43 = vpop.f32.mrf.mxu1 }
 0x283   : > { %3113 = vmatpush.xpose.msrb.mxu2 %v886_v49  ;;  %3073 = vmatpush.xpose.msrb.mxu0 %v884_v52  ;;  %v804_v49 = vld [vmem:[%s5547_s7 + $0x1160] sm:$0xff]  ;;  %v2302_v52 = vperm.slane %v2296_v16, 2 }
 0x284   : > { %3133 = vmatpush.xpose.msrb.mxu3 %v887_v53  ;;  %3093 = vmatpush.xpose.msrb.mxu1 %v885_v54  ;;  %v6276_v53 = vpop.f32.mrf.mxu0  ;;  %v798_v54 = vld [vmem:[%s5547_s7 + $0x1130] sm:$0xff] }
 0x285   : > { %3069 = vmatmul.f32.vlgmr.msra.gmra.mxu3 %v6064_v45  ;;  %3029 = vmatmul.f32.vlgmr.msra.gmra.mxu1 %v6068_v47  ;;  %v862_v45 = vld [vmem:[%s5547_s7 + $0x1330] sm:$0xff]  ;;  %v861_v47 = vld [vmem:[%s5547_s7 + $0x1328] sm:$0xff] }
 0x287   : > { %3114 = vmatpush.xpose.msrb.mxu2 %v878_v55  ;;  %3074 = vmatpush.xpose.msrb.mxu0 %v876_v33  ;;  %v2531_v55 = vadd.f32 %v6226_v1, %v2301_v46  ;;  %v2750_v33 = vpop.f32.mrf.mxu3  ;;  %v791_v1 = vld [vmem:[%s5547_s7 + $0x10f8] sm:$0xff]  ;;  %v765_v46 = vld [vmem:[%s5547_s7 + $0x1028] sm:$0xff] }
 0x288   : > { %3134 = vmatpush.xpose.msrb.mxu3 %v879_v56  ;;  %3094 = vmatpush.xpose.msrb.mxu1 %v877_v39  ;;  %v796_v56 = vld [vmem:[%s5547_s7 + $0x1120] sm:$0xff]  ;;  %v799_v39 = vld [vmem:[%s5547_s7 + $0x1138] sm:$0xff] }
 0x28a   : > { %v6234_v6 = vpop.f32.mrf.mxu1 }
 0x28b   : > { %3115 = vmatpush.xpose.msrb.mxu2 %v870_v58  ;;  %3075 = vmatpush.xpose.msrb.mxu0 %v868_v60  ;;  %v2300_v58 = vperm.slane %v2296_v16, 0  ;;  %v2691_v60 = vadd.f32 %v2690_v30, %v2302_v52  ;;  %v1000_v52 = vld [vmem:[%s5547_s7 + $0x1780] sm:$0xff] }
 0x28c   : > { %3135 = vmatpush.xpose.msrb.mxu3 %v871_v42  ;;  %3095 = vmatpush.xpose.msrb.mxu1 %v869_v61  ;;  %v797_v61 = vld [vmem:[%s5547_s7 + $0x1128] sm:$0xff] }
 0x28f   : > { %3116 = vmatpush.xpose.msrb.mxu2 %v862_v45  ;;  %3076 = vmatpush.xpose.msrb.mxu0 %v860_v62  ;;  %v790_v45 = vld [vmem:[%s5547_s7 + $0x10f0] sm:$0xff]  ;;  %v2551_v62 = vadd.f32 %v6234_v6, %v2531_v55  ;;  %v6325_v55 = vld.sshfl [vmem:[#allocation1 + $0x30] sm:$0xff pattern:$0x73625140] }
 0x290   : > { %3136 = vmatpush.xpose.msrb.mxu3 %v863_v63  ;;  %3096 = vmatpush.xpose.msrb.mxu1 %v861_v47  ;;  %v788_v63 = vld [vmem:[%s5547_s7 + $0x10e0] sm:$0xff]  ;;  %v2303_v47 = vperm.slane %v2296_v16, 3 }
 0x291   : > { %v2571_v6 = vadd.f32 %v6240_v13, %v2551_v62  ;;  %v995_v62 = vld [vmem:[%s5547_s7 + $0x1758] sm:$0xff] }
 0x292   : > { %v6252_v24 = vpop.f32.mrf.mxu1 }
 0x293   : > { %3117 = vmatpush.xpose.msrb.mxu2 %v854_v2  ;;  %3077 = vmatpush.xpose.msrb.mxu0 %v852_v3  ;;  %v2371_v2 = vadd.f32 %v6188_v41, %v2300_v58  ;;  %v2591_v13 = vadd.f32 %v6248_v21, %v2571_v6  ;;  %v6334_v58 = vld.sshfl [vmem:[#allocation1 + $0x38] sm:$0xff pattern:$0x73625140]  ;;  %v987_v6 = vld [vmem:[%s5547_s7 + $0x1718] sm:$0xff] }
 0x294   : > { %3137 = vmatpush.xpose.msrb.mxu3 %v855_v4  ;;  %3097 = vmatpush.xpose.msrb.mxu1 %v853_v7  ;;  %v6291_v4 = vpop.f32.mrf.mxu2  ;;  %v789_v7 = vld [vmem:[%s5547_s7 + $0x10e8] sm:$0xff] }
 0x295   : > { %v2391_v41 = vadd.f32 %v6195_v51, %v2371_v2  ;;  %v2611_v21 = vadd.f32 %v6244_v18, %v2591_v13  ;;  %v1009_v18 = vld [vmem:[%s5547_s7 + $0x17c8] sm:$0xff] }
 0x297   : > { %3118 = vmatpush.xpose.msrb.mxu2 %v846_v8  ;;  %3078 = vmatpush.xpose.msrb.mxu0 %v844_v9  ;;  %v2850_v8 = vpop.f32.mrf.mxu0  ;;  %v782_v9 = vld [vmem:[%s5547_s7 + $0x10b0] sm:$0xff] }
 0x298   : > { %3138 = vmatpush.xpose.msrb.mxu3 %v847_v11  ;;  %3098 = vmatpush.xpose.msrb.mxu1 %v845_v15  ;;  %v780_v11 = vld [vmem:[%s5547_s7 + $0x10a0] sm:$0xff]  ;;  %v783_v15 = vld [vmem:[%s5547_s7 + $0x10b8] sm:$0xff] }
 0x29a   : > { %v2710_v36 = vpop.f32.mrf.mxu1 }
 0x29b   : > { %3119 = vmatpush.xpose.msrb.mxu2 %v838_v17  ;;  %3079 = vmatpush.xpose.msrb.mxu0 %v836_v19  ;;  %v2711_v3 = vadd.f32 %v2710_v36, %v2691_v60  ;;  %v2851_v17 = vadd.f32 %v2850_v8, %v2303_v47  ;;  %v764_v36 = vld [vmem:[%s5547_s7 + $0x1020] sm:$0xff] }
 0x29c   : > { %3139 = vmatpush.xpose.msrb.mxu3 %v839_v20  ;;  %3099 = vmatpush.xpose.msrb.mxu1 %v837_v22  ;;  %v6299_v20 = vpop.f32.mrf.mxu3  ;;  %v781_v22 = vld [vmem:[%s5547_s7 + $0x10a8] sm:$0xff]  ;;  %v984_v8 = vld [vmem:[%s5547_s7 + $0x1700] sm:$0xff] }
 0x29d   : > { %v2731_v19 = vadd.f32 %v2730_v48, %v2711_v3  ;;  %v986_v3 = vld [vmem:[%s5547_s7 + $0x1710] sm:$0xff] }
 0x29f   : > { %3120 = vmatpush.xpose.msrb.mxu2 %v830_v23  ;;  %3080 = vmatpush.xpose.msrb.mxu0 %v828_v25  ;;  %v774_v25 = vld [vmem:[%s5547_s7 + $0x1070] sm:$0xff]  ;;  %v2751_v30 = vadd.f32 %v2750_v33, %v2731_v19  ;;  %v6329_v33 = vld.sshfl [vmem:[#allocation1 + $0x20] sm:$0xff pattern:$0x73625140] }
 0x2a0   : > { %3140 = vmatpush.xpose.msrb.mxu3 %v831_v26  ;;  %3100 = vmatpush.xpose.msrb.mxu1 %v829_v27  ;;  %v772_v26 = vld [vmem:[%s5547_s7 + $0x1060] sm:$0xff]  ;;  %v775_v27 = vld [vmem:[%s5547_s7 + $0x1078] sm:$0xff] }
 0x2a1   : > { %v2771_v16 = vadd.f32 %v6276_v53, %v2751_v30  ;;  %v969_v30 = vld [vmem:[%s5547_s7 + $0x1688] sm:$0xff] }
 0x2a2   : > { %v6283_v42 = vpop.f32.mrf.mxu1 }
 0x2a3   : > { %3121 = vmatpush.xpose.msrb.mxu2 %v822_v28  ;;  %3081 = vmatpush.xpose.msrb.mxu0 %v820_v31  ;;  %v2411_v28 = vadd.f32 %v6202_v37, %v2391_v41  ;;  %v773_v31 = vld [vmem:[%s5547_s7 + $0x1068] sm:$0xff]  ;;  %v978_v41 = vld [vmem:[%s5547_s7 + $0x16d0] sm:$0xff] }
 0x2a4   : > { %3141 = vmatpush.xpose.msrb.mxu3 %v823_v32  ;;  %3101 = vmatpush.xpose.msrb.mxu1 %v821_v34  ;;  %v2890_v32 = vpop.f32.mrf.mxu2  ;;  %v766_v34 = vld [vmem:[%s5547_s7 + $0x1030] sm:$0xff]  ;;  %v2910_v48 = vpop.f32.mrf.mxu3 }
 0x2a5   : > { %v2431_v37 = vadd.f32 %v6213_v59, %v2411_v28  ;;  %v971_v28 = vld [vmem:[%s5547_s7 + $0x1698] sm:$0xff] }
 0x2a7   : > { %3122 = vmatpush.xpose.msrb.mxu2 %v814_v10  ;;  %3082 = vmatpush.xpose.msrb.mxu0 %v812_v14  ;;  %v1010_v10 = vld [vmem:[%s5547_s7 + $0x17d0] sm:$0xff]  ;;  %v767_v14 = vld [vmem:[%s5547_s7 + $0x1038] sm:$0xff]  ;;  %v2451_v53 = vadd.f32 %v6208_v57, %v2431_v37  ;;  %v944_v37 = vld [vmem:[%s5547_s7 + $0x15c0] sm:$0xff] }
 0x2a8   : > { %3142 = vmatpush.xpose.msrb.mxu3 %v815_v40  ;;  %3102 = vmatpush.xpose.msrb.mxu1 %v813_v38  ;;  %v1008_v40 = vld [vmem:[%s5547_s7 + $0x17c0] sm:$0xff] }
 0x2aa   : > { %v2870_v23 = vpop.f32.mrf.mxu1 }
 0x2ab   : > { %3123 = vmatpush.xpose.msrb.mxu2 %v806_v44  ;;  %3083 = vmatpush.xpose.msrb.mxu0 %v804_v49  ;;  %v2871_v51 = vadd.f32 %v2870_v23, %v2851_v17  ;;  %v1011_v44 = vld [vmem:[%s5547_s7 + $0x17d8] sm:$0xff]  ;;  %v2631_v49 = vadd.f32 %v6252_v24, %v2611_v21  ;;  %v1001_v24 = vld [vmem:[%s5547_s7 + $0x1788] sm:$0xff] }
 0x2ac   : > { %3143 = vmatpush.xpose.msrb.mxu3 %v807_v50  ;;  %3103 = vmatpush.xpose.msrb.mxu1 %v805_v12  ;;  %v1002_v50 = vld [vmem:[%s5547_s7 + $0x1790] sm:$0xff]  ;;  %v2791_v12 = vadd.f32 %v6283_v42, %v2771_v16  ;;  %v992_v42 = vld [vmem:[%s5547_s7 + $0x1740] sm:$0xff]  ;;  %v979_v23 = vld [vmem:[%s5547_s7 + $0x16d8] sm:$0xff] }
 0x2ad   : > { %v2891_v38 = vadd.f32 %v2890_v32, %v2871_v51  ;;  %v968_v51 = vld [vmem:[%s5547_s7 + $0x1680] sm:$0xff]  ;;  %v961_v21 = vld [vmem:[%s5547_s7 + $0x1648] sm:$0xff]  ;;  %v947_v16 = vld [vmem:[%s5547_s7 + $0x15d8] sm:$0xff] }
 0x2ae   : > { %v960_v32 = vld [vmem:[%s5547_s7 + $0x1640] sm:$0xff] }
 0x2af   : > { %3124 = vmatpush.xpose.msrb.mxu2 %v798_v54  ;;  %3084 = vmatpush.xpose.msrb.mxu0 %v796_v56  ;;  %v2911_v59 = vadd.f32 %v2910_v48, %v2891_v38  ;;  %v1003_v54 = vld [vmem:[%s5547_s7 + $0x1798] sm:$0xff]  ;;  %v2651_v56 = vadd.f32 %v6258_v29, %v2631_v49  ;;  %v2811_v29 = vadd.f32 %v6291_v4, %v2791_v12  ;;  %v946_v38 = vld [vmem:[%s5547_s7 + $0x15d0] sm:$0xff]  ;;  %v936_v48 = vld [vmem:[%s5547_s7 + $0x1580] sm:$0xff] }
 0x2b0   : > { %3144 = vmatpush.xpose.msrb.mxu3 %v799_v39  ;;  %3104 = vmatpush.xpose.msrb.mxu1 %v797_v61  ;;  %v994_v39 = vld [vmem:[%s5547_s7 + $0x1750] sm:$0xff]  ;;  %v937_v49 = vld [vmem:[%s5547_s7 + $0x1588] sm:$0xff] }
 0x2b1   : > { %v6338_v61 = vld.sshfl [vmem:[#allocation1 + $0x28] sm:$0xff pattern:$0x73625140]  ;;  %v2671_v47 = vadd.f32 %v6265_v35, %v2651_v56  ;;  %v2831_v4 = vadd.f32 %v6299_v20, %v2811_v29  ;;  %v985_v35 = vld [vmem:[%s5547_s7 + $0x1708] sm:$0xff]  ;;  %v904_v29 = vld [vmem:[%s5547_s7 + $0x1480] sm:$0xff] }
 0x2b2   : > { %v922_v12 = vld [vmem:[%s5547_s7 + $0x1510] sm:$0xff]  ;;  %v921_v56 = vld [vmem:[%s5547_s7 + $0x1508] sm:$0xff] }
 0x2b3   : > { %3125 = vmatpush.xpose.msrb.mxu2 %v790_v45  ;;  %3085 = vmatpush.xpose.msrb.mxu0 %v788_v63  ;;  %v2471_v45 = vadd.f32 %v6218_v43, %v2451_v53  ;;  %v4930_v20 = vrot.slane %v2831_v4, 4  ;;  %v929_v53 = vld [vmem:[%s5547_s7 + $0x1548] sm:$0xff]  ;;  %v891_v4 = vld [vmem:[%s5547_s7 + $0x1418] sm:$0xff] }
 0x2b4   : > { %3145 = vmatpush.xpose.msrb.mxu3 %v791_v1  ;;  %3105 = vmatpush.xpose.msrb.mxu1 %v789_v7  ;;  %v993_v1 = vld [vmem:[%s5547_s7 + $0x1748] sm:$0xff] }
 0x2b5   : > { %v2491_v43 = vadd.f32 %v6224_v0, %v2471_v45  ;;  %v976_v0 = vld [vmem:[%s5547_s7 + $0x16c0] sm:$0xff]  ;;  %v906_v45 = vld [vmem:[%s5547_s7 + $0x1490] sm:$0xff] }
 0x2b7   : > { %3126 = vmatpush.xpose.msrb.mxu2 %v782_v9  ;;  %3086 = vmatpush.xpose.msrb.mxu0 %v780_v11  ;;  %v2511_v19 = vadd.f32 %v6232_v5, %v2491_v43  ;;  %v888_v43 = vld [vmem:[%s5547_s7 + $0x1400] sm:$0xff] }
 0x2b8   : > { %3146 = vmatpush.xpose.msrb.mxu3 %v783_v15  ;;  %3106 = vmatpush.xpose.msrb.mxu1 %v781_v22  ;;  %v4929_v15 = vrot.slane %v2671_v47, 6  ;;  %v896_v47 = vld [vmem:[%s5547_s7 + $0x1440] sm:$0xff] }
 0x2ba   : > { %v4942_v13 = vsel %vm4941_vm0, %v2511_v19, %v4929_v15  ;;  %v1006_v15 = vld [vmem:[%s5547_s7 + $0x17b0] sm:$0xff]  ;;  %v1005_v19 = vld [vmem:[%s5547_s7 + $0x17a8] sm:$0xff] }
 0x2bb   : > { %3127 = vmatpush.xpose.msrb.mxu2 %v774_v25  ;;  %3087 = vmatpush.xpose.msrb.mxu0 %v772_v26  ;;  %v977_v25 = vld [vmem:[%s5547_s7 + $0x16c8] sm:$0xff] }
 0x2bc   : > { %3147 = vmatpush.xpose.msrb.mxu3 %v775_v27  ;;  %3107 = vmatpush.xpose.msrb.mxu1 %v773_v31  ;;  %v970_v27 = vld [vmem:[%s5547_s7 + $0x1690] sm:$0xff] }
 0x2bd   : > { %v962_v31 = vld [vmem:[%s5547_s7 + $0x1650] sm:$0xff] }
 0x2bf   : > { %3128 = vmatpush.xpose.msrb.mxu2 %v766_v34  ;;  %3088 = vmatpush.xpose.msrb.mxu0 %v764_v36  ;;  %v2930_v57 = vpop.f32.mrf.mxu0  ;;  %v963_v34 = vld [vmem:[%s5547_s7 + $0x1658] sm:$0xff]  ;;  %v952_v36 = vld [vmem:[%s5547_s7 + $0x1600] sm:$0xff] }
 0x2c0   : > { %3148 = vmatpush.xpose.msrb.mxu3 %v767_v14  ;;  %3108 = vmatpush.xpose.msrb.mxu1 %v765_v46  ;;  %v2931_v60 = vadd.f32 %v2930_v57, %v2911_v59  ;;  %v955_v14 = vld [vmem:[%s5547_s7 + $0x1618] sm:$0xff]  ;;  %v938_v46 = vld [vmem:[%s5547_s7 + $0x1590] sm:$0xff]  ;;  %v928_v59 = vld [vmem:[%s5547_s7 + $0x1540] sm:$0xff] }
 0x2c1   : > { %v914_v57 = vld [vmem:[%s5547_s7 + $0x14d0] sm:$0xff] }
 0x2c2   : > { %3129 = vmatmul.f32.vlgmr.msrb.gmra.mxu2 %v6325_v55  ;;  %3089 = vmatmul.f32.vlgmr.msrb.gmra.mxu0 %v6329_v33  ;;  %v2950_v63 = vpop.f32.mrf.mxu1 }
 0x2c3   : > { %3193 = vmatpush.xpose.msra.mxu2 %v1010_v10  ;;  %3153 = vmatpush.xpose.msra.mxu0 %v1008_v40  ;;  %v2951_v2 = vadd.f32 %v2950_v63, %v2931_v60  ;;  %v954_v10 = vld [vmem:[%s5547_s7 + $0x1610] sm:$0xff]  ;;  %v953_v40 = vld [vmem:[%s5547_s7 + $0x1608] sm:$0xff]  ;;  %v915_v60 = vld [vmem:[%s5547_s7 + $0x14d8] sm:$0xff] }
 0x2c4   : > { %3213 = vmatpush.xpose.msra.mxu3 %v1011_v44  ;;  %3173 = vmatpush.xpose.msra.mxu1 %v1009_v18  ;;  %v945_v44 = vld [vmem:[%s5547_s7 + $0x15c8] sm:$0xff]  ;;  %v939_v18 = vld [vmem:[%s5547_s7 + $0x1598] sm:$0xff] }
 0x2c5   : > { %3149 = vmatmul.f32.vlgmr.msrb.gmra.mxu3 %v6334_v58  ;;  %3109 = vmatmul.f32.vlgmr.msrb.gmra.mxu1 %v6338_v61  ;;  %v2970_v7 = vpop.f32.mrf.mxu2  ;;  %v905_v63 = vld [vmem:[%s5547_s7 + $0x1488] sm:$0xff] }
 0x2c6   : > { %v2971_v9 = vadd.f32 %v2970_v7, %v2951_v2  ;;  %v899_v2 = vld [vmem:[%s5547_s7 + $0x1458] sm:$0xff]  ;;  %v890_v7 = vld [vmem:[%s5547_s7 + $0x1410] sm:$0xff] }
 0x2c7   : > { %3194 = vmatpush.xpose.msra.mxu2 %v1002_v50  ;;  %3154 = vmatpush.xpose.msra.mxu0 %v1000_v52  ;;  %v930_v50 = vld [vmem:[%s5547_s7 + $0x1550] sm:$0xff]  ;;  %v931_v52 = vld [vmem:[%s5547_s7 + $0x1558] sm:$0xff] }
 0x2c8   : > { %3214 = vmatpush.xpose.msra.mxu3 %v1003_v54  ;;  %3174 = vmatpush.xpose.msra.mxu1 %v1001_v24  ;;  %v2990_v11 = vpop.f32.mrf.mxu3  ;;  %v920_v54 = vld [vmem:[%s5547_s7 + $0x1500] sm:$0xff]  ;;  %v923_v24 = vld [vmem:[%s5547_s7 + $0x1518] sm:$0xff] }
 0x2c9   : > { %v2991_v17 = vadd.f32 %v2990_v11, %v2971_v9  ;;  %v1012_v9 = vld [vmem:[%s5547_s7 + $0x17e0] sm:$0xff]  ;;  %v889_v11 = vld [vmem:[%s5547_s7 + $0x1408] sm:$0xff] }
 0x2cb   : > { %3195 = vmatpush.xpose.msra.mxu2 %v994_v39  ;;  %3155 = vmatpush.xpose.msra.mxu0 %v992_v42  ;;  %v4931_v22 = vrot.slane %v2991_v17, 2  ;;  %v912_v39 = vld [vmem:[%s5547_s7 + $0x14c0] sm:$0xff]  ;;  %v913_v42 = vld [vmem:[%s5547_s7 + $0x14c8] sm:$0xff] }
 0x2cc   : > { %3215 = vmatpush.xpose.msra.mxu3 %v995_v62  ;;  %3175 = vmatpush.xpose.msra.mxu1 %v993_v1  ;;  %v907_v62 = vld [vmem:[%s5547_s7 + $0x1498] sm:$0xff]  ;;  %v898_v1 = vld [vmem:[%s5547_s7 + $0x1450] sm:$0xff]  ;;  %v1004_v17 = vld [vmem:[%s5547_s7 + $0x17a0] sm:$0xff] }
 0x2cd   : > { %v4944_v26 = vsel %vm4943_vm1, %v4930_v20, %v4931_v22  ;;  %v6419_v20 = vld.sshfl [vmem:[#allocation1] sm:$0xff pattern:$0x73625140]  ;;  %v998_v22 = vld [vmem:[%s5547_s7 + $0x1770] sm:$0xff] }
 0x2ce   : > { %v4946_v5 = vsel %vm4945_vm2, %v4942_v13, %v4944_v26  ;;  %v6427_v13 = vld.sshfl [vmem:[#allocation1 + $0x8] sm:$0xff pattern:$0x73625140]  ;;  %v999_v26 = vld [vmem:[%s5547_s7 + $0x1778] sm:$0xff] }
 0x2cf   : > { %3196 = vmatpush.xpose.msra.mxu2 %v986_v3  ;;  %3156 = vmatpush.xpose.msra.mxu0 %v984_v8  ;;  %4960 = vst [vmem:[%s6363_s10] sm:$0xff] %v4946_v5  ;;  %v897_v3 = vld [vmem:[%s5547_s7 + $0x1448] sm:$0xff]  ;;  %v1014_v8 = vld [vmem:[%s5547_s7 + $0x17f0] sm:$0xff] }
 0x2d0   : > { %3216 = vmatpush.xpose.msra.mxu3 %v987_v6  ;;  %3176 = vmatpush.xpose.msra.mxu1 %v985_v35  ;;  %v1015_v6 = vld [vmem:[%s5547_s7 + $0x17f8] sm:$0xff]  ;;  %v1013_v35 = vld [vmem:[%s5547_s7 + $0x17e8] sm:$0xff]  ;;  %v990_v5 = vld [vmem:[%s5547_s7 + $0x1730] sm:$0xff] }
 0x2d3   : > { %3197 = vmatpush.xpose.msra.mxu2 %v978_v41  ;;  %3157 = vmatpush.xpose.msra.mxu0 %v976_v0  ;;  %v1007_v41 = vld [vmem:[%s5547_s7 + $0x17b8] sm:$0xff] }
 0x2d4   : > { %3217 = vmatpush.xpose.msra.mxu3 %v979_v23  ;;  %3177 = vmatpush.xpose.msra.mxu1 %v977_v25  ;;  %v6415_v0 = vld.sshfl [vmem:[#allocation1 + $0x10] sm:$0xff pattern:$0x73625140]  ;;  %v6423_v23 = vld.sshfl [vmem:[#allocation1 + $0x18] sm:$0xff pattern:$0x73625140] }
 0x2d5   : > { %v996_v25 = vld [vmem:[%s5547_s7 + $0x1760] sm:$0xff] }
 0x2d7   : > { %3198 = vmatpush.xpose.msra.mxu2 %v970_v27  ;;  %3158 = vmatpush.xpose.msra.mxu0 %v968_v51  ;;  %v997_v27 = vld [vmem:[%s5547_s7 + $0x1768] sm:$0xff]  ;;  %v988_v51 = vld [vmem:[%s5547_s7 + $0x1720] sm:$0xff] }
 0x2d8   : > { %3218 = vmatpush.xpose.msra.mxu3 %v971_v28  ;;  %3178 = vmatpush.xpose.msra.mxu1 %v969_v30  ;;  %v991_v28 = vld [vmem:[%s5547_s7 + $0x1738] sm:$0xff]  ;;  %v989_v30 = vld [vmem:[%s5547_s7 + $0x1728] sm:$0xff] }
 0x2db   : > { %3199 = vmatpush.xpose.msra.mxu2 %v962_v31  ;;  %3159 = vmatpush.xpose.msra.mxu0 %v960_v32  ;;  %v982_v31 = vld [vmem:[%s5547_s7 + $0x16f0] sm:$0xff]  ;;  %v980_v32 = vld [vmem:[%s5547_s7 + $0x16e0] sm:$0xff] }
 0x2dc   : > { %3219 = vmatpush.xpose.msra.mxu3 %v963_v34  ;;  %3179 = vmatpush.xpose.msra.mxu1 %v961_v21  ;;  %v983_v34 = vld [vmem:[%s5547_s7 + $0x16f8] sm:$0xff]  ;;  %v981_v21 = vld [vmem:[%s5547_s7 + $0x16e8] sm:$0xff] }
 0x2df   : > { %3200 = vmatpush.xpose.msra.mxu2 %v954_v10  ;;  %3160 = vmatpush.xpose.msra.mxu0 %v952_v36  ;;  %v974_v10 = vld [vmem:[%s5547_s7 + $0x16b0] sm:$0xff]  ;;  %v972_v36 = vld [vmem:[%s5547_s7 + $0x16a0] sm:$0xff] }
 0x2e0   : > { %3220 = vmatpush.xpose.msra.mxu3 %v955_v14  ;;  %3180 = vmatpush.xpose.msra.mxu1 %v953_v40  ;;  %v975_v14 = vld [vmem:[%s5547_s7 + $0x16b8] sm:$0xff]  ;;  %v973_v40 = vld [vmem:[%s5547_s7 + $0x16a8] sm:$0xff] }
 0x2e3   : > { %3201 = vmatpush.xpose.msra.mxu2 %v946_v38  ;;  %3161 = vmatpush.xpose.msra.mxu0 %v944_v37  ;;  %v966_v38 = vld [vmem:[%s5547_s7 + $0x1670] sm:$0xff]  ;;  %v964_v37 = vld [vmem:[%s5547_s7 + $0x1660] sm:$0xff] }
 0x2e4   : > { %3221 = vmatpush.xpose.msra.mxu3 %v947_v16  ;;  %3181 = vmatpush.xpose.msra.mxu1 %v945_v44  ;;  %v967_v16 = vld [vmem:[%s5547_s7 + $0x1678] sm:$0xff]  ;;  %v965_v44 = vld [vmem:[%s5547_s7 + $0x1668] sm:$0xff] }
 0x2e7   : > { %3202 = vmatpush.xpose.msra.mxu2 %v938_v46  ;;  %3162 = vmatpush.xpose.msra.mxu0 %v936_v48  ;;  %v958_v46 = vld [vmem:[%s5547_s7 + $0x1630] sm:$0xff]  ;;  %v956_v48 = vld [vmem:[%s5547_s7 + $0x1620] sm:$0xff] }
 0x2e8   : > { %3222 = vmatpush.xpose.msra.mxu3 %v939_v18  ;;  %3182 = vmatpush.xpose.msra.mxu1 %v937_v49  ;;  %v959_v18 = vld [vmem:[%s5547_s7 + $0x1638] sm:$0xff]  ;;  %v957_v49 = vld [vmem:[%s5547_s7 + $0x1628] sm:$0xff] }
 0x2eb   : > { %3203 = vmatpush.xpose.msra.mxu2 %v930_v50  ;;  %3163 = vmatpush.xpose.msra.mxu0 %v928_v59  ;;  %v950_v50 = vld [vmem:[%s5547_s7 + $0x15f0] sm:$0xff]  ;;  %v948_v59 = vld [vmem:[%s5547_s7 + $0x15e0] sm:$0xff] }
 0x2ec   : > { %3223 = vmatpush.xpose.msra.mxu3 %v931_v52  ;;  %3183 = vmatpush.xpose.msra.mxu1 %v929_v53  ;;  %v951_v52 = vld [vmem:[%s5547_s7 + $0x15f8] sm:$0xff]  ;;  %v949_v53 = vld [vmem:[%s5547_s7 + $0x15e8] sm:$0xff] }
 0x2ef   : > { %3204 = vmatpush.xpose.msra.mxu2 %v922_v12  ;;  %3164 = vmatpush.xpose.msra.mxu0 %v920_v54  ;;  %v942_v12 = vld [vmem:[%s5547_s7 + $0x15b0] sm:$0xff]  ;;  %v940_v54 = vld [vmem:[%s5547_s7 + $0x15a0] sm:$0xff] }
 0x2f0   : > { %3224 = vmatpush.xpose.msra.mxu3 %v923_v24  ;;  %3184 = vmatpush.xpose.msra.mxu1 %v921_v56  ;;  %v943_v24 = vld [vmem:[%s5547_s7 + $0x15b8] sm:$0xff]  ;;  %v941_v56 = vld [vmem:[%s5547_s7 + $0x15a8] sm:$0xff] }
 0x2f3   : > { %3205 = vmatpush.xpose.msra.mxu2 %v914_v57  ;;  %3165 = vmatpush.xpose.msra.mxu0 %v912_v39  ;;  %v934_v57 = vld [vmem:[%s5547_s7 + $0x1570] sm:$0xff]  ;;  %v932_v39 = vld [vmem:[%s5547_s7 + $0x1560] sm:$0xff] }
 0x2f4   : > { %3225 = vmatpush.xpose.msra.mxu3 %v915_v60  ;;  %3185 = vmatpush.xpose.msra.mxu1 %v913_v42  ;;  %v935_v60 = vld [vmem:[%s5547_s7 + $0x1578] sm:$0xff]  ;;  %v933_v42 = vld [vmem:[%s5547_s7 + $0x1568] sm:$0xff] }
 0x2f7   : > { %3206 = vmatpush.xpose.msra.mxu2 %v906_v45  ;;  %3166 = vmatpush.xpose.msra.mxu0 %v904_v29  ;;  %v926_v45 = vld [vmem:[%s5547_s7 + $0x1530] sm:$0xff]  ;;  %v924_v29 = vld [vmem:[%s5547_s7 + $0x1520] sm:$0xff] }
 0x2f8   : > { %3226 = vmatpush.xpose.msra.mxu3 %v907_v62  ;;  %3186 = vmatpush.xpose.msra.mxu1 %v905_v63  ;;  %v927_v62 = vld [vmem:[%s5547_s7 + $0x1538] sm:$0xff]  ;;  %v925_v63 = vld [vmem:[%s5547_s7 + $0x1528] sm:$0xff] }
 0x2fb   : > { %3207 = vmatpush.xpose.msra.mxu2 %v898_v1  ;;  %3167 = vmatpush.xpose.msra.mxu0 %v896_v47  ;;  %v918_v1 = vld [vmem:[%s5547_s7 + $0x14f0] sm:$0xff]  ;;  %v916_v47 = vld [vmem:[%s5547_s7 + $0x14e0] sm:$0xff] }
 0x2fc   : > { %3227 = vmatpush.xpose.msra.mxu3 %v899_v2  ;;  %3187 = vmatpush.xpose.msra.mxu1 %v897_v3  ;;  %v919_v2 = vld [vmem:[%s5547_s7 + $0x14f8] sm:$0xff]  ;;  %v917_v3 = vld [vmem:[%s5547_s7 + $0x14e8] sm:$0xff] }
 0x2ff   : > { %3208 = vmatpush.xpose.msra.mxu2 %v890_v7  ;;  %3168 = vmatpush.xpose.msra.mxu0 %v888_v43  ;;  %v910_v7 = vld [vmem:[%s5547_s7 + $0x14b0] sm:$0xff]  ;;  %v911_v43 = vld [vmem:[%s5547_s7 + $0x14b8] sm:$0xff] }
 0x300   : > { %3228 = vmatpush.xpose.msra.mxu3 %v891_v4  ;;  %3188 = vmatpush.xpose.msra.mxu1 %v889_v11  ;;  %v909_v4 = vld [vmem:[%s5547_s7 + $0x14a8] sm:$0xff]  ;;  %v903_v11 = vld [vmem:[%s5547_s7 + $0x1478] sm:$0xff] }
 0x302   : > { %3209 = vmatmul.f32.vlgmr.msra.gmra.mxu2 %v6415_v0  ;;  %3169 = vmatmul.f32.vlgmr.msra.gmra.mxu0 %v6419_v20 }
 0x303   : > { %3273 = vmatpush.xpose.msrb.mxu2 %v1014_v8  ;;  %3233 = vmatpush.xpose.msrb.mxu0 %v1012_v9  ;;  %v908_v8 = vld [vmem:[%s5547_s7 + $0x14a0] sm:$0xff]  ;;  %v902_v9 = vld [vmem:[%s5547_s7 + $0x1470] sm:$0xff] }
 0x304   : > { %3293 = vmatpush.xpose.msrb.mxu3 %v1015_v6  ;;  %3253 = vmatpush.xpose.msrb.mxu1 %v1013_v35  ;;  %v900_v6 = vld [vmem:[%s5547_s7 + $0x1460] sm:$0xff]  ;;  %v901_v35 = vld [vmem:[%s5547_s7 + $0x1468] sm:$0xff] }
 0x305   : > { %3229 = vmatmul.f32.vlgmr.msra.gmra.mxu3 %v6423_v23  ;;  %3189 = vmatmul.f32.vlgmr.msra.gmra.mxu1 %v6427_v13 }
 0x307   : > { %3274 = vmatpush.xpose.msrb.mxu2 %v1006_v15  ;;  %3234 = vmatpush.xpose.msrb.mxu0 %v1004_v17  ;;  %v894_v15 = vld [vmem:[%s5547_s7 + $0x1430] sm:$0xff] }
 0x308   : > { %3294 = vmatpush.xpose.msrb.mxu3 %v1007_v41  ;;  %3254 = vmatpush.xpose.msrb.mxu1 %v1005_v19  ;;  %v1138_v17 = vld [vmem:[%s5547_s7 + $0x1bd0] sm:$0xff]  ;;  %v892_v41 = vld [vmem:[%s5547_s7 + $0x1420] sm:$0xff]  ;;  %v895_v19 = vld [vmem:[%s5547_s7 + $0x1438] sm:$0xff] }
 0x30b   : > { %3275 = vmatpush.xpose.msrb.mxu2 %v998_v22  ;;  %3235 = vmatpush.xpose.msrb.mxu0 %v996_v25  ;;  %v1136_v22 = vld [vmem:[%s5547_s7 + $0x1bc0] sm:$0xff]  ;;  %v1139_v25 = vld [vmem:[%s5547_s7 + $0x1bd8] sm:$0xff] }
 0x30c   : > { %3295 = vmatpush.xpose.msrb.mxu3 %v999_v26  ;;  %3255 = vmatpush.xpose.msrb.mxu1 %v997_v27  ;;  %v893_v26 = vld [vmem:[%s5547_s7 + $0x1428] sm:$0xff] }
 0x30d   : > { %v1137_v27 = vld [vmem:[%s5547_s7 + $0x1bc8] sm:$0xff] }
 0x30f   : > { %3276 = vmatpush.xpose.msrb.mxu2 %v990_v5  ;;  %3236 = vmatpush.xpose.msrb.mxu0 %v988_v51  ;;  %v1130_v5 = vld [vmem:[%s5547_s7 + $0x1b90] sm:$0xff]  ;;  %v1128_v51 = vld [vmem:[%s5547_s7 + $0x1b80] sm:$0xff] }
 0x310   : > { %3296 = vmatpush.xpose.msrb.mxu3 %v991_v28  ;;  %3256 = vmatpush.xpose.msrb.mxu1 %v989_v30  ;;  %v1131_v28 = vld [vmem:[%s5547_s7 + $0x1b98] sm:$0xff]  ;;  %v1129_v30 = vld [vmem:[%s5547_s7 + $0x1b88] sm:$0xff] }
 0x313   : > { %3277 = vmatpush.xpose.msrb.mxu2 %v982_v31  ;;  %3237 = vmatpush.xpose.msrb.mxu0 %v980_v32  ;;  %v1120_v31 = vld [vmem:[%s5547_s7 + $0x1b40] sm:$0xff]  ;;  %v1123_v32 = vld [vmem:[%s5547_s7 + $0x1b58] sm:$0xff] }
 0x314   : > { %3297 = vmatpush.xpose.msrb.mxu3 %v983_v34  ;;  %3257 = vmatpush.xpose.msrb.mxu1 %v981_v21  ;;  %v1112_v34 = vld [vmem:[%s5547_s7 + $0x1b00] sm:$0xff]  ;;  %v1115_v21 = vld [vmem:[%s5547_s7 + $0x1b18] sm:$0xff] }
 0x317   : > { %3278 = vmatpush.xpose.msrb.mxu2 %v974_v10  ;;  %3238 = vmatpush.xpose.msrb.mxu0 %v972_v36  ;;  %v1106_v10 = vld [vmem:[%s5547_s7 + $0x1ad0] sm:$0xff]  ;;  %v1104_v36 = vld [vmem:[%s5547_s7 + $0x1ac0] sm:$0xff] }
 0x318   : > { %3298 = vmatpush.xpose.msrb.mxu3 %v975_v14  ;;  %3258 = vmatpush.xpose.msrb.mxu1 %v973_v40  ;;  %v1107_v14 = vld [vmem:[%s5547_s7 + $0x1ad8] sm:$0xff]  ;;  %v1105_v40 = vld [vmem:[%s5547_s7 + $0x1ac8] sm:$0xff] }
 0x31b   : > { %3279 = vmatpush.xpose.msrb.mxu2 %v966_v38  ;;  %3239 = vmatpush.xpose.msrb.mxu0 %v964_v37  ;;  %v1098_v38 = vld [vmem:[%s5547_s7 + $0x1a90] sm:$0xff]  ;;  %v1096_v37 = vld [vmem:[%s5547_s7 + $0x1a80] sm:$0xff] }
 0x31c   : > { %3299 = vmatpush.xpose.msrb.mxu3 %v967_v16  ;;  %3259 = vmatpush.xpose.msrb.mxu1 %v965_v44  ;;  %v1099_v16 = vld [vmem:[%s5547_s7 + $0x1a98] sm:$0xff]  ;;  %v1097_v44 = vld [vmem:[%s5547_s7 + $0x1a88] sm:$0xff] }
 0x31f   : > { %3280 = vmatpush.xpose.msrb.mxu2 %v958_v46  ;;  %3240 = vmatpush.xpose.msrb.mxu0 %v956_v48  ;;  %v1090_v46 = vld [vmem:[%s5547_s7 + $0x1a50] sm:$0xff]  ;;  %v1088_v48 = vld [vmem:[%s5547_s7 + $0x1a40] sm:$0xff] }
 0x320   : > { %3300 = vmatpush.xpose.msrb.mxu3 %v959_v18  ;;  %3260 = vmatpush.xpose.msrb.mxu1 %v957_v49  ;;  %v1091_v18 = vld [vmem:[%s5547_s7 + $0x1a58] sm:$0xff]  ;;  %v1089_v49 = vld [vmem:[%s5547_s7 + $0x1a48] sm:$0xff] }
 0x323   : > { %3281 = vmatpush.xpose.msrb.mxu2 %v950_v50  ;;  %3241 = vmatpush.xpose.msrb.mxu0 %v948_v59  ;;  %v1082_v50 = vld [vmem:[%s5547_s7 + $0x1a10] sm:$0xff]  ;;  %v1080_v59 = vld [vmem:[%s5547_s7 + $0x1a00] sm:$0xff] }
 0x324   : > { %3301 = vmatpush.xpose.msrb.mxu3 %v951_v52  ;;  %3261 = vmatpush.xpose.msrb.mxu1 %v949_v53  ;;  %v1083_v52 = vld [vmem:[%s5547_s7 + $0x1a18] sm:$0xff]  ;;  %v1081_v53 = vld [vmem:[%s5547_s7 + $0x1a08] sm:$0xff] }
 0x327   : > { %3282 = vmatpush.xpose.msrb.mxu2 %v942_v12  ;;  %3242 = vmatpush.xpose.msrb.mxu0 %v940_v54  ;;  %v1074_v12 = vld [vmem:[%s5547_s7 + $0x19d0] sm:$0xff]  ;;  %v1072_v54 = vld [vmem:[%s5547_s7 + $0x19c0] sm:$0xff] }
 0x328   : > { %3302 = vmatpush.xpose.msrb.mxu3 %v943_v24  ;;  %3262 = vmatpush.xpose.msrb.mxu1 %v941_v56  ;;  %v1075_v24 = vld [vmem:[%s5547_s7 + $0x19d8] sm:$0xff]  ;;  %v1073_v56 = vld [vmem:[%s5547_s7 + $0x19c8] sm:$0xff] }
 0x32b   : > { %3283 = vmatpush.xpose.msrb.mxu2 %v934_v57  ;;  %3243 = vmatpush.xpose.msrb.mxu0 %v932_v39  ;;  %v1066_v57 = vld [vmem:[%s5547_s7 + $0x1990] sm:$0xff]  ;;  %v1064_v39 = vld [vmem:[%s5547_s7 + $0x1980] sm:$0xff] }
 0x32c   : > { %3303 = vmatpush.xpose.msrb.mxu3 %v935_v60  ;;  %3263 = vmatpush.xpose.msrb.mxu1 %v933_v42  ;;  %v1067_v60 = vld [vmem:[%s5547_s7 + $0x1998] sm:$0xff]  ;;  %v1065_v42 = vld [vmem:[%s5547_s7 + $0x1988] sm:$0xff] }
 0x32f   : > { %3284 = vmatpush.xpose.msrb.mxu2 %v926_v45  ;;  %3244 = vmatpush.xpose.msrb.mxu0 %v924_v29  ;;  %v1058_v45 = vld [vmem:[%s5547_s7 + $0x1950] sm:$0xff]  ;;  %v1056_v29 = vld [vmem:[%s5547_s7 + $0x1940] sm:$0xff] }
 0x330   : > { %3304 = vmatpush.xpose.msrb.mxu3 %v927_v62  ;;  %3264 = vmatpush.xpose.msrb.mxu1 %v925_v63  ;;  %v1059_v62 = vld [vmem:[%s5547_s7 + $0x1958] sm:$0xff]  ;;  %v1057_v63 = vld [vmem:[%s5547_s7 + $0x1948] sm:$0xff] }
 0x333   : > { %3285 = vmatpush.xpose.msrb.mxu2 %v918_v1  ;;  %3245 = vmatpush.xpose.msrb.mxu0 %v916_v47  ;;  %v1050_v1 = vld [vmem:[%s5547_s7 + $0x1910] sm:$0xff]  ;;  %v1048_v47 = vld [vmem:[%s5547_s7 + $0x1900] sm:$0xff] }
 0x334   : > { %3305 = vmatpush.xpose.msrb.mxu3 %v919_v2  ;;  %3265 = vmatpush.xpose.msrb.mxu1 %v917_v3  ;;  %v1051_v2 = vld [vmem:[%s5547_s7 + $0x1918] sm:$0xff]  ;;  %v1049_v3 = vld [vmem:[%s5547_s7 + $0x1908] sm:$0xff] }
 0x337   : > { %3286 = vmatpush.xpose.msrb.mxu2 %v910_v7  ;;  %3246 = vmatpush.xpose.msrb.mxu0 %v908_v8  ;;  %v1042_v7 = vld [vmem:[%s5547_s7 + $0x18d0] sm:$0xff]  ;;  %v1040_v8 = vld [vmem:[%s5547_s7 + $0x18c0] sm:$0xff] }
 0x338   : > { %3306 = vmatpush.xpose.msrb.mxu3 %v911_v43  ;;  %3266 = vmatpush.xpose.msrb.mxu1 %v909_v4  ;;  %v1043_v43 = vld [vmem:[%s5547_s7 + $0x18d8] sm:$0xff]  ;;  %v1041_v4 = vld [vmem:[%s5547_s7 + $0x18c8] sm:$0xff] }
 0x33b   : > { %3287 = vmatpush.xpose.msrb.mxu2 %v902_v9  ;;  %3247 = vmatpush.xpose.msrb.mxu0 %v900_v6  ;;  %v1034_v9 = vld [vmem:[%s5547_s7 + $0x1890] sm:$0xff]  ;;  %v1032_v6 = vld [vmem:[%s5547_s7 + $0x1880] sm:$0xff] }
 0x33c   : > { %3307 = vmatpush.xpose.msrb.mxu3 %v903_v11  ;;  %3267 = vmatpush.xpose.msrb.mxu1 %v901_v35  ;;  %v1035_v11 = vld [vmem:[%s5547_s7 + $0x1898] sm:$0xff]  ;;  %v1033_v35 = vld [vmem:[%s5547_s7 + $0x1888] sm:$0xff] }
 0x33f   : > { %3288 = vmatpush.xpose.msrb.mxu2 %v894_v15  ;;  %3248 = vmatpush.xpose.msrb.mxu0 %v892_v41  ;;  %v1026_v15 = vld [vmem:[%s5547_s7 + $0x1850] sm:$0xff]  ;;  %v1027_v41 = vld [vmem:[%s5547_s7 + $0x1858] sm:$0xff] }
 0x340   : > { %3308 = vmatpush.xpose.msrb.mxu3 %v895_v19  ;;  %3268 = vmatpush.xpose.msrb.mxu1 %v893_v26  ;;  %v1025_v19 = vld [vmem:[%s5547_s7 + $0x1848] sm:$0xff]  ;;  %v1142_v26 = vld [vmem:[%s5547_s7 + $0x1bf0] sm:$0xff] }
 0x342   : > { %3289 = vmatmul.f32.vlgmr.msrb.gmra.mxu2 %v6325_v55  ;;  %3249 = vmatmul.f32.vlgmr.msrb.gmra.mxu0 %v6329_v33  ;;  %v1122_v55 = vld [vmem:[%s5547_s7 + $0x1b50] sm:$0xff]  ;;  %v1121_v33 = vld [vmem:[%s5547_s7 + $0x1b48] sm:$0xff] }
 0x343   : > { %3353 = vmatpush.xpose.msra.mxu2 %v1138_v17  ;;  %3313 = vmatpush.xpose.msra.mxu0 %v1136_v22  ;;  %v1024_v17 = vld [vmem:[%s5547_s7 + $0x1840] sm:$0xff]  ;;  %v1018_v22 = vld [vmem:[%s5547_s7 + $0x1810] sm:$0xff] }
 0x344   : > { %3373 = vmatpush.xpose.msra.mxu3 %v1139_v25  ;;  %3333 = vmatpush.xpose.msra.mxu1 %v1137_v27  ;;  %v1016_v25 = vld [vmem:[%s5547_s7 + $0x1800] sm:$0xff]  ;;  %v1019_v27 = vld [vmem:[%s5547_s7 + $0x1818] sm:$0xff] }
 0x345   : > { %3309 = vmatmul.f32.vlgmr.msrb.gmra.mxu3 %v6334_v58  ;;  %3269 = vmatmul.f32.vlgmr.msrb.gmra.mxu1 %v6338_v61  ;;  %v1114_v58 = vld [vmem:[%s5547_s7 + $0x1b10] sm:$0xff]  ;;  %v1113_v61 = vld [vmem:[%s5547_s7 + $0x1b08] sm:$0xff] }
 0x347   : > { %3354 = vmatpush.xpose.msra.mxu2 %v1130_v5  ;;  %3314 = vmatpush.xpose.msra.mxu0 %v1128_v51  ;;  %v1140_v5 = vld [vmem:[%s5547_s7 + $0x1be0] sm:$0xff]  ;;  %v1143_v51 = vld [vmem:[%s5547_s7 + $0x1bf8] sm:$0xff] }
 0x348   : > { %3374 = vmatpush.xpose.msra.mxu3 %v1131_v28  ;;  %3334 = vmatpush.xpose.msra.mxu1 %v1129_v30  ;;  %v1017_v28 = vld [vmem:[%s5547_s7 + $0x1808] sm:$0xff] }
 0x349   : > { %v1141_v30 = vld [vmem:[%s5547_s7 + $0x1be8] sm:$0xff] }
 0x34b   : > { %3355 = vmatpush.xpose.msra.mxu2 %v1122_v55  ;;  %3315 = vmatpush.xpose.msra.mxu0 %v1120_v31  ;;  %v1134_v55 = vld [vmem:[%s5547_s7 + $0x1bb0] sm:$0xff]  ;;  %v1132_v31 = vld [vmem:[%s5547_s7 + $0x1ba0] sm:$0xff] }
 0x34c   : > { %3375 = vmatpush.xpose.msra.mxu3 %v1123_v32  ;;  %3335 = vmatpush.xpose.msra.mxu1 %v1121_v33  ;;  %v1135_v32 = vld [vmem:[%s5547_s7 + $0x1bb8] sm:$0xff]  ;;  %v1133_v33 = vld [vmem:[%s5547_s7 + $0x1ba8] sm:$0xff] }
 0x34f   : > { %3356 = vmatpush.xpose.msra.mxu2 %v1114_v58  ;;  %3316 = vmatpush.xpose.msra.mxu0 %v1112_v34  ;;  %v1126_v58 = vld [vmem:[%s5547_s7 + $0x1b70] sm:$0xff]  ;;  %v1124_v34 = vld [vmem:[%s5547_s7 + $0x1b60] sm:$0xff] }
 0x350   : > { %3376 = vmatpush.xpose.msra.mxu3 %v1115_v21  ;;  %3336 = vmatpush.xpose.msra.mxu1 %v1113_v61  ;;  %v1127_v21 = vld [vmem:[%s5547_s7 + $0x1b78] sm:$0xff] }
 0x351   : > { %v1119_v61 = vld [vmem:[%s5547_s7 + $0x1b38] sm:$0xff] }
 0x353   : > { %3357 = vmatpush.xpose.msra.mxu2 %v1106_v10  ;;  %3317 = vmatpush.xpose.msra.mxu0 %v1104_v36  ;;  %v1117_v10 = vld [vmem:[%s5547_s7 + $0x1b28] sm:$0xff]  ;;  %v1108_v36 = vld [vmem:[%s5547_s7 + $0x1ae0] sm:$0xff] }
 0x354   : > { %3377 = vmatpush.xpose.msra.mxu3 %v1107_v14  ;;  %3337 = vmatpush.xpose.msra.mxu1 %v1105_v40  ;;  %v1111_v14 = vld [vmem:[%s5547_s7 + $0x1af8] sm:$0xff]  ;;  %v1109_v40 = vld [vmem:[%s5547_s7 + $0x1ae8] sm:$0xff] }
 0x357   : > { %3358 = vmatpush.xpose.msra.mxu2 %v1098_v38  ;;  %3318 = vmatpush.xpose.msra.mxu0 %v1096_v37  ;;  %v1102_v38 = vld [vmem:[%s5547_s7 + $0x1ab0] sm:$0xff]  ;;  %v1100_v37 = vld [vmem:[%s5547_s7 + $0x1aa0] sm:$0xff] }
 0x358   : > { %3378 = vmatpush.xpose.msra.mxu3 %v1099_v16  ;;  %3338 = vmatpush.xpose.msra.mxu1 %v1097_v44  ;;  %v1103_v16 = vld [vmem:[%s5547_s7 + $0x1ab8] sm:$0xff]  ;;  %v1101_v44 = vld [vmem:[%s5547_s7 + $0x1aa8] sm:$0xff] }
 0x35b   : > { %3359 = vmatpush.xpose.msra.mxu2 %v1090_v46  ;;  %3319 = vmatpush.xpose.msra.mxu0 %v1088_v48  ;;  %v1094_v46 = vld [vmem:[%s5547_s7 + $0x1a70] sm:$0xff]  ;;  %v1092_v48 = vld [vmem:[%s5547_s7 + $0x1a60] sm:$0xff] }
 0x35c   : > { %3379 = vmatpush.xpose.msra.mxu3 %v1091_v18  ;;  %3339 = vmatpush.xpose.msra.mxu1 %v1089_v49  ;;  %v1095_v18 = vld [vmem:[%s5547_s7 + $0x1a78] sm:$0xff]  ;;  %v1093_v49 = vld [vmem:[%s5547_s7 + $0x1a68] sm:$0xff] }
 0x35f   : > { %3360 = vmatpush.xpose.msra.mxu2 %v1082_v50  ;;  %3320 = vmatpush.xpose.msra.mxu0 %v1080_v59  ;;  %v1086_v50 = vld [vmem:[%s5547_s7 + $0x1a30] sm:$0xff]  ;;  %v1084_v59 = vld [vmem:[%s5547_s7 + $0x1a20] sm:$0xff] }
 0x360   : > { %3380 = vmatpush.xpose.msra.mxu3 %v1083_v52  ;;  %3340 = vmatpush.xpose.msra.mxu1 %v1081_v53  ;;  %v1087_v52 = vld [vmem:[%s5547_s7 + $0x1a38] sm:$0xff]  ;;  %v1085_v53 = vld [vmem:[%s5547_s7 + $0x1a28] sm:$0xff] }
 0x363   : > { %3361 = vmatpush.xpose.msra.mxu2 %v1074_v12  ;;  %3321 = vmatpush.xpose.msra.mxu0 %v1072_v54  ;;  %v1078_v12 = vld [vmem:[%s5547_s7 + $0x19f0] sm:$0xff]  ;;  %v1076_v54 = vld [vmem:[%s5547_s7 + $0x19e0] sm:$0xff] }
 0x364   : > { %3381 = vmatpush.xpose.msra.mxu3 %v1075_v24  ;;  %3341 = vmatpush.xpose.msra.mxu1 %v1073_v56  ;;  %v1079_v24 = vld [vmem:[%s5547_s7 + $0x19f8] sm:$0xff]  ;;  %v1077_v56 = vld [vmem:[%s5547_s7 + $0x19e8] sm:$0xff] }
 0x367   : > { %3362 = vmatpush.xpose.msra.mxu2 %v1066_v57  ;;  %3322 = vmatpush.xpose.msra.mxu0 %v1064_v39  ;;  %v1070_v57 = vld [vmem:[%s5547_s7 + $0x19b0] sm:$0xff]  ;;  %v1068_v39 = vld [vmem:[%s5547_s7 + $0x19a0] sm:$0xff] }
 0x368   : > { %3382 = vmatpush.xpose.msra.mxu3 %v1067_v60  ;;  %3342 = vmatpush.xpose.msra.mxu1 %v1065_v42  ;;  %v1071_v60 = vld [vmem:[%s5547_s7 + $0x19b8] sm:$0xff]  ;;  %v1069_v42 = vld [vmem:[%s5547_s7 + $0x19a8] sm:$0xff] }
 0x36b   : > { %3363 = vmatpush.xpose.msra.mxu2 %v1058_v45  ;;  %3323 = vmatpush.xpose.msra.mxu0 %v1056_v29  ;;  %v1062_v45 = vld [vmem:[%s5547_s7 + $0x1970] sm:$0xff]  ;;  %v1060_v29 = vld [vmem:[%s5547_s7 + $0x1960] sm:$0xff] }
 0x36c   : > { %3383 = vmatpush.xpose.msra.mxu3 %v1059_v62  ;;  %3343 = vmatpush.xpose.msra.mxu1 %v1057_v63  ;;  %v1063_v62 = vld [vmem:[%s5547_s7 + $0x1978] sm:$0xff]  ;;  %v1061_v63 = vld [vmem:[%s5547_s7 + $0x1968] sm:$0xff] }
 0x36f   : > { %3364 = vmatpush.xpose.msra.mxu2 %v1050_v1  ;;  %3324 = vmatpush.xpose.msra.mxu0 %v1048_v47  ;;  %v1054_v1 = vld [vmem:[%s5547_s7 + $0x1930] sm:$0xff]  ;;  %v1052_v47 = vld [vmem:[%s5547_s7 + $0x1920] sm:$0xff] }
 0x370   : > { %3384 = vmatpush.xpose.msra.mxu3 %v1051_v2  ;;  %3344 = vmatpush.xpose.msra.mxu1 %v1049_v3  ;;  %v1055_v2 = vld [vmem:[%s5547_s7 + $0x1938] sm:$0xff]  ;;  %v1053_v3 = vld [vmem:[%s5547_s7 + $0x1928] sm:$0xff] }
 0x373   : > { %3365 = vmatpush.xpose.msra.mxu2 %v1042_v7  ;;  %3325 = vmatpush.xpose.msra.mxu0 %v1040_v8  ;;  %v1046_v7 = vld [vmem:[%s5547_s7 + $0x18f0] sm:$0xff]  ;;  %v1044_v8 = vld [vmem:[%s5547_s7 + $0x18e0] sm:$0xff] }
 0x374   : > { %3385 = vmatpush.xpose.msra.mxu3 %v1043_v43  ;;  %3345 = vmatpush.xpose.msra.mxu1 %v1041_v4  ;;  %v1047_v43 = vld [vmem:[%s5547_s7 + $0x18f8] sm:$0xff]  ;;  %v1045_v4 = vld [vmem:[%s5547_s7 + $0x18e8] sm:$0xff] }
 0x377   : > { %3366 = vmatpush.xpose.msra.mxu2 %v1034_v9  ;;  %3326 = vmatpush.xpose.msra.mxu0 %v1032_v6  ;;  %v1038_v9 = vld [vmem:[%s5547_s7 + $0x18b0] sm:$0xff]  ;;  %v1036_v6 = vld [vmem:[%s5547_s7 + $0x18a0] sm:$0xff] }
 0x378   : > { %3386 = vmatpush.xpose.msra.mxu3 %v1035_v11  ;;  %3346 = vmatpush.xpose.msra.mxu1 %v1033_v35  ;;  %v1039_v11 = vld [vmem:[%s5547_s7 + $0x18b8] sm:$0xff]  ;;  %v1037_v35 = vld [vmem:[%s5547_s7 + $0x18a8] sm:$0xff] }
 0x37b   : > { %3367 = vmatpush.xpose.msra.mxu2 %v1026_v15  ;;  %3327 = vmatpush.xpose.msra.mxu0 %v1024_v17  ;;  %v1030_v15 = vld [vmem:[%s5547_s7 + $0x1870] sm:$0xff]  ;;  %v1028_v17 = vld [vmem:[%s5547_s7 + $0x1860] sm:$0xff] }
 0x37c   : > { %3387 = vmatpush.xpose.msra.mxu3 %v1027_v41  ;;  %3347 = vmatpush.xpose.msra.mxu1 %v1025_v19  ;;  %v1031_v41 = vld [vmem:[%s5547_s7 + $0x1878] sm:$0xff]  ;;  %v1029_v19 = vld [vmem:[%s5547_s7 + $0x1868] sm:$0xff] }
 0x37f   : > { %3368 = vmatpush.xpose.msra.mxu2 %v1018_v22  ;;  %3328 = vmatpush.xpose.msra.mxu0 %v1016_v25  ;;  %v1022_v22 = vld [vmem:[%s5547_s7 + $0x1830] sm:$0xff] }
 0x380   : > { %3388 = vmatpush.xpose.msra.mxu3 %v1019_v27  ;;  %3348 = vmatpush.xpose.msra.mxu1 %v1017_v28  ;;  %v1266_v25 = vld [vmem:[%s5547_s7 + $0x1fd0] sm:$0xff]  ;;  %v1023_v27 = vld [vmem:[%s5547_s7 + $0x1838] sm:$0xff]  ;;  %v1021_v28 = vld [vmem:[%s5547_s7 + $0x1828] sm:$0xff] }
 0x382   : > { %3369 = vmatmul.f32.vlgmr.msra.gmra.mxu2 %v6415_v0  ;;  %3329 = vmatmul.f32.vlgmr.msra.gmra.mxu0 %v6419_v20  ;;  %v1125_v0 = vld [vmem:[%s5547_s7 + $0x1b68] sm:$0xff]  ;;  %v1118_v20 = vld [vmem:[%s5547_s7 + $0x1b30] sm:$0xff] }
 0x383   : > { %3433 = vmatpush.xpose.msrb.mxu2 %v1142_v26  ;;  %3393 = vmatpush.xpose.msrb.mxu0 %v1140_v5  ;;  %v1020_v26 = vld [vmem:[%s5547_s7 + $0x1820] sm:$0xff] }
 0x384   : > { %3453 = vmatpush.xpose.msrb.mxu3 %v1143_v51  ;;  %3413 = vmatpush.xpose.msrb.mxu1 %v1141_v30  ;;  %v1264_v5 = vld [vmem:[%s5547_s7 + $0x1fc0] sm:$0xff]  ;;  %v1267_v51 = vld [vmem:[%s5547_s7 + $0x1fd8] sm:$0xff]  ;;  %v1265_v30 = vld [vmem:[%s5547_s7 + $0x1fc8] sm:$0xff] }
 0x385   : > { %3389 = vmatmul.f32.vlgmr.msra.gmra.mxu3 %v6423_v23  ;;  %3349 = vmatmul.f32.vlgmr.msra.gmra.mxu1 %v6427_v13  ;;  %v1116_v23 = vld [vmem:[%s5547_s7 + $0x1b20] sm:$0xff]  ;;  %v1110_v13 = vld [vmem:[%s5547_s7 + $0x1af0] sm:$0xff] }
 0x387   : > { %3434 = vmatpush.xpose.msrb.mxu2 %v1134_v55  ;;  %3394 = vmatpush.xpose.msrb.mxu0 %v1132_v31  ;;  %v1258_v55 = vld [vmem:[%s5547_s7 + $0x1f90] sm:$0xff]  ;;  %v1256_v31 = vld [vmem:[%s5547_s7 + $0x1f80] sm:$0xff] }
 0x388   : > { %3454 = vmatpush.xpose.msrb.mxu3 %v1135_v32  ;;  %3414 = vmatpush.xpose.msrb.mxu1 %v1133_v33  ;;  %v1259_v32 = vld [vmem:[%s5547_s7 + $0x1f98] sm:$0xff] }
 0x389   : > { %v6627_v33 = vld.sshfl [vmem:[#allocation1 + $0x30] sm:$0xff pattern:$0x73625140] }
 0x38b   : > { %3435 = vmatpush.xpose.msrb.mxu2 %v1126_v58  ;;  %3395 = vmatpush.xpose.msrb.mxu0 %v1124_v34  ;;  %v1257_v58 = vld [vmem:[%s5547_s7 + $0x1f88] sm:$0xff] }
 0x38c   : > { %3455 = vmatpush.xpose.msrb.mxu3 %v1127_v21  ;;  %3415 = vmatpush.xpose.msrb.mxu1 %v1125_v0  ;;  %v6631_v34 = vld.sshfl [vmem:[#allocation1 + $0x20] sm:$0xff pattern:$0x73625140]  ;;  %v1250_v21 = vld [vmem:[%s5547_s7 + $0x1f50] sm:$0xff] }
 0x38d   : > { %v6635_v0 = vld.sshfl [vmem:[#allocation1 + $0x38] sm:$0xff pattern:$0x73625140] }
 0x38f   : > { %3436 = vmatpush.xpose.msrb.mxu2 %v1118_v20  ;;  %3396 = vmatpush.xpose.msrb.mxu0 %v1116_v23  ;;  %v1248_v20 = vld [vmem:[%s5547_s7 + $0x1f40] sm:$0xff]  ;;  %v6639_v23 = vld.sshfl [vmem:[#allocation1 + $0x28] sm:$0xff pattern:$0x73625140] }
 0x390   : > { %3456 = vmatpush.xpose.msrb.mxu3 %v1119_v61  ;;  %3416 = vmatpush.xpose.msrb.mxu1 %v1117_v10  ;;  %v1251_v61 = vld [vmem:[%s5547_s7 + $0x1f58] sm:$0xff]  ;;  %v1249_v10 = vld [vmem:[%s5547_s7 + $0x1f48] sm:$0xff] }
 0x393   : > { %3437 = vmatpush.xpose.msrb.mxu2 %v1110_v13  ;;  %3397 = vmatpush.xpose.msrb.mxu0 %v1108_v36  ;;  %v1242_v13 = vld [vmem:[%s5547_s7 + $0x1f10] sm:$0xff]  ;;  %v1240_v36 = vld [vmem:[%s5547_s7 + $0x1f00] sm:$0xff] }
 0x394   : > { %3457 = vmatpush.xpose.msrb.mxu3 %v1111_v14  ;;  %3417 = vmatpush.xpose.msrb.mxu1 %v1109_v40  ;;  %v1243_v14 = vld [vmem:[%s5547_s7 + $0x1f18] sm:$0xff]  ;;  %v1241_v40 = vld [vmem:[%s5547_s7 + $0x1f08] sm:$0xff] }
 0x397   : > { %3438 = vmatpush.xpose.msrb.mxu2 %v1102_v38  ;;  %3398 = vmatpush.xpose.msrb.mxu0 %v1100_v37  ;;  %v1234_v38 = vld [vmem:[%s5547_s7 + $0x1ed0] sm:$0xff]  ;;  %v1232_v37 = vld [vmem:[%s5547_s7 + $0x1ec0] sm:$0xff] }
 0x398   : > { %3458 = vmatpush.xpose.msrb.mxu3 %v1103_v16  ;;  %3418 = vmatpush.xpose.msrb.mxu1 %v1101_v44  ;;  %v1235_v16 = vld [vmem:[%s5547_s7 + $0x1ed8] sm:$0xff]  ;;  %v1233_v44 = vld [vmem:[%s5547_s7 + $0x1ec8] sm:$0xff] }
 0x39b   : > { %3439 = vmatpush.xpose.msrb.mxu2 %v1094_v46  ;;  %3399 = vmatpush.xpose.msrb.mxu0 %v1092_v48  ;;  %v1226_v46 = vld [vmem:[%s5547_s7 + $0x1e90] sm:$0xff]  ;;  %v1224_v48 = vld [vmem:[%s5547_s7 + $0x1e80] sm:$0xff] }
 0x39c   : > { %3459 = vmatpush.xpose.msrb.mxu3 %v1095_v18  ;;  %3419 = vmatpush.xpose.msrb.mxu1 %v1093_v49  ;;  %v1227_v18 = vld [vmem:[%s5547_s7 + $0x1e98] sm:$0xff]  ;;  %v1225_v49 = vld [vmem:[%s5547_s7 + $0x1e88] sm:$0xff] }
 0x39f   : > { %3440 = vmatpush.xpose.msrb.mxu2 %v1086_v50  ;;  %3400 = vmatpush.xpose.msrb.mxu0 %v1084_v59  ;;  %v1218_v50 = vld [vmem:[%s5547_s7 + $0x1e50] sm:$0xff]  ;;  %v1216_v59 = vld [vmem:[%s5547_s7 + $0x1e40] sm:$0xff] }
 0x3a0   : > { %3460 = vmatpush.xpose.msrb.mxu3 %v1087_v52  ;;  %3420 = vmatpush.xpose.msrb.mxu1 %v1085_v53  ;;  %v1219_v52 = vld [vmem:[%s5547_s7 + $0x1e58] sm:$0xff]  ;;  %v1217_v53 = vld [vmem:[%s5547_s7 + $0x1e48] sm:$0xff] }
 0x3a3   : > { %3441 = vmatpush.xpose.msrb.mxu2 %v1078_v12  ;;  %3401 = vmatpush.xpose.msrb.mxu0 %v1076_v54  ;;  %v1210_v12 = vld [vmem:[%s5547_s7 + $0x1e10] sm:$0xff]  ;;  %v1208_v54 = vld [vmem:[%s5547_s7 + $0x1e00] sm:$0xff] }
 0x3a4   : > { %3461 = vmatpush.xpose.msrb.mxu3 %v1079_v24  ;;  %3421 = vmatpush.xpose.msrb.mxu1 %v1077_v56  ;;  %v1211_v24 = vld [vmem:[%s5547_s7 + $0x1e18] sm:$0xff]  ;;  %v1209_v56 = vld [vmem:[%s5547_s7 + $0x1e08] sm:$0xff] }
 0x3a7   : > { %3442 = vmatpush.xpose.msrb.mxu2 %v1070_v57  ;;  %3402 = vmatpush.xpose.msrb.mxu0 %v1068_v39  ;;  %v1202_v57 = vld [vmem:[%s5547_s7 + $0x1dd0] sm:$0xff]  ;;  %v1200_v39 = vld [vmem:[%s5547_s7 + $0x1dc0] sm:$0xff] }
 0x3a8   : > { %3462 = vmatpush.xpose.msrb.mxu3 %v1071_v60  ;;  %3422 = vmatpush.xpose.msrb.mxu1 %v1069_v42  ;;  %v1203_v60 = vld [vmem:[%s5547_s7 + $0x1dd8] sm:$0xff]  ;;  %v1201_v42 = vld [vmem:[%s5547_s7 + $0x1dc8] sm:$0xff] }
 0x3ab   : > { %3443 = vmatpush.xpose.msrb.mxu2 %v1062_v45  ;;  %3403 = vmatpush.xpose.msrb.mxu0 %v1060_v29  ;;  %v1194_v45 = vld [vmem:[%s5547_s7 + $0x1d90] sm:$0xff]  ;;  %v1192_v29 = vld [vmem:[%s5547_s7 + $0x1d80] sm:$0xff] }
 0x3ac   : > { %3463 = vmatpush.xpose.msrb.mxu3 %v1063_v62  ;;  %3423 = vmatpush.xpose.msrb.mxu1 %v1061_v63  ;;  %v1195_v62 = vld [vmem:[%s5547_s7 + $0x1d98] sm:$0xff]  ;;  %v1193_v63 = vld [vmem:[%s5547_s7 + $0x1d88] sm:$0xff] }
 0x3af   : > { %3444 = vmatpush.xpose.msrb.mxu2 %v1054_v1  ;;  %3404 = vmatpush.xpose.msrb.mxu0 %v1052_v47  ;;  %v1186_v1 = vld [vmem:[%s5547_s7 + $0x1d50] sm:$0xff]  ;;  %v1184_v47 = vld [vmem:[%s5547_s7 + $0x1d40] sm:$0xff] }
 0x3b0   : > { %3464 = vmatpush.xpose.msrb.mxu3 %v1055_v2  ;;  %3424 = vmatpush.xpose.msrb.mxu1 %v1053_v3  ;;  %v1187_v2 = vld [vmem:[%s5547_s7 + $0x1d58] sm:$0xff]  ;;  %v1185_v3 = vld [vmem:[%s5547_s7 + $0x1d48] sm:$0xff] }
 0x3b3   : > { %3445 = vmatpush.xpose.msrb.mxu2 %v1046_v7  ;;  %3405 = vmatpush.xpose.msrb.mxu0 %v1044_v8  ;;  %v1178_v7 = vld [vmem:[%s5547_s7 + $0x1d10] sm:$0xff]  ;;  %v1176_v8 = vld [vmem:[%s5547_s7 + $0x1d00] sm:$0xff] }
 0x3b4   : > { %3465 = vmatpush.xpose.msrb.mxu3 %v1047_v43  ;;  %3425 = vmatpush.xpose.msrb.mxu1 %v1045_v4  ;;  %v1179_v43 = vld [vmem:[%s5547_s7 + $0x1d18] sm:$0xff]  ;;  %v1177_v4 = vld [vmem:[%s5547_s7 + $0x1d08] sm:$0xff] }
 0x3b7   : > { %3446 = vmatpush.xpose.msrb.mxu2 %v1038_v9  ;;  %3406 = vmatpush.xpose.msrb.mxu0 %v1036_v6  ;;  %v1170_v9 = vld [vmem:[%s5547_s7 + $0x1cd0] sm:$0xff]  ;;  %v1168_v6 = vld [vmem:[%s5547_s7 + $0x1cc0] sm:$0xff] }
 0x3b8   : > { %3466 = vmatpush.xpose.msrb.mxu3 %v1039_v11  ;;  %3426 = vmatpush.xpose.msrb.mxu1 %v1037_v35  ;;  %v1171_v11 = vld [vmem:[%s5547_s7 + $0x1cd8] sm:$0xff]  ;;  %v1169_v35 = vld [vmem:[%s5547_s7 + $0x1cc8] sm:$0xff] }
 0x3bb   : > { %3447 = vmatpush.xpose.msrb.mxu2 %v1030_v15  ;;  %3407 = vmatpush.xpose.msrb.mxu0 %v1028_v17  ;;  %v1162_v15 = vld [vmem:[%s5547_s7 + $0x1c90] sm:$0xff]  ;;  %v1160_v17 = vld [vmem:[%s5547_s7 + $0x1c80] sm:$0xff] }
 0x3bc   : > { %3467 = vmatpush.xpose.msrb.mxu3 %v1031_v41  ;;  %3427 = vmatpush.xpose.msrb.mxu1 %v1029_v19  ;;  %v1163_v41 = vld [vmem:[%s5547_s7 + $0x1c98] sm:$0xff]  ;;  %v1161_v19 = vld [vmem:[%s5547_s7 + $0x1c88] sm:$0xff] }
 0x3bf   : > { %3448 = vmatpush.xpose.msrb.mxu2 %v1022_v22  ;;  %3408 = vmatpush.xpose.msrb.mxu0 %v1020_v26  ;;  %v1154_v22 = vld [vmem:[%s5547_s7 + $0x1c50] sm:$0xff]  ;;  %v1155_v26 = vld [vmem:[%s5547_s7 + $0x1c58] sm:$0xff] }
 0x3c0   : > { %3468 = vmatpush.xpose.msrb.mxu3 %v1023_v27  ;;  %3428 = vmatpush.xpose.msrb.mxu1 %v1021_v28  ;;  %v1153_v27 = vld [vmem:[%s5547_s7 + $0x1c48] sm:$0xff]  ;;  %v1144_v28 = vld [vmem:[%s5547_s7 + $0x1c00] sm:$0xff] }
 0x3c2   : > { %3449 = vmatmul.f32.vlgmr.msrb.gmra.mxu2 %v6627_v33  ;;  %3409 = vmatmul.f32.vlgmr.msrb.gmra.mxu0 %v6631_v34 }
 0x3c3   : > { %3513 = vmatpush.xpose.msra.mxu2 %v1266_v25  ;;  %3473 = vmatpush.xpose.msra.mxu0 %v1264_v5  ;;  %v1152_v25 = vld [vmem:[%s5547_s7 + $0x1c40] sm:$0xff]  ;;  %v1146_v5 = vld [vmem:[%s5547_s7 + $0x1c10] sm:$0xff] }
 0x3c4   : > { %3533 = vmatpush.xpose.msra.mxu3 %v1267_v51  ;;  %3493 = vmatpush.xpose.msra.mxu1 %v1265_v30  ;;  %v1270_v51 = vld [vmem:[%s5547_s7 + $0x1ff0] sm:$0xff]  ;;  %v1147_v30 = vld [vmem:[%s5547_s7 + $0x1c18] sm:$0xff] }
 0x3c5   : > { %3469 = vmatmul.f32.vlgmr.msrb.gmra.mxu3 %v6635_v0  ;;  %3429 = vmatmul.f32.vlgmr.msrb.gmra.mxu1 %v6639_v23 }
 0x3c7   : > { %3514 = vmatpush.xpose.msra.mxu2 %v1258_v55  ;;  %3474 = vmatpush.xpose.msra.mxu0 %v1256_v31  ;;  %v1268_v55 = vld [vmem:[%s5547_s7 + $0x1fe0] sm:$0xff]  ;;  %v1271_v31 = vld [vmem:[%s5547_s7 + $0x1ff8] sm:$0xff] }
 0x3c8   : > { %3534 = vmatpush.xpose.msra.mxu3 %v1259_v32  ;;  %3494 = vmatpush.xpose.msra.mxu1 %v1257_v58  ;;  %v1145_v32 = vld [vmem:[%s5547_s7 + $0x1c08] sm:$0xff] }
 0x3c9   : > { %v1269_v58 = vld [vmem:[%s5547_s7 + $0x1fe8] sm:$0xff] }
 0x3cb   : > { %3515 = vmatpush.xpose.msra.mxu2 %v1250_v21  ;;  %3475 = vmatpush.xpose.msra.mxu0 %v1248_v20  ;;  %v1262_v21 = vld [vmem:[%s5547_s7 + $0x1fb0] sm:$0xff]  ;;  %v1260_v20 = vld [vmem:[%s5547_s7 + $0x1fa0] sm:$0xff] }
 0x3cc   : > { %3535 = vmatpush.xpose.msra.mxu3 %v1251_v61  ;;  %3495 = vmatpush.xpose.msra.mxu1 %v1249_v10  ;;  %v1263_v61 = vld [vmem:[%s5547_s7 + $0x1fb8] sm:$0xff] }
 0x3cd   : > { %v6703_v10 = vld.sshfl [vmem:[#allocation1 + $0x10] sm:$0xff pattern:$0x73625140] }
 0x3cf   : > { %3516 = vmatpush.xpose.msra.mxu2 %v1242_v13  ;;  %3476 = vmatpush.xpose.msra.mxu0 %v1240_v36  ;;  %v1261_v13 = vld [vmem:[%s5547_s7 + $0x1fa8] sm:$0xff] }
 0x3d0   : > { %3536 = vmatpush.xpose.msra.mxu3 %v1243_v14  ;;  %3496 = vmatpush.xpose.msra.mxu1 %v1241_v40  ;;  %v6707_v36 = vld.sshfl [vmem:[#allocation1] sm:$0xff pattern:$0x73625140]  ;;  %v1254_v14 = vld [vmem:[%s5547_s7 + $0x1f70] sm:$0xff] }
 0x3d1   : > { %v6711_v40 = vld.sshfl [vmem:[#allocation1 + $0x18] sm:$0xff pattern:$0x73625140] }
 0x3d3   : > { %3517 = vmatpush.xpose.msra.mxu2 %v1234_v38  ;;  %3477 = vmatpush.xpose.msra.mxu0 %v1232_v37  ;;  %v1252_v38 = vld [vmem:[%s5547_s7 + $0x1f60] sm:$0xff]  ;;  %v6715_v37 = vld.sshfl [vmem:[#allocation1 + $0x8] sm:$0xff pattern:$0x73625140] }
 0x3d4   : > { %3537 = vmatpush.xpose.msra.mxu3 %v1235_v16  ;;  %3497 = vmatpush.xpose.msra.mxu1 %v1233_v44  ;;  %v1255_v16 = vld [vmem:[%s5547_s7 + $0x1f78] sm:$0xff]  ;;  %v1253_v44 = vld [vmem:[%s5547_s7 + $0x1f68] sm:$0xff] }
 0x3d7   : > { %3518 = vmatpush.xpose.msra.mxu2 %v1226_v46  ;;  %3478 = vmatpush.xpose.msra.mxu0 %v1224_v48  ;;  %v1246_v46 = vld [vmem:[%s5547_s7 + $0x1f30] sm:$0xff]  ;;  %v1244_v48 = vld [vmem:[%s5547_s7 + $0x1f20] sm:$0xff] }
 0x3d8   : > { %3538 = vmatpush.xpose.msra.mxu3 %v1227_v18  ;;  %3498 = vmatpush.xpose.msra.mxu1 %v1225_v49  ;;  %v1247_v18 = vld [vmem:[%s5547_s7 + $0x1f38] sm:$0xff]  ;;  %v1245_v49 = vld [vmem:[%s5547_s7 + $0x1f28] sm:$0xff] }
 0x3db   : > { %3519 = vmatpush.xpose.msra.mxu2 %v1218_v50  ;;  %3479 = vmatpush.xpose.msra.mxu0 %v1216_v59  ;;  %v1238_v50 = vld [vmem:[%s5547_s7 + $0x1ef0] sm:$0xff]  ;;  %v1236_v59 = vld [vmem:[%s5547_s7 + $0x1ee0] sm:$0xff] }
 0x3dc   : > { %3539 = vmatpush.xpose.msra.mxu3 %v1219_v52  ;;  %3499 = vmatpush.xpose.msra.mxu1 %v1217_v53  ;;  %v1239_v52 = vld [vmem:[%s5547_s7 + $0x1ef8] sm:$0xff]  ;;  %v1237_v53 = vld [vmem:[%s5547_s7 + $0x1ee8] sm:$0xff] }
 0x3df   : > { %3520 = vmatpush.xpose.msra.mxu2 %v1210_v12  ;;  %3480 = vmatpush.xpose.msra.mxu0 %v1208_v54  ;;  %v1230_v12 = vld [vmem:[%s5547_s7 + $0x1eb0] sm:$0xff]  ;;  %v1228_v54 = vld [vmem:[%s5547_s7 + $0x1ea0] sm:$0xff] }
 0x3e0   : > { %3540 = vmatpush.xpose.msra.mxu3 %v1211_v24  ;;  %3500 = vmatpush.xpose.msra.mxu1 %v1209_v56  ;;  %v1231_v24 = vld [vmem:[%s5547_s7 + $0x1eb8] sm:$0xff]  ;;  %v1229_v56 = vld [vmem:[%s5547_s7 + $0x1ea8] sm:$0xff] }
 0x3e3   : > { %3521 = vmatpush.xpose.msra.mxu2 %v1202_v57  ;;  %3481 = vmatpush.xpose.msra.mxu0 %v1200_v39  ;;  %v1222_v57 = vld [vmem:[%s5547_s7 + $0x1e70] sm:$0xff]  ;;  %v1220_v39 = vld [vmem:[%s5547_s7 + $0x1e60] sm:$0xff] }
 0x3e4   : > { %3541 = vmatpush.xpose.msra.mxu3 %v1203_v60  ;;  %3501 = vmatpush.xpose.msra.mxu1 %v1201_v42  ;;  %v1223_v60 = vld [vmem:[%s5547_s7 + $0x1e78] sm:$0xff]  ;;  %v1221_v42 = vld [vmem:[%s5547_s7 + $0x1e68] sm:$0xff] }
 0x3e7   : > { %3522 = vmatpush.xpose.msra.mxu2 %v1194_v45  ;;  %3482 = vmatpush.xpose.msra.mxu0 %v1192_v29  ;;  %v1214_v45 = vld [vmem:[%s5547_s7 + $0x1e30] sm:$0xff]  ;;  %v1212_v29 = vld [vmem:[%s5547_s7 + $0x1e20] sm:$0xff] }
 0x3e8   : > { %3542 = vmatpush.xpose.msra.mxu3 %v1195_v62  ;;  %3502 = vmatpush.xpose.msra.mxu1 %v1193_v63  ;;  %v1215_v62 = vld [vmem:[%s5547_s7 + $0x1e38] sm:$0xff]  ;;  %v1213_v63 = vld [vmem:[%s5547_s7 + $0x1e28] sm:$0xff] }
 0x3eb   : > { %3523 = vmatpush.xpose.msra.mxu2 %v1186_v1  ;;  %3483 = vmatpush.xpose.msra.mxu0 %v1184_v47  ;;  %v1206_v1 = vld [vmem:[%s5547_s7 + $0x1df0] sm:$0xff]  ;;  %v1204_v47 = vld [vmem:[%s5547_s7 + $0x1de0] sm:$0xff] }
 0x3ec   : > { %3543 = vmatpush.xpose.msra.mxu3 %v1187_v2  ;;  %3503 = vmatpush.xpose.msra.mxu1 %v1185_v3  ;;  %v1207_v2 = vld [vmem:[%s5547_s7 + $0x1df8] sm:$0xff]  ;;  %v1205_v3 = vld [vmem:[%s5547_s7 + $0x1de8] sm:$0xff] }
 0x3ef   : > { %3524 = vmatpush.xpose.msra.mxu2 %v1178_v7  ;;  %3484 = vmatpush.xpose.msra.mxu0 %v1176_v8  ;;  %v1198_v7 = vld [vmem:[%s5547_s7 + $0x1db0] sm:$0xff]  ;;  %v1196_v8 = vld [vmem:[%s5547_s7 + $0x1da0] sm:$0xff] }
 0x3f0   : > { %3544 = vmatpush.xpose.msra.mxu3 %v1179_v43  ;;  %3504 = vmatpush.xpose.msra.mxu1 %v1177_v4  ;;  %v1199_v43 = vld [vmem:[%s5547_s7 + $0x1db8] sm:$0xff]  ;;  %v1197_v4 = vld [vmem:[%s5547_s7 + $0x1da8] sm:$0xff] }
 0x3f3   : > { %3525 = vmatpush.xpose.msra.mxu2 %v1170_v9  ;;  %3485 = vmatpush.xpose.msra.mxu0 %v1168_v6  ;;  %v1190_v9 = vld [vmem:[%s5547_s7 + $0x1d70] sm:$0xff]  ;;  %v1188_v6 = vld [vmem:[%s5547_s7 + $0x1d60] sm:$0xff] }
 0x3f4   : > { %3545 = vmatpush.xpose.msra.mxu3 %v1171_v11  ;;  %3505 = vmatpush.xpose.msra.mxu1 %v1169_v35  ;;  %v1191_v11 = vld [vmem:[%s5547_s7 + $0x1d78] sm:$0xff]  ;;  %v1189_v35 = vld [vmem:[%s5547_s7 + $0x1d68] sm:$0xff] }
 0x3f7   : > { %3526 = vmatpush.xpose.msra.mxu2 %v1162_v15  ;;  %3486 = vmatpush.xpose.msra.mxu0 %v1160_v17  ;;  %v1182_v15 = vld [vmem:[%s5547_s7 + $0x1d30] sm:$0xff]  ;;  %v1180_v17 = vld [vmem:[%s5547_s7 + $0x1d20] sm:$0xff] }
 0x3f8   : > { %3546 = vmatpush.xpose.msra.mxu3 %v1163_v41  ;;  %3506 = vmatpush.xpose.msra.mxu1 %v1161_v19  ;;  %v1183_v41 = vld [vmem:[%s5547_s7 + $0x1d38] sm:$0xff]  ;;  %v1181_v19 = vld [vmem:[%s5547_s7 + $0x1d28] sm:$0xff] }
 0x3fb   : > { %3527 = vmatpush.xpose.msra.mxu2 %v1154_v22  ;;  %3487 = vmatpush.xpose.msra.mxu0 %v1152_v25  ;;  %v1174_v22 = vld [vmem:[%s5547_s7 + $0x1cf0] sm:$0xff]  ;;  %v1172_v25 = vld [vmem:[%s5547_s7 + $0x1ce0] sm:$0xff] }
 0x3fc   : > { %3547 = vmatpush.xpose.msra.mxu3 %v1155_v26  ;;  %3507 = vmatpush.xpose.msra.mxu1 %v1153_v27  ;;  %v1175_v26 = vld [vmem:[%s5547_s7 + $0x1cf8] sm:$0xff]  ;;  %v1173_v27 = vld [vmem:[%s5547_s7 + $0x1ce8] sm:$0xff] }
 0x3ff   : > { %3528 = vmatpush.xpose.msra.mxu2 %v1146_v5  ;;  %3488 = vmatpush.xpose.msra.mxu0 %v1144_v28  ;;  %v1166_v5 = vld [vmem:[%s5547_s7 + $0x1cb0] sm:$0xff]  ;;  %v1167_v28 = vld [vmem:[%s5547_s7 + $0x1cb8] sm:$0xff] }
 0x400   : > { %3548 = vmatpush.xpose.msra.mxu3 %v1147_v30  ;;  %3508 = vmatpush.xpose.msra.mxu1 %v1145_v32  ;;  %v1165_v30 = vld [vmem:[%s5547_s7 + $0x1ca8] sm:$0xff]  ;;  %v1159_v32 = vld [vmem:[%s5547_s7 + $0x1c78] sm:$0xff] }
 0x402   : > { %3529 = vmatmul.f32.vlgmr.msra.gmra.mxu2 %v6703_v10  ;;  %3489 = vmatmul.f32.vlgmr.msra.gmra.mxu0 %v6707_v36 }
 0x403   : > { %3593 = vmatpush.xpose.msrb.mxu2 %v1270_v51  ;;  %3553 = vmatpush.xpose.msrb.mxu0 %v1268_v55  ;;  %v1164_v51 = vld [vmem:[%s5547_s7 + $0x1ca0] sm:$0xff]  ;;  %v1158_v55 = vld [vmem:[%s5547_s7 + $0x1c70] sm:$0xff] }
 0x404   : > { %3613 = vmatpush.xpose.msrb.mxu3 %v1271_v31  ;;  %3573 = vmatpush.xpose.msrb.mxu1 %v1269_v58  ;;  %v1156_v31 = vld [vmem:[%s5547_s7 + $0x1c60] sm:$0xff]  ;;  %v1157_v58 = vld [vmem:[%s5547_s7 + $0x1c68] sm:$0xff] }
 0x405   : > { %3549 = vmatmul.f32.vlgmr.msra.gmra.mxu3 %v6711_v40  ;;  %3509 = vmatmul.f32.vlgmr.msra.gmra.mxu1 %v6715_v37 }
 0x407   : > { %3594 = vmatpush.xpose.msrb.mxu2 %v1262_v21  ;;  %3554 = vmatpush.xpose.msrb.mxu0 %v1260_v20  ;;  %v1150_v21 = vld [vmem:[%s5547_s7 + $0x1c30] sm:$0xff] }
 0x408   : > { %3614 = vmatpush.xpose.msrb.mxu3 %v1263_v61  ;;  %3574 = vmatpush.xpose.msrb.mxu1 %v1261_v13  ;;  %v1394_v20 = vld [vmem:[%s5547_s7 + $0x23d0] sm:$0xff]  ;;  %v1148_v61 = vld [vmem:[%s5547_s7 + $0x1c20] sm:$0xff]  ;;  %v1151_v13 = vld [vmem:[%s5547_s7 + $0x1c38] sm:$0xff] }
 0x40b   : > { %3595 = vmatpush.xpose.msrb.mxu2 %v1254_v14  ;;  %3555 = vmatpush.xpose.msrb.mxu0 %v1252_v38  ;;  %v1392_v14 = vld [vmem:[%s5547_s7 + $0x23c0] sm:$0xff]  ;;  %v1395_v38 = vld [vmem:[%s5547_s7 + $0x23d8] sm:$0xff] }
 0x40c   : > { %3615 = vmatpush.xpose.msrb.mxu3 %v1255_v16  ;;  %3575 = vmatpush.xpose.msrb.mxu1 %v1253_v44  ;;  %v1149_v16 = vld [vmem:[%s5547_s7 + $0x1c28] sm:$0xff] }
 0x40d   : > { %v1393_v44 = vld [vmem:[%s5547_s7 + $0x23c8] sm:$0xff] }
 0x40f   : > { %3596 = vmatpush.xpose.msrb.mxu2 %v1246_v46  ;;  %3556 = vmatpush.xpose.msrb.mxu0 %v1244_v48  ;;  %v1386_v46 = vld [vmem:[%s5547_s7 + $0x2390] sm:$0xff]  ;;  %v1384_v48 = vld [vmem:[%s5547_s7 + $0x2380] sm:$0xff] }
 0x410   : > { %3616 = vmatpush.xpose.msrb.mxu3 %v1247_v18  ;;  %3576 = vmatpush.xpose.msrb.mxu1 %v1245_v49  ;;  %v1387_v18 = vld [vmem:[%s5547_s7 + $0x2398] sm:$0xff]  ;;  %v1385_v49 = vld [vmem:[%s5547_s7 + $0x2388] sm:$0xff] }
 0x413   : > { %3597 = vmatpush.xpose.msrb.mxu2 %v1238_v50  ;;  %3557 = vmatpush.xpose.msrb.mxu0 %v1236_v59  ;;  %v1376_v50 = vld [vmem:[%s5547_s7 + $0x2340] sm:$0xff]  ;;  %v1379_v59 = vld [vmem:[%s5547_s7 + $0x2358] sm:$0xff] }
 0x414   : > { %3617 = vmatpush.xpose.msrb.mxu3 %v1239_v52  ;;  %3577 = vmatpush.xpose.msrb.mxu1 %v1237_v53  ;;  %v1368_v52 = vld [vmem:[%s5547_s7 + $0x2300] sm:$0xff]  ;;  %v1371_v53 = vld [vmem:[%s5547_s7 + $0x2318] sm:$0xff] }
 0x417   : > { %3598 = vmatpush.xpose.msrb.mxu2 %v1230_v12  ;;  %3558 = vmatpush.xpose.msrb.mxu0 %v1228_v54  ;;  %v1362_v12 = vld [vmem:[%s5547_s7 + $0x22d0] sm:$0xff]  ;;  %v1360_v54 = vld [vmem:[%s5547_s7 + $0x22c0] sm:$0xff] }
 0x418   : > { %3618 = vmatpush.xpose.msrb.mxu3 %v1231_v24  ;;  %3578 = vmatpush.xpose.msrb.mxu1 %v1229_v56  ;;  %v1363_v24 = vld [vmem:[%s5547_s7 + $0x22d8] sm:$0xff]  ;;  %v1361_v56 = vld [vmem:[%s5547_s7 + $0x22c8] sm:$0xff] }
 0x41b   : > { %3599 = vmatpush.xpose.msrb.mxu2 %v1222_v57  ;;  %3559 = vmatpush.xpose.msrb.mxu0 %v1220_v39  ;;  %v1354_v57 = vld [vmem:[%s5547_s7 + $0x2290] sm:$0xff]  ;;  %v1352_v39 = vld [vmem:[%s5547_s7 + $0x2280] sm:$0xff] }
 0x41c   : > { %3619 = vmatpush.xpose.msrb.mxu3 %v1223_v60  ;;  %3579 = vmatpush.xpose.msrb.mxu1 %v1221_v42  ;;  %v1355_v60 = vld [vmem:[%s5547_s7 + $0x2298] sm:$0xff]  ;;  %v1353_v42 = vld [vmem:[%s5547_s7 + $0x2288] sm:$0xff] }
 0x41f   : > { %3600 = vmatpush.xpose.msrb.mxu2 %v1214_v45  ;;  %3560 = vmatpush.xpose.msrb.mxu0 %v1212_v29  ;;  %v1346_v45 = vld [vmem:[%s5547_s7 + $0x2250] sm:$0xff]  ;;  %v1344_v29 = vld [vmem:[%s5547_s7 + $0x2240] sm:$0xff] }
 0x420   : > { %3620 = vmatpush.xpose.msrb.mxu3 %v1215_v62  ;;  %3580 = vmatpush.xpose.msrb.mxu1 %v1213_v63  ;;  %v1347_v62 = vld [vmem:[%s5547_s7 + $0x2258] sm:$0xff]  ;;  %v1345_v63 = vld [vmem:[%s5547_s7 + $0x2248] sm:$0xff] }
 0x423   : > { %3601 = vmatpush.xpose.msrb.mxu2 %v1206_v1  ;;  %3561 = vmatpush.xpose.msrb.mxu0 %v1204_v47  ;;  %v1338_v1 = vld [vmem:[%s5547_s7 + $0x2210] sm:$0xff]  ;;  %v1336_v47 = vld [vmem:[%s5547_s7 + $0x2200] sm:$0xff] }
 0x424   : > { %3621 = vmatpush.xpose.msrb.mxu3 %v1207_v2  ;;  %3581 = vmatpush.xpose.msrb.mxu1 %v1205_v3  ;;  %v1339_v2 = vld [vmem:[%s5547_s7 + $0x2218] sm:$0xff]  ;;  %v1337_v3 = vld [vmem:[%s5547_s7 + $0x2208] sm:$0xff] }
 0x427   : > { %3602 = vmatpush.xpose.msrb.mxu2 %v1198_v7  ;;  %3562 = vmatpush.xpose.msrb.mxu0 %v1196_v8  ;;  %v1330_v7 = vld [vmem:[%s5547_s7 + $0x21d0] sm:$0xff]  ;;  %v1328_v8 = vld [vmem:[%s5547_s7 + $0x21c0] sm:$0xff] }
 0x428   : > { %3622 = vmatpush.xpose.msrb.mxu3 %v1199_v43  ;;  %3582 = vmatpush.xpose.msrb.mxu1 %v1197_v4  ;;  %v1331_v43 = vld [vmem:[%s5547_s7 + $0x21d8] sm:$0xff]  ;;  %v1329_v4 = vld [vmem:[%s5547_s7 + $0x21c8] sm:$0xff] }
 0x42b   : > { %3603 = vmatpush.xpose.msrb.mxu2 %v1190_v9  ;;  %3563 = vmatpush.xpose.msrb.mxu0 %v1188_v6  ;;  %v1322_v9 = vld [vmem:[%s5547_s7 + $0x2190] sm:$0xff]  ;;  %v1320_v6 = vld [vmem:[%s5547_s7 + $0x2180] sm:$0xff] }
 0x42c   : > { %3623 = vmatpush.xpose.msrb.mxu3 %v1191_v11  ;;  %3583 = vmatpush.xpose.msrb.mxu1 %v1189_v35  ;;  %v1323_v11 = vld [vmem:[%s5547_s7 + $0x2198] sm:$0xff]  ;;  %v1321_v35 = vld [vmem:[%s5547_s7 + $0x2188] sm:$0xff] }
 0x42f   : > { %3604 = vmatpush.xpose.msrb.mxu2 %v1182_v15  ;;  %3564 = vmatpush.xpose.msrb.mxu0 %v1180_v17  ;;  %v1314_v15 = vld [vmem:[%s5547_s7 + $0x2150] sm:$0xff]  ;;  %v1312_v17 = vld [vmem:[%s5547_s7 + $0x2140] sm:$0xff] }
 0x430   : > { %3624 = vmatpush.xpose.msrb.mxu3 %v1183_v41  ;;  %3584 = vmatpush.xpose.msrb.mxu1 %v1181_v19  ;;  %v1315_v41 = vld [vmem:[%s5547_s7 + $0x2158] sm:$0xff]  ;;  %v1313_v19 = vld [vmem:[%s5547_s7 + $0x2148] sm:$0xff] }
 0x433   : > { %3605 = vmatpush.xpose.msrb.mxu2 %v1174_v22  ;;  %3565 = vmatpush.xpose.msrb.mxu0 %v1172_v25  ;;  %v1306_v22 = vld [vmem:[%s5547_s7 + $0x2110] sm:$0xff]  ;;  %v1304_v25 = vld [vmem:[%s5547_s7 + $0x2100] sm:$0xff] }
 0x434   : > { %3625 = vmatpush.xpose.msrb.mxu3 %v1175_v26  ;;  %3585 = vmatpush.xpose.msrb.mxu1 %v1173_v27  ;;  %v1307_v26 = vld [vmem:[%s5547_s7 + $0x2118] sm:$0xff]  ;;  %v1305_v27 = vld [vmem:[%s5547_s7 + $0x2108] sm:$0xff] }
 0x437   : > { %3606 = vmatpush.xpose.msrb.mxu2 %v1166_v5  ;;  %3566 = vmatpush.xpose.msrb.mxu0 %v1164_v51  ;;  %v1298_v5 = vld [vmem:[%s5547_s7 + $0x20d0] sm:$0xff]  ;;  %v1296_v51 = vld [vmem:[%s5547_s7 + $0x20c0] sm:$0xff] }
 0x438   : > { %3626 = vmatpush.xpose.msrb.mxu3 %v1167_v28  ;;  %3586 = vmatpush.xpose.msrb.mxu1 %v1165_v30  ;;  %v1299_v28 = vld [vmem:[%s5547_s7 + $0x20d8] sm:$0xff]  ;;  %v1297_v30 = vld [vmem:[%s5547_s7 + $0x20c8] sm:$0xff] }
 0x43b   : > { %3607 = vmatpush.xpose.msrb.mxu2 %v1158_v55  ;;  %3567 = vmatpush.xpose.msrb.mxu0 %v1156_v31  ;;  %v1290_v55 = vld [vmem:[%s5547_s7 + $0x2090] sm:$0xff]  ;;  %v1288_v31 = vld [vmem:[%s5547_s7 + $0x2080] sm:$0xff] }
 0x43c   : > { %3627 = vmatpush.xpose.msrb.mxu3 %v1159_v32  ;;  %3587 = vmatpush.xpose.msrb.mxu1 %v1157_v58  ;;  %v1291_v32 = vld [vmem:[%s5547_s7 + $0x2098] sm:$0xff]  ;;  %v1289_v58 = vld [vmem:[%s5547_s7 + $0x2088] sm:$0xff] }
 0x43f   : > { %3608 = vmatpush.xpose.msrb.mxu2 %v1150_v21  ;;  %3568 = vmatpush.xpose.msrb.mxu0 %v1148_v61  ;;  %v1282_v21 = vld [vmem:[%s5547_s7 + $0x2050] sm:$0xff]  ;;  %v1283_v61 = vld [vmem:[%s5547_s7 + $0x2058] sm:$0xff] }
 0x440   : > { %3628 = vmatpush.xpose.msrb.mxu3 %v1151_v13  ;;  %3588 = vmatpush.xpose.msrb.mxu1 %v1149_v16  ;;  %v6835_v13 = vpop.f32.mrf.mxu0  ;;  %v1272_v16 = vld [vmem:[%s5547_s7 + $0x2000] sm:$0xff] }
 0x442   : > { %3609 = vmatmul.f32.vlgmr.msrb.gmra.mxu2 %v6627_v33  ;;  %3569 = vmatmul.f32.vlgmr.msrb.gmra.mxu0 %v6631_v34  ;;  %v1378_v33 = vld [vmem:[%s5547_s7 + $0x2350] sm:$0xff]  ;;  %v1377_v34 = vld [vmem:[%s5547_s7 + $0x2348] sm:$0xff] }
 0x443   : > { %3673 = vmatpush.xpose.msra.mxu2 %v1394_v20  ;;  %3633 = vmatpush.xpose.msra.mxu0 %v1392_v14  ;;  %v1280_v20 = vld [vmem:[%s5547_s7 + $0x2040] sm:$0xff]  ;;  %v1281_v14 = vld [vmem:[%s5547_s7 + $0x2048] sm:$0xff] }
 0x444   : > { %3693 = vmatpush.xpose.msra.mxu3 %v1395_v38  ;;  %3653 = vmatpush.xpose.msra.mxu1 %v1393_v44  ;;  %v1274_v38 = vld [vmem:[%s5547_s7 + $0x2010] sm:$0xff] }
 0x445   : > { %3629 = vmatmul.f32.vlgmr.msrb.gmra.mxu3 %v6635_v0  ;;  %3589 = vmatmul.f32.vlgmr.msrb.gmra.mxu1 %v6639_v23  ;;  %v1370_v0 = vld [vmem:[%s5547_s7 + $0x2310] sm:$0xff]  ;;  %v1369_v23 = vld [vmem:[%s5547_s7 + $0x2308] sm:$0xff] }
 0x446   : > { %v1398_v44 = vld [vmem:[%s5547_s7 + $0x23f0] sm:$0xff] }
 0x447   : > { %3674 = vmatpush.xpose.msra.mxu2 %v1386_v46  ;;  %3634 = vmatpush.xpose.msra.mxu0 %v1384_v48  ;;  %v1275_v46 = vld [vmem:[%s5547_s7 + $0x2018] sm:$0xff]  ;;  %v6842_v48 = vpop.f32.mrf.mxu1 }
 0x448   : > { %3694 = vmatpush.xpose.msra.mxu3 %v1387_v18  ;;  %3654 = vmatpush.xpose.msra.mxu1 %v1385_v49  ;;  %v1396_v18 = vld [vmem:[%s5547_s7 + $0x23e0] sm:$0xff]  ;;  %v1399_v49 = vld [vmem:[%s5547_s7 + $0x23f8] sm:$0xff] }
 0x44b   : > { %3675 = vmatpush.xpose.msra.mxu2 %v1378_v33  ;;  %3635 = vmatpush.xpose.msra.mxu0 %v1376_v50  ;;  %v1273_v33 = vld [vmem:[%s5547_s7 + $0x2008] sm:$0xff] }
 0x44c   : > { %3695 = vmatpush.xpose.msra.mxu3 %v1379_v59  ;;  %3655 = vmatpush.xpose.msra.mxu1 %v1377_v34  ;;  %v1397_v50 = vld [vmem:[%s5547_s7 + $0x23e8] sm:$0xff]  ;;  %v1390_v59 = vld [vmem:[%s5547_s7 + $0x23b0] sm:$0xff]  ;;  %v6849_v34 = vpop.f32.mrf.mxu2 }
 0x44f   : > { %3676 = vmatpush.xpose.msra.mxu2 %v1370_v0  ;;  %3636 = vmatpush.xpose.msra.mxu0 %v1368_v52  ;;  %v1388_v0 = vld [vmem:[%s5547_s7 + $0x23a0] sm:$0xff]  ;;  %v1391_v52 = vld [vmem:[%s5547_s7 + $0x23b8] sm:$0xff] }
 0x450   : > { %3696 = vmatpush.xpose.msra.mxu3 %v1371_v53  ;;  %3656 = vmatpush.xpose.msra.mxu1 %v1369_v23  ;;  %v6855_v53 = vpop.f32.mrf.mxu0  ;;  %v1389_v23 = vld [vmem:[%s5547_s7 + $0x23a8] sm:$0xff] }
 0x453   : > { %3677 = vmatpush.xpose.msra.mxu2 %v1362_v12  ;;  %3637 = vmatpush.xpose.msra.mxu0 %v1360_v54  ;;  %v1382_v12 = vld [vmem:[%s5547_s7 + $0x2370] sm:$0xff]  ;;  %v6860_v54 = vpop.f32.mrf.mxu3 }
 0x454   : > { %3697 = vmatpush.xpose.msra.mxu3 %v1363_v24  ;;  %3657 = vmatpush.xpose.msra.mxu1 %v1361_v56  ;;  %v1380_v24 = vld [vmem:[%s5547_s7 + $0x2360] sm:$0xff]  ;;  %v1381_v56 = vld [vmem:[%s5547_s7 + $0x2368] sm:$0xff] }
 0x457   : > { %3678 = vmatpush.xpose.msra.mxu2 %v1354_v57  ;;  %3638 = vmatpush.xpose.msra.mxu0 %v1352_v39  ;;  %v1372_v57 = vld [vmem:[%s5547_s7 + $0x2320] sm:$0xff]  ;;  %v1375_v39 = vld [vmem:[%s5547_s7 + $0x2338] sm:$0xff] }
 0x458   : > { %3698 = vmatpush.xpose.msra.mxu3 %v1355_v60  ;;  %3658 = vmatpush.xpose.msra.mxu1 %v1353_v42  ;;  %v6871_v60 = vpop.f32.mrf.mxu2  ;;  %v6873_v42 = vpop.f32.mrf.mxu0 }
 0x45b   : > { %3679 = vmatpush.xpose.msra.mxu2 %v1346_v45  ;;  %3639 = vmatpush.xpose.msra.mxu0 %v1344_v29  ;;  %v1366_v45 = vld [vmem:[%s5547_s7 + $0x22f0] sm:$0xff]  ;;  %v1364_v29 = vld [vmem:[%s5547_s7 + $0x22e0] sm:$0xff] }
 0x45c   : > { %3699 = vmatpush.xpose.msra.mxu3 %v1347_v62  ;;  %3659 = vmatpush.xpose.msra.mxu1 %v1345_v63  ;;  %v1367_v62 = vld [vmem:[%s5547_s7 + $0x22f8] sm:$0xff]  ;;  %v6879_v63 = vpop.f32.mrf.mxu3 }
 0x45f   : > { %3680 = vmatpush.xpose.msra.mxu2 %v1338_v1  ;;  %3640 = vmatpush.xpose.msra.mxu0 %v1336_v47  ;;  %v1365_v47 = vld [vmem:[%s5547_s7 + $0x22e8] sm:$0xff] }
 0x460   : > { %3700 = vmatpush.xpose.msra.mxu3 %v1339_v2  ;;  %3660 = vmatpush.xpose.msra.mxu1 %v1337_v3  ;;  %v1358_v2 = vld [vmem:[%s5547_s7 + $0x22b0] sm:$0xff]  ;;  %v1356_v3 = vld [vmem:[%s5547_s7 + $0x22a0] sm:$0xff] }
 0x463   : > { %3681 = vmatpush.xpose.msra.mxu2 %v1330_v7  ;;  %3641 = vmatpush.xpose.msra.mxu0 %v1328_v8  ;;  %v1359_v7 = vld [vmem:[%s5547_s7 + $0x22b8] sm:$0xff]  ;;  %v6887_v8 = vpop.f32.mrf.mxu2 }
 0x464   : > { %3701 = vmatpush.xpose.msra.mxu3 %v1331_v43  ;;  %3661 = vmatpush.xpose.msra.mxu1 %v1329_v4  ;;  %v1357_v43 = vld [vmem:[%s5547_s7 + $0x22a8] sm:$0xff]  ;;  %v1350_v4 = vld [vmem:[%s5547_s7 + $0x2270] sm:$0xff] }
 0x467   : > { %3682 = vmatpush.xpose.msra.mxu2 %v1322_v9  ;;  %3642 = vmatpush.xpose.msra.mxu0 %v1320_v6  ;;  %v6891_v9 = vpop.f32.mrf.mxu0  ;;  %v1348_v6 = vld [vmem:[%s5547_s7 + $0x2260] sm:$0xff] }
 0x468   : > { %3702 = vmatpush.xpose.msra.mxu3 %v1323_v11  ;;  %3662 = vmatpush.xpose.msra.mxu1 %v1321_v35  ;;  %v1351_v11 = vld [vmem:[%s5547_s7 + $0x2278] sm:$0xff]  ;;  %v6895_v35 = vpop.f32.mrf.mxu3 }
 0x46b   : > { %3683 = vmatpush.xpose.msra.mxu2 %v1314_v15  ;;  %3643 = vmatpush.xpose.msra.mxu0 %v1312_v17  ;;  %v1349_v15 = vld [vmem:[%s5547_s7 + $0x2268] sm:$0xff]  ;;  %v1342_v17 = vld [vmem:[%s5547_s7 + $0x2230] sm:$0xff] }
 0x46c   : > { %3703 = vmatpush.xpose.msra.mxu3 %v1315_v41  ;;  %3663 = vmatpush.xpose.msra.mxu1 %v1313_v19  ;;  %v1340_v19 = vld [vmem:[%s5547_s7 + $0x2220] sm:$0xff] }
 0x46f   : > { %3684 = vmatpush.xpose.msra.mxu2 %v1306_v22  ;;  %3644 = vmatpush.xpose.msra.mxu0 %v1304_v25  ;;  %v1343_v22 = vld [vmem:[%s5547_s7 + $0x2238] sm:$0xff]  ;;  %v1341_v25 = vld [vmem:[%s5547_s7 + $0x2228] sm:$0xff] }
 0x470   : > { %3704 = vmatpush.xpose.msra.mxu3 %v1307_v26  ;;  %3664 = vmatpush.xpose.msra.mxu1 %v1305_v27  ;;  %v1334_v26 = vld [vmem:[%s5547_s7 + $0x21f0] sm:$0xff]  ;;  %v6905_v27 = vpop.f32.mrf.mxu2 }
 0x473   : > { %3685 = vmatpush.xpose.msra.mxu2 %v1298_v5  ;;  %3645 = vmatpush.xpose.msra.mxu0 %v1296_v51  ;;  %v3330_v5 = vpop.f32.mrf.mxu0  ;;  %v1332_v51 = vld [vmem:[%s5547_s7 + $0x21e0] sm:$0xff] }
 0x474   : > { %3705 = vmatpush.xpose.msra.mxu3 %v1299_v28  ;;  %3665 = vmatpush.xpose.msra.mxu1 %v1297_v30  ;;  %v1335_v28 = vld [vmem:[%s5547_s7 + $0x21f8] sm:$0xff]  ;;  %v1333_v30 = vld [vmem:[%s5547_s7 + $0x21e8] sm:$0xff] }
 0x477   : > { %3686 = vmatpush.xpose.msra.mxu2 %v1290_v55  ;;  %3646 = vmatpush.xpose.msra.mxu0 %v1288_v31  ;;  %v1326_v55 = vld [vmem:[%s5547_s7 + $0x21b0] sm:$0xff]  ;;  %v6911_v31 = vpop.f32.mrf.mxu3 }
 0x478   : > { %3706 = vmatpush.xpose.msra.mxu3 %v1291_v32  ;;  %3666 = vmatpush.xpose.msra.mxu1 %v1289_v58  ;;  %v1324_v58 = vld [vmem:[%s5547_s7 + $0x21a0] sm:$0xff] }
 0x47b   : > { %3687 = vmatpush.xpose.msra.mxu2 %v1282_v21  ;;  %3647 = vmatpush.xpose.msra.mxu0 %v1280_v20  ;;  %v1327_v21 = vld [vmem:[%s5547_s7 + $0x21b8] sm:$0xff]  ;;  %v1325_v20 = vld [vmem:[%s5547_s7 + $0x21a8] sm:$0xff] }
 0x47c   : > { %3707 = vmatpush.xpose.msra.mxu3 %v1283_v61  ;;  %3667 = vmatpush.xpose.msra.mxu1 %v1281_v14  ;;  %v1318_v61 = vld [vmem:[%s5547_s7 + $0x2170] sm:$0xff] }
 0x47d   : > { %v5194_v14 = vld [vmem:[%s6270_s23] sm:$0xff] }
 0x47f   : > { %3688 = vmatpush.xpose.msra.mxu2 %v1274_v38  ;;  %3648 = vmatpush.xpose.msra.mxu0 %v1272_v16  ;;  %v2305_v38 = vperm.slane %v5194_v14, 5  ;;  %v3370_v16 = vpop.f32.mrf.mxu2 }
 0x480   : > { %3708 = vmatpush.xpose.msra.mxu3 %v1275_v46  ;;  %3668 = vmatpush.xpose.msra.mxu1 %v1273_v33  ;;  %v1319_v46 = vld [vmem:[%s5547_s7 + $0x2178] sm:$0xff]  ;;  %v1317_v33 = vld [vmem:[%s5547_s7 + $0x2168] sm:$0xff] }
 0x482   : > { %3689 = vmatmul.f32.vlgmr.msra.gmra.mxu2 %v6703_v10  ;;  %3649 = vmatmul.f32.vlgmr.msra.gmra.mxu0 %v6707_v36  ;;  %v1383_v10 = vld [vmem:[%s5547_s7 + $0x2378] sm:$0xff]  ;;  %v6865_v36 = vpop.f32.mrf.mxu1 }
 0x483   : > { %3753 = vmatpush.xpose.msrb.mxu2 %v1398_v44  ;;  %3713 = vmatpush.xpose.msrb.mxu0 %v1396_v18  ;;  %v1316_v44 = vld [vmem:[%s5547_s7 + $0x2160] sm:$0xff]  ;;  %v2306_v18 = vperm.slane %v5194_v14, 6 }
 0x484   : > { %3773 = vmatpush.xpose.msrb.mxu3 %v1399_v49  ;;  %3733 = vmatpush.xpose.msrb.mxu1 %v1397_v50  ;;  %v6920_v49 = vpop.f32.mrf.mxu0  ;;  %v1310_v50 = vld [vmem:[%s5547_s7 + $0x2130] sm:$0xff] }
 0x485   : > { %3709 = vmatmul.f32.vlgmr.msra.gmra.mxu3 %v6711_v40  ;;  %3669 = vmatmul.f32.vlgmr.msra.gmra.mxu1 %v6715_v37  ;;  %v1374_v40 = vld [vmem:[%s5547_s7 + $0x2330] sm:$0xff]  ;;  %v1373_v37 = vld [vmem:[%s5547_s7 + $0x2328] sm:$0xff] }
 0x487   : > { %3754 = vmatpush.xpose.msrb.mxu2 %v1390_v59  ;;  %3714 = vmatpush.xpose.msrb.mxu0 %v1388_v0  ;;  %v3171_v59 = vadd.f32 %v6873_v42, %v2305_v38  ;;  %v3390_v0 = vpop.f32.mrf.mxu3  ;;  %v1303_v42 = vld [vmem:[%s5547_s7 + $0x20f8] sm:$0xff]  ;;  %v1277_v38 = vld [vmem:[%s5547_s7 + $0x2028] sm:$0xff] }
 0x488   : > { %3774 = vmatpush.xpose.msrb.mxu3 %v1391_v52  ;;  %3734 = vmatpush.xpose.msrb.mxu1 %v1389_v23  ;;  %v1308_v52 = vld [vmem:[%s5547_s7 + $0x2120] sm:$0xff]  ;;  %v1311_v23 = vld [vmem:[%s5547_s7 + $0x2138] sm:$0xff] }
 0x48a   : > { %v6881_v1 = vpop.f32.mrf.mxu1 }
 0x48b   : > { %3755 = vmatpush.xpose.msrb.mxu2 %v1382_v12  ;;  %3715 = vmatpush.xpose.msrb.mxu0 %v1380_v24  ;;  %v2304_v12 = vperm.slane %v5194_v14, 4  ;;  %v3331_v24 = vadd.f32 %v3330_v5, %v2306_v18  ;;  %v1512_v18 = vld [vmem:[%s5547_s7 + $0x2780] sm:$0xff] }
 0x48c   : > { %3775 = vmatpush.xpose.msrb.mxu3 %v1383_v10  ;;  %3735 = vmatpush.xpose.msrb.mxu1 %v1381_v56  ;;  %v1309_v56 = vld [vmem:[%s5547_s7 + $0x2128] sm:$0xff] }
 0x48f   : > { %3756 = vmatpush.xpose.msrb.mxu2 %v1374_v40  ;;  %3716 = vmatpush.xpose.msrb.mxu0 %v1372_v57  ;;  %v1302_v40 = vld [vmem:[%s5547_s7 + $0x20f0] sm:$0xff]  ;;  %v3191_v57 = vadd.f32 %v6881_v1, %v3171_v59  ;;  %v6969_v59 = vld.sshfl [vmem:[#allocation1 + $0x30] sm:$0xff pattern:$0x73625140] }
 0x490   : > { %3776 = vmatpush.xpose.msrb.mxu3 %v1375_v39  ;;  %3736 = vmatpush.xpose.msrb.mxu1 %v1373_v37  ;;  %v1300_v39 = vld [vmem:[%s5547_s7 + $0x20e0] sm:$0xff]  ;;  %v2307_v37 = vperm.slane %v5194_v14, 7  ;;  %v1523_v14 = vld [vmem:[%s5547_s7 + $0x27d8] sm:$0xff] }
 0x491   : > { %v3211_v1 = vadd.f32 %v6887_v8, %v3191_v57  ;;  %v1507_v57 = vld [vmem:[%s5547_s7 + $0x2758] sm:$0xff] }
 0x492   : > { %v6899_v41 = vpop.f32.mrf.mxu1 }
 0x493   : > { %3757 = vmatpush.xpose.msrb.mxu2 %v1366_v45  ;;  %3717 = vmatpush.xpose.msrb.mxu0 %v1364_v29  ;;  %v3011_v45 = vadd.f32 %v6835_v13, %v2304_v12  ;;  %v3231_v8 = vadd.f32 %v6895_v35, %v3211_v1  ;;  %v6978_v12 = vld.sshfl [vmem:[#allocation1 + $0x38] sm:$0xff pattern:$0x73625140]  ;;  %v1499_v1 = vld [vmem:[%s5547_s7 + $0x2718] sm:$0xff] }
 0x494   : > { %3777 = vmatpush.xpose.msrb.mxu3 %v1367_v62  ;;  %3737 = vmatpush.xpose.msrb.mxu1 %v1365_v47  ;;  %v6935_v62 = vpop.f32.mrf.mxu2  ;;  %v1301_v47 = vld [vmem:[%s5547_s7 + $0x20e8] sm:$0xff] }
 0x495   : > { %v3031_v13 = vadd.f32 %v6842_v48, %v3011_v45  ;;  %v3251_v35 = vadd.f32 %v6891_v9, %v3231_v8  ;;  %v1521_v9 = vld [vmem:[%s5547_s7 + $0x27c8] sm:$0xff] }
 0x497   : > { %3758 = vmatpush.xpose.msrb.mxu2 %v1358_v2  ;;  %3718 = vmatpush.xpose.msrb.mxu0 %v1356_v3  ;;  %v3490_v2 = vpop.f32.mrf.mxu0  ;;  %v1294_v3 = vld [vmem:[%s5547_s7 + $0x20b0] sm:$0xff] }
 0x498   : > { %3778 = vmatpush.xpose.msrb.mxu3 %v1359_v7  ;;  %3738 = vmatpush.xpose.msrb.mxu1 %v1357_v43  ;;  %v1292_v7 = vld [vmem:[%s5547_s7 + $0x20a0] sm:$0xff]  ;;  %v1295_v43 = vld [vmem:[%s5547_s7 + $0x20b8] sm:$0xff] }
 0x49a   : > { %v3350_v32 = vpop.f32.mrf.mxu1 }
 0x49b   : > { %3759 = vmatpush.xpose.msrb.mxu2 %v1350_v4  ;;  %3719 = vmatpush.xpose.msrb.mxu0 %v1348_v6  ;;  %v3351_v29 = vadd.f32 %v3350_v32, %v3331_v24  ;;  %v3491_v4 = vadd.f32 %v3490_v2, %v2307_v37  ;;  %v1276_v32 = vld [vmem:[%s5547_s7 + $0x2020] sm:$0xff] }
 0x49c   : > { %3779 = vmatpush.xpose.msrb.mxu3 %v1351_v11  ;;  %3739 = vmatpush.xpose.msrb.mxu1 %v1349_v15  ;;  %v6943_v11 = vpop.f32.mrf.mxu3  ;;  %v1293_v15 = vld [vmem:[%s5547_s7 + $0x20a8] sm:$0xff]  ;;  %v1496_v2 = vld [vmem:[%s5547_s7 + $0x2700] sm:$0xff] }
 0x49d   : > { %v3371_v6 = vadd.f32 %v3370_v16, %v3351_v29  ;;  %v1498_v29 = vld [vmem:[%s5547_s7 + $0x2710] sm:$0xff] }
 0x49f   : > { %3760 = vmatpush.xpose.msrb.mxu2 %v1342_v17  ;;  %3720 = vmatpush.xpose.msrb.mxu0 %v1340_v19  ;;  %v1286_v19 = vld [vmem:[%s5547_s7 + $0x2070] sm:$0xff]  ;;  %v3391_v5 = vadd.f32 %v3390_v0, %v3371_v6  ;;  %v6973_v0 = vld.sshfl [vmem:[#allocation1 + $0x20] sm:$0xff pattern:$0x73625140]  ;;  %v1488_v6 = vld [vmem:[%s5547_s7 + $0x26c0] sm:$0xff] }
 0x4a0   : > { %3780 = vmatpush.xpose.msrb.mxu3 %v1343_v22  ;;  %3740 = vmatpush.xpose.msrb.mxu1 %v1341_v25  ;;  %v1284_v22 = vld [vmem:[%s5547_s7 + $0x2060] sm:$0xff]  ;;  %v1287_v25 = vld [vmem:[%s5547_s7 + $0x2078] sm:$0xff] }
 0x4a2   : > { %v6927_v10 = vpop.f32.mrf.mxu1 }
 0x4a3   : > { %3761 = vmatpush.xpose.msrb.mxu2 %v1334_v26  ;;  %3721 = vmatpush.xpose.msrb.mxu0 %v1332_v51  ;;  %v3051_v26 = vadd.f32 %v6849_v34, %v3031_v13  ;;  %v1285_v51 = vld [vmem:[%s5547_s7 + $0x2068] sm:$0xff]  ;;  %v1490_v13 = vld [vmem:[%s5547_s7 + $0x26d0] sm:$0xff] }
 0x4a4   : > { %3781 = vmatpush.xpose.msrb.mxu3 %v1335_v28  ;;  %3741 = vmatpush.xpose.msrb.mxu1 %v1333_v30  ;;  %v3530_v28 = vpop.f32.mrf.mxu2  ;;  %v1278_v30 = vld [vmem:[%s5547_s7 + $0x2030] sm:$0xff]  ;;  %v3550_v16 = vpop.f32.mrf.mxu3 }
 0x4a5   : > { %v3071_v34 = vadd.f32 %v6860_v54, %v3051_v26  ;;  %v1483_v26 = vld [vmem:[%s5547_s7 + $0x2698] sm:$0xff] }
 0x4a7   : > { %3762 = vmatpush.xpose.msrb.mxu2 %v1326_v55  ;;  %3722 = vmatpush.xpose.msrb.mxu0 %v1324_v58  ;;  %v1522_v55 = vld [vmem:[%s5547_s7 + $0x27d0] sm:$0xff]  ;;  %v1279_v58 = vld [vmem:[%s5547_s7 + $0x2038] sm:$0xff] }
 0x4a8   : > { %3782 = vmatpush.xpose.msrb.mxu3 %v1327_v21  ;;  %3742 = vmatpush.xpose.msrb.mxu1 %v1325_v20  ;;  %v1520_v21 = vld [vmem:[%s5547_s7 + $0x27c0] sm:$0xff] }
 0x4aa   : > { %v3510_v17 = vpop.f32.mrf.mxu1 }
 0x4ab   : > { %3763 = vmatpush.xpose.msrb.mxu2 %v1318_v61  ;;  %3723 = vmatpush.xpose.msrb.mxu0 %v1316_v44  ;;  %v3511_v48 = vadd.f32 %v3510_v17, %v3491_v4  ;;  %v3411_v61 = vadd.f32 %v6920_v49, %v3391_v5  ;;  %v3271_v44 = vadd.f32 %v6899_v41, %v3251_v35  ;;  %v1513_v41 = vld [vmem:[%s5547_s7 + $0x2788] sm:$0xff]  ;;  %v1491_v17 = vld [vmem:[%s5547_s7 + $0x26d8] sm:$0xff] }
 0x4ac   : > { %3783 = vmatpush.xpose.msrb.mxu3 %v1319_v46  ;;  %3743 = vmatpush.xpose.msrb.mxu1 %v1317_v33  ;;  %v1514_v46 = vld [vmem:[%s5547_s7 + $0x2790] sm:$0xff]  ;;  %v3091_v49 = vadd.f32 %v6855_v53, %v3071_v34  ;;  %v1481_v5 = vld [vmem:[%s5547_s7 + $0x2688] sm:$0xff]  ;;  %v1456_v34 = vld [vmem:[%s5547_s7 + $0x25c0] sm:$0xff] }
 0x4ad   : > { %v3531_v20 = vadd.f32 %v3530_v28, %v3511_v48  ;;  %v3431_v33 = vadd.f32 %v6927_v10, %v3411_v61  ;;  %v1504_v10 = vld [vmem:[%s5547_s7 + $0x2740] sm:$0xff]  ;;  %v1473_v35 = vld [vmem:[%s5547_s7 + $0x2648] sm:$0xff]  ;;  %v1459_v61 = vld [vmem:[%s5547_s7 + $0x25d8] sm:$0xff] }
 0x4ae   : > { %v1480_v48 = vld [vmem:[%s5547_s7 + $0x2680] sm:$0xff] }
 0x4af   : > { %3764 = vmatpush.xpose.msrb.mxu2 %v1310_v50  ;;  %3724 = vmatpush.xpose.msrb.mxu0 %v1308_v52  ;;  %v3551_v54 = vadd.f32 %v3550_v16, %v3531_v20  ;;  %v1515_v50 = vld [vmem:[%s5547_s7 + $0x2798] sm:$0xff]  ;;  %v3291_v52 = vadd.f32 %v6905_v27, %v3271_v44  ;;  %v3451_v27 = vadd.f32 %v6935_v62, %v3431_v33  ;;  %v1472_v28 = vld [vmem:[%s5547_s7 + $0x2640] sm:$0xff]  ;;  %v1458_v20 = vld [vmem:[%s5547_s7 + $0x25d0] sm:$0xff] }
 0x4b0   : > { %3784 = vmatpush.xpose.msrb.mxu3 %v1311_v23  ;;  %3744 = vmatpush.xpose.msrb.mxu1 %v1309_v56  ;;  %v1506_v23 = vld [vmem:[%s5547_s7 + $0x2750] sm:$0xff]  ;;  %v1448_v16 = vld [vmem:[%s5547_s7 + $0x2580] sm:$0xff]  ;;  %v1449_v44 = vld [vmem:[%s5547_s7 + $0x2588] sm:$0xff] }
 0x4b1   : > { %v6982_v56 = vld.sshfl [vmem:[#allocation1 + $0x28] sm:$0xff pattern:$0x73625140]  ;;  %v3311_v37 = vadd.f32 %v6911_v31, %v3291_v52  ;;  %v3471_v62 = vadd.f32 %v6943_v11, %v3451_v27  ;;  %v1497_v31 = vld [vmem:[%s5547_s7 + $0x2708] sm:$0xff]  ;;  %v1416_v27 = vld [vmem:[%s5547_s7 + $0x2480] sm:$0xff] }
 0x4b2   : > { %v1434_v33 = vld [vmem:[%s5547_s7 + $0x2510] sm:$0xff]  ;;  %v1433_v52 = vld [vmem:[%s5547_s7 + $0x2508] sm:$0xff] }
 0x4b3   : > { %3765 = vmatpush.xpose.msrb.mxu2 %v1302_v40  ;;  %3725 = vmatpush.xpose.msrb.mxu0 %v1300_v39  ;;  %v3111_v40 = vadd.f32 %v6865_v36, %v3091_v49  ;;  %v4933_v11 = vrot.slane %v3471_v62, 4  ;;  %v1441_v49 = vld [vmem:[%s5547_s7 + $0x2548] sm:$0xff]  ;;  %v1403_v62 = vld [vmem:[%s5547_s7 + $0x2418] sm:$0xff] }
 0x4b4   : > { %3785 = vmatpush.xpose.msrb.mxu3 %v1303_v42  ;;  %3745 = vmatpush.xpose.msrb.mxu1 %v1301_v47  ;;  %v1505_v42 = vld [vmem:[%s5547_s7 + $0x2748] sm:$0xff] }
 0x4b5   : > { %v3131_v36 = vadd.f32 %v6871_v60, %v3111_v40  ;;  %v1418_v40 = vld [vmem:[%s5547_s7 + $0x2490] sm:$0xff] }
 0x4b7   : > { %3766 = vmatpush.xpose.msrb.mxu2 %v1294_v3  ;;  %3726 = vmatpush.xpose.msrb.mxu0 %v1292_v7  ;;  %v3151_v60 = vadd.f32 %v6879_v63, %v3131_v36  ;;  %v1400_v36 = vld [vmem:[%s5547_s7 + $0x2400] sm:$0xff] }
 0x4b8   : > { %3786 = vmatpush.xpose.msrb.mxu3 %v1295_v43  ;;  %3746 = vmatpush.xpose.msrb.mxu1 %v1293_v15  ;;  %v4932_v43 = vrot.slane %v3311_v37, 6  ;;  %v1408_v37 = vld [vmem:[%s5547_s7 + $0x2440] sm:$0xff] }
 0x4ba   : > { %v4947_v8 = vsel %vm4941_vm0, %v3151_v60, %v4932_v43  ;;  %v1518_v43 = vld [vmem:[%s5547_s7 + $0x27b0] sm:$0xff]  ;;  %v1517_v60 = vld [vmem:[%s5547_s7 + $0x27a8] sm:$0xff] }
 0x4bb   : > { %3767 = vmatpush.xpose.msrb.mxu2 %v1286_v19  ;;  %3727 = vmatpush.xpose.msrb.mxu0 %v1284_v22  ;;  %v1489_v19 = vld [vmem:[%s5547_s7 + $0x26c8] sm:$0xff] }
 0x4bc   : > { %3787 = vmatpush.xpose.msrb.mxu3 %v1287_v25  ;;  %3747 = vmatpush.xpose.msrb.mxu1 %v1285_v51  ;;  %v1482_v25 = vld [vmem:[%s5547_s7 + $0x2690] sm:$0xff] }
 0x4bd   : > { %v1474_v51 = vld [vmem:[%s5547_s7 + $0x2650] sm:$0xff] }
 0x4bf   : > { %3768 = vmatpush.xpose.msrb.mxu2 %v1278_v30  ;;  %3728 = vmatpush.xpose.msrb.mxu0 %v1276_v32  ;;  %v3570_v53 = vpop.f32.mrf.mxu0  ;;  %v1475_v30 = vld [vmem:[%s5547_s7 + $0x2658] sm:$0xff]  ;;  %v1464_v32 = vld [vmem:[%s5547_s7 + $0x2600] sm:$0xff] }
 0x4c0   : > { %3788 = vmatpush.xpose.msrb.mxu3 %v1279_v58  ;;  %3748 = vmatpush.xpose.msrb.mxu1 %v1277_v38  ;;  %v3571_v24 = vadd.f32 %v3570_v53, %v3551_v54  ;;  %v1467_v58 = vld [vmem:[%s5547_s7 + $0x2618] sm:$0xff]  ;;  %v1450_v38 = vld [vmem:[%s5547_s7 + $0x2590] sm:$0xff]  ;;  %v1440_v54 = vld [vmem:[%s5547_s7 + $0x2540] sm:$0xff] }
 0x4c1   : > { %v1426_v53 = vld [vmem:[%s5547_s7 + $0x24d0] sm:$0xff] }
 0x4c2   : > { %3769 = vmatmul.f32.vlgmr.msrb.gmra.mxu2 %v6969_v59  ;;  %3729 = vmatmul.f32.vlgmr.msrb.gmra.mxu0 %v6973_v0  ;;  %v3590_v39 = vpop.f32.mrf.mxu1 }
 0x4c3   : > { %3833 = vmatpush.xpose.msra.mxu2 %v1522_v55  ;;  %3793 = vmatpush.xpose.msra.mxu0 %v1520_v21  ;;  %v3591_v45 = vadd.f32 %v3590_v39, %v3571_v24  ;;  %v1466_v55 = vld [vmem:[%s5547_s7 + $0x2610] sm:$0xff]  ;;  %v1465_v21 = vld [vmem:[%s5547_s7 + $0x2608] sm:$0xff]  ;;  %v1427_v24 = vld [vmem:[%s5547_s7 + $0x24d8] sm:$0xff] }
 0x4c4   : > { %3853 = vmatpush.xpose.msra.mxu3 %v1523_v14  ;;  %3813 = vmatpush.xpose.msra.mxu1 %v1521_v9  ;;  %v1457_v14 = vld [vmem:[%s5547_s7 + $0x25c8] sm:$0xff]  ;;  %v1451_v9 = vld [vmem:[%s5547_s7 + $0x2598] sm:$0xff] }
 0x4c5   : > { %3789 = vmatmul.f32.vlgmr.msrb.gmra.mxu3 %v6978_v12  ;;  %3749 = vmatmul.f32.vlgmr.msrb.gmra.mxu1 %v6982_v56  ;;  %v3610_v47 = vpop.f32.mrf.mxu2  ;;  %v1417_v39 = vld [vmem:[%s5547_s7 + $0x2488] sm:$0xff] }
 0x4c6   : > { %v3611_v3 = vadd.f32 %v3610_v47, %v3591_v45  ;;  %v1411_v45 = vld [vmem:[%s5547_s7 + $0x2458] sm:$0xff]  ;;  %v1402_v47 = vld [vmem:[%s5547_s7 + $0x2410] sm:$0xff] }
 0x4c7   : > { %3834 = vmatpush.xpose.msra.mxu2 %v1514_v46  ;;  %3794 = vmatpush.xpose.msra.mxu0 %v1512_v18  ;;  %v1442_v46 = vld [vmem:[%s5547_s7 + $0x2550] sm:$0xff]  ;;  %v1443_v18 = vld [vmem:[%s5547_s7 + $0x2558] sm:$0xff] }
 0x4c8   : > { %3854 = vmatpush.xpose.msra.mxu3 %v1515_v50  ;;  %3814 = vmatpush.xpose.msra.mxu1 %v1513_v41  ;;  %v3630_v7 = vpop.f32.mrf.mxu3  ;;  %v1432_v50 = vld [vmem:[%s5547_s7 + $0x2500] sm:$0xff]  ;;  %v1435_v41 = vld [vmem:[%s5547_s7 + $0x2518] sm:$0xff] }
 0x4c9   : > { %v3631_v4 = vadd.f32 %v3630_v7, %v3611_v3  ;;  %v1524_v3 = vld [vmem:[%s5547_s7 + $0x27e0] sm:$0xff]  ;;  %v1401_v7 = vld [vmem:[%s5547_s7 + $0x2408] sm:$0xff] }
 0x4cb   : > { %3835 = vmatpush.xpose.msra.mxu2 %v1506_v23  ;;  %3795 = vmatpush.xpose.msra.mxu0 %v1504_v10  ;;  %v4934_v15 = vrot.slane %v3631_v4, 2  ;;  %v1424_v23 = vld [vmem:[%s5547_s7 + $0x24c0] sm:$0xff]  ;;  %v1425_v10 = vld [vmem:[%s5547_s7 + $0x24c8] sm:$0xff] }
 0x4cc   : > { %3855 = vmatpush.xpose.msra.mxu3 %v1507_v57  ;;  %3815 = vmatpush.xpose.msra.mxu1 %v1505_v42  ;;  %v1419_v57 = vld [vmem:[%s5547_s7 + $0x2498] sm:$0xff]  ;;  %v1410_v42 = vld [vmem:[%s5547_s7 + $0x2450] sm:$0xff]  ;;  %v1516_v4 = vld [vmem:[%s5547_s7 + $0x27a0] sm:$0xff] }
 0x4cd   : > { %v4948_v22 = vsel %vm4943_vm1, %v4933_v11, %v4934_v15  ;;  %v7060_v11 = vld.sshfl [vmem:[#allocation1] sm:$0xff pattern:$0x73625140]  ;;  %v1510_v15 = vld [vmem:[%s5547_s7 + $0x2770] sm:$0xff] }
 0x4ce   : > { %v4949_v63 = vsel %vm4945_vm2, %v4947_v8, %v4948_v22  ;;  %v7068_v8 = vld.sshfl [vmem:[#allocation1 + $0x8] sm:$0xff pattern:$0x73625140]  ;;  %v1511_v22 = vld [vmem:[%s5547_s7 + $0x2778] sm:$0xff] }
 0x4cf   : > { %3836 = vmatpush.xpose.msra.mxu2 %v1498_v29  ;;  %3796 = vmatpush.xpose.msra.mxu0 %v1496_v2  ;;  %4961 = vst [vmem:[%s6363_s10 + $0x8] sm:$0xff] %v4949_v63  ;;  %v1409_v29 = vld [vmem:[%s5547_s7 + $0x2448] sm:$0xff]  ;;  %v1526_v2 = vld [vmem:[%s5547_s7 + $0x27f0] sm:$0xff] }
 0x4d0   : > { %3856 = vmatpush.xpose.msra.mxu3 %v1499_v1  ;;  %3816 = vmatpush.xpose.msra.mxu1 %v1497_v31  ;;  %v1527_v1 = vld [vmem:[%s5547_s7 + $0x27f8] sm:$0xff]  ;;  %v1525_v31 = vld [vmem:[%s5547_s7 + $0x27e8] sm:$0xff]  ;;  %v1502_v63 = vld [vmem:[%s5547_s7 + $0x2730] sm:$0xff] }
 0x4d3   : > { %3837 = vmatpush.xpose.msra.mxu2 %v1490_v13  ;;  %3797 = vmatpush.xpose.msra.mxu0 %v1488_v6  ;;  %v1519_v13 = vld [vmem:[%s5547_s7 + $0x27b8] sm:$0xff] }
 0x4d4   : > { %3857 = vmatpush.xpose.msra.mxu3 %v1491_v17  ;;  %3817 = vmatpush.xpose.msra.mxu1 %v1489_v19  ;;  %v7056_v6 = vld.sshfl [vmem:[#allocation1 + $0x10] sm:$0xff pattern:$0x73625140]  ;;  %v7064_v17 = vld.sshfl [vmem:[#allocation1 + $0x18] sm:$0xff pattern:$0x73625140] }
 0x4d5   : > { %v1508_v19 = vld [vmem:[%s5547_s7 + $0x2760] sm:$0xff] }
 0x4d7   : > { %3838 = vmatpush.xpose.msra.mxu2 %v1482_v25  ;;  %3798 = vmatpush.xpose.msra.mxu0 %v1480_v48  ;;  %v1509_v25 = vld [vmem:[%s5547_s7 + $0x2768] sm:$0xff]  ;;  %v1500_v48 = vld [vmem:[%s5547_s7 + $0x2720] sm:$0xff] }
 0x4d8   : > { %3858 = vmatpush.xpose.msra.mxu3 %v1483_v26  ;;  %3818 = vmatpush.xpose.msra.mxu1 %v1481_v5  ;;  %v1503_v26 = vld [vmem:[%s5547_s7 + $0x2738] sm:$0xff]  ;;  %v1501_v5 = vld [vmem:[%s5547_s7 + $0x2728] sm:$0xff] }
 0x4db   : > { %3839 = vmatpush.xpose.msra.mxu2 %v1474_v51  ;;  %3799 = vmatpush.xpose.msra.mxu0 %v1472_v28  ;;  %v1494_v51 = vld [vmem:[%s5547_s7 + $0x26f0] sm:$0xff]  ;;  %v1492_v28 = vld [vmem:[%s5547_s7 + $0x26e0] sm:$0xff] }
 0x4dc   : > { %3859 = vmatpush.xpose.msra.mxu3 %v1475_v30  ;;  %3819 = vmatpush.xpose.msra.mxu1 %v1473_v35  ;;  %v1495_v30 = vld [vmem:[%s5547_s7 + $0x26f8] sm:$0xff]  ;;  %v1493_v35 = vld [vmem:[%s5547_s7 + $0x26e8] sm:$0xff] }
 0x4df   : > { %3840 = vmatpush.xpose.msra.mxu2 %v1466_v55  ;;  %3800 = vmatpush.xpose.msra.mxu0 %v1464_v32  ;;  %v1486_v55 = vld [vmem:[%s5547_s7 + $0x26b0] sm:$0xff]  ;;  %v1484_v32 = vld [vmem:[%s5547_s7 + $0x26a0] sm:$0xff] }
 0x4e0   : > { %3860 = vmatpush.xpose.msra.mxu3 %v1467_v58  ;;  %3820 = vmatpush.xpose.msra.mxu1 %v1465_v21  ;;  %v1487_v58 = vld [vmem:[%s5547_s7 + $0x26b8] sm:$0xff]  ;;  %v1485_v21 = vld [vmem:[%s5547_s7 + $0x26a8] sm:$0xff] }
 0x4e3   : > { %3841 = vmatpush.xpose.msra.mxu2 %v1458_v20  ;;  %3801 = vmatpush.xpose.msra.mxu0 %v1456_v34  ;;  %v1478_v20 = vld [vmem:[%s5547_s7 + $0x2670] sm:$0xff]  ;;  %v1476_v34 = vld [vmem:[%s5547_s7 + $0x2660] sm:$0xff] }
 0x4e4   : > { %3861 = vmatpush.xpose.msra.mxu3 %v1459_v61  ;;  %3821 = vmatpush.xpose.msra.mxu1 %v1457_v14  ;;  %v1479_v61 = vld [vmem:[%s5547_s7 + $0x2678] sm:$0xff]  ;;  %v1477_v14 = vld [vmem:[%s5547_s7 + $0x2668] sm:$0xff] }
 0x4e7   : > { %3842 = vmatpush.xpose.msra.mxu2 %v1450_v38  ;;  %3802 = vmatpush.xpose.msra.mxu0 %v1448_v16  ;;  %v1470_v38 = vld [vmem:[%s5547_s7 + $0x2630] sm:$0xff]  ;;  %v1468_v16 = vld [vmem:[%s5547_s7 + $0x2620] sm:$0xff] }
 0x4e8   : > { %3862 = vmatpush.xpose.msra.mxu3 %v1451_v9  ;;  %3822 = vmatpush.xpose.msra.mxu1 %v1449_v44  ;;  %v1471_v9 = vld [vmem:[%s5547_s7 + $0x2638] sm:$0xff]  ;;  %v1469_v44 = vld [vmem:[%s5547_s7 + $0x2628] sm:$0xff] }
 0x4eb   : > { %3843 = vmatpush.xpose.msra.mxu2 %v1442_v46  ;;  %3803 = vmatpush.xpose.msra.mxu0 %v1440_v54  ;;  %v1462_v46 = vld [vmem:[%s5547_s7 + $0x25f0] sm:$0xff]  ;;  %v1460_v54 = vld [vmem:[%s5547_s7 + $0x25e0] sm:$0xff] }
 0x4ec   : > { %3863 = vmatpush.xpose.msra.mxu3 %v1443_v18  ;;  %3823 = vmatpush.xpose.msra.mxu1 %v1441_v49  ;;  %v1463_v18 = vld [vmem:[%s5547_s7 + $0x25f8] sm:$0xff]  ;;  %v1461_v49 = vld [vmem:[%s5547_s7 + $0x25e8] sm:$0xff] }
 0x4ef   : > { %3844 = vmatpush.xpose.msra.mxu2 %v1434_v33  ;;  %3804 = vmatpush.xpose.msra.mxu0 %v1432_v50  ;;  %v1454_v33 = vld [vmem:[%s5547_s7 + $0x25b0] sm:$0xff]  ;;  %v1452_v50 = vld [vmem:[%s5547_s7 + $0x25a0] sm:$0xff] }
 0x4f0   : > { %3864 = vmatpush.xpose.msra.mxu3 %v1435_v41  ;;  %3824 = vmatpush.xpose.msra.mxu1 %v1433_v52  ;;  %v1455_v41 = vld [vmem:[%s5547_s7 + $0x25b8] sm:$0xff]  ;;  %v1453_v52 = vld [vmem:[%s5547_s7 + $0x25a8] sm:$0xff] }
 0x4f3   : > { %3845 = vmatpush.xpose.msra.mxu2 %v1426_v53  ;;  %3805 = vmatpush.xpose.msra.mxu0 %v1424_v23  ;;  %v1446_v53 = vld [vmem:[%s5547_s7 + $0x2570] sm:$0xff]  ;;  %v1444_v23 = vld [vmem:[%s5547_s7 + $0x2560] sm:$0xff] }
 0x4f4   : > { %3865 = vmatpush.xpose.msra.mxu3 %v1427_v24  ;;  %3825 = vmatpush.xpose.msra.mxu1 %v1425_v10  ;;  %v1447_v24 = vld [vmem:[%s5547_s7 + $0x2578] sm:$0xff]  ;;  %v1445_v10 = vld [vmem:[%s5547_s7 + $0x2568] sm:$0xff] }
 0x4f7   : > { %3846 = vmatpush.xpose.msra.mxu2 %v1418_v40  ;;  %3806 = vmatpush.xpose.msra.mxu0 %v1416_v27  ;;  %v1438_v40 = vld [vmem:[%s5547_s7 + $0x2530] sm:$0xff]  ;;  %v1436_v27 = vld [vmem:[%s5547_s7 + $0x2520] sm:$0xff] }
 0x4f8   : > { %3866 = vmatpush.xpose.msra.mxu3 %v1419_v57  ;;  %3826 = vmatpush.xpose.msra.mxu1 %v1417_v39  ;;  %v1439_v57 = vld [vmem:[%s5547_s7 + $0x2538] sm:$0xff]  ;;  %v1437_v39 = vld [vmem:[%s5547_s7 + $0x2528] sm:$0xff] }
 0x4fb   : > { %3847 = vmatpush.xpose.msra.mxu2 %v1410_v42  ;;  %3807 = vmatpush.xpose.msra.mxu0 %v1408_v37  ;;  %v1430_v42 = vld [vmem:[%s5547_s7 + $0x24f0] sm:$0xff]  ;;  %v1428_v37 = vld [vmem:[%s5547_s7 + $0x24e0] sm:$0xff] }
 0x4fc   : > { %3867 = vmatpush.xpose.msra.mxu3 %v1411_v45  ;;  %3827 = vmatpush.xpose.msra.mxu1 %v1409_v29  ;;  %v1431_v45 = vld [vmem:[%s5547_s7 + $0x24f8] sm:$0xff]  ;;  %v1429_v29 = vld [vmem:[%s5547_s7 + $0x24e8] sm:$0xff] }
 0x4ff   : > { %3848 = vmatpush.xpose.msra.mxu2 %v1402_v47  ;;  %3808 = vmatpush.xpose.msra.mxu0 %v1400_v36  ;;  %v1422_v47 = vld [vmem:[%s5547_s7 + $0x24b0] sm:$0xff]  ;;  %v1423_v36 = vld [vmem:[%s5547_s7 + $0x24b8] sm:$0xff] }
 0x500   : > { %3868 = vmatpush.xpose.msra.mxu3 %v1403_v62  ;;  %3828 = vmatpush.xpose.msra.mxu1 %v1401_v7  ;;  %v1421_v62 = vld [vmem:[%s5547_s7 + $0x24a8] sm:$0xff]  ;;  %v1415_v7 = vld [vmem:[%s5547_s7 + $0x2478] sm:$0xff] }
 0x502   : > { %3849 = vmatmul.f32.vlgmr.msra.gmra.mxu2 %v7056_v6  ;;  %3809 = vmatmul.f32.vlgmr.msra.gmra.mxu0 %v7060_v11 }
 0x503   : > { %3913 = vmatpush.xpose.msrb.mxu2 %v1526_v2  ;;  %3873 = vmatpush.xpose.msrb.mxu0 %v1524_v3  ;;  %v1420_v2 = vld [vmem:[%s5547_s7 + $0x24a0] sm:$0xff]  ;;  %v1414_v3 = vld [vmem:[%s5547_s7 + $0x2470] sm:$0xff] }
 0x504   : > { %3933 = vmatpush.xpose.msrb.mxu3 %v1527_v1  ;;  %3893 = vmatpush.xpose.msrb.mxu1 %v1525_v31  ;;  %v1412_v1 = vld [vmem:[%s5547_s7 + $0x2460] sm:$0xff]  ;;  %v1413_v31 = vld [vmem:[%s5547_s7 + $0x2468] sm:$0xff] }
 0x505   : > { %3869 = vmatmul.f32.vlgmr.msra.gmra.mxu3 %v7064_v17  ;;  %3829 = vmatmul.f32.vlgmr.msra.gmra.mxu1 %v7068_v8 }
 0x507   : > { %3914 = vmatpush.xpose.msrb.mxu2 %v1518_v43  ;;  %3874 = vmatpush.xpose.msrb.mxu0 %v1516_v4  ;;  %v1406_v43 = vld [vmem:[%s5547_s7 + $0x2430] sm:$0xff] }
 0x508   : > { %3934 = vmatpush.xpose.msrb.mxu3 %v1519_v13  ;;  %3894 = vmatpush.xpose.msrb.mxu1 %v1517_v60  ;;  %v1650_v4 = vld [vmem:[%s5547_s7 + $0x2bd0] sm:$0xff]  ;;  %v1404_v13 = vld [vmem:[%s5547_s7 + $0x2420] sm:$0xff]  ;;  %v1407_v60 = vld [vmem:[%s5547_s7 + $0x2438] sm:$0xff] }
 0x50b   : > { %3915 = vmatpush.xpose.msrb.mxu2 %v1510_v15  ;;  %3875 = vmatpush.xpose.msrb.mxu0 %v1508_v19  ;;  %v1648_v15 = vld [vmem:[%s5547_s7 + $0x2bc0] sm:$0xff]  ;;  %v1651_v19 = vld [vmem:[%s5547_s7 + $0x2bd8] sm:$0xff] }
 0x50c   : > { %3935 = vmatpush.xpose.msrb.mxu3 %v1511_v22  ;;  %3895 = vmatpush.xpose.msrb.mxu1 %v1509_v25  ;;  %v1405_v22 = vld [vmem:[%s5547_s7 + $0x2428] sm:$0xff] }
 0x50d   : > { %v1649_v25 = vld [vmem:[%s5547_s7 + $0x2bc8] sm:$0xff] }
 0x50f   : > { %3916 = vmatpush.xpose.msrb.mxu2 %v1502_v63  ;;  %3876 = vmatpush.xpose.msrb.mxu0 %v1500_v48  ;;  %v1642_v63 = vld [vmem:[%s5547_s7 + $0x2b90] sm:$0xff]  ;;  %v1640_v48 = vld [vmem:[%s5547_s7 + $0x2b80] sm:$0xff] }
 0x510   : > { %3936 = vmatpush.xpose.msrb.mxu3 %v1503_v26  ;;  %3896 = vmatpush.xpose.msrb.mxu1 %v1501_v5  ;;  %v1643_v26 = vld [vmem:[%s5547_s7 + $0x2b98] sm:$0xff]  ;;  %v1641_v5 = vld [vmem:[%s5547_s7 + $0x2b88] sm:$0xff] }
 0x513   : > { %3917 = vmatpush.xpose.msrb.mxu2 %v1494_v51  ;;  %3877 = vmatpush.xpose.msrb.mxu0 %v1492_v28  ;;  %v1632_v51 = vld [vmem:[%s5547_s7 + $0x2b40] sm:$0xff]  ;;  %v1635_v28 = vld [vmem:[%s5547_s7 + $0x2b58] sm:$0xff] }
 0x514   : > { %3937 = vmatpush.xpose.msrb.mxu3 %v1495_v30  ;;  %3897 = vmatpush.xpose.msrb.mxu1 %v1493_v35  ;;  %v1624_v30 = vld [vmem:[%s5547_s7 + $0x2b00] sm:$0xff]  ;;  %v1627_v35 = vld [vmem:[%s5547_s7 + $0x2b18] sm:$0xff] }
 0x517   : > { %3918 = vmatpush.xpose.msrb.mxu2 %v1486_v55  ;;  %3878 = vmatpush.xpose.msrb.mxu0 %v1484_v32  ;;  %v1618_v55 = vld [vmem:[%s5547_s7 + $0x2ad0] sm:$0xff]  ;;  %v1616_v32 = vld [vmem:[%s5547_s7 + $0x2ac0] sm:$0xff] }
 0x518   : > { %3938 = vmatpush.xpose.msrb.mxu3 %v1487_v58  ;;  %3898 = vmatpush.xpose.msrb.mxu1 %v1485_v21  ;;  %v1619_v58 = vld [vmem:[%s5547_s7 + $0x2ad8] sm:$0xff]  ;;  %v1617_v21 = vld [vmem:[%s5547_s7 + $0x2ac8] sm:$0xff] }
 0x51b   : > { %3919 = vmatpush.xpose.msrb.mxu2 %v1478_v20  ;;  %3879 = vmatpush.xpose.msrb.mxu0 %v1476_v34  ;;  %v1610_v20 = vld [vmem:[%s5547_s7 + $0x2a90] sm:$0xff]  ;;  %v1608_v34 = vld [vmem:[%s5547_s7 + $0x2a80] sm:$0xff] }
 0x51c   : > { %3939 = vmatpush.xpose.msrb.mxu3 %v1479_v61  ;;  %3899 = vmatpush.xpose.msrb.mxu1 %v1477_v14  ;;  %v1611_v61 = vld [vmem:[%s5547_s7 + $0x2a98] sm:$0xff]  ;;  %v1609_v14 = vld [vmem:[%s5547_s7 + $0x2a88] sm:$0xff] }
 0x51f   : > { %3920 = vmatpush.xpose.msrb.mxu2 %v1470_v38  ;;  %3880 = vmatpush.xpose.msrb.mxu0 %v1468_v16  ;;  %v1602_v38 = vld [vmem:[%s5547_s7 + $0x2a50] sm:$0xff]  ;;  %v1600_v16 = vld [vmem:[%s5547_s7 + $0x2a40] sm:$0xff] }
 0x520   : > { %3940 = vmatpush.xpose.msrb.mxu3 %v1471_v9  ;;  %3900 = vmatpush.xpose.msrb.mxu1 %v1469_v44  ;;  %v1603_v9 = vld [vmem:[%s5547_s7 + $0x2a58] sm:$0xff]  ;;  %v1601_v44 = vld [vmem:[%s5547_s7 + $0x2a48] sm:$0xff] }
 0x523   : > { %3921 = vmatpush.xpose.msrb.mxu2 %v1462_v46  ;;  %3881 = vmatpush.xpose.msrb.mxu0 %v1460_v54  ;;  %v1594_v46 = vld [vmem:[%s5547_s7 + $0x2a10] sm:$0xff]  ;;  %v1592_v54 = vld [vmem:[%s5547_s7 + $0x2a00] sm:$0xff] }
 0x524   : > { %3941 = vmatpush.xpose.msrb.mxu3 %v1463_v18  ;;  %3901 = vmatpush.xpose.msrb.mxu1 %v1461_v49  ;;  %v1595_v18 = vld [vmem:[%s5547_s7 + $0x2a18] sm:$0xff]  ;;  %v1593_v49 = vld [vmem:[%s5547_s7 + $0x2a08] sm:$0xff] }
 0x527   : > { %3922 = vmatpush.xpose.msrb.mxu2 %v1454_v33  ;;  %3882 = vmatpush.xpose.msrb.mxu0 %v1452_v50  ;;  %v1586_v33 = vld [vmem:[%s5547_s7 + $0x29d0] sm:$0xff]  ;;  %v1584_v50 = vld [vmem:[%s5547_s7 + $0x29c0] sm:$0xff] }
 0x528   : > { %3942 = vmatpush.xpose.msrb.mxu3 %v1455_v41  ;;  %3902 = vmatpush.xpose.msrb.mxu1 %v1453_v52  ;;  %v1587_v41 = vld [vmem:[%s5547_s7 + $0x29d8] sm:$0xff]  ;;  %v1585_v52 = vld [vmem:[%s5547_s7 + $0x29c8] sm:$0xff] }
 0x52b   : > { %3923 = vmatpush.xpose.msrb.mxu2 %v1446_v53  ;;  %3883 = vmatpush.xpose.msrb.mxu0 %v1444_v23  ;;  %v1578_v53 = vld [vmem:[%s5547_s7 + $0x2990] sm:$0xff]  ;;  %v1576_v23 = vld [vmem:[%s5547_s7 + $0x2980] sm:$0xff] }
 0x52c   : > { %3943 = vmatpush.xpose.msrb.mxu3 %v1447_v24  ;;  %3903 = vmatpush.xpose.msrb.mxu1 %v1445_v10  ;;  %v1579_v24 = vld [vmem:[%s5547_s7 + $0x2998] sm:$0xff]  ;;  %v1577_v10 = vld [vmem:[%s5547_s7 + $0x2988] sm:$0xff] }
 0x52f   : > { %3924 = vmatpush.xpose.msrb.mxu2 %v1438_v40  ;;  %3884 = vmatpush.xpose.msrb.mxu0 %v1436_v27  ;;  %v1570_v40 = vld [vmem:[%s5547_s7 + $0x2950] sm:$0xff]  ;;  %v1568_v27 = vld [vmem:[%s5547_s7 + $0x2940] sm:$0xff] }
 0x530   : > { %3944 = vmatpush.xpose.msrb.mxu3 %v1439_v57  ;;  %3904 = vmatpush.xpose.msrb.mxu1 %v1437_v39  ;;  %v1571_v57 = vld [vmem:[%s5547_s7 + $0x2958] sm:$0xff]  ;;  %v1569_v39 = vld [vmem:[%s5547_s7 + $0x2948] sm:$0xff] }
 0x533   : > { %3925 = vmatpush.xpose.msrb.mxu2 %v1430_v42  ;;  %3885 = vmatpush.xpose.msrb.mxu0 %v1428_v37  ;;  %v1562_v42 = vld [vmem:[%s5547_s7 + $0x2910] sm:$0xff]  ;;  %v1560_v37 = vld [vmem:[%s5547_s7 + $0x2900] sm:$0xff] }
 0x534   : > { %3945 = vmatpush.xpose.msrb.mxu3 %v1431_v45  ;;  %3905 = vmatpush.xpose.msrb.mxu1 %v1429_v29  ;;  %v1563_v45 = vld [vmem:[%s5547_s7 + $0x2918] sm:$0xff]  ;;  %v1561_v29 = vld [vmem:[%s5547_s7 + $0x2908] sm:$0xff] }
 0x537   : > { %3926 = vmatpush.xpose.msrb.mxu2 %v1422_v47  ;;  %3886 = vmatpush.xpose.msrb.mxu0 %v1420_v2  ;;  %v1554_v47 = vld [vmem:[%s5547_s7 + $0x28d0] sm:$0xff]  ;;  %v1552_v2 = vld [vmem:[%s5547_s7 + $0x28c0] sm:$0xff] }
 0x538   : > { %3946 = vmatpush.xpose.msrb.mxu3 %v1423_v36  ;;  %3906 = vmatpush.xpose.msrb.mxu1 %v1421_v62  ;;  %v1555_v36 = vld [vmem:[%s5547_s7 + $0x28d8] sm:$0xff]  ;;  %v1553_v62 = vld [vmem:[%s5547_s7 + $0x28c8] sm:$0xff] }
 0x53b   : > { %3927 = vmatpush.xpose.msrb.mxu2 %v1414_v3  ;;  %3887 = vmatpush.xpose.msrb.mxu0 %v1412_v1  ;;  %v1546_v3 = vld [vmem:[%s5547_s7 + $0x2890] sm:$0xff]  ;;  %v1544_v1 = vld [vmem:[%s5547_s7 + $0x2880] sm:$0xff] }
 0x53c   : > { %3947 = vmatpush.xpose.msrb.mxu3 %v1415_v7  ;;  %3907 = vmatpush.xpose.msrb.mxu1 %v1413_v31  ;;  %v1547_v7 = vld [vmem:[%s5547_s7 + $0x2898] sm:$0xff]  ;;  %v1545_v31 = vld [vmem:[%s5547_s7 + $0x2888] sm:$0xff] }
 0x53f   : > { %3928 = vmatpush.xpose.msrb.mxu2 %v1406_v43  ;;  %3888 = vmatpush.xpose.msrb.mxu0 %v1404_v13  ;;  %v1538_v43 = vld [vmem:[%s5547_s7 + $0x2850] sm:$0xff]  ;;  %v1539_v13 = vld [vmem:[%s5547_s7 + $0x2858] sm:$0xff] }
 0x540   : > { %3948 = vmatpush.xpose.msrb.mxu3 %v1407_v60  ;;  %3908 = vmatpush.xpose.msrb.mxu1 %v1405_v22  ;;  %v1537_v60 = vld [vmem:[%s5547_s7 + $0x2848] sm:$0xff]  ;;  %v1654_v22 = vld [vmem:[%s5547_s7 + $0x2bf0] sm:$0xff] }
 0x542   : > { %3929 = vmatmul.f32.vlgmr.msrb.gmra.mxu2 %v6969_v59  ;;  %3889 = vmatmul.f32.vlgmr.msrb.gmra.mxu0 %v6973_v0  ;;  %v1634_v59 = vld [vmem:[%s5547_s7 + $0x2b50] sm:$0xff]  ;;  %v1633_v0 = vld [vmem:[%s5547_s7 + $0x2b48] sm:$0xff] }
 0x543   : > { %3993 = vmatpush.xpose.msra.mxu2 %v1650_v4  ;;  %3953 = vmatpush.xpose.msra.mxu0 %v1648_v15  ;;  %v1536_v4 = vld [vmem:[%s5547_s7 + $0x2840] sm:$0xff]  ;;  %v1530_v15 = vld [vmem:[%s5547_s7 + $0x2810] sm:$0xff] }
 0x544   : > { %4013 = vmatpush.xpose.msra.mxu3 %v1651_v19  ;;  %3973 = vmatpush.xpose.msra.mxu1 %v1649_v25  ;;  %v1528_v19 = vld [vmem:[%s5547_s7 + $0x2800] sm:$0xff]  ;;  %v1531_v25 = vld [vmem:[%s5547_s7 + $0x2818] sm:$0xff] }
 0x545   : > { %3949 = vmatmul.f32.vlgmr.msrb.gmra.mxu3 %v6978_v12  ;;  %3909 = vmatmul.f32.vlgmr.msrb.gmra.mxu1 %v6982_v56  ;;  %v1626_v12 = vld [vmem:[%s5547_s7 + $0x2b10] sm:$0xff]  ;;  %v1625_v56 = vld [vmem:[%s5547_s7 + $0x2b08] sm:$0xff] }
 0x547   : > { %3994 = vmatpush.xpose.msra.mxu2 %v1642_v63  ;;  %3954 = vmatpush.xpose.msra.mxu0 %v1640_v48  ;;  %v1652_v63 = vld [vmem:[%s5547_s7 + $0x2be0] sm:$0xff]  ;;  %v1655_v48 = vld [vmem:[%s5547_s7 + $0x2bf8] sm:$0xff] }
 0x548   : > { %4014 = vmatpush.xpose.msra.mxu3 %v1643_v26  ;;  %3974 = vmatpush.xpose.msra.mxu1 %v1641_v5  ;;  %v1529_v26 = vld [vmem:[%s5547_s7 + $0x2808] sm:$0xff] }
 0x549   : > { %v1653_v5 = vld [vmem:[%s5547_s7 + $0x2be8] sm:$0xff] }
 0x54b   : > { %3995 = vmatpush.xpose.msra.mxu2 %v1634_v59  ;;  %3955 = vmatpush.xpose.msra.mxu0 %v1632_v51  ;;  %v1646_v59 = vld [vmem:[%s5547_s7 + $0x2bb0] sm:$0xff]  ;;  %v1644_v51 = vld [vmem:[%s5547_s7 + $0x2ba0] sm:$0xff] }
 0x54c   : > { %4015 = vmatpush.xpose.msra.mxu3 %v1635_v28  ;;  %3975 = vmatpush.xpose.msra.mxu1 %v1633_v0  ;;  %v1647_v28 = vld [vmem:[%s5547_s7 + $0x2bb8] sm:$0xff]  ;;  %v1645_v0 = vld [vmem:[%s5547_s7 + $0x2ba8] sm:$0xff] }
 0x54f   : > { %3996 = vmatpush.xpose.msra.mxu2 %v1626_v12  ;;  %3956 = vmatpush.xpose.msra.mxu0 %v1624_v30  ;;  %v1638_v12 = vld [vmem:[%s5547_s7 + $0x2b70] sm:$0xff]  ;;  %v1636_v30 = vld [vmem:[%s5547_s7 + $0x2b60] sm:$0xff] }
 0x550   : > { %4016 = vmatpush.xpose.msra.mxu3 %v1627_v35  ;;  %3976 = vmatpush.xpose.msra.mxu1 %v1625_v56  ;;  %v1639_v35 = vld [vmem:[%s5547_s7 + $0x2b78] sm:$0xff] }
 0x551   : > { %v1631_v56 = vld [vmem:[%s5547_s7 + $0x2b38] sm:$0xff] }
 0x553   : > { %3997 = vmatpush.xpose.msra.mxu2 %v1618_v55  ;;  %3957 = vmatpush.xpose.msra.mxu0 %v1616_v32  ;;  %v1629_v55 = vld [vmem:[%s5547_s7 + $0x2b28] sm:$0xff]  ;;  %v1620_v32 = vld [vmem:[%s5547_s7 + $0x2ae0] sm:$0xff] }
 0x554   : > { %4017 = vmatpush.xpose.msra.mxu3 %v1619_v58  ;;  %3977 = vmatpush.xpose.msra.mxu1 %v1617_v21  ;;  %v1623_v58 = vld [vmem:[%s5547_s7 + $0x2af8] sm:$0xff]  ;;  %v1621_v21 = vld [vmem:[%s5547_s7 + $0x2ae8] sm:$0xff] }
 0x557   : > { %3998 = vmatpush.xpose.msra.mxu2 %v1610_v20  ;;  %3958 = vmatpush.xpose.msra.mxu0 %v1608_v34  ;;  %v1614_v20 = vld [vmem:[%s5547_s7 + $0x2ab0] sm:$0xff]  ;;  %v1612_v34 = vld [vmem:[%s5547_s7 + $0x2aa0] sm:$0xff] }
 0x558   : > { %4018 = vmatpush.xpose.msra.mxu3 %v1611_v61  ;;  %3978 = vmatpush.xpose.msra.mxu1 %v1609_v14  ;;  %v1615_v61 = vld [vmem:[%s5547_s7 + $0x2ab8] sm:$0xff]  ;;  %v1613_v14 = vld [vmem:[%s5547_s7 + $0x2aa8] sm:$0xff] }
 0x55b   : > { %3999 = vmatpush.xpose.msra.mxu2 %v1602_v38  ;;  %3959 = vmatpush.xpose.msra.mxu0 %v1600_v16  ;;  %v1606_v38 = vld [vmem:[%s5547_s7 + $0x2a70] sm:$0xff]  ;;  %v1604_v16 = vld [vmem:[%s5547_s7 + $0x2a60] sm:$0xff] }
 0x55c   : > { %4019 = vmatpush.xpose.msra.mxu3 %v1603_v9  ;;  %3979 = vmatpush.xpose.msra.mxu1 %v1601_v44  ;;  %v1607_v9 = vld [vmem:[%s5547_s7 + $0x2a78] sm:$0xff]  ;;  %v1605_v44 = vld [vmem:[%s5547_s7 + $0x2a68] sm:$0xff] }
 0x55f   : > { %4000 = vmatpush.xpose.msra.mxu2 %v1594_v46  ;;  %3960 = vmatpush.xpose.msra.mxu0 %v1592_v54  ;;  %v1598_v46 = vld [vmem:[%s5547_s7 + $0x2a30] sm:$0xff]  ;;  %v1596_v54 = vld [vmem:[%s5547_s7 + $0x2a20] sm:$0xff] }
 0x560   : > { %4020 = vmatpush.xpose.msra.mxu3 %v1595_v18  ;;  %3980 = vmatpush.xpose.msra.mxu1 %v1593_v49  ;;  %v1599_v18 = vld [vmem:[%s5547_s7 + $0x2a38] sm:$0xff]  ;;  %v1597_v49 = vld [vmem:[%s5547_s7 + $0x2a28] sm:$0xff] }
 0x563   : > { %4001 = vmatpush.xpose.msra.mxu2 %v1586_v33  ;;  %3961 = vmatpush.xpose.msra.mxu0 %v1584_v50  ;;  %v1590_v33 = vld [vmem:[%s5547_s7 + $0x29f0] sm:$0xff]  ;;  %v1588_v50 = vld [vmem:[%s5547_s7 + $0x29e0] sm:$0xff] }
 0x564   : > { %4021 = vmatpush.xpose.msra.mxu3 %v1587_v41  ;;  %3981 = vmatpush.xpose.msra.mxu1 %v1585_v52  ;;  %v1591_v41 = vld [vmem:[%s5547_s7 + $0x29f8] sm:$0xff]  ;;  %v1589_v52 = vld [vmem:[%s5547_s7 + $0x29e8] sm:$0xff] }
 0x567   : > { %4002 = vmatpush.xpose.msra.mxu2 %v1578_v53  ;;  %3962 = vmatpush.xpose.msra.mxu0 %v1576_v23  ;;  %v1582_v53 = vld [vmem:[%s5547_s7 + $0x29b0] sm:$0xff]  ;;  %v1580_v23 = vld [vmem:[%s5547_s7 + $0x29a0] sm:$0xff] }
 0x568   : > { %4022 = vmatpush.xpose.msra.mxu3 %v1579_v24  ;;  %3982 = vmatpush.xpose.msra.mxu1 %v1577_v10  ;;  %v1583_v24 = vld [vmem:[%s5547_s7 + $0x29b8] sm:$0xff]  ;;  %v1581_v10 = vld [vmem:[%s5547_s7 + $0x29a8] sm:$0xff] }
 0x56b   : > { %4003 = vmatpush.xpose.msra.mxu2 %v1570_v40  ;;  %3963 = vmatpush.xpose.msra.mxu0 %v1568_v27  ;;  %v1574_v40 = vld [vmem:[%s5547_s7 + $0x2970] sm:$0xff]  ;;  %v1572_v27 = vld [vmem:[%s5547_s7 + $0x2960] sm:$0xff] }
 0x56c   : > { %4023 = vmatpush.xpose.msra.mxu3 %v1571_v57  ;;  %3983 = vmatpush.xpose.msra.mxu1 %v1569_v39  ;;  %v1575_v57 = vld [vmem:[%s5547_s7 + $0x2978] sm:$0xff]  ;;  %v1573_v39 = vld [vmem:[%s5547_s7 + $0x2968] sm:$0xff] }
 0x56f   : > { %4004 = vmatpush.xpose.msra.mxu2 %v1562_v42  ;;  %3964 = vmatpush.xpose.msra.mxu0 %v1560_v37  ;;  %v1566_v42 = vld [vmem:[%s5547_s7 + $0x2930] sm:$0xff]  ;;  %v1564_v37 = vld [vmem:[%s5547_s7 + $0x2920] sm:$0xff] }
 0x570   : > { %4024 = vmatpush.xpose.msra.mxu3 %v1563_v45  ;;  %3984 = vmatpush.xpose.msra.mxu1 %v1561_v29  ;;  %v1567_v45 = vld [vmem:[%s5547_s7 + $0x2938] sm:$0xff]  ;;  %v1565_v29 = vld [vmem:[%s5547_s7 + $0x2928] sm:$0xff] }
 0x573   : > { %4005 = vmatpush.xpose.msra.mxu2 %v1554_v47  ;;  %3965 = vmatpush.xpose.msra.mxu0 %v1552_v2  ;;  %v1558_v47 = vld [vmem:[%s5547_s7 + $0x28f0] sm:$0xff]  ;;  %v1556_v2 = vld [vmem:[%s5547_s7 + $0x28e0] sm:$0xff] }
 0x574   : > { %4025 = vmatpush.xpose.msra.mxu3 %v1555_v36  ;;  %3985 = vmatpush.xpose.msra.mxu1 %v1553_v62  ;;  %v1559_v36 = vld [vmem:[%s5547_s7 + $0x28f8] sm:$0xff]  ;;  %v1557_v62 = vld [vmem:[%s5547_s7 + $0x28e8] sm:$0xff] }
 0x577   : > { %4006 = vmatpush.xpose.msra.mxu2 %v1546_v3  ;;  %3966 = vmatpush.xpose.msra.mxu0 %v1544_v1  ;;  %v1550_v3 = vld [vmem:[%s5547_s7 + $0x28b0] sm:$0xff]  ;;  %v1548_v1 = vld [vmem:[%s5547_s7 + $0x28a0] sm:$0xff] }
 0x578   : > { %4026 = vmatpush.xpose.msra.mxu3 %v1547_v7  ;;  %3986 = vmatpush.xpose.msra.mxu1 %v1545_v31  ;;  %v1551_v7 = vld [vmem:[%s5547_s7 + $0x28b8] sm:$0xff]  ;;  %v1549_v31 = vld [vmem:[%s5547_s7 + $0x28a8] sm:$0xff] }
 0x57b   : > { %4007 = vmatpush.xpose.msra.mxu2 %v1538_v43  ;;  %3967 = vmatpush.xpose.msra.mxu0 %v1536_v4  ;;  %v1542_v43 = vld [vmem:[%s5547_s7 + $0x2870] sm:$0xff]  ;;  %v1540_v4 = vld [vmem:[%s5547_s7 + $0x2860] sm:$0xff] }
 0x57c   : > { %4027 = vmatpush.xpose.msra.mxu3 %v1539_v13  ;;  %3987 = vmatpush.xpose.msra.mxu1 %v1537_v60  ;;  %v1543_v13 = vld [vmem:[%s5547_s7 + $0x2878] sm:$0xff]  ;;  %v1541_v60 = vld [vmem:[%s5547_s7 + $0x2868] sm:$0xff] }
 0x57f   : > { %4008 = vmatpush.xpose.msra.mxu2 %v1530_v15  ;;  %3968 = vmatpush.xpose.msra.mxu0 %v1528_v19  ;;  %v1534_v15 = vld [vmem:[%s5547_s7 + $0x2830] sm:$0xff] }
 0x580   : > { %4028 = vmatpush.xpose.msra.mxu3 %v1531_v25  ;;  %3988 = vmatpush.xpose.msra.mxu1 %v1529_v26  ;;  %v1778_v19 = vld [vmem:[%s5547_s7 + $0x2fd0] sm:$0xff]  ;;  %v1535_v25 = vld [vmem:[%s5547_s7 + $0x2838] sm:$0xff]  ;;  %v1533_v26 = vld [vmem:[%s5547_s7 + $0x2828] sm:$0xff] }
 0x582   : > { %4009 = vmatmul.f32.vlgmr.msra.gmra.mxu2 %v7056_v6  ;;  %3969 = vmatmul.f32.vlgmr.msra.gmra.mxu0 %v7060_v11  ;;  %v1637_v6 = vld [vmem:[%s5547_s7 + $0x2b68] sm:$0xff]  ;;  %v1630_v11 = vld [vmem:[%s5547_s7 + $0x2b30] sm:$0xff] }
 0x583   : > { %4073 = vmatpush.xpose.msrb.mxu2 %v1654_v22  ;;  %4033 = vmatpush.xpose.msrb.mxu0 %v1652_v63  ;;  %v1532_v22 = vld [vmem:[%s5547_s7 + $0x2820] sm:$0xff] }
 0x584   : > { %4093 = vmatpush.xpose.msrb.mxu3 %v1655_v48  ;;  %4053 = vmatpush.xpose.msrb.mxu1 %v1653_v5  ;;  %v1776_v63 = vld [vmem:[%s5547_s7 + $0x2fc0] sm:$0xff]  ;;  %v1779_v48 = vld [vmem:[%s5547_s7 + $0x2fd8] sm:$0xff]  ;;  %v1777_v5 = vld [vmem:[%s5547_s7 + $0x2fc8] sm:$0xff] }
 0x585   : > { %4029 = vmatmul.f32.vlgmr.msra.gmra.mxu3 %v7064_v17  ;;  %3989 = vmatmul.f32.vlgmr.msra.gmra.mxu1 %v7068_v8  ;;  %v1628_v17 = vld [vmem:[%s5547_s7 + $0x2b20] sm:$0xff]  ;;  %v1622_v8 = vld [vmem:[%s5547_s7 + $0x2af0] sm:$0xff] }
 0x587   : > { %4074 = vmatpush.xpose.msrb.mxu2 %v1646_v59  ;;  %4034 = vmatpush.xpose.msrb.mxu0 %v1644_v51  ;;  %v1770_v59 = vld [vmem:[%s5547_s7 + $0x2f90] sm:$0xff]  ;;  %v1768_v51 = vld [vmem:[%s5547_s7 + $0x2f80] sm:$0xff] }
 0x588   : > { %4094 = vmatpush.xpose.msrb.mxu3 %v1647_v28  ;;  %4054 = vmatpush.xpose.msrb.mxu1 %v1645_v0  ;;  %v1771_v28 = vld [vmem:[%s5547_s7 + $0x2f98] sm:$0xff] }
 0x589   : > { %v7268_v0 = vld.sshfl [vmem:[#allocation1 + $0x30] sm:$0xff pattern:$0x73625140] }
 0x58b   : > { %4075 = vmatpush.xpose.msrb.mxu2 %v1638_v12  ;;  %4035 = vmatpush.xpose.msrb.mxu0 %v1636_v30  ;;  %v1769_v12 = vld [vmem:[%s5547_s7 + $0x2f88] sm:$0xff] }
 0x58c   : > { %4095 = vmatpush.xpose.msrb.mxu3 %v1639_v35  ;;  %4055 = vmatpush.xpose.msrb.mxu1 %v1637_v6  ;;  %v7272_v30 = vld.sshfl [vmem:[#allocation1 + $0x20] sm:$0xff pattern:$0x73625140]  ;;  %v1762_v35 = vld [vmem:[%s5547_s7 + $0x2f50] sm:$0xff] }
 0x58d   : > { %v7276_v6 = vld.sshfl [vmem:[#allocation1 + $0x38] sm:$0xff pattern:$0x73625140] }
 0x58f   : > { %4076 = vmatpush.xpose.msrb.mxu2 %v1630_v11  ;;  %4036 = vmatpush.xpose.msrb.mxu0 %v1628_v17  ;;  %v1760_v11 = vld [vmem:[%s5547_s7 + $0x2f40] sm:$0xff]  ;;  %v7280_v17 = vld.sshfl [vmem:[#allocation1 + $0x28] sm:$0xff pattern:$0x73625140] }
 0x590   : > { %4096 = vmatpush.xpose.msrb.mxu3 %v1631_v56  ;;  %4056 = vmatpush.xpose.msrb.mxu1 %v1629_v55  ;;  %v1763_v56 = vld [vmem:[%s5547_s7 + $0x2f58] sm:$0xff]  ;;  %v1761_v55 = vld [vmem:[%s5547_s7 + $0x2f48] sm:$0xff] }
 0x593   : > { %4077 = vmatpush.xpose.msrb.mxu2 %v1622_v8  ;;  %4037 = vmatpush.xpose.msrb.mxu0 %v1620_v32  ;;  %v1754_v8 = vld [vmem:[%s5547_s7 + $0x2f10] sm:$0xff]  ;;  %v1752_v32 = vld [vmem:[%s5547_s7 + $0x2f00] sm:$0xff] }
 0x594   : > { %4097 = vmatpush.xpose.msrb.mxu3 %v1623_v58  ;;  %4057 = vmatpush.xpose.msrb.mxu1 %v1621_v21  ;;  %v1755_v58 = vld [vmem:[%s5547_s7 + $0x2f18] sm:$0xff]  ;;  %v1753_v21 = vld [vmem:[%s5547_s7 + $0x2f08] sm:$0xff] }
 0x597   : > { %4078 = vmatpush.xpose.msrb.mxu2 %v1614_v20  ;;  %4038 = vmatpush.xpose.msrb.mxu0 %v1612_v34  ;;  %v1746_v20 = vld [vmem:[%s5547_s7 + $0x2ed0] sm:$0xff]  ;;  %v1744_v34 = vld [vmem:[%s5547_s7 + $0x2ec0] sm:$0xff] }
 0x598   : > { %4098 = vmatpush.xpose.msrb.mxu3 %v1615_v61  ;;  %4058 = vmatpush.xpose.msrb.mxu1 %v1613_v14  ;;  %v1747_v61 = vld [vmem:[%s5547_s7 + $0x2ed8] sm:$0xff]  ;;  %v1745_v14 = vld [vmem:[%s5547_s7 + $0x2ec8] sm:$0xff] }
 0x59b   : > { %4079 = vmatpush.xpose.msrb.mxu2 %v1606_v38  ;;  %4039 = vmatpush.xpose.msrb.mxu0 %v1604_v16  ;;  %v1738_v38 = vld [vmem:[%s5547_s7 + $0x2e90] sm:$0xff]  ;;  %v1736_v16 = vld [vmem:[%s5547_s7 + $0x2e80] sm:$0xff] }
 0x59c   : > { %4099 = vmatpush.xpose.msrb.mxu3 %v1607_v9  ;;  %4059 = vmatpush.xpose.msrb.mxu1 %v1605_v44  ;;  %v1739_v9 = vld [vmem:[%s5547_s7 + $0x2e98] sm:$0xff]  ;;  %v1737_v44 = vld [vmem:[%s5547_s7 + $0x2e88] sm:$0xff] }
 0x59f   : > { %4080 = vmatpush.xpose.msrb.mxu2 %v1598_v46  ;;  %4040 = vmatpush.xpose.msrb.mxu0 %v1596_v54  ;;  %v1730_v46 = vld [vmem:[%s5547_s7 + $0x2e50] sm:$0xff]  ;;  %v1728_v54 = vld [vmem:[%s5547_s7 + $0x2e40] sm:$0xff] }
 0x5a0   : > { %4100 = vmatpush.xpose.msrb.mxu3 %v1599_v18  ;;  %4060 = vmatpush.xpose.msrb.mxu1 %v1597_v49  ;;  %v1731_v18 = vld [vmem:[%s5547_s7 + $0x2e58] sm:$0xff]  ;;  %v1729_v49 = vld [vmem:[%s5547_s7 + $0x2e48] sm:$0xff] }
 0x5a3   : > { %4081 = vmatpush.xpose.msrb.mxu2 %v1590_v33  ;;  %4041 = vmatpush.xpose.msrb.mxu0 %v1588_v50  ;;  %v1722_v33 = vld [vmem:[%s5547_s7 + $0x2e10] sm:$0xff]  ;;  %v1720_v50 = vld [vmem:[%s5547_s7 + $0x2e00] sm:$0xff] }
 0x5a4   : > { %4101 = vmatpush.xpose.msrb.mxu3 %v1591_v41  ;;  %4061 = vmatpush.xpose.msrb.mxu1 %v1589_v52  ;;  %v1723_v41 = vld [vmem:[%s5547_s7 + $0x2e18] sm:$0xff]  ;;  %v1721_v52 = vld [vmem:[%s5547_s7 + $0x2e08] sm:$0xff] }
 0x5a7   : > { %4082 = vmatpush.xpose.msrb.mxu2 %v1582_v53  ;;  %4042 = vmatpush.xpose.msrb.mxu0 %v1580_v23  ;;  %v1714_v53 = vld [vmem:[%s5547_s7 + $0x2dd0] sm:$0xff]  ;;  %v1712_v23 = vld [vmem:[%s5547_s7 + $0x2dc0] sm:$0xff] }
 0x5a8   : > { %4102 = vmatpush.xpose.msrb.mxu3 %v1583_v24  ;;  %4062 = vmatpush.xpose.msrb.mxu1 %v1581_v10  ;;  %v1715_v24 = vld [vmem:[%s5547_s7 + $0x2dd8] sm:$0xff]  ;;  %v1713_v10 = vld [vmem:[%s5547_s7 + $0x2dc8] sm:$0xff] }
 0x5ab   : > { %4083 = vmatpush.xpose.msrb.mxu2 %v1574_v40  ;;  %4043 = vmatpush.xpose.msrb.mxu0 %v1572_v27  ;;  %v1706_v40 = vld [vmem:[%s5547_s7 + $0x2d90] sm:$0xff]  ;;  %v1704_v27 = vld [vmem:[%s5547_s7 + $0x2d80] sm:$0xff] }
 0x5ac   : > { %4103 = vmatpush.xpose.msrb.mxu3 %v1575_v57  ;;  %4063 = vmatpush.xpose.msrb.mxu1 %v1573_v39  ;;  %v1707_v57 = vld [vmem:[%s5547_s7 + $0x2d98] sm:$0xff]  ;;  %v1705_v39 = vld [vmem:[%s5547_s7 + $0x2d88] sm:$0xff] }
 0x5af   : > { %4084 = vmatpush.xpose.msrb.mxu2 %v1566_v42  ;;  %4044 = vmatpush.xpose.msrb.mxu0 %v1564_v37  ;;  %v1698_v42 = vld [vmem:[%s5547_s7 + $0x2d50] sm:$0xff]  ;;  %v1696_v37 = vld [vmem:[%s5547_s7 + $0x2d40] sm:$0xff] }
 0x5b0   : > { %4104 = vmatpush.xpose.msrb.mxu3 %v1567_v45  ;;  %4064 = vmatpush.xpose.msrb.mxu1 %v1565_v29  ;;  %v1699_v45 = vld [vmem:[%s5547_s7 + $0x2d58] sm:$0xff]  ;;  %v1697_v29 = vld [vmem:[%s5547_s7 + $0x2d48] sm:$0xff] }
 0x5b3   : > { %4085 = vmatpush.xpose.msrb.mxu2 %v1558_v47  ;;  %4045 = vmatpush.xpose.msrb.mxu0 %v1556_v2  ;;  %v1690_v47 = vld [vmem:[%s5547_s7 + $0x2d10] sm:$0xff]  ;;  %v1688_v2 = vld [vmem:[%s5547_s7 + $0x2d00] sm:$0xff] }
 0x5b4   : > { %4105 = vmatpush.xpose.msrb.mxu3 %v1559_v36  ;;  %4065 = vmatpush.xpose.msrb.mxu1 %v1557_v62  ;;  %v1691_v36 = vld [vmem:[%s5547_s7 + $0x2d18] sm:$0xff]  ;;  %v1689_v62 = vld [vmem:[%s5547_s7 + $0x2d08] sm:$0xff] }
 0x5b7   : > { %4086 = vmatpush.xpose.msrb.mxu2 %v1550_v3  ;;  %4046 = vmatpush.xpose.msrb.mxu0 %v1548_v1  ;;  %v1682_v3 = vld [vmem:[%s5547_s7 + $0x2cd0] sm:$0xff]  ;;  %v1680_v1 = vld [vmem:[%s5547_s7 + $0x2cc0] sm:$0xff] }
 0x5b8   : > { %4106 = vmatpush.xpose.msrb.mxu3 %v1551_v7  ;;  %4066 = vmatpush.xpose.msrb.mxu1 %v1549_v31  ;;  %v1683_v7 = vld [vmem:[%s5547_s7 + $0x2cd8] sm:$0xff]  ;;  %v1681_v31 = vld [vmem:[%s5547_s7 + $0x2cc8] sm:$0xff] }
 0x5bb   : > { %4087 = vmatpush.xpose.msrb.mxu2 %v1542_v43  ;;  %4047 = vmatpush.xpose.msrb.mxu0 %v1540_v4  ;;  %v1674_v43 = vld [vmem:[%s5547_s7 + $0x2c90] sm:$0xff]  ;;  %v1672_v4 = vld [vmem:[%s5547_s7 + $0x2c80] sm:$0xff] }
 0x5bc   : > { %4107 = vmatpush.xpose.msrb.mxu3 %v1543_v13  ;;  %4067 = vmatpush.xpose.msrb.mxu1 %v1541_v60  ;;  %v1675_v13 = vld [vmem:[%s5547_s7 + $0x2c98] sm:$0xff]  ;;  %v1673_v60 = vld [vmem:[%s5547_s7 + $0x2c88] sm:$0xff] }
 0x5bf   : > { %4088 = vmatpush.xpose.msrb.mxu2 %v1534_v15  ;;  %4048 = vmatpush.xpose.msrb.mxu0 %v1532_v22  ;;  %v1666_v15 = vld [vmem:[%s5547_s7 + $0x2c50] sm:$0xff]  ;;  %v1667_v22 = vld [vmem:[%s5547_s7 + $0x2c58] sm:$0xff] }
 0x5c0   : > { %4108 = vmatpush.xpose.msrb.mxu3 %v1535_v25  ;;  %4068 = vmatpush.xpose.msrb.mxu1 %v1533_v26  ;;  %v1665_v25 = vld [vmem:[%s5547_s7 + $0x2c48] sm:$0xff]  ;;  %v1656_v26 = vld [vmem:[%s5547_s7 + $0x2c00] sm:$0xff] }
 0x5c2   : > { %4089 = vmatmul.f32.vlgmr.msrb.gmra.mxu2 %v7268_v0  ;;  %4049 = vmatmul.f32.vlgmr.msrb.gmra.mxu0 %v7272_v30 }
 0x5c3   : > { %4153 = vmatpush.xpose.msra.mxu2 %v1778_v19  ;;  %4113 = vmatpush.xpose.msra.mxu0 %v1776_v63  ;;  %v1664_v19 = vld [vmem:[%s5547_s7 + $0x2c40] sm:$0xff]  ;;  %v1658_v63 = vld [vmem:[%s5547_s7 + $0x2c10] sm:$0xff] }
 0x5c4   : > { %4173 = vmatpush.xpose.msra.mxu3 %v1779_v48  ;;  %4133 = vmatpush.xpose.msra.mxu1 %v1777_v5  ;;  %v1782_v48 = vld [vmem:[%s5547_s7 + $0x2ff0] sm:$0xff]  ;;  %v1659_v5 = vld [vmem:[%s5547_s7 + $0x2c18] sm:$0xff] }
 0x5c5   : > { %4109 = vmatmul.f32.vlgmr.msrb.gmra.mxu3 %v7276_v6  ;;  %4069 = vmatmul.f32.vlgmr.msrb.gmra.mxu1 %v7280_v17 }
 0x5c7   : > { %4154 = vmatpush.xpose.msra.mxu2 %v1770_v59  ;;  %4114 = vmatpush.xpose.msra.mxu0 %v1768_v51  ;;  %v1780_v59 = vld [vmem:[%s5547_s7 + $0x2fe0] sm:$0xff]  ;;  %v1783_v51 = vld [vmem:[%s5547_s7 + $0x2ff8] sm:$0xff] }
 0x5c8   : > { %4174 = vmatpush.xpose.msra.mxu3 %v1771_v28  ;;  %4134 = vmatpush.xpose.msra.mxu1 %v1769_v12  ;;  %v1657_v28 = vld [vmem:[%s5547_s7 + $0x2c08] sm:$0xff] }
 0x5c9   : > { %v1781_v12 = vld [vmem:[%s5547_s7 + $0x2fe8] sm:$0xff] }
 0x5cb   : > { %4155 = vmatpush.xpose.msra.mxu2 %v1762_v35  ;;  %4115 = vmatpush.xpose.msra.mxu0 %v1760_v11  ;;  %v1774_v35 = vld [vmem:[%s5547_s7 + $0x2fb0] sm:$0xff]  ;;  %v1772_v11 = vld [vmem:[%s5547_s7 + $0x2fa0] sm:$0xff] }
 0x5cc   : > { %4175 = vmatpush.xpose.msra.mxu3 %v1763_v56  ;;  %4135 = vmatpush.xpose.msra.mxu1 %v1761_v55  ;;  %v1775_v56 = vld [vmem:[%s5547_s7 + $0x2fb8] sm:$0xff] }
 0x5cd   : > { %v7344_v55 = vld.sshfl [vmem:[#allocation1 + $0x10] sm:$0xff pattern:$0x73625140] }
 0x5cf   : > { %4156 = vmatpush.xpose.msra.mxu2 %v1754_v8  ;;  %4116 = vmatpush.xpose.msra.mxu0 %v1752_v32  ;;  %v1773_v8 = vld [vmem:[%s5547_s7 + $0x2fa8] sm:$0xff] }
 0x5d0   : > { %4176 = vmatpush.xpose.msra.mxu3 %v1755_v58  ;;  %4136 = vmatpush.xpose.msra.mxu1 %v1753_v21  ;;  %v7348_v32 = vld.sshfl [vmem:[#allocation1] sm:$0xff pattern:$0x73625140]  ;;  %v1766_v58 = vld [vmem:[%s5547_s7 + $0x2f70] sm:$0xff] }
 0x5d1   : > { %v7352_v21 = vld.sshfl [vmem:[#allocation1 + $0x18] sm:$0xff pattern:$0x73625140] }
 0x5d3   : > { %4157 = vmatpush.xpose.msra.mxu2 %v1746_v20  ;;  %4117 = vmatpush.xpose.msra.mxu0 %v1744_v34  ;;  %v1764_v20 = vld [vmem:[%s5547_s7 + $0x2f60] sm:$0xff]  ;;  %v7356_v34 = vld.sshfl [vmem:[#allocation1 + $0x8] sm:$0xff pattern:$0x73625140] }
 0x5d4   : > { %4177 = vmatpush.xpose.msra.mxu3 %v1747_v61  ;;  %4137 = vmatpush.xpose.msra.mxu1 %v1745_v14  ;;  %v1767_v61 = vld [vmem:[%s5547_s7 + $0x2f78] sm:$0xff]  ;;  %v1765_v14 = vld [vmem:[%s5547_s7 + $0x2f68] sm:$0xff] }
 0x5d7   : > { %4158 = vmatpush.xpose.msra.mxu2 %v1738_v38  ;;  %4118 = vmatpush.xpose.msra.mxu0 %v1736_v16  ;;  %v1758_v38 = vld [vmem:[%s5547_s7 + $0x2f30] sm:$0xff]  ;;  %v1756_v16 = vld [vmem:[%s5547_s7 + $0x2f20] sm:$0xff] }
 0x5d8   : > { %4178 = vmatpush.xpose.msra.mxu3 %v1739_v9  ;;  %4138 = vmatpush.xpose.msra.mxu1 %v1737_v44  ;;  %v1759_v9 = vld [vmem:[%s5547_s7 + $0x2f38] sm:$0xff]  ;;  %v1757_v44 = vld [vmem:[%s5547_s7 + $0x2f28] sm:$0xff] }
 0x5db   : > { %4159 = vmatpush.xpose.msra.mxu2 %v1730_v46  ;;  %4119 = vmatpush.xpose.msra.mxu0 %v1728_v54  ;;  %v1750_v46 = vld [vmem:[%s5547_s7 + $0x2ef0] sm:$0xff]  ;;  %v1748_v54 = vld [vmem:[%s5547_s7 + $0x2ee0] sm:$0xff] }
 0x5dc   : > { %4179 = vmatpush.xpose.msra.mxu3 %v1731_v18  ;;  %4139 = vmatpush.xpose.msra.mxu1 %v1729_v49  ;;  %v1751_v18 = vld [vmem:[%s5547_s7 + $0x2ef8] sm:$0xff]  ;;  %v1749_v49 = vld [vmem:[%s5547_s7 + $0x2ee8] sm:$0xff] }
 0x5df   : > { %4160 = vmatpush.xpose.msra.mxu2 %v1722_v33  ;;  %4120 = vmatpush.xpose.msra.mxu0 %v1720_v50  ;;  %v1742_v33 = vld [vmem:[%s5547_s7 + $0x2eb0] sm:$0xff]  ;;  %v1740_v50 = vld [vmem:[%s5547_s7 + $0x2ea0] sm:$0xff] }
 0x5e0   : > { %4180 = vmatpush.xpose.msra.mxu3 %v1723_v41  ;;  %4140 = vmatpush.xpose.msra.mxu1 %v1721_v52  ;;  %v1743_v41 = vld [vmem:[%s5547_s7 + $0x2eb8] sm:$0xff]  ;;  %v1741_v52 = vld [vmem:[%s5547_s7 + $0x2ea8] sm:$0xff] }
 0x5e3   : > { %4161 = vmatpush.xpose.msra.mxu2 %v1714_v53  ;;  %4121 = vmatpush.xpose.msra.mxu0 %v1712_v23  ;;  %v1734_v53 = vld [vmem:[%s5547_s7 + $0x2e70] sm:$0xff]  ;;  %v1732_v23 = vld [vmem:[%s5547_s7 + $0x2e60] sm:$0xff] }
 0x5e4   : > { %4181 = vmatpush.xpose.msra.mxu3 %v1715_v24  ;;  %4141 = vmatpush.xpose.msra.mxu1 %v1713_v10  ;;  %v1735_v24 = vld [vmem:[%s5547_s7 + $0x2e78] sm:$0xff]  ;;  %v1733_v10 = vld [vmem:[%s5547_s7 + $0x2e68] sm:$0xff] }
 0x5e7   : > { %4162 = vmatpush.xpose.msra.mxu2 %v1706_v40  ;;  %4122 = vmatpush.xpose.msra.mxu0 %v1704_v27  ;;  %v1726_v40 = vld [vmem:[%s5547_s7 + $0x2e30] sm:$0xff]  ;;  %v1724_v27 = vld [vmem:[%s5547_s7 + $0x2e20] sm:$0xff] }
 0x5e8   : > { %4182 = vmatpush.xpose.msra.mxu3 %v1707_v57  ;;  %4142 = vmatpush.xpose.msra.mxu1 %v1705_v39  ;;  %v1727_v57 = vld [vmem:[%s5547_s7 + $0x2e38] sm:$0xff]  ;;  %v1725_v39 = vld [vmem:[%s5547_s7 + $0x2e28] sm:$0xff] }
 0x5eb   : > { %4163 = vmatpush.xpose.msra.mxu2 %v1698_v42  ;;  %4123 = vmatpush.xpose.msra.mxu0 %v1696_v37  ;;  %v1718_v42 = vld [vmem:[%s5547_s7 + $0x2df0] sm:$0xff]  ;;  %v1716_v37 = vld [vmem:[%s5547_s7 + $0x2de0] sm:$0xff] }
 0x5ec   : > { %4183 = vmatpush.xpose.msra.mxu3 %v1699_v45  ;;  %4143 = vmatpush.xpose.msra.mxu1 %v1697_v29  ;;  %v1719_v45 = vld [vmem:[%s5547_s7 + $0x2df8] sm:$0xff]  ;;  %v1717_v29 = vld [vmem:[%s5547_s7 + $0x2de8] sm:$0xff] }
 0x5ef   : > { %4164 = vmatpush.xpose.msra.mxu2 %v1690_v47  ;;  %4124 = vmatpush.xpose.msra.mxu0 %v1688_v2  ;;  %v1710_v47 = vld [vmem:[%s5547_s7 + $0x2db0] sm:$0xff]  ;;  %v1708_v2 = vld [vmem:[%s5547_s7 + $0x2da0] sm:$0xff] }
 0x5f0   : > { %4184 = vmatpush.xpose.msra.mxu3 %v1691_v36  ;;  %4144 = vmatpush.xpose.msra.mxu1 %v1689_v62  ;;  %v1711_v36 = vld [vmem:[%s5547_s7 + $0x2db8] sm:$0xff]  ;;  %v1709_v62 = vld [vmem:[%s5547_s7 + $0x2da8] sm:$0xff] }
 0x5f3   : > { %4165 = vmatpush.xpose.msra.mxu2 %v1682_v3  ;;  %4125 = vmatpush.xpose.msra.mxu0 %v1680_v1  ;;  %v1702_v3 = vld [vmem:[%s5547_s7 + $0x2d70] sm:$0xff]  ;;  %v1700_v1 = vld [vmem:[%s5547_s7 + $0x2d60] sm:$0xff] }
 0x5f4   : > { %4185 = vmatpush.xpose.msra.mxu3 %v1683_v7  ;;  %4145 = vmatpush.xpose.msra.mxu1 %v1681_v31  ;;  %v1703_v7 = vld [vmem:[%s5547_s7 + $0x2d78] sm:$0xff]  ;;  %v1701_v31 = vld [vmem:[%s5547_s7 + $0x2d68] sm:$0xff] }
 0x5f7   : > { %4166 = vmatpush.xpose.msra.mxu2 %v1674_v43  ;;  %4126 = vmatpush.xpose.msra.mxu0 %v1672_v4  ;;  %v1694_v43 = vld [vmem:[%s5547_s7 + $0x2d30] sm:$0xff]  ;;  %v1692_v4 = vld [vmem:[%s5547_s7 + $0x2d20] sm:$0xff] }
 0x5f8   : > { %4186 = vmatpush.xpose.msra.mxu3 %v1675_v13  ;;  %4146 = vmatpush.xpose.msra.mxu1 %v1673_v60  ;;  %v1695_v13 = vld [vmem:[%s5547_s7 + $0x2d38] sm:$0xff]  ;;  %v1693_v60 = vld [vmem:[%s5547_s7 + $0x2d28] sm:$0xff] }
 0x5fb   : > { %4167 = vmatpush.xpose.msra.mxu2 %v1666_v15  ;;  %4127 = vmatpush.xpose.msra.mxu0 %v1664_v19  ;;  %v1686_v15 = vld [vmem:[%s5547_s7 + $0x2cf0] sm:$0xff]  ;;  %v1684_v19 = vld [vmem:[%s5547_s7 + $0x2ce0] sm:$0xff] }
 0x5fc   : > { %4187 = vmatpush.xpose.msra.mxu3 %v1667_v22  ;;  %4147 = vmatpush.xpose.msra.mxu1 %v1665_v25  ;;  %v1687_v22 = vld [vmem:[%s5547_s7 + $0x2cf8] sm:$0xff]  ;;  %v1685_v25 = vld [vmem:[%s5547_s7 + $0x2ce8] sm:$0xff] }
 0x5ff   : > { %4168 = vmatpush.xpose.msra.mxu2 %v1658_v63  ;;  %4128 = vmatpush.xpose.msra.mxu0 %v1656_v26  ;;  %v1678_v63 = vld [vmem:[%s5547_s7 + $0x2cb0] sm:$0xff]  ;;  %v1679_v26 = vld [vmem:[%s5547_s7 + $0x2cb8] sm:$0xff] }
 0x600   : > { %4188 = vmatpush.xpose.msra.mxu3 %v1659_v5  ;;  %4148 = vmatpush.xpose.msra.mxu1 %v1657_v28  ;;  %v1677_v5 = vld [vmem:[%s5547_s7 + $0x2ca8] sm:$0xff]  ;;  %v1671_v28 = vld [vmem:[%s5547_s7 + $0x2c78] sm:$0xff] }
 0x602   : > { %4169 = vmatmul.f32.vlgmr.msra.gmra.mxu2 %v7344_v55  ;;  %4129 = vmatmul.f32.vlgmr.msra.gmra.mxu0 %v7348_v32 }
 0x603   : > { %4233 = vmatpush.xpose.msrb.mxu2 %v1782_v48  ;;  %4193 = vmatpush.xpose.msrb.mxu0 %v1780_v59  ;;  %v1676_v48 = vld [vmem:[%s5547_s7 + $0x2ca0] sm:$0xff]  ;;  %v1670_v59 = vld [vmem:[%s5547_s7 + $0x2c70] sm:$0xff] }
 0x604   : > { %4253 = vmatpush.xpose.msrb.mxu3 %v1783_v51  ;;  %4213 = vmatpush.xpose.msrb.mxu1 %v1781_v12  ;;  %v1668_v51 = vld [vmem:[%s5547_s7 + $0x2c60] sm:$0xff]  ;;  %v1669_v12 = vld [vmem:[%s5547_s7 + $0x2c68] sm:$0xff] }
 0x605   : > { %4189 = vmatmul.f32.vlgmr.msra.gmra.mxu3 %v7352_v21  ;;  %4149 = vmatmul.f32.vlgmr.msra.gmra.mxu1 %v7356_v34 }
 0x607   : > { %4234 = vmatpush.xpose.msrb.mxu2 %v1774_v35  ;;  %4194 = vmatpush.xpose.msrb.mxu0 %v1772_v11  ;;  %v1662_v35 = vld [vmem:[%s5547_s7 + $0x2c30] sm:$0xff] }
 0x608   : > { %4254 = vmatpush.xpose.msrb.mxu3 %v1775_v56  ;;  %4214 = vmatpush.xpose.msrb.mxu1 %v1773_v8  ;;  %v1906_v11 = vld [vmem:[%s5547_s7 + $0x33d0] sm:$0xff]  ;;  %v1660_v56 = vld [vmem:[%s5547_s7 + $0x2c20] sm:$0xff]  ;;  %v1663_v8 = vld [vmem:[%s5547_s7 + $0x2c38] sm:$0xff] }
 0x60b   : > { %4235 = vmatpush.xpose.msrb.mxu2 %v1766_v58  ;;  %4195 = vmatpush.xpose.msrb.mxu0 %v1764_v20  ;;  %v1904_v58 = vld [vmem:[%s5547_s7 + $0x33c0] sm:$0xff]  ;;  %v1907_v20 = vld [vmem:[%s5547_s7 + $0x33d8] sm:$0xff] }
 0x60c   : > { %4255 = vmatpush.xpose.msrb.mxu3 %v1767_v61  ;;  %4215 = vmatpush.xpose.msrb.mxu1 %v1765_v14  ;;  %v1661_v61 = vld [vmem:[%s5547_s7 + $0x2c28] sm:$0xff] }
 0x60d   : > { %v1905_v14 = vld [vmem:[%s5547_s7 + $0x33c8] sm:$0xff] }
 0x60f   : > { %4236 = vmatpush.xpose.msrb.mxu2 %v1758_v38  ;;  %4196 = vmatpush.xpose.msrb.mxu0 %v1756_v16  ;;  %v1898_v38 = vld [vmem:[%s5547_s7 + $0x3390] sm:$0xff]  ;;  %v1896_v16 = vld [vmem:[%s5547_s7 + $0x3380] sm:$0xff] }
 0x610   : > { %4256 = vmatpush.xpose.msrb.mxu3 %v1759_v9  ;;  %4216 = vmatpush.xpose.msrb.mxu1 %v1757_v44  ;;  %v1899_v9 = vld [vmem:[%s5547_s7 + $0x3398] sm:$0xff]  ;;  %v1897_v44 = vld [vmem:[%s5547_s7 + $0x3388] sm:$0xff] }
 0x613   : > { %4237 = vmatpush.xpose.msrb.mxu2 %v1750_v46  ;;  %4197 = vmatpush.xpose.msrb.mxu0 %v1748_v54  ;;  %v1888_v46 = vld [vmem:[%s5547_s7 + $0x3340] sm:$0xff]  ;;  %v1891_v54 = vld [vmem:[%s5547_s7 + $0x3358] sm:$0xff] }
 0x614   : > { %4257 = vmatpush.xpose.msrb.mxu3 %v1751_v18  ;;  %4217 = vmatpush.xpose.msrb.mxu1 %v1749_v49  ;;  %v1880_v18 = vld [vmem:[%s5547_s7 + $0x3300] sm:$0xff]  ;;  %v1883_v49 = vld [vmem:[%s5547_s7 + $0x3318] sm:$0xff] }
 0x617   : > { %4238 = vmatpush.xpose.msrb.mxu2 %v1742_v33  ;;  %4198 = vmatpush.xpose.msrb.mxu0 %v1740_v50  ;;  %v1874_v33 = vld [vmem:[%s5547_s7 + $0x32d0] sm:$0xff]  ;;  %v1872_v50 = vld [vmem:[%s5547_s7 + $0x32c0] sm:$0xff] }
 0x618   : > { %4258 = vmatpush.xpose.msrb.mxu3 %v1743_v41  ;;  %4218 = vmatpush.xpose.msrb.mxu1 %v1741_v52  ;;  %v1875_v41 = vld [vmem:[%s5547_s7 + $0x32d8] sm:$0xff]  ;;  %v1873_v52 = vld [vmem:[%s5547_s7 + $0x32c8] sm:$0xff] }
 0x61b   : > { %4239 = vmatpush.xpose.msrb.mxu2 %v1734_v53  ;;  %4199 = vmatpush.xpose.msrb.mxu0 %v1732_v23  ;;  %v1866_v53 = vld [vmem:[%s5547_s7 + $0x3290] sm:$0xff]  ;;  %v1864_v23 = vld [vmem:[%s5547_s7 + $0x3280] sm:$0xff] }
 0x61c   : > { %4259 = vmatpush.xpose.msrb.mxu3 %v1735_v24  ;;  %4219 = vmatpush.xpose.msrb.mxu1 %v1733_v10  ;;  %v1867_v24 = vld [vmem:[%s5547_s7 + $0x3298] sm:$0xff]  ;;  %v1865_v10 = vld [vmem:[%s5547_s7 + $0x3288] sm:$0xff] }
 0x61f   : > { %4240 = vmatpush.xpose.msrb.mxu2 %v1726_v40  ;;  %4200 = vmatpush.xpose.msrb.mxu0 %v1724_v27  ;;  %v1858_v40 = vld [vmem:[%s5547_s7 + $0x3250] sm:$0xff]  ;;  %v1856_v27 = vld [vmem:[%s5547_s7 + $0x3240] sm:$0xff] }
 0x620   : > { %4260 = vmatpush.xpose.msrb.mxu3 %v1727_v57  ;;  %4220 = vmatpush.xpose.msrb.mxu1 %v1725_v39  ;;  %v1859_v57 = vld [vmem:[%s5547_s7 + $0x3258] sm:$0xff]  ;;  %v1857_v39 = vld [vmem:[%s5547_s7 + $0x3248] sm:$0xff] }
 0x623   : > { %4241 = vmatpush.xpose.msrb.mxu2 %v1718_v42  ;;  %4201 = vmatpush.xpose.msrb.mxu0 %v1716_v37  ;;  %v1850_v42 = vld [vmem:[%s5547_s7 + $0x3210] sm:$0xff]  ;;  %v1848_v37 = vld [vmem:[%s5547_s7 + $0x3200] sm:$0xff] }
 0x624   : > { %4261 = vmatpush.xpose.msrb.mxu3 %v1719_v45  ;;  %4221 = vmatpush.xpose.msrb.mxu1 %v1717_v29  ;;  %v1851_v45 = vld [vmem:[%s5547_s7 + $0x3218] sm:$0xff]  ;;  %v1849_v29 = vld [vmem:[%s5547_s7 + $0x3208] sm:$0xff] }
 0x627   : > { %4242 = vmatpush.xpose.msrb.mxu2 %v1710_v47  ;;  %4202 = vmatpush.xpose.msrb.mxu0 %v1708_v2  ;;  %v1842_v47 = vld [vmem:[%s5547_s7 + $0x31d0] sm:$0xff]  ;;  %v1840_v2 = vld [vmem:[%s5547_s7 + $0x31c0] sm:$0xff] }
 0x628   : > { %4262 = vmatpush.xpose.msrb.mxu3 %v1711_v36  ;;  %4222 = vmatpush.xpose.msrb.mxu1 %v1709_v62  ;;  %v1843_v36 = vld [vmem:[%s5547_s7 + $0x31d8] sm:$0xff]  ;;  %v1841_v62 = vld [vmem:[%s5547_s7 + $0x31c8] sm:$0xff] }
 0x62b   : > { %4243 = vmatpush.xpose.msrb.mxu2 %v1702_v3  ;;  %4203 = vmatpush.xpose.msrb.mxu0 %v1700_v1  ;;  %v1834_v3 = vld [vmem:[%s5547_s7 + $0x3190] sm:$0xff]  ;;  %v1832_v1 = vld [vmem:[%s5547_s7 + $0x3180] sm:$0xff] }
 0x62c   : > { %4263 = vmatpush.xpose.msrb.mxu3 %v1703_v7  ;;  %4223 = vmatpush.xpose.msrb.mxu1 %v1701_v31  ;;  %v1835_v7 = vld [vmem:[%s5547_s7 + $0x3198] sm:$0xff]  ;;  %v1833_v31 = vld [vmem:[%s5547_s7 + $0x3188] sm:$0xff] }
 0x62f   : > { %4244 = vmatpush.xpose.msrb.mxu2 %v1694_v43  ;;  %4204 = vmatpush.xpose.msrb.mxu0 %v1692_v4  ;;  %v1826_v43 = vld [vmem:[%s5547_s7 + $0x3150] sm:$0xff]  ;;  %v1824_v4 = vld [vmem:[%s5547_s7 + $0x3140] sm:$0xff] }
 0x630   : > { %4264 = vmatpush.xpose.msrb.mxu3 %v1695_v13  ;;  %4224 = vmatpush.xpose.msrb.mxu1 %v1693_v60  ;;  %v1827_v13 = vld [vmem:[%s5547_s7 + $0x3158] sm:$0xff]  ;;  %v1825_v60 = vld [vmem:[%s5547_s7 + $0x3148] sm:$0xff] }
 0x633   : > { %4245 = vmatpush.xpose.msrb.mxu2 %v1686_v15  ;;  %4205 = vmatpush.xpose.msrb.mxu0 %v1684_v19  ;;  %v1818_v15 = vld [vmem:[%s5547_s7 + $0x3110] sm:$0xff]  ;;  %v1816_v19 = vld [vmem:[%s5547_s7 + $0x3100] sm:$0xff] }
 0x634   : > { %4265 = vmatpush.xpose.msrb.mxu3 %v1687_v22  ;;  %4225 = vmatpush.xpose.msrb.mxu1 %v1685_v25  ;;  %v1819_v22 = vld [vmem:[%s5547_s7 + $0x3118] sm:$0xff]  ;;  %v1817_v25 = vld [vmem:[%s5547_s7 + $0x3108] sm:$0xff] }
 0x637   : > { %4246 = vmatpush.xpose.msrb.mxu2 %v1678_v63  ;;  %4206 = vmatpush.xpose.msrb.mxu0 %v1676_v48  ;;  %v1810_v63 = vld [vmem:[%s5547_s7 + $0x30d0] sm:$0xff]  ;;  %v1808_v48 = vld [vmem:[%s5547_s7 + $0x30c0] sm:$0xff] }
 0x638   : > { %4266 = vmatpush.xpose.msrb.mxu3 %v1679_v26  ;;  %4226 = vmatpush.xpose.msrb.mxu1 %v1677_v5  ;;  %v1811_v26 = vld [vmem:[%s5547_s7 + $0x30d8] sm:$0xff]  ;;  %v1809_v5 = vld [vmem:[%s5547_s7 + $0x30c8] sm:$0xff] }
 0x63b   : > { %4247 = vmatpush.xpose.msrb.mxu2 %v1670_v59  ;;  %4207 = vmatpush.xpose.msrb.mxu0 %v1668_v51  ;;  %v1802_v59 = vld [vmem:[%s5547_s7 + $0x3090] sm:$0xff]  ;;  %v1800_v51 = vld [vmem:[%s5547_s7 + $0x3080] sm:$0xff] }
 0x63c   : > { %4267 = vmatpush.xpose.msrb.mxu3 %v1671_v28  ;;  %4227 = vmatpush.xpose.msrb.mxu1 %v1669_v12  ;;  %v1803_v28 = vld [vmem:[%s5547_s7 + $0x3098] sm:$0xff]  ;;  %v1801_v12 = vld [vmem:[%s5547_s7 + $0x3088] sm:$0xff] }
 0x63f   : > { %4248 = vmatpush.xpose.msrb.mxu2 %v1662_v35  ;;  %4208 = vmatpush.xpose.msrb.mxu0 %v1660_v56  ;;  %v1794_v35 = vld [vmem:[%s5547_s7 + $0x3050] sm:$0xff]  ;;  %v1795_v56 = vld [vmem:[%s5547_s7 + $0x3058] sm:$0xff] }
 0x640   : > { %4268 = vmatpush.xpose.msrb.mxu3 %v1663_v8  ;;  %4228 = vmatpush.xpose.msrb.mxu1 %v1661_v61  ;;  %v7476_v8 = vpop.f32.mrf.mxu0  ;;  %v1784_v61 = vld [vmem:[%s5547_s7 + $0x3000] sm:$0xff] }
 0x642   : > { %4249 = vmatmul.f32.vlgmr.msrb.gmra.mxu2 %v7268_v0  ;;  %4209 = vmatmul.f32.vlgmr.msrb.gmra.mxu0 %v7272_v30  ;;  %v1890_v0 = vld [vmem:[%s5547_s7 + $0x3350] sm:$0xff]  ;;  %v1889_v30 = vld [vmem:[%s5547_s7 + $0x3348] sm:$0xff] }
 0x643   : > { %4313 = vmatpush.xpose.msra.mxu2 %v1906_v11  ;;  %4273 = vmatpush.xpose.msra.mxu0 %v1904_v58  ;;  %v1792_v11 = vld [vmem:[%s5547_s7 + $0x3040] sm:$0xff]  ;;  %v1793_v58 = vld [vmem:[%s5547_s7 + $0x3048] sm:$0xff] }
 0x644   : > { %4333 = vmatpush.xpose.msra.mxu3 %v1907_v20  ;;  %4293 = vmatpush.xpose.msra.mxu1 %v1905_v14  ;;  %v1786_v20 = vld [vmem:[%s5547_s7 + $0x3010] sm:$0xff] }
 0x645   : > { %4269 = vmatmul.f32.vlgmr.msrb.gmra.mxu3 %v7276_v6  ;;  %4229 = vmatmul.f32.vlgmr.msrb.gmra.mxu1 %v7280_v17  ;;  %v1882_v6 = vld [vmem:[%s5547_s7 + $0x3310] sm:$0xff]  ;;  %v1881_v17 = vld [vmem:[%s5547_s7 + $0x3308] sm:$0xff] }
 0x646   : > { %v1910_v14 = vld [vmem:[%s5547_s7 + $0x33f0] sm:$0xff] }
 0x647   : > { %4314 = vmatpush.xpose.msra.mxu2 %v1898_v38  ;;  %4274 = vmatpush.xpose.msra.mxu0 %v1896_v16  ;;  %v1787_v38 = vld [vmem:[%s5547_s7 + $0x3018] sm:$0xff]  ;;  %v7483_v16 = vpop.f32.mrf.mxu1 }
 0x648   : > { %4334 = vmatpush.xpose.msra.mxu3 %v1899_v9  ;;  %4294 = vmatpush.xpose.msra.mxu1 %v1897_v44  ;;  %v1908_v9 = vld [vmem:[%s5547_s7 + $0x33e0] sm:$0xff]  ;;  %v1911_v44 = vld [vmem:[%s5547_s7 + $0x33f8] sm:$0xff] }
 0x64b   : > { %4315 = vmatpush.xpose.msra.mxu2 %v1890_v0  ;;  %4275 = vmatpush.xpose.msra.mxu0 %v1888_v46  ;;  %v1785_v0 = vld [vmem:[%s5547_s7 + $0x3008] sm:$0xff] }
 0x64c   : > { %4335 = vmatpush.xpose.msra.mxu3 %v1891_v54  ;;  %4295 = vmatpush.xpose.msra.mxu1 %v1889_v30  ;;  %v1909_v46 = vld [vmem:[%s5547_s7 + $0x33e8] sm:$0xff]  ;;  %v1902_v54 = vld [vmem:[%s5547_s7 + $0x33b0] sm:$0xff]  ;;  %v7490_v30 = vpop.f32.mrf.mxu2 }
 0x64f   : > { %4316 = vmatpush.xpose.msra.mxu2 %v1882_v6  ;;  %4276 = vmatpush.xpose.msra.mxu0 %v1880_v18  ;;  %v1900_v6 = vld [vmem:[%s5547_s7 + $0x33a0] sm:$0xff]  ;;  %v1903_v18 = vld [vmem:[%s5547_s7 + $0x33b8] sm:$0xff] }
 0x650   : > { %4336 = vmatpush.xpose.msra.mxu3 %v1883_v49  ;;  %4296 = vmatpush.xpose.msra.mxu1 %v1881_v17  ;;  %v7496_v49 = vpop.f32.mrf.mxu0  ;;  %v1901_v17 = vld [vmem:[%s5547_s7 + $0x33a8] sm:$0xff] }
 0x653   : > { %4317 = vmatpush.xpose.msra.mxu2 %v1874_v33  ;;  %4277 = vmatpush.xpose.msra.mxu0 %v1872_v50  ;;  %v1894_v33 = vld [vmem:[%s5547_s7 + $0x3370] sm:$0xff]  ;;  %v7501_v50 = vpop.f32.mrf.mxu3 }
 0x654   : > { %4337 = vmatpush.xpose.msra.mxu3 %v1875_v41  ;;  %4297 = vmatpush.xpose.msra.mxu1 %v1873_v52  ;;  %v1892_v41 = vld [vmem:[%s5547_s7 + $0x3360] sm:$0xff]  ;;  %v1893_v52 = vld [vmem:[%s5547_s7 + $0x3368] sm:$0xff] }
 0x657   : > { %4318 = vmatpush.xpose.msra.mxu2 %v1866_v53  ;;  %4278 = vmatpush.xpose.msra.mxu0 %v1864_v23  ;;  %v1884_v53 = vld [vmem:[%s5547_s7 + $0x3320] sm:$0xff]  ;;  %v1887_v23 = vld [vmem:[%s5547_s7 + $0x3338] sm:$0xff] }
 0x658   : > { %4338 = vmatpush.xpose.msra.mxu3 %v1867_v24  ;;  %4298 = vmatpush.xpose.msra.mxu1 %v1865_v10  ;;  %v7512_v24 = vpop.f32.mrf.mxu2  ;;  %v7514_v10 = vpop.f32.mrf.mxu0 }
 0x65b   : > { %4319 = vmatpush.xpose.msra.mxu2 %v1858_v40  ;;  %4279 = vmatpush.xpose.msra.mxu0 %v1856_v27  ;;  %v1878_v40 = vld [vmem:[%s5547_s7 + $0x32f0] sm:$0xff]  ;;  %v1876_v27 = vld [vmem:[%s5547_s7 + $0x32e0] sm:$0xff] }
 0x65c   : > { %4339 = vmatpush.xpose.msra.mxu3 %v1859_v57  ;;  %4299 = vmatpush.xpose.msra.mxu1 %v1857_v39  ;;  %v1879_v57 = vld [vmem:[%s5547_s7 + $0x32f8] sm:$0xff]  ;;  %v7520_v39 = vpop.f32.mrf.mxu3 }
 0x65f   : > { %4320 = vmatpush.xpose.msra.mxu2 %v1850_v42  ;;  %4280 = vmatpush.xpose.msra.mxu0 %v1848_v37  ;;  %v1877_v37 = vld [vmem:[%s5547_s7 + $0x32e8] sm:$0xff] }
 0x660   : > { %4340 = vmatpush.xpose.msra.mxu3 %v1851_v45  ;;  %4300 = vmatpush.xpose.msra.mxu1 %v1849_v29  ;;  %v1870_v45 = vld [vmem:[%s5547_s7 + $0x32b0] sm:$0xff]  ;;  %v1868_v29 = vld [vmem:[%s5547_s7 + $0x32a0] sm:$0xff] }
 0x663   : > { %4321 = vmatpush.xpose.msra.mxu2 %v1842_v47  ;;  %4281 = vmatpush.xpose.msra.mxu0 %v1840_v2  ;;  %v1871_v47 = vld [vmem:[%s5547_s7 + $0x32b8] sm:$0xff]  ;;  %v7528_v2 = vpop.f32.mrf.mxu2 }
 0x664   : > { %4341 = vmatpush.xpose.msra.mxu3 %v1843_v36  ;;  %4301 = vmatpush.xpose.msra.mxu1 %v1841_v62  ;;  %v1869_v36 = vld [vmem:[%s5547_s7 + $0x32a8] sm:$0xff]  ;;  %v1862_v62 = vld [vmem:[%s5547_s7 + $0x3270] sm:$0xff] }
 0x667   : > { %4322 = vmatpush.xpose.msra.mxu2 %v1834_v3  ;;  %4282 = vmatpush.xpose.msra.mxu0 %v1832_v1  ;;  %v7532_v3 = vpop.f32.mrf.mxu0  ;;  %v1860_v1 = vld [vmem:[%s5547_s7 + $0x3260] sm:$0xff] }
 0x668   : > { %4342 = vmatpush.xpose.msra.mxu3 %v1835_v7  ;;  %4302 = vmatpush.xpose.msra.mxu1 %v1833_v31  ;;  %v1863_v7 = vld [vmem:[%s5547_s7 + $0x3278] sm:$0xff]  ;;  %v7536_v31 = vpop.f32.mrf.mxu3 }
 0x66b   : > { %4323 = vmatpush.xpose.msra.mxu2 %v1826_v43  ;;  %4283 = vmatpush.xpose.msra.mxu0 %v1824_v4  ;;  %v1861_v43 = vld [vmem:[%s5547_s7 + $0x3268] sm:$0xff]  ;;  %v1854_v4 = vld [vmem:[%s5547_s7 + $0x3230] sm:$0xff] }
 0x66c   : > { %4343 = vmatpush.xpose.msra.mxu3 %v1827_v13  ;;  %4303 = vmatpush.xpose.msra.mxu1 %v1825_v60  ;;  %v1852_v60 = vld [vmem:[%s5547_s7 + $0x3220] sm:$0xff] }
 0x66f   : > { %4324 = vmatpush.xpose.msra.mxu2 %v1818_v15  ;;  %4284 = vmatpush.xpose.msra.mxu0 %v1816_v19  ;;  %v1855_v15 = vld [vmem:[%s5547_s7 + $0x3238] sm:$0xff]  ;;  %v1853_v19 = vld [vmem:[%s5547_s7 + $0x3228] sm:$0xff] }
 0x670   : > { %4344 = vmatpush.xpose.msra.mxu3 %v1819_v22  ;;  %4304 = vmatpush.xpose.msra.mxu1 %v1817_v25  ;;  %v1846_v22 = vld [vmem:[%s5547_s7 + $0x31f0] sm:$0xff]  ;;  %v7546_v25 = vpop.f32.mrf.mxu2 }
 0x673   : > { %4325 = vmatpush.xpose.msra.mxu2 %v1810_v63  ;;  %4285 = vmatpush.xpose.msra.mxu0 %v1808_v48  ;;  %v3970_v63 = vpop.f32.mrf.mxu0  ;;  %v1844_v48 = vld [vmem:[%s5547_s7 + $0x31e0] sm:$0xff] }
 0x674   : > { %4345 = vmatpush.xpose.msra.mxu3 %v1811_v26  ;;  %4305 = vmatpush.xpose.msra.mxu1 %v1809_v5  ;;  %v1847_v26 = vld [vmem:[%s5547_s7 + $0x31f8] sm:$0xff]  ;;  %v1845_v5 = vld [vmem:[%s5547_s7 + $0x31e8] sm:$0xff] }
 0x677   : > { %4326 = vmatpush.xpose.msra.mxu2 %v1802_v59  ;;  %4286 = vmatpush.xpose.msra.mxu0 %v1800_v51  ;;  %v1838_v59 = vld [vmem:[%s5547_s7 + $0x31b0] sm:$0xff]  ;;  %v7552_v51 = vpop.f32.mrf.mxu3 }
 0x678   : > { %4346 = vmatpush.xpose.msra.mxu3 %v1803_v28  ;;  %4306 = vmatpush.xpose.msra.mxu1 %v1801_v12  ;;  %v1836_v12 = vld [vmem:[%s5547_s7 + $0x31a0] sm:$0xff] }
 0x67b   : > { %4327 = vmatpush.xpose.msra.mxu2 %v1794_v35  ;;  %4287 = vmatpush.xpose.msra.mxu0 %v1792_v11  ;;  %v1839_v35 = vld [vmem:[%s5547_s7 + $0x31b8] sm:$0xff]  ;;  %v1837_v11 = vld [vmem:[%s5547_s7 + $0x31a8] sm:$0xff] }
 0x67c   : > { %4347 = vmatpush.xpose.msra.mxu3 %v1795_v56  ;;  %4307 = vmatpush.xpose.msra.mxu1 %v1793_v58  ;;  %v2297_v56 = vld [vmem:[%s6270_s23 + $0x8] sm:$0xff]  ;;  %v1830_v58 = vld [vmem:[%s5547_s7 + $0x3170] sm:$0xff] }
 0x67f   : > { %4328 = vmatpush.xpose.msra.mxu2 %v1786_v20  ;;  %4288 = vmatpush.xpose.msra.mxu0 %v1784_v61  ;;  %v2309_v20 = vperm.slane %v2297_v56, 1  ;;  %v4010_v61 = vpop.f32.mrf.mxu2 }
 0x680   : > { %4348 = vmatpush.xpose.msra.mxu3 %v1787_v38  ;;  %4308 = vmatpush.xpose.msra.mxu1 %v1785_v0  ;;  %v1831_v38 = vld [vmem:[%s5547_s7 + $0x3178] sm:$0xff]  ;;  %v1829_v0 = vld [vmem:[%s5547_s7 + $0x3168] sm:$0xff] }
 0x682   : > { %4329 = vmatmul.f32.vlgmr.msra.gmra.mxu2 %v7344_v55  ;;  %4289 = vmatmul.f32.vlgmr.msra.gmra.mxu0 %v7348_v32  ;;  %v1895_v55 = vld [vmem:[%s5547_s7 + $0x3378] sm:$0xff]  ;;  %v7506_v32 = vpop.f32.mrf.mxu1 }
 0x683   : > { %4393 = vmatpush.xpose.msrb.mxu2 %v1910_v14  ;;  %4353 = vmatpush.xpose.msrb.mxu0 %v1908_v9  ;;  %v1828_v14 = vld [vmem:[%s5547_s7 + $0x3160] sm:$0xff]  ;;  %v2310_v9 = vperm.slane %v2297_v56, 2 }
 0x684   : > { %4413 = vmatpush.xpose.msrb.mxu3 %v1911_v44  ;;  %4373 = vmatpush.xpose.msrb.mxu1 %v1909_v46  ;;  %v7561_v44 = vpop.f32.mrf.mxu0  ;;  %v1822_v46 = vld [vmem:[%s5547_s7 + $0x3130] sm:$0xff] }
 0x685   : > { %4349 = vmatmul.f32.vlgmr.msra.gmra.mxu3 %v7352_v21  ;;  %4309 = vmatmul.f32.vlgmr.msra.gmra.mxu1 %v7356_v34  ;;  %v1886_v21 = vld [vmem:[%s5547_s7 + $0x3330] sm:$0xff]  ;;  %v1885_v34 = vld [vmem:[%s5547_s7 + $0x3328] sm:$0xff] }
 0x687   : > { %4394 = vmatpush.xpose.msrb.mxu2 %v1902_v54  ;;  %4354 = vmatpush.xpose.msrb.mxu0 %v1900_v6  ;;  %v3811_v54 = vadd.f32 %v7514_v10, %v2309_v20  ;;  %v4030_v6 = vpop.f32.mrf.mxu3  ;;  %v1815_v10 = vld [vmem:[%s5547_s7 + $0x30f8] sm:$0xff]  ;;  %v1789_v20 = vld [vmem:[%s5547_s7 + $0x3028] sm:$0xff] }
 0x688   : > { %4414 = vmatpush.xpose.msrb.mxu3 %v1903_v18  ;;  %4374 = vmatpush.xpose.msrb.mxu1 %v1901_v17  ;;  %v1820_v18 = vld [vmem:[%s5547_s7 + $0x3120] sm:$0xff]  ;;  %v1823_v17 = vld [vmem:[%s5547_s7 + $0x3138] sm:$0xff] }
 0x68a   : > { %v7522_v42 = vpop.f32.mrf.mxu1 }
 0x68b   : > { %4395 = vmatpush.xpose.msrb.mxu2 %v1894_v33  ;;  %4355 = vmatpush.xpose.msrb.mxu0 %v1892_v41  ;;  %v2308_v33 = vperm.slane %v2297_v56, 0  ;;  %v3971_v41 = vadd.f32 %v3970_v63, %v2310_v9  ;;  %v2024_v9 = vld [vmem:[%s5547_s7 + $0x3780] sm:$0xff] }
 0x68c   : > { %4415 = vmatpush.xpose.msrb.mxu3 %v1895_v55  ;;  %4375 = vmatpush.xpose.msrb.mxu1 %v1893_v52  ;;  %v1821_v52 = vld [vmem:[%s5547_s7 + $0x3128] sm:$0xff] }
 0x68f   : > { %4396 = vmatpush.xpose.msrb.mxu2 %v1886_v21  ;;  %4356 = vmatpush.xpose.msrb.mxu0 %v1884_v53  ;;  %v1814_v21 = vld [vmem:[%s5547_s7 + $0x30f0] sm:$0xff]  ;;  %v3831_v53 = vadd.f32 %v7522_v42, %v3811_v54  ;;  %v7610_v54 = vld.sshfl [vmem:[#allocation1 + $0x30] sm:$0xff pattern:$0x73625140] }
 0x690   : > { %4416 = vmatpush.xpose.msrb.mxu3 %v1887_v23  ;;  %4376 = vmatpush.xpose.msrb.mxu1 %v1885_v34  ;;  %v1812_v23 = vld [vmem:[%s5547_s7 + $0x30e0] sm:$0xff]  ;;  %v2311_v34 = vperm.slane %v2297_v56, 3 }
 0x691   : > { %v3851_v42 = vadd.f32 %v7528_v2, %v3831_v53  ;;  %v2019_v53 = vld [vmem:[%s5547_s7 + $0x3758] sm:$0xff] }
 0x692   : > { %v7540_v13 = vpop.f32.mrf.mxu1 }
 0x693   : > { %4397 = vmatpush.xpose.msrb.mxu2 %v1878_v40  ;;  %4357 = vmatpush.xpose.msrb.mxu0 %v1876_v27  ;;  %v3651_v40 = vadd.f32 %v7476_v8, %v2308_v33  ;;  %v3871_v2 = vadd.f32 %v7536_v31, %v3851_v42  ;;  %v7619_v33 = vld.sshfl [vmem:[#allocation1 + $0x38] sm:$0xff pattern:$0x73625140]  ;;  %v2011_v42 = vld [vmem:[%s5547_s7 + $0x3718] sm:$0xff] }
 0x694   : > { %4417 = vmatpush.xpose.msrb.mxu3 %v1879_v57  ;;  %4377 = vmatpush.xpose.msrb.mxu1 %v1877_v37  ;;  %v7576_v57 = vpop.f32.mrf.mxu2  ;;  %v1813_v37 = vld [vmem:[%s5547_s7 + $0x30e8] sm:$0xff] }
 0x695   : > { %v3671_v8 = vadd.f32 %v7483_v16, %v3651_v40  ;;  %v3891_v31 = vadd.f32 %v7532_v3, %v3871_v2  ;;  %v2033_v3 = vld [vmem:[%s5547_s7 + $0x37c8] sm:$0xff] }
 0x697   : > { %4398 = vmatpush.xpose.msrb.mxu2 %v1870_v45  ;;  %4358 = vmatpush.xpose.msrb.mxu0 %v1868_v29  ;;  %v4130_v45 = vpop.f32.mrf.mxu0  ;;  %v1806_v29 = vld [vmem:[%s5547_s7 + $0x30b0] sm:$0xff] }
 0x698   : > { %4418 = vmatpush.xpose.msrb.mxu3 %v1871_v47  ;;  %4378 = vmatpush.xpose.msrb.mxu1 %v1869_v36  ;;  %v1804_v47 = vld [vmem:[%s5547_s7 + $0x30a0] sm:$0xff]  ;;  %v1807_v36 = vld [vmem:[%s5547_s7 + $0x30b8] sm:$0xff] }
 0x69a   : > { %v3990_v28 = vpop.f32.mrf.mxu1 }
 0x69b   : > { %4399 = vmatpush.xpose.msrb.mxu2 %v1862_v62  ;;  %4359 = vmatpush.xpose.msrb.mxu0 %v1860_v1  ;;  %v3991_v27 = vadd.f32 %v3990_v28, %v3971_v41  ;;  %v4131_v62 = vadd.f32 %v4130_v45, %v2311_v34  ;;  %v1788_v28 = vld [vmem:[%s5547_s7 + $0x3020] sm:$0xff] }
 0x69c   : > { %4419 = vmatpush.xpose.msrb.mxu3 %v1863_v7  ;;  %4379 = vmatpush.xpose.msrb.mxu1 %v1861_v43  ;;  %v7584_v7 = vpop.f32.mrf.mxu3  ;;  %v1805_v43 = vld [vmem:[%s5547_s7 + $0x30a8] sm:$0xff]  ;;  %v2008_v45 = vld [vmem:[%s5547_s7 + $0x3700] sm:$0xff] }
 0x69d   : > { %v4011_v1 = vadd.f32 %v4010_v61, %v3991_v27  ;;  %v2010_v27 = vld [vmem:[%s5547_s7 + $0x3710] sm:$0xff] }
 0x69f   : > { %4400 = vmatpush.xpose.msrb.mxu2 %v1854_v4  ;;  %4360 = vmatpush.xpose.msrb.mxu0 %v1852_v60  ;;  %v1798_v60 = vld [vmem:[%s5547_s7 + $0x3070] sm:$0xff]  ;;  %v4031_v63 = vadd.f32 %v4030_v6, %v4011_v1  ;;  %v7614_v6 = vld.sshfl [vmem:[#allocation1 + $0x20] sm:$0xff pattern:$0x73625140]  ;;  %v2000_v1 = vld [vmem:[%s5547_s7 + $0x36c0] sm:$0xff] }
 0x6a0   : > { %4420 = vmatpush.xpose.msrb.mxu3 %v1855_v15  ;;  %4380 = vmatpush.xpose.msrb.mxu1 %v1853_v19  ;;  %v1796_v15 = vld [vmem:[%s5547_s7 + $0x3060] sm:$0xff]  ;;  %v1799_v19 = vld [vmem:[%s5547_s7 + $0x3078] sm:$0xff] }
 0x6a1   : > { %v4051_v56 = vadd.f32 %v7561_v44, %v4031_v63  ;;  %v1993_v63 = vld [vmem:[%s5547_s7 + $0x3688] sm:$0xff] }
 0x6a2   : > { %v7568_v55 = vpop.f32.mrf.mxu1 }
 0x6a3   : > { %4401 = vmatpush.xpose.msrb.mxu2 %v1846_v22  ;;  %4361 = vmatpush.xpose.msrb.mxu0 %v1844_v48  ;;  %v3691_v22 = vadd.f32 %v7490_v30, %v3671_v8  ;;  %v1797_v48 = vld [vmem:[%s5547_s7 + $0x3068] sm:$0xff]  ;;  %v2002_v8 = vld [vmem:[%s5547_s7 + $0x36d0] sm:$0xff] }
 0x6a4   : > { %4421 = vmatpush.xpose.msrb.mxu3 %v1847_v26  ;;  %4381 = vmatpush.xpose.msrb.mxu1 %v1845_v5  ;;  %v4170_v26 = vpop.f32.mrf.mxu2  ;;  %v1790_v5 = vld [vmem:[%s5547_s7 + $0x3030] sm:$0xff]  ;;  %v4190_v61 = vpop.f32.mrf.mxu3 }
 0x6a5   : > { %v3711_v30 = vadd.f32 %v7501_v50, %v3691_v22  ;;  %v1995_v22 = vld [vmem:[%s5547_s7 + $0x3698] sm:$0xff] }
 0x6a7   : > { %4402 = vmatpush.xpose.msrb.mxu2 %v1838_v59  ;;  %4362 = vmatpush.xpose.msrb.mxu0 %v1836_v12  ;;  %v2034_v59 = vld [vmem:[%s5547_s7 + $0x37d0] sm:$0xff]  ;;  %v1791_v12 = vld [vmem:[%s5547_s7 + $0x3038] sm:$0xff]  ;;  %v3731_v44 = vadd.f32 %v7496_v49, %v3711_v30  ;;  %v1968_v30 = vld [vmem:[%s5547_s7 + $0x35c0] sm:$0xff] }
 0x6a8   : > { %4422 = vmatpush.xpose.msrb.mxu3 %v1839_v35  ;;  %4382 = vmatpush.xpose.msrb.mxu1 %v1837_v11  ;;  %v2032_v35 = vld [vmem:[%s5547_s7 + $0x37c0] sm:$0xff] }
 0x6aa   : > { %v4150_v4 = vpop.f32.mrf.mxu1 }
 0x6ab   : > { %4403 = vmatpush.xpose.msrb.mxu2 %v1830_v58  ;;  %4363 = vmatpush.xpose.msrb.mxu0 %v1828_v14  ;;  %v4151_v16 = vadd.f32 %v4150_v4, %v4131_v62  ;;  %v2035_v58 = vld [vmem:[%s5547_s7 + $0x37d8] sm:$0xff]  ;;  %v3911_v14 = vadd.f32 %v7540_v13, %v3891_v31  ;;  %v2025_v13 = vld [vmem:[%s5547_s7 + $0x3788] sm:$0xff] }
 0x6ac   : > { %4423 = vmatpush.xpose.msrb.mxu3 %v1831_v38  ;;  %4383 = vmatpush.xpose.msrb.mxu1 %v1829_v0  ;;  %v2026_v38 = vld [vmem:[%s5547_s7 + $0x3790] sm:$0xff]  ;;  %v4071_v0 = vadd.f32 %v7568_v55, %v4051_v56  ;;  %v2016_v55 = vld [vmem:[%s5547_s7 + $0x3740] sm:$0xff]  ;;  %v2003_v4 = vld [vmem:[%s5547_s7 + $0x36d8] sm:$0xff] }
 0x6ad   : > { %v4171_v11 = vadd.f32 %v4170_v26, %v4151_v16  ;;  %v1992_v16 = vld [vmem:[%s5547_s7 + $0x3680] sm:$0xff]  ;;  %v1985_v31 = vld [vmem:[%s5547_s7 + $0x3648] sm:$0xff]  ;;  %v1971_v56 = vld [vmem:[%s5547_s7 + $0x35d8] sm:$0xff] }
 0x6ae   : > { %v1984_v26 = vld [vmem:[%s5547_s7 + $0x3640] sm:$0xff] }
 0x6af   : > { %4404 = vmatpush.xpose.msrb.mxu2 %v1822_v46  ;;  %4364 = vmatpush.xpose.msrb.mxu0 %v1820_v18  ;;  %v4191_v50 = vadd.f32 %v4190_v61, %v4171_v11  ;;  %v2027_v46 = vld [vmem:[%s5547_s7 + $0x3798] sm:$0xff]  ;;  %v3931_v18 = vadd.f32 %v7546_v25, %v3911_v14  ;;  %v4091_v25 = vadd.f32 %v7576_v57, %v4071_v0  ;;  %v1970_v11 = vld [vmem:[%s5547_s7 + $0x35d0] sm:$0xff]  ;;  %v1960_v61 = vld [vmem:[%s5547_s7 + $0x3580] sm:$0xff] }
 0x6b0   : > { %4424 = vmatpush.xpose.msrb.mxu3 %v1823_v17  ;;  %4384 = vmatpush.xpose.msrb.mxu1 %v1821_v52  ;;  %v2018_v17 = vld [vmem:[%s5547_s7 + $0x3750] sm:$0xff]  ;;  %v1961_v14 = vld [vmem:[%s5547_s7 + $0x3588] sm:$0xff] }
 0x6b1   : > { %v7623_v52 = vld.sshfl [vmem:[#allocation1 + $0x28] sm:$0xff pattern:$0x73625140]  ;;  %v3951_v34 = vadd.f32 %v7552_v51, %v3931_v18  ;;  %v4111_v57 = vadd.f32 %v7584_v7, %v4091_v25  ;;  %v2009_v51 = vld [vmem:[%s5547_s7 + $0x3708] sm:$0xff]  ;;  %v1928_v25 = vld [vmem:[%s5547_s7 + $0x3480] sm:$0xff] }
 0x6b2   : > { %v1946_v0 = vld [vmem:[%s5547_s7 + $0x3510] sm:$0xff]  ;;  %v1945_v18 = vld [vmem:[%s5547_s7 + $0x3508] sm:$0xff] }
 0x6b3   : > { %4405 = vmatpush.xpose.msrb.mxu2 %v1814_v21  ;;  %4365 = vmatpush.xpose.msrb.mxu0 %v1812_v23  ;;  %v3751_v21 = vadd.f32 %v7506_v32, %v3731_v44  ;;  %v4936_v7 = vrot.slane %v4111_v57, 4  ;;  %v1953_v44 = vld [vmem:[%s5547_s7 + $0x3548] sm:$0xff]  ;;  %v1915_v57 = vld [vmem:[%s5547_s7 + $0x3418] sm:$0xff] }
 0x6b4   : > { %4425 = vmatpush.xpose.msrb.mxu3 %v1815_v10  ;;  %4385 = vmatpush.xpose.msrb.mxu1 %v1813_v37  ;;  %v2017_v10 = vld [vmem:[%s5547_s7 + $0x3748] sm:$0xff] }
 0x6b5   : > { %v3771_v32 = vadd.f32 %v7512_v24, %v3751_v21  ;;  %v1930_v21 = vld [vmem:[%s5547_s7 + $0x3490] sm:$0xff] }
 0x6b7   : > { %4406 = vmatpush.xpose.msrb.mxu2 %v1806_v29  ;;  %4366 = vmatpush.xpose.msrb.mxu0 %v1804_v47  ;;  %v3791_v24 = vadd.f32 %v7520_v39, %v3771_v32  ;;  %v1912_v32 = vld [vmem:[%s5547_s7 + $0x3400] sm:$0xff] }
 0x6b8   : > { %4426 = vmatpush.xpose.msrb.mxu3 %v1807_v36  ;;  %4386 = vmatpush.xpose.msrb.mxu1 %v1805_v43  ;;  %v4935_v36 = vrot.slane %v3951_v34, 6  ;;  %v1920_v34 = vld [vmem:[%s5547_s7 + $0x3440] sm:$0xff] }
 0x6ba   : > { %v4950_v2 = vsel %vm4941_vm0, %v3791_v24, %v4935_v36  ;;  %v2030_v36 = vld [vmem:[%s5547_s7 + $0x37b0] sm:$0xff]  ;;  %v2029_v24 = vld [vmem:[%s5547_s7 + $0x37a8] sm:$0xff] }
 0x6bb   : > { %4407 = vmatpush.xpose.msrb.mxu2 %v1798_v60  ;;  %4367 = vmatpush.xpose.msrb.mxu0 %v1796_v15  ;;  %v2001_v60 = vld [vmem:[%s5547_s7 + $0x36c8] sm:$0xff] }
 0x6bc   : > { %4427 = vmatpush.xpose.msrb.mxu3 %v1799_v19  ;;  %4387 = vmatpush.xpose.msrb.mxu1 %v1797_v48  ;;  %v1994_v19 = vld [vmem:[%s5547_s7 + $0x3690] sm:$0xff] }
 0x6bd   : > { %v1986_v48 = vld [vmem:[%s5547_s7 + $0x3650] sm:$0xff] }
 0x6bf   : > { %4408 = vmatpush.xpose.msrb.mxu2 %v1790_v5  ;;  %4368 = vmatpush.xpose.msrb.mxu0 %v1788_v28  ;;  %v4210_v49 = vpop.f32.mrf.mxu0  ;;  %v1987_v5 = vld [vmem:[%s5547_s7 + $0x3658] sm:$0xff]  ;;  %v1976_v28 = vld [vmem:[%s5547_s7 + $0x3600] sm:$0xff] }
 0x6c0   : > { %4428 = vmatpush.xpose.msrb.mxu3 %v1791_v12  ;;  %4388 = vmatpush.xpose.msrb.mxu1 %v1789_v20  ;;  %v4211_v41 = vadd.f32 %v4210_v49, %v4191_v50  ;;  %v1979_v12 = vld [vmem:[%s5547_s7 + $0x3618] sm:$0xff]  ;;  %v1962_v20 = vld [vmem:[%s5547_s7 + $0x3590] sm:$0xff]  ;;  %v1952_v50 = vld [vmem:[%s5547_s7 + $0x3540] sm:$0xff] }
 0x6c1   : > { %v1938_v49 = vld [vmem:[%s5547_s7 + $0x34d0] sm:$0xff] }
 0x6c2   : > { %4409 = vmatmul.f32.vlgmr.msrb.gmra.mxu2 %v7610_v54  ;;  %4369 = vmatmul.f32.vlgmr.msrb.gmra.mxu0 %v7614_v6  ;;  %v4230_v23 = vpop.f32.mrf.mxu1 }
 0x6c3   : > { %4473 = vmatpush.xpose.msra.mxu2 %v2034_v59  ;;  %4433 = vmatpush.xpose.msra.mxu0 %v2032_v35  ;;  %v4231_v40 = vadd.f32 %v4230_v23, %v4211_v41  ;;  %v1978_v59 = vld [vmem:[%s5547_s7 + $0x3610] sm:$0xff]  ;;  %v1977_v35 = vld [vmem:[%s5547_s7 + $0x3608] sm:$0xff]  ;;  %v1939_v41 = vld [vmem:[%s5547_s7 + $0x34d8] sm:$0xff] }
 0x6c4   : > { %4493 = vmatpush.xpose.msra.mxu3 %v2035_v58  ;;  %4453 = vmatpush.xpose.msra.mxu1 %v2033_v3  ;;  %v1969_v58 = vld [vmem:[%s5547_s7 + $0x35c8] sm:$0xff]  ;;  %v1963_v3 = vld [vmem:[%s5547_s7 + $0x3598] sm:$0xff] }
 0x6c5   : > { %4429 = vmatmul.f32.vlgmr.msrb.gmra.mxu3 %v7619_v33  ;;  %4389 = vmatmul.f32.vlgmr.msrb.gmra.mxu1 %v7623_v52  ;;  %v4250_v37 = vpop.f32.mrf.mxu2  ;;  %v1929_v23 = vld [vmem:[%s5547_s7 + $0x3488] sm:$0xff] }
 0x6c6   : > { %v4251_v29 = vadd.f32 %v4250_v37, %v4231_v40  ;;  %v1923_v40 = vld [vmem:[%s5547_s7 + $0x3458] sm:$0xff]  ;;  %v1914_v37 = vld [vmem:[%s5547_s7 + $0x3410] sm:$0xff] }
 0x6c7   : > { %4474 = vmatpush.xpose.msra.mxu2 %v2026_v38  ;;  %4434 = vmatpush.xpose.msra.mxu0 %v2024_v9  ;;  %v1954_v38 = vld [vmem:[%s5547_s7 + $0x3550] sm:$0xff]  ;;  %v1955_v9 = vld [vmem:[%s5547_s7 + $0x3558] sm:$0xff] }
 0x6c8   : > { %4494 = vmatpush.xpose.msra.mxu3 %v2027_v46  ;;  %4454 = vmatpush.xpose.msra.mxu1 %v2025_v13  ;;  %v4270_v47 = vpop.f32.mrf.mxu3  ;;  %v1944_v46 = vld [vmem:[%s5547_s7 + $0x3500] sm:$0xff]  ;;  %v1947_v13 = vld [vmem:[%s5547_s7 + $0x3518] sm:$0xff] }
 0x6c9   : > { %v4271_v62 = vadd.f32 %v4270_v47, %v4251_v29  ;;  %v2036_v29 = vld [vmem:[%s5547_s7 + $0x37e0] sm:$0xff]  ;;  %v1913_v47 = vld [vmem:[%s5547_s7 + $0x3408] sm:$0xff] }
 0x6cb   : > { %4475 = vmatpush.xpose.msra.mxu2 %v2018_v17  ;;  %4435 = vmatpush.xpose.msra.mxu0 %v2016_v55  ;;  %v4937_v43 = vrot.slane %v4271_v62, 2  ;;  %v1936_v17 = vld [vmem:[%s5547_s7 + $0x34c0] sm:$0xff]  ;;  %v1937_v55 = vld [vmem:[%s5547_s7 + $0x34c8] sm:$0xff] }
 0x6cc   : > { %4495 = vmatpush.xpose.msra.mxu3 %v2019_v53  ;;  %4455 = vmatpush.xpose.msra.mxu1 %v2017_v10  ;;  %v1931_v53 = vld [vmem:[%s5547_s7 + $0x3498] sm:$0xff]  ;;  %v1922_v10 = vld [vmem:[%s5547_s7 + $0x3450] sm:$0xff]  ;;  %v2028_v62 = vld [vmem:[%s5547_s7 + $0x37a0] sm:$0xff] }
 0x6cd   : > { %v4951_v15 = vsel %vm4943_vm1, %v4936_v7, %v4937_v43  ;;  %v7701_v7 = vld.sshfl [vmem:[#allocation1] sm:$0xff pattern:$0x73625140]  ;;  %v2022_v43 = vld [vmem:[%s5547_s7 + $0x3770] sm:$0xff] }
 0x6ce   : > { %v4952_v39 = vsel %vm4945_vm2, %v4950_v2, %v4951_v15  ;;  %v7709_v2 = vld.sshfl [vmem:[#allocation1 + $0x8] sm:$0xff pattern:$0x73625140]  ;;  %v2023_v15 = vld [vmem:[%s5547_s7 + $0x3778] sm:$0xff] }
 0x6cf   : > { %4476 = vmatpush.xpose.msra.mxu2 %v2010_v27  ;;  %4436 = vmatpush.xpose.msra.mxu0 %v2008_v45  ;;  %4962 = vst [vmem:[%s6363_s10 + $0x10] sm:$0xff] %v4952_v39  ;;  %v1921_v27 = vld [vmem:[%s5547_s7 + $0x3448] sm:$0xff]  ;;  %v2038_v45 = vld [vmem:[%s5547_s7 + $0x37f0] sm:$0xff] }
 0x6d0   : > { %4496 = vmatpush.xpose.msra.mxu3 %v2011_v42  ;;  %4456 = vmatpush.xpose.msra.mxu1 %v2009_v51  ;;  %v2039_v42 = vld [vmem:[%s5547_s7 + $0x37f8] sm:$0xff]  ;;  %v2037_v51 = vld [vmem:[%s5547_s7 + $0x37e8] sm:$0xff]  ;;  %v2014_v39 = vld [vmem:[%s5547_s7 + $0x3730] sm:$0xff] }
 0x6d3   : > { %4477 = vmatpush.xpose.msra.mxu2 %v2002_v8  ;;  %4437 = vmatpush.xpose.msra.mxu0 %v2000_v1  ;;  %v2031_v8 = vld [vmem:[%s5547_s7 + $0x37b8] sm:$0xff] }
 0x6d4   : > { %4497 = vmatpush.xpose.msra.mxu3 %v2003_v4  ;;  %4457 = vmatpush.xpose.msra.mxu1 %v2001_v60  ;;  %v7697_v1 = vld.sshfl [vmem:[#allocation1 + $0x10] sm:$0xff pattern:$0x73625140]  ;;  %v7705_v4 = vld.sshfl [vmem:[#allocation1 + $0x18] sm:$0xff pattern:$0x73625140] }
 0x6d5   : > { %v2020_v60 = vld [vmem:[%s5547_s7 + $0x3760] sm:$0xff] }
 0x6d7   : > { %4478 = vmatpush.xpose.msra.mxu2 %v1994_v19  ;;  %4438 = vmatpush.xpose.msra.mxu0 %v1992_v16  ;;  %v2021_v19 = vld [vmem:[%s5547_s7 + $0x3768] sm:$0xff]  ;;  %v2012_v16 = vld [vmem:[%s5547_s7 + $0x3720] sm:$0xff] }
 0x6d8   : > { %4498 = vmatpush.xpose.msra.mxu3 %v1995_v22  ;;  %4458 = vmatpush.xpose.msra.mxu1 %v1993_v63  ;;  %v2015_v22 = vld [vmem:[%s5547_s7 + $0x3738] sm:$0xff]  ;;  %v2013_v63 = vld [vmem:[%s5547_s7 + $0x3728] sm:$0xff] }
 0x6db   : > { %4479 = vmatpush.xpose.msra.mxu2 %v1986_v48  ;;  %4439 = vmatpush.xpose.msra.mxu0 %v1984_v26  ;;  %v2006_v48 = vld [vmem:[%s5547_s7 + $0x36f0] sm:$0xff]  ;;  %v2004_v26 = vld [vmem:[%s5547_s7 + $0x36e0] sm:$0xff] }
 0x6dc   : > { %4499 = vmatpush.xpose.msra.mxu3 %v1987_v5  ;;  %4459 = vmatpush.xpose.msra.mxu1 %v1985_v31  ;;  %v2007_v5 = vld [vmem:[%s5547_s7 + $0x36f8] sm:$0xff]  ;;  %v2005_v31 = vld [vmem:[%s5547_s7 + $0x36e8] sm:$0xff] }
 0x6df   : > { %4480 = vmatpush.xpose.msra.mxu2 %v1978_v59  ;;  %4440 = vmatpush.xpose.msra.mxu0 %v1976_v28  ;;  %v1998_v59 = vld [vmem:[%s5547_s7 + $0x36b0] sm:$0xff]  ;;  %v1996_v28 = vld [vmem:[%s5547_s7 + $0x36a0] sm:$0xff] }
 0x6e0   : > { %4500 = vmatpush.xpose.msra.mxu3 %v1979_v12  ;;  %4460 = vmatpush.xpose.msra.mxu1 %v1977_v35  ;;  %v1999_v12 = vld [vmem:[%s5547_s7 + $0x36b8] sm:$0xff]  ;;  %v1997_v35 = vld [vmem:[%s5547_s7 + $0x36a8] sm:$0xff] }
 0x6e3   : > { %4481 = vmatpush.xpose.msra.mxu2 %v1970_v11  ;;  %4441 = vmatpush.xpose.msra.mxu0 %v1968_v30  ;;  %v1990_v11 = vld [vmem:[%s5547_s7 + $0x3670] sm:$0xff]  ;;  %v1988_v30 = vld [vmem:[%s5547_s7 + $0x3660] sm:$0xff] }
 0x6e4   : > { %4501 = vmatpush.xpose.msra.mxu3 %v1971_v56  ;;  %4461 = vmatpush.xpose.msra.mxu1 %v1969_v58  ;;  %v1991_v56 = vld [vmem:[%s5547_s7 + $0x3678] sm:$0xff]  ;;  %v1989_v58 = vld [vmem:[%s5547_s7 + $0x3668] sm:$0xff] }
 0x6e7   : > { %4482 = vmatpush.xpose.msra.mxu2 %v1962_v20  ;;  %4442 = vmatpush.xpose.msra.mxu0 %v1960_v61  ;;  %v1982_v20 = vld [vmem:[%s5547_s7 + $0x3630] sm:$0xff]  ;;  %v1980_v61 = vld [vmem:[%s5547_s7 + $0x3620] sm:$0xff] }
 0x6e8   : > { %4502 = vmatpush.xpose.msra.mxu3 %v1963_v3  ;;  %4462 = vmatpush.xpose.msra.mxu1 %v1961_v14  ;;  %v1983_v3 = vld [vmem:[%s5547_s7 + $0x3638] sm:$0xff]  ;;  %v1981_v14 = vld [vmem:[%s5547_s7 + $0x3628] sm:$0xff] }
 0x6eb   : > { %4483 = vmatpush.xpose.msra.mxu2 %v1954_v38  ;;  %4443 = vmatpush.xpose.msra.mxu0 %v1952_v50  ;;  %v1974_v38 = vld [vmem:[%s5547_s7 + $0x35f0] sm:$0xff]  ;;  %v1972_v50 = vld [vmem:[%s5547_s7 + $0x35e0] sm:$0xff] }
 0x6ec   : > { %4503 = vmatpush.xpose.msra.mxu3 %v1955_v9  ;;  %4463 = vmatpush.xpose.msra.mxu1 %v1953_v44  ;;  %v1975_v9 = vld [vmem:[%s5547_s7 + $0x35f8] sm:$0xff]  ;;  %v1973_v44 = vld [vmem:[%s5547_s7 + $0x35e8] sm:$0xff] }
 0x6ef   : > { %4484 = vmatpush.xpose.msra.mxu2 %v1946_v0  ;;  %4444 = vmatpush.xpose.msra.mxu0 %v1944_v46  ;;  %v1966_v0 = vld [vmem:[%s5547_s7 + $0x35b0] sm:$0xff]  ;;  %v1964_v46 = vld [vmem:[%s5547_s7 + $0x35a0] sm:$0xff] }
 0x6f0   : > { %4504 = vmatpush.xpose.msra.mxu3 %v1947_v13  ;;  %4464 = vmatpush.xpose.msra.mxu1 %v1945_v18  ;;  %v1967_v13 = vld [vmem:[%s5547_s7 + $0x35b8] sm:$0xff]  ;;  %v1965_v18 = vld [vmem:[%s5547_s7 + $0x35a8] sm:$0xff] }
 0x6f3   : > { %4485 = vmatpush.xpose.msra.mxu2 %v1938_v49  ;;  %4445 = vmatpush.xpose.msra.mxu0 %v1936_v17  ;;  %v1958_v49 = vld [vmem:[%s5547_s7 + $0x3570] sm:$0xff]  ;;  %v1956_v17 = vld [vmem:[%s5547_s7 + $0x3560] sm:$0xff] }
 0x6f4   : > { %4505 = vmatpush.xpose.msra.mxu3 %v1939_v41  ;;  %4465 = vmatpush.xpose.msra.mxu1 %v1937_v55  ;;  %v1959_v41 = vld [vmem:[%s5547_s7 + $0x3578] sm:$0xff]  ;;  %v1957_v55 = vld [vmem:[%s5547_s7 + $0x3568] sm:$0xff] }
 0x6f7   : > { %4486 = vmatpush.xpose.msra.mxu2 %v1930_v21  ;;  %4446 = vmatpush.xpose.msra.mxu0 %v1928_v25  ;;  %v1950_v21 = vld [vmem:[%s5547_s7 + $0x3530] sm:$0xff]  ;;  %v1948_v25 = vld [vmem:[%s5547_s7 + $0x3520] sm:$0xff] }
 0x6f8   : > { %4506 = vmatpush.xpose.msra.mxu3 %v1931_v53  ;;  %4466 = vmatpush.xpose.msra.mxu1 %v1929_v23  ;;  %v1951_v53 = vld [vmem:[%s5547_s7 + $0x3538] sm:$0xff]  ;;  %v1949_v23 = vld [vmem:[%s5547_s7 + $0x3528] sm:$0xff] }
 0x6fb   : > { %4487 = vmatpush.xpose.msra.mxu2 %v1922_v10  ;;  %4447 = vmatpush.xpose.msra.mxu0 %v1920_v34  ;;  %v1942_v10 = vld [vmem:[%s5547_s7 + $0x34f0] sm:$0xff]  ;;  %v1940_v34 = vld [vmem:[%s5547_s7 + $0x34e0] sm:$0xff] }
 0x6fc   : > { %4507 = vmatpush.xpose.msra.mxu3 %v1923_v40  ;;  %4467 = vmatpush.xpose.msra.mxu1 %v1921_v27  ;;  %v1943_v40 = vld [vmem:[%s5547_s7 + $0x34f8] sm:$0xff]  ;;  %v1941_v27 = vld [vmem:[%s5547_s7 + $0x34e8] sm:$0xff] }
 0x6ff   : > { %4488 = vmatpush.xpose.msra.mxu2 %v1914_v37  ;;  %4448 = vmatpush.xpose.msra.mxu0 %v1912_v32  ;;  %v1934_v37 = vld [vmem:[%s5547_s7 + $0x34b0] sm:$0xff]  ;;  %v1935_v32 = vld [vmem:[%s5547_s7 + $0x34b8] sm:$0xff] }
 0x700   : > { %4508 = vmatpush.xpose.msra.mxu3 %v1915_v57  ;;  %4468 = vmatpush.xpose.msra.mxu1 %v1913_v47  ;;  %v1933_v57 = vld [vmem:[%s5547_s7 + $0x34a8] sm:$0xff]  ;;  %v1927_v47 = vld [vmem:[%s5547_s7 + $0x3478] sm:$0xff] }
 0x702   : > { %4489 = vmatmul.f32.vlgmr.msra.gmra.mxu2 %v7697_v1  ;;  %4449 = vmatmul.f32.vlgmr.msra.gmra.mxu0 %v7701_v7 }
 0x703   : > { %4553 = vmatpush.xpose.msrb.mxu2 %v2038_v45  ;;  %4513 = vmatpush.xpose.msrb.mxu0 %v2036_v29  ;;  %v1932_v45 = vld [vmem:[%s5547_s7 + $0x34a0] sm:$0xff]  ;;  %v1926_v29 = vld [vmem:[%s5547_s7 + $0x3470] sm:$0xff] }
 0x704   : > { %4573 = vmatpush.xpose.msrb.mxu3 %v2039_v42  ;;  %4533 = vmatpush.xpose.msrb.mxu1 %v2037_v51  ;;  %v1924_v42 = vld [vmem:[%s5547_s7 + $0x3460] sm:$0xff]  ;;  %v1925_v51 = vld [vmem:[%s5547_s7 + $0x3468] sm:$0xff] }
 0x705   : > { %4509 = vmatmul.f32.vlgmr.msra.gmra.mxu3 %v7705_v4  ;;  %4469 = vmatmul.f32.vlgmr.msra.gmra.mxu1 %v7709_v2 }
 0x707   : > { %4554 = vmatpush.xpose.msrb.mxu2 %v2030_v36  ;;  %4514 = vmatpush.xpose.msrb.mxu0 %v2028_v62  ;;  %v1918_v36 = vld [vmem:[%s5547_s7 + $0x3430] sm:$0xff] }
 0x708   : > { %4574 = vmatpush.xpose.msrb.mxu3 %v2031_v8  ;;  %4534 = vmatpush.xpose.msrb.mxu1 %v2029_v24  ;;  %v2162_v62 = vld [vmem:[%s5547_s7 + $0x3bd0] sm:$0xff]  ;;  %v1916_v8 = vld [vmem:[%s5547_s7 + $0x3420] sm:$0xff]  ;;  %v1919_v24 = vld [vmem:[%s5547_s7 + $0x3438] sm:$0xff] }
 0x70b   : > { %4555 = vmatpush.xpose.msrb.mxu2 %v2022_v43  ;;  %4515 = vmatpush.xpose.msrb.mxu0 %v2020_v60  ;;  %v2160_v43 = vld [vmem:[%s5547_s7 + $0x3bc0] sm:$0xff]  ;;  %v2163_v60 = vld [vmem:[%s5547_s7 + $0x3bd8] sm:$0xff] }
 0x70c   : > { %4575 = vmatpush.xpose.msrb.mxu3 %v2023_v15  ;;  %4535 = vmatpush.xpose.msrb.mxu1 %v2021_v19  ;;  %v1917_v15 = vld [vmem:[%s5547_s7 + $0x3428] sm:$0xff] }
 0x70d   : > { %v2161_v19 = vld [vmem:[%s5547_s7 + $0x3bc8] sm:$0xff] }
 0x70f   : > { %4556 = vmatpush.xpose.msrb.mxu2 %v2014_v39  ;;  %4516 = vmatpush.xpose.msrb.mxu0 %v2012_v16  ;;  %v2154_v39 = vld [vmem:[%s5547_s7 + $0x3b90] sm:$0xff]  ;;  %v2152_v16 = vld [vmem:[%s5547_s7 + $0x3b80] sm:$0xff] }
 0x710   : > { %4576 = vmatpush.xpose.msrb.mxu3 %v2015_v22  ;;  %4536 = vmatpush.xpose.msrb.mxu1 %v2013_v63  ;;  %v2155_v22 = vld [vmem:[%s5547_s7 + $0x3b98] sm:$0xff]  ;;  %v2153_v63 = vld [vmem:[%s5547_s7 + $0x3b88] sm:$0xff] }
 0x713   : > { %4557 = vmatpush.xpose.msrb.mxu2 %v2006_v48  ;;  %4517 = vmatpush.xpose.msrb.mxu0 %v2004_v26  ;;  %v2144_v48 = vld [vmem:[%s5547_s7 + $0x3b40] sm:$0xff]  ;;  %v2147_v26 = vld [vmem:[%s5547_s7 + $0x3b58] sm:$0xff] }
 0x714   : > { %4577 = vmatpush.xpose.msrb.mxu3 %v2007_v5  ;;  %4537 = vmatpush.xpose.msrb.mxu1 %v2005_v31  ;;  %v2136_v5 = vld [vmem:[%s5547_s7 + $0x3b00] sm:$0xff]  ;;  %v2139_v31 = vld [vmem:[%s5547_s7 + $0x3b18] sm:$0xff] }
 0x717   : > { %4558 = vmatpush.xpose.msrb.mxu2 %v1998_v59  ;;  %4518 = vmatpush.xpose.msrb.mxu0 %v1996_v28  ;;  %v2130_v59 = vld [vmem:[%s5547_s7 + $0x3ad0] sm:$0xff]  ;;  %v2128_v28 = vld [vmem:[%s5547_s7 + $0x3ac0] sm:$0xff] }
 0x718   : > { %4578 = vmatpush.xpose.msrb.mxu3 %v1999_v12  ;;  %4538 = vmatpush.xpose.msrb.mxu1 %v1997_v35  ;;  %v2131_v12 = vld [vmem:[%s5547_s7 + $0x3ad8] sm:$0xff]  ;;  %v2129_v35 = vld [vmem:[%s5547_s7 + $0x3ac8] sm:$0xff] }
 0x71b   : > { %4559 = vmatpush.xpose.msrb.mxu2 %v1990_v11  ;;  %4519 = vmatpush.xpose.msrb.mxu0 %v1988_v30  ;;  %v2122_v11 = vld [vmem:[%s5547_s7 + $0x3a90] sm:$0xff]  ;;  %v2120_v30 = vld [vmem:[%s5547_s7 + $0x3a80] sm:$0xff] }
 0x71c   : > { %4579 = vmatpush.xpose.msrb.mxu3 %v1991_v56  ;;  %4539 = vmatpush.xpose.msrb.mxu1 %v1989_v58  ;;  %v2123_v56 = vld [vmem:[%s5547_s7 + $0x3a98] sm:$0xff]  ;;  %v2121_v58 = vld [vmem:[%s5547_s7 + $0x3a88] sm:$0xff] }
 0x71f   : > { %4560 = vmatpush.xpose.msrb.mxu2 %v1982_v20  ;;  %4520 = vmatpush.xpose.msrb.mxu0 %v1980_v61  ;;  %v2114_v20 = vld [vmem:[%s5547_s7 + $0x3a50] sm:$0xff]  ;;  %v2112_v61 = vld [vmem:[%s5547_s7 + $0x3a40] sm:$0xff] }
 0x720   : > { %4580 = vmatpush.xpose.msrb.mxu3 %v1983_v3  ;;  %4540 = vmatpush.xpose.msrb.mxu1 %v1981_v14  ;;  %v2115_v3 = vld [vmem:[%s5547_s7 + $0x3a58] sm:$0xff]  ;;  %v2113_v14 = vld [vmem:[%s5547_s7 + $0x3a48] sm:$0xff] }
 0x723   : > { %4561 = vmatpush.xpose.msrb.mxu2 %v1974_v38  ;;  %4521 = vmatpush.xpose.msrb.mxu0 %v1972_v50  ;;  %v2106_v38 = vld [vmem:[%s5547_s7 + $0x3a10] sm:$0xff]  ;;  %v2104_v50 = vld [vmem:[%s5547_s7 + $0x3a00] sm:$0xff] }
 0x724   : > { %4581 = vmatpush.xpose.msrb.mxu3 %v1975_v9  ;;  %4541 = vmatpush.xpose.msrb.mxu1 %v1973_v44  ;;  %v2107_v9 = vld [vmem:[%s5547_s7 + $0x3a18] sm:$0xff]  ;;  %v2105_v44 = vld [vmem:[%s5547_s7 + $0x3a08] sm:$0xff] }
 0x727   : > { %4562 = vmatpush.xpose.msrb.mxu2 %v1966_v0  ;;  %4522 = vmatpush.xpose.msrb.mxu0 %v1964_v46  ;;  %v2098_v0 = vld [vmem:[%s5547_s7 + $0x39d0] sm:$0xff]  ;;  %v2096_v46 = vld [vmem:[%s5547_s7 + $0x39c0] sm:$0xff] }
 0x728   : > { %4582 = vmatpush.xpose.msrb.mxu3 %v1967_v13  ;;  %4542 = vmatpush.xpose.msrb.mxu1 %v1965_v18  ;;  %v2099_v13 = vld [vmem:[%s5547_s7 + $0x39d8] sm:$0xff]  ;;  %v2097_v18 = vld [vmem:[%s5547_s7 + $0x39c8] sm:$0xff] }
 0x72b   : > { %4563 = vmatpush.xpose.msrb.mxu2 %v1958_v49  ;;  %4523 = vmatpush.xpose.msrb.mxu0 %v1956_v17  ;;  %v2090_v49 = vld [vmem:[%s5547_s7 + $0x3990] sm:$0xff]  ;;  %v2088_v17 = vld [vmem:[%s5547_s7 + $0x3980] sm:$0xff] }
 0x72c   : > { %4583 = vmatpush.xpose.msrb.mxu3 %v1959_v41  ;;  %4543 = vmatpush.xpose.msrb.mxu1 %v1957_v55  ;;  %v2091_v41 = vld [vmem:[%s5547_s7 + $0x3998] sm:$0xff]  ;;  %v2089_v55 = vld [vmem:[%s5547_s7 + $0x3988] sm:$0xff] }
 0x72f   : > { %4564 = vmatpush.xpose.msrb.mxu2 %v1950_v21  ;;  %4524 = vmatpush.xpose.msrb.mxu0 %v1948_v25  ;;  %v2082_v21 = vld [vmem:[%s5547_s7 + $0x3950] sm:$0xff]  ;;  %v2080_v25 = vld [vmem:[%s5547_s7 + $0x3940] sm:$0xff] }
 0x730   : > { %4584 = vmatpush.xpose.msrb.mxu3 %v1951_v53  ;;  %4544 = vmatpush.xpose.msrb.mxu1 %v1949_v23  ;;  %v2083_v53 = vld [vmem:[%s5547_s7 + $0x3958] sm:$0xff]  ;;  %v2081_v23 = vld [vmem:[%s5547_s7 + $0x3948] sm:$0xff] }
 0x733   : > { %4565 = vmatpush.xpose.msrb.mxu2 %v1942_v10  ;;  %4525 = vmatpush.xpose.msrb.mxu0 %v1940_v34  ;;  %v2074_v10 = vld [vmem:[%s5547_s7 + $0x3910] sm:$0xff]  ;;  %v2072_v34 = vld [vmem:[%s5547_s7 + $0x3900] sm:$0xff] }
 0x734   : > { %4585 = vmatpush.xpose.msrb.mxu3 %v1943_v40  ;;  %4545 = vmatpush.xpose.msrb.mxu1 %v1941_v27  ;;  %v2075_v40 = vld [vmem:[%s5547_s7 + $0x3918] sm:$0xff]  ;;  %v2073_v27 = vld [vmem:[%s5547_s7 + $0x3908] sm:$0xff] }
 0x737   : > { %4566 = vmatpush.xpose.msrb.mxu2 %v1934_v37  ;;  %4526 = vmatpush.xpose.msrb.mxu0 %v1932_v45  ;;  %v2066_v37 = vld [vmem:[%s5547_s7 + $0x38d0] sm:$0xff]  ;;  %v2064_v45 = vld [vmem:[%s5547_s7 + $0x38c0] sm:$0xff] }
 0x738   : > { %4586 = vmatpush.xpose.msrb.mxu3 %v1935_v32  ;;  %4546 = vmatpush.xpose.msrb.mxu1 %v1933_v57  ;;  %v2067_v32 = vld [vmem:[%s5547_s7 + $0x38d8] sm:$0xff]  ;;  %v2065_v57 = vld [vmem:[%s5547_s7 + $0x38c8] sm:$0xff] }
 0x73b   : > { %4567 = vmatpush.xpose.msrb.mxu2 %v1926_v29  ;;  %4527 = vmatpush.xpose.msrb.mxu0 %v1924_v42  ;;  %v2058_v29 = vld [vmem:[%s5547_s7 + $0x3890] sm:$0xff]  ;;  %v2056_v42 = vld [vmem:[%s5547_s7 + $0x3880] sm:$0xff] }
 0x73c   : > { %4587 = vmatpush.xpose.msrb.mxu3 %v1927_v47  ;;  %4547 = vmatpush.xpose.msrb.mxu1 %v1925_v51  ;;  %v2059_v47 = vld [vmem:[%s5547_s7 + $0x3898] sm:$0xff]  ;;  %v2057_v51 = vld [vmem:[%s5547_s7 + $0x3888] sm:$0xff] }
 0x73f   : > { %4568 = vmatpush.xpose.msrb.mxu2 %v1918_v36  ;;  %4528 = vmatpush.xpose.msrb.mxu0 %v1916_v8  ;;  %v2050_v36 = vld [vmem:[%s5547_s7 + $0x3850] sm:$0xff]  ;;  %v2051_v8 = vld [vmem:[%s5547_s7 + $0x3858] sm:$0xff] }
 0x740   : > { %4588 = vmatpush.xpose.msrb.mxu3 %v1919_v24  ;;  %4548 = vmatpush.xpose.msrb.mxu1 %v1917_v15  ;;  %v2049_v24 = vld [vmem:[%s5547_s7 + $0x3848] sm:$0xff]  ;;  %v2166_v15 = vld [vmem:[%s5547_s7 + $0x3bf0] sm:$0xff] }
 0x742   : > { %4569 = vmatmul.f32.vlgmr.msrb.gmra.mxu2 %v7610_v54  ;;  %4529 = vmatmul.f32.vlgmr.msrb.gmra.mxu0 %v7614_v6  ;;  %v2146_v54 = vld [vmem:[%s5547_s7 + $0x3b50] sm:$0xff]  ;;  %v2145_v6 = vld [vmem:[%s5547_s7 + $0x3b48] sm:$0xff] }
 0x743   : > { %4633 = vmatpush.xpose.msra.mxu2 %v2162_v62  ;;  %4593 = vmatpush.xpose.msra.mxu0 %v2160_v43  ;;  %v2048_v62 = vld [vmem:[%s5547_s7 + $0x3840] sm:$0xff]  ;;  %v2042_v43 = vld [vmem:[%s5547_s7 + $0x3810] sm:$0xff] }
 0x744   : > { %4653 = vmatpush.xpose.msra.mxu3 %v2163_v60  ;;  %4613 = vmatpush.xpose.msra.mxu1 %v2161_v19  ;;  %v2040_v60 = vld [vmem:[%s5547_s7 + $0x3800] sm:$0xff]  ;;  %v2043_v19 = vld [vmem:[%s5547_s7 + $0x3818] sm:$0xff] }
 0x745   : > { %4589 = vmatmul.f32.vlgmr.msrb.gmra.mxu3 %v7619_v33  ;;  %4549 = vmatmul.f32.vlgmr.msrb.gmra.mxu1 %v7623_v52  ;;  %v2138_v33 = vld [vmem:[%s5547_s7 + $0x3b10] sm:$0xff]  ;;  %v2137_v52 = vld [vmem:[%s5547_s7 + $0x3b08] sm:$0xff] }
 0x747   : > { %4634 = vmatpush.xpose.msra.mxu2 %v2154_v39  ;;  %4594 = vmatpush.xpose.msra.mxu0 %v2152_v16  ;;  %v2164_v39 = vld [vmem:[%s5547_s7 + $0x3be0] sm:$0xff]  ;;  %v2167_v16 = vld [vmem:[%s5547_s7 + $0x3bf8] sm:$0xff] }
 0x748   : > { %4654 = vmatpush.xpose.msra.mxu3 %v2155_v22  ;;  %4614 = vmatpush.xpose.msra.mxu1 %v2153_v63  ;;  %v2041_v22 = vld [vmem:[%s5547_s7 + $0x3808] sm:$0xff] }
 0x749   : > { %v2165_v63 = vld [vmem:[%s5547_s7 + $0x3be8] sm:$0xff] }
 0x74b   : > { %4635 = vmatpush.xpose.msra.mxu2 %v2146_v54  ;;  %4595 = vmatpush.xpose.msra.mxu0 %v2144_v48  ;;  %v2158_v54 = vld [vmem:[%s5547_s7 + $0x3bb0] sm:$0xff]  ;;  %v2156_v48 = vld [vmem:[%s5547_s7 + $0x3ba0] sm:$0xff] }
 0x74c   : > { %4655 = vmatpush.xpose.msra.mxu3 %v2147_v26  ;;  %4615 = vmatpush.xpose.msra.mxu1 %v2145_v6  ;;  %v2159_v26 = vld [vmem:[%s5547_s7 + $0x3bb8] sm:$0xff]  ;;  %v2157_v6 = vld [vmem:[%s5547_s7 + $0x3ba8] sm:$0xff] }
 0x74f   : > { %4636 = vmatpush.xpose.msra.mxu2 %v2138_v33  ;;  %4596 = vmatpush.xpose.msra.mxu0 %v2136_v5  ;;  %v2150_v33 = vld [vmem:[%s5547_s7 + $0x3b70] sm:$0xff]  ;;  %v2148_v5 = vld [vmem:[%s5547_s7 + $0x3b60] sm:$0xff] }
 0x750   : > { %4656 = vmatpush.xpose.msra.mxu3 %v2139_v31  ;;  %4616 = vmatpush.xpose.msra.mxu1 %v2137_v52  ;;  %v2151_v31 = vld [vmem:[%s5547_s7 + $0x3b78] sm:$0xff] }
 0x751   : > { %v2143_v52 = vld [vmem:[%s5547_s7 + $0x3b38] sm:$0xff] }
 0x753   : > { %4637 = vmatpush.xpose.msra.mxu2 %v2130_v59  ;;  %4597 = vmatpush.xpose.msra.mxu0 %v2128_v28  ;;  %v2141_v59 = vld [vmem:[%s5547_s7 + $0x3b28] sm:$0xff]  ;;  %v2132_v28 = vld [vmem:[%s5547_s7 + $0x3ae0] sm:$0xff] }
 0x754   : > { %4657 = vmatpush.xpose.msra.mxu3 %v2131_v12  ;;  %4617 = vmatpush.xpose.msra.mxu1 %v2129_v35  ;;  %v2135_v12 = vld [vmem:[%s5547_s7 + $0x3af8] sm:$0xff]  ;;  %v2133_v35 = vld [vmem:[%s5547_s7 + $0x3ae8] sm:$0xff] }
 0x757   : > { %4638 = vmatpush.xpose.msra.mxu2 %v2122_v11  ;;  %4598 = vmatpush.xpose.msra.mxu0 %v2120_v30  ;;  %v2126_v11 = vld [vmem:[%s5547_s7 + $0x3ab0] sm:$0xff]  ;;  %v2124_v30 = vld [vmem:[%s5547_s7 + $0x3aa0] sm:$0xff] }
 0x758   : > { %4658 = vmatpush.xpose.msra.mxu3 %v2123_v56  ;;  %4618 = vmatpush.xpose.msra.mxu1 %v2121_v58  ;;  %v2127_v56 = vld [vmem:[%s5547_s7 + $0x3ab8] sm:$0xff]  ;;  %v2125_v58 = vld [vmem:[%s5547_s7 + $0x3aa8] sm:$0xff] }
 0x75b   : > { %4639 = vmatpush.xpose.msra.mxu2 %v2114_v20  ;;  %4599 = vmatpush.xpose.msra.mxu0 %v2112_v61  ;;  %v2118_v20 = vld [vmem:[%s5547_s7 + $0x3a70] sm:$0xff]  ;;  %v2116_v61 = vld [vmem:[%s5547_s7 + $0x3a60] sm:$0xff] }
 0x75c   : > { %4659 = vmatpush.xpose.msra.mxu3 %v2115_v3  ;;  %4619 = vmatpush.xpose.msra.mxu1 %v2113_v14  ;;  %v2119_v3 = vld [vmem:[%s5547_s7 + $0x3a78] sm:$0xff]  ;;  %v2117_v14 = vld [vmem:[%s5547_s7 + $0x3a68] sm:$0xff] }
 0x75f   : > { %4640 = vmatpush.xpose.msra.mxu2 %v2106_v38  ;;  %4600 = vmatpush.xpose.msra.mxu0 %v2104_v50  ;;  %v2110_v38 = vld [vmem:[%s5547_s7 + $0x3a30] sm:$0xff]  ;;  %v2108_v50 = vld [vmem:[%s5547_s7 + $0x3a20] sm:$0xff] }
 0x760   : > { %4660 = vmatpush.xpose.msra.mxu3 %v2107_v9  ;;  %4620 = vmatpush.xpose.msra.mxu1 %v2105_v44  ;;  %v2111_v9 = vld [vmem:[%s5547_s7 + $0x3a38] sm:$0xff]  ;;  %v2109_v44 = vld [vmem:[%s5547_s7 + $0x3a28] sm:$0xff] }
 0x763   : > { %4641 = vmatpush.xpose.msra.mxu2 %v2098_v0  ;;  %4601 = vmatpush.xpose.msra.mxu0 %v2096_v46  ;;  %v2102_v0 = vld [vmem:[%s5547_s7 + $0x39f0] sm:$0xff]  ;;  %v2100_v46 = vld [vmem:[%s5547_s7 + $0x39e0] sm:$0xff] }
 0x764   : > { %4661 = vmatpush.xpose.msra.mxu3 %v2099_v13  ;;  %4621 = vmatpush.xpose.msra.mxu1 %v2097_v18  ;;  %v2103_v13 = vld [vmem:[%s5547_s7 + $0x39f8] sm:$0xff]  ;;  %v2101_v18 = vld [vmem:[%s5547_s7 + $0x39e8] sm:$0xff] }
 0x767   : > { %4642 = vmatpush.xpose.msra.mxu2 %v2090_v49  ;;  %4602 = vmatpush.xpose.msra.mxu0 %v2088_v17  ;;  %v2094_v49 = vld [vmem:[%s5547_s7 + $0x39b0] sm:$0xff]  ;;  %v2092_v17 = vld [vmem:[%s5547_s7 + $0x39a0] sm:$0xff] }
 0x768   : > { %4662 = vmatpush.xpose.msra.mxu3 %v2091_v41  ;;  %4622 = vmatpush.xpose.msra.mxu1 %v2089_v55  ;;  %v2095_v41 = vld [vmem:[%s5547_s7 + $0x39b8] sm:$0xff]  ;;  %v2093_v55 = vld [vmem:[%s5547_s7 + $0x39a8] sm:$0xff] }
 0x76b   : > { %4643 = vmatpush.xpose.msra.mxu2 %v2082_v21  ;;  %4603 = vmatpush.xpose.msra.mxu0 %v2080_v25  ;;  %v2086_v21 = vld [vmem:[%s5547_s7 + $0x3970] sm:$0xff]  ;;  %v2084_v25 = vld [vmem:[%s5547_s7 + $0x3960] sm:$0xff] }
 0x76c   : > { %4663 = vmatpush.xpose.msra.mxu3 %v2083_v53  ;;  %4623 = vmatpush.xpose.msra.mxu1 %v2081_v23  ;;  %v2087_v53 = vld [vmem:[%s5547_s7 + $0x3978] sm:$0xff]  ;;  %v2085_v23 = vld [vmem:[%s5547_s7 + $0x3968] sm:$0xff] }
 0x76f   : > { %4644 = vmatpush.xpose.msra.mxu2 %v2074_v10  ;;  %4604 = vmatpush.xpose.msra.mxu0 %v2072_v34  ;;  %v2078_v10 = vld [vmem:[%s5547_s7 + $0x3930] sm:$0xff]  ;;  %v2076_v34 = vld [vmem:[%s5547_s7 + $0x3920] sm:$0xff] }
 0x770   : > { %4664 = vmatpush.xpose.msra.mxu3 %v2075_v40  ;;  %4624 = vmatpush.xpose.msra.mxu1 %v2073_v27  ;;  %v2079_v40 = vld [vmem:[%s5547_s7 + $0x3938] sm:$0xff]  ;;  %v2077_v27 = vld [vmem:[%s5547_s7 + $0x3928] sm:$0xff] }
 0x773   : > { %4645 = vmatpush.xpose.msra.mxu2 %v2066_v37  ;;  %4605 = vmatpush.xpose.msra.mxu0 %v2064_v45  ;;  %v2070_v37 = vld [vmem:[%s5547_s7 + $0x38f0] sm:$0xff]  ;;  %v2068_v45 = vld [vmem:[%s5547_s7 + $0x38e0] sm:$0xff] }
 0x774   : > { %4665 = vmatpush.xpose.msra.mxu3 %v2067_v32  ;;  %4625 = vmatpush.xpose.msra.mxu1 %v2065_v57  ;;  %v2071_v32 = vld [vmem:[%s5547_s7 + $0x38f8] sm:$0xff]  ;;  %v2069_v57 = vld [vmem:[%s5547_s7 + $0x38e8] sm:$0xff] }
 0x777   : > { %4646 = vmatpush.xpose.msra.mxu2 %v2058_v29  ;;  %4606 = vmatpush.xpose.msra.mxu0 %v2056_v42  ;;  %v2062_v29 = vld [vmem:[%s5547_s7 + $0x38b0] sm:$0xff]  ;;  %v2060_v42 = vld [vmem:[%s5547_s7 + $0x38a0] sm:$0xff] }
 0x778   : > { %4666 = vmatpush.xpose.msra.mxu3 %v2059_v47  ;;  %4626 = vmatpush.xpose.msra.mxu1 %v2057_v51  ;;  %v2063_v47 = vld [vmem:[%s5547_s7 + $0x38b8] sm:$0xff]  ;;  %v2061_v51 = vld [vmem:[%s5547_s7 + $0x38a8] sm:$0xff] }
 0x77b   : > { %4647 = vmatpush.xpose.msra.mxu2 %v2050_v36  ;;  %4607 = vmatpush.xpose.msra.mxu0 %v2048_v62  ;;  %v2054_v36 = vld [vmem:[%s5547_s7 + $0x3870] sm:$0xff]  ;;  %v2052_v62 = vld [vmem:[%s5547_s7 + $0x3860] sm:$0xff] }
 0x77c   : > { %4667 = vmatpush.xpose.msra.mxu3 %v2051_v8  ;;  %4627 = vmatpush.xpose.msra.mxu1 %v2049_v24  ;;  %v2055_v8 = vld [vmem:[%s5547_s7 + $0x3878] sm:$0xff]  ;;  %v2053_v24 = vld [vmem:[%s5547_s7 + $0x3868] sm:$0xff] }
 0x77f   : > { %4648 = vmatpush.xpose.msra.mxu2 %v2042_v43  ;;  %4608 = vmatpush.xpose.msra.mxu0 %v2040_v60  ;;  %v2046_v43 = vld [vmem:[%s5547_s7 + $0x3830] sm:$0xff] }
 0x780   : > { %4668 = vmatpush.xpose.msra.mxu3 %v2043_v19  ;;  %4628 = vmatpush.xpose.msra.mxu1 %v2041_v22  ;;  %v2290_v60 = vld [vmem:[%s5547_s7 + $0x3fd0] sm:$0xff]  ;;  %v2047_v19 = vld [vmem:[%s5547_s7 + $0x3838] sm:$0xff]  ;;  %v2045_v22 = vld [vmem:[%s5547_s7 + $0x3828] sm:$0xff] }
 0x782   : > { %4649 = vmatmul.f32.vlgmr.msra.gmra.mxu2 %v7697_v1  ;;  %4609 = vmatmul.f32.vlgmr.msra.gmra.mxu0 %v7701_v7  ;;  %v2149_v1 = vld [vmem:[%s5547_s7 + $0x3b68] sm:$0xff]  ;;  %v2142_v7 = vld [vmem:[%s5547_s7 + $0x3b30] sm:$0xff] }
 0x783   : > { %4713 = vmatpush.xpose.msrb.mxu2 %v2166_v15  ;;  %4673 = vmatpush.xpose.msrb.mxu0 %v2164_v39  ;;  %v2044_v15 = vld [vmem:[%s5547_s7 + $0x3820] sm:$0xff] }
 0x784   : > { %4733 = vmatpush.xpose.msrb.mxu3 %v2167_v16  ;;  %4693 = vmatpush.xpose.msrb.mxu1 %v2165_v63  ;;  %v2288_v39 = vld [vmem:[%s5547_s7 + $0x3fc0] sm:$0xff]  ;;  %v2291_v16 = vld [vmem:[%s5547_s7 + $0x3fd8] sm:$0xff]  ;;  %v2289_v63 = vld [vmem:[%s5547_s7 + $0x3fc8] sm:$0xff] }
 0x785   : > { %4669 = vmatmul.f32.vlgmr.msra.gmra.mxu3 %v7705_v4  ;;  %4629 = vmatmul.f32.vlgmr.msra.gmra.mxu1 %v7709_v2  ;;  %v2140_v4 = vld [vmem:[%s5547_s7 + $0x3b20] sm:$0xff]  ;;  %v2134_v2 = vld [vmem:[%s5547_s7 + $0x3af0] sm:$0xff] }
 0x787   : > { %4714 = vmatpush.xpose.msrb.mxu2 %v2158_v54  ;;  %4674 = vmatpush.xpose.msrb.mxu0 %v2156_v48  ;;  %v2282_v54 = vld [vmem:[%s5547_s7 + $0x3f90] sm:$0xff]  ;;  %v2280_v48 = vld [vmem:[%s5547_s7 + $0x3f80] sm:$0xff] }
 0x788   : > { %4734 = vmatpush.xpose.msrb.mxu3 %v2159_v26  ;;  %4694 = vmatpush.xpose.msrb.mxu1 %v2157_v6  ;;  %v2283_v26 = vld [vmem:[%s5547_s7 + $0x3f98] sm:$0xff] }
 0x789   : > { %v7909_v6 = vld.sshfl [vmem:[#allocation1 + $0x30] sm:$0xff pattern:$0x73625140] }
 0x78b   : > { %4715 = vmatpush.xpose.msrb.mxu2 %v2150_v33  ;;  %4675 = vmatpush.xpose.msrb.mxu0 %v2148_v5  ;;  %v2281_v33 = vld [vmem:[%s5547_s7 + $0x3f88] sm:$0xff] }
 0x78c   : > { %4735 = vmatpush.xpose.msrb.mxu3 %v2151_v31  ;;  %4695 = vmatpush.xpose.msrb.mxu1 %v2149_v1  ;;  %v7913_v5 = vld.sshfl [vmem:[#allocation1 + $0x20] sm:$0xff pattern:$0x73625140]  ;;  %v2274_v31 = vld [vmem:[%s5547_s7 + $0x3f50] sm:$0xff] }
 0x78d   : > { %v7917_v1 = vld.sshfl [vmem:[#allocation1 + $0x38] sm:$0xff pattern:$0x73625140] }
 0x78f   : > { %4716 = vmatpush.xpose.msrb.mxu2 %v2142_v7  ;;  %4676 = vmatpush.xpose.msrb.mxu0 %v2140_v4  ;;  %v2272_v7 = vld [vmem:[%s5547_s7 + $0x3f40] sm:$0xff]  ;;  %v7921_v4 = vld.sshfl [vmem:[#allocation1 + $0x28] sm:$0xff pattern:$0x73625140] }
 0x790   : > { %4736 = vmatpush.xpose.msrb.mxu3 %v2143_v52  ;;  %4696 = vmatpush.xpose.msrb.mxu1 %v2141_v59  ;;  %v2275_v52 = vld [vmem:[%s5547_s7 + $0x3f58] sm:$0xff]  ;;  %v2273_v59 = vld [vmem:[%s5547_s7 + $0x3f48] sm:$0xff] }
 0x793   : > { %4717 = vmatpush.xpose.msrb.mxu2 %v2134_v2  ;;  %4677 = vmatpush.xpose.msrb.mxu0 %v2132_v28  ;;  %v2266_v2 = vld [vmem:[%s5547_s7 + $0x3f10] sm:$0xff]  ;;  %v2264_v28 = vld [vmem:[%s5547_s7 + $0x3f00] sm:$0xff] }
 0x794   : > { %4737 = vmatpush.xpose.msrb.mxu3 %v2135_v12  ;;  %4697 = vmatpush.xpose.msrb.mxu1 %v2133_v35  ;;  %v2267_v12 = vld [vmem:[%s5547_s7 + $0x3f18] sm:$0xff]  ;;  %v2265_v35 = vld [vmem:[%s5547_s7 + $0x3f08] sm:$0xff] }
 0x797   : > { %4718 = vmatpush.xpose.msrb.mxu2 %v2126_v11  ;;  %4678 = vmatpush.xpose.msrb.mxu0 %v2124_v30  ;;  %v2258_v11 = vld [vmem:[%s5547_s7 + $0x3ed0] sm:$0xff]  ;;  %v2256_v30 = vld [vmem:[%s5547_s7 + $0x3ec0] sm:$0xff] }
 0x798   : > { %4738 = vmatpush.xpose.msrb.mxu3 %v2127_v56  ;;  %4698 = vmatpush.xpose.msrb.mxu1 %v2125_v58  ;;  %v2259_v56 = vld [vmem:[%s5547_s7 + $0x3ed8] sm:$0xff]  ;;  %v2257_v58 = vld [vmem:[%s5547_s7 + $0x3ec8] sm:$0xff] }
 0x79b   : > { %4719 = vmatpush.xpose.msrb.mxu2 %v2118_v20  ;;  %4679 = vmatpush.xpose.msrb.mxu0 %v2116_v61  ;;  %v2250_v20 = vld [vmem:[%s5547_s7 + $0x3e90] sm:$0xff]  ;;  %v2248_v61 = vld [vmem:[%s5547_s7 + $0x3e80] sm:$0xff] }
 0x79c   : > { %4739 = vmatpush.xpose.msrb.mxu3 %v2119_v3  ;;  %4699 = vmatpush.xpose.msrb.mxu1 %v2117_v14  ;;  %v2251_v3 = vld [vmem:[%s5547_s7 + $0x3e98] sm:$0xff]  ;;  %v2249_v14 = vld [vmem:[%s5547_s7 + $0x3e88] sm:$0xff] }
 0x79f   : > { %4720 = vmatpush.xpose.msrb.mxu2 %v2110_v38  ;;  %4680 = vmatpush.xpose.msrb.mxu0 %v2108_v50  ;;  %v2242_v38 = vld [vmem:[%s5547_s7 + $0x3e50] sm:$0xff]  ;;  %v2240_v50 = vld [vmem:[%s5547_s7 + $0x3e40] sm:$0xff] }
 0x7a0   : > { %4740 = vmatpush.xpose.msrb.mxu3 %v2111_v9  ;;  %4700 = vmatpush.xpose.msrb.mxu1 %v2109_v44  ;;  %v2243_v9 = vld [vmem:[%s5547_s7 + $0x3e58] sm:$0xff]  ;;  %v2241_v44 = vld [vmem:[%s5547_s7 + $0x3e48] sm:$0xff] }
 0x7a3   : > { %4721 = vmatpush.xpose.msrb.mxu2 %v2102_v0  ;;  %4681 = vmatpush.xpose.msrb.mxu0 %v2100_v46  ;;  %v2234_v0 = vld [vmem:[%s5547_s7 + $0x3e10] sm:$0xff]  ;;  %v2232_v46 = vld [vmem:[%s5547_s7 + $0x3e00] sm:$0xff] }
 0x7a4   : > { %4741 = vmatpush.xpose.msrb.mxu3 %v2103_v13  ;;  %4701 = vmatpush.xpose.msrb.mxu1 %v2101_v18  ;;  %v2235_v13 = vld [vmem:[%s5547_s7 + $0x3e18] sm:$0xff]  ;;  %v2233_v18 = vld [vmem:[%s5547_s7 + $0x3e08] sm:$0xff] }
 0x7a7   : > { %4722 = vmatpush.xpose.msrb.mxu2 %v2094_v49  ;;  %4682 = vmatpush.xpose.msrb.mxu0 %v2092_v17  ;;  %v2226_v49 = vld [vmem:[%s5547_s7 + $0x3dd0] sm:$0xff]  ;;  %v2224_v17 = vld [vmem:[%s5547_s7 + $0x3dc0] sm:$0xff] }
 0x7a8   : > { %4742 = vmatpush.xpose.msrb.mxu3 %v2095_v41  ;;  %4702 = vmatpush.xpose.msrb.mxu1 %v2093_v55  ;;  %v2227_v41 = vld [vmem:[%s5547_s7 + $0x3dd8] sm:$0xff]  ;;  %v2225_v55 = vld [vmem:[%s5547_s7 + $0x3dc8] sm:$0xff] }
 0x7ab   : > { %4723 = vmatpush.xpose.msrb.mxu2 %v2086_v21  ;;  %4683 = vmatpush.xpose.msrb.mxu0 %v2084_v25  ;;  %v2218_v21 = vld [vmem:[%s5547_s7 + $0x3d90] sm:$0xff]  ;;  %v2216_v25 = vld [vmem:[%s5547_s7 + $0x3d80] sm:$0xff] }
 0x7ac   : > { %4743 = vmatpush.xpose.msrb.mxu3 %v2087_v53  ;;  %4703 = vmatpush.xpose.msrb.mxu1 %v2085_v23  ;;  %v2219_v53 = vld [vmem:[%s5547_s7 + $0x3d98] sm:$0xff]  ;;  %v2217_v23 = vld [vmem:[%s5547_s7 + $0x3d88] sm:$0xff] }
 0x7af   : > { %4724 = vmatpush.xpose.msrb.mxu2 %v2078_v10  ;;  %4684 = vmatpush.xpose.msrb.mxu0 %v2076_v34  ;;  %v2210_v10 = vld [vmem:[%s5547_s7 + $0x3d50] sm:$0xff]  ;;  %v2208_v34 = vld [vmem:[%s5547_s7 + $0x3d40] sm:$0xff] }
 0x7b0   : > { %4744 = vmatpush.xpose.msrb.mxu3 %v2079_v40  ;;  %4704 = vmatpush.xpose.msrb.mxu1 %v2077_v27  ;;  %v2211_v40 = vld [vmem:[%s5547_s7 + $0x3d58] sm:$0xff]  ;;  %v2209_v27 = vld [vmem:[%s5547_s7 + $0x3d48] sm:$0xff] }
 0x7b3   : > { %4725 = vmatpush.xpose.msrb.mxu2 %v2070_v37  ;;  %4685 = vmatpush.xpose.msrb.mxu0 %v2068_v45  ;;  %v2202_v37 = vld [vmem:[%s5547_s7 + $0x3d10] sm:$0xff]  ;;  %v2200_v45 = vld [vmem:[%s5547_s7 + $0x3d00] sm:$0xff] }
 0x7b4   : > { %4745 = vmatpush.xpose.msrb.mxu3 %v2071_v32  ;;  %4705 = vmatpush.xpose.msrb.mxu1 %v2069_v57  ;;  %v2203_v32 = vld [vmem:[%s5547_s7 + $0x3d18] sm:$0xff]  ;;  %v2201_v57 = vld [vmem:[%s5547_s7 + $0x3d08] sm:$0xff] }
 0x7b7   : > { %4726 = vmatpush.xpose.msrb.mxu2 %v2062_v29  ;;  %4686 = vmatpush.xpose.msrb.mxu0 %v2060_v42  ;;  %v2194_v29 = vld [vmem:[%s5547_s7 + $0x3cd0] sm:$0xff]  ;;  %v2192_v42 = vld [vmem:[%s5547_s7 + $0x3cc0] sm:$0xff] }
 0x7b8   : > { %4746 = vmatpush.xpose.msrb.mxu3 %v2063_v47  ;;  %4706 = vmatpush.xpose.msrb.mxu1 %v2061_v51  ;;  %v2195_v47 = vld [vmem:[%s5547_s7 + $0x3cd8] sm:$0xff]  ;;  %v2193_v51 = vld [vmem:[%s5547_s7 + $0x3cc8] sm:$0xff] }
 0x7bb   : > { %4727 = vmatpush.xpose.msrb.mxu2 %v2054_v36  ;;  %4687 = vmatpush.xpose.msrb.mxu0 %v2052_v62  ;;  %v2186_v36 = vld [vmem:[%s5547_s7 + $0x3c90] sm:$0xff]  ;;  %v2184_v62 = vld [vmem:[%s5547_s7 + $0x3c80] sm:$0xff] }
 0x7bc   : > { %4747 = vmatpush.xpose.msrb.mxu3 %v2055_v8  ;;  %4707 = vmatpush.xpose.msrb.mxu1 %v2053_v24  ;;  %v2187_v8 = vld [vmem:[%s5547_s7 + $0x3c98] sm:$0xff]  ;;  %v2185_v24 = vld [vmem:[%s5547_s7 + $0x3c88] sm:$0xff] }
 0x7bf   : > { %4728 = vmatpush.xpose.msrb.mxu2 %v2046_v43  ;;  %4688 = vmatpush.xpose.msrb.mxu0 %v2044_v15  ;;  %v2178_v43 = vld [vmem:[%s5547_s7 + $0x3c50] sm:$0xff]  ;;  %v2179_v15 = vld [vmem:[%s5547_s7 + $0x3c58] sm:$0xff] }
 0x7c0   : > { %4748 = vmatpush.xpose.msrb.mxu3 %v2047_v19  ;;  %4708 = vmatpush.xpose.msrb.mxu1 %v2045_v22  ;;  %v2177_v19 = vld [vmem:[%s5547_s7 + $0x3c48] sm:$0xff]  ;;  %v2168_v22 = vld [vmem:[%s5547_s7 + $0x3c00] sm:$0xff] }
 0x7c2   : > { %4729 = vmatmul.f32.vlgmr.msrb.gmra.mxu2 %v7909_v6  ;;  %4689 = vmatmul.f32.vlgmr.msrb.gmra.mxu0 %v7913_v5 }
 0x7c3   : > { %4793 = vmatpush.xpose.msra.mxu2 %v2290_v60  ;;  %4753 = vmatpush.xpose.msra.mxu0 %v2288_v39  ;;  %v2176_v60 = vld [vmem:[%s5547_s7 + $0x3c40] sm:$0xff]  ;;  %v2170_v39 = vld [vmem:[%s5547_s7 + $0x3c10] sm:$0xff] }
 0x7c4   : > { %4813 = vmatpush.xpose.msra.mxu3 %v2291_v16  ;;  %4773 = vmatpush.xpose.msra.mxu1 %v2289_v63  ;;  %v2294_v16 = vld [vmem:[%s5547_s7 + $0x3ff0] sm:$0xff]  ;;  %v2171_v63 = vld [vmem:[%s5547_s7 + $0x3c18] sm:$0xff] }
 0x7c5   : > { %4749 = vmatmul.f32.vlgmr.msrb.gmra.mxu3 %v7917_v1  ;;  %4709 = vmatmul.f32.vlgmr.msrb.gmra.mxu1 %v7921_v4 }
 0x7c7   : > { %4794 = vmatpush.xpose.msra.mxu2 %v2282_v54  ;;  %4754 = vmatpush.xpose.msra.mxu0 %v2280_v48  ;;  %v2292_v54 = vld [vmem:[%s5547_s7 + $0x3fe0] sm:$0xff]  ;;  %v2295_v48 = vld [vmem:[%s5547_s7 + $0x3ff8] sm:$0xff] }
 0x7c8   : > { %4814 = vmatpush.xpose.msra.mxu3 %v2283_v26  ;;  %4774 = vmatpush.xpose.msra.mxu1 %v2281_v33  ;;  %v2169_v26 = vld [vmem:[%s5547_s7 + $0x3c08] sm:$0xff] }
 0x7c9   : > { %v2293_v33 = vld [vmem:[%s5547_s7 + $0x3fe8] sm:$0xff] }
 0x7cb   : > { %4795 = vmatpush.xpose.msra.mxu2 %v2274_v31  ;;  %4755 = vmatpush.xpose.msra.mxu0 %v2272_v7  ;;  %v2286_v31 = vld [vmem:[%s5547_s7 + $0x3fb0] sm:$0xff]  ;;  %v2284_v7 = vld [vmem:[%s5547_s7 + $0x3fa0] sm:$0xff] }
 0x7cc   : > { %4815 = vmatpush.xpose.msra.mxu3 %v2275_v52  ;;  %4775 = vmatpush.xpose.msra.mxu1 %v2273_v59  ;;  %v2287_v52 = vld [vmem:[%s5547_s7 + $0x3fb8] sm:$0xff] }
 0x7cd   : > { %v5223_v59 = vld.sshfl [vmem:[#allocation1 + $0x10] sm:$0xff pattern:$0x73625140] }
 0x7cf   : > { %4796 = vmatpush.xpose.msra.mxu2 %v2266_v2  ;;  %4756 = vmatpush.xpose.msra.mxu0 %v2264_v28  ;;  %v2285_v2 = vld [vmem:[%s5547_s7 + $0x3fa8] sm:$0xff] }
 0x7d0   : > { %4816 = vmatpush.xpose.msra.mxu3 %v2267_v12  ;;  %4776 = vmatpush.xpose.msra.mxu1 %v2265_v35  ;;  %v5224_v28 = vld.sshfl [vmem:[#allocation1] sm:$0xff pattern:$0x73625140]  ;;  %v2278_v12 = vld [vmem:[%s5547_s7 + $0x3f70] sm:$0xff] }
 0x7d1   : > { %v5225_v35 = vld.sshfl [vmem:[#allocation1 + $0x18] sm:$0xff pattern:$0x73625140] }
 0x7d3   : > { %4797 = vmatpush.xpose.msra.mxu2 %v2258_v11  ;;  %4757 = vmatpush.xpose.msra.mxu0 %v2256_v30  ;;  %v2276_v11 = vld [vmem:[%s5547_s7 + $0x3f60] sm:$0xff]  ;;  %v5226_v30 = vld.sshfl [vmem:[#allocation1 + $0x8] sm:$0xff pattern:$0x73625140] }
 0x7d4   : > { %4817 = vmatpush.xpose.msra.mxu3 %v2259_v56  ;;  %4777 = vmatpush.xpose.msra.mxu1 %v2257_v58  ;;  %v2279_v56 = vld [vmem:[%s5547_s7 + $0x3f78] sm:$0xff]  ;;  %v2277_v58 = vld [vmem:[%s5547_s7 + $0x3f68] sm:$0xff] }
 0x7d7   : > { %4798 = vmatpush.xpose.msra.mxu2 %v2250_v20  ;;  %4758 = vmatpush.xpose.msra.mxu0 %v2248_v61  ;;  %v2270_v20 = vld [vmem:[%s5547_s7 + $0x3f30] sm:$0xff]  ;;  %v2268_v61 = vld [vmem:[%s5547_s7 + $0x3f20] sm:$0xff] }
 0x7d8   : > { %4818 = vmatpush.xpose.msra.mxu3 %v2251_v3  ;;  %4778 = vmatpush.xpose.msra.mxu1 %v2249_v14  ;;  %v2271_v3 = vld [vmem:[%s5547_s7 + $0x3f38] sm:$0xff]  ;;  %v2269_v14 = vld [vmem:[%s5547_s7 + $0x3f28] sm:$0xff] }
 0x7db   : > { %4799 = vmatpush.xpose.msra.mxu2 %v2242_v38  ;;  %4759 = vmatpush.xpose.msra.mxu0 %v2240_v50  ;;  %v2262_v38 = vld [vmem:[%s5547_s7 + $0x3ef0] sm:$0xff]  ;;  %v2260_v50 = vld [vmem:[%s5547_s7 + $0x3ee0] sm:$0xff] }
 0x7dc   : > { %4819 = vmatpush.xpose.msra.mxu3 %v2243_v9  ;;  %4779 = vmatpush.xpose.msra.mxu1 %v2241_v44  ;;  %v2263_v9 = vld [vmem:[%s5547_s7 + $0x3ef8] sm:$0xff]  ;;  %v2261_v44 = vld [vmem:[%s5547_s7 + $0x3ee8] sm:$0xff] }
 0x7df   : > { %4800 = vmatpush.xpose.msra.mxu2 %v2234_v0  ;;  %4760 = vmatpush.xpose.msra.mxu0 %v2232_v46  ;;  %v2254_v0 = vld [vmem:[%s5547_s7 + $0x3eb0] sm:$0xff]  ;;  %v2252_v46 = vld [vmem:[%s5547_s7 + $0x3ea0] sm:$0xff] }
 0x7e0   : > { %4820 = vmatpush.xpose.msra.mxu3 %v2235_v13  ;;  %4780 = vmatpush.xpose.msra.mxu1 %v2233_v18  ;;  %v2255_v13 = vld [vmem:[%s5547_s7 + $0x3eb8] sm:$0xff]  ;;  %v2253_v18 = vld [vmem:[%s5547_s7 + $0x3ea8] sm:$0xff] }
 0x7e3   : > { %4801 = vmatpush.xpose.msra.mxu2 %v2226_v49  ;;  %4761 = vmatpush.xpose.msra.mxu0 %v2224_v17  ;;  %v2246_v49 = vld [vmem:[%s5547_s7 + $0x3e70] sm:$0xff]  ;;  %v2244_v17 = vld [vmem:[%s5547_s7 + $0x3e60] sm:$0xff] }
 0x7e4   : > { %4821 = vmatpush.xpose.msra.mxu3 %v2227_v41  ;;  %4781 = vmatpush.xpose.msra.mxu1 %v2225_v55  ;;  %v2247_v41 = vld [vmem:[%s5547_s7 + $0x3e78] sm:$0xff]  ;;  %v2245_v55 = vld [vmem:[%s5547_s7 + $0x3e68] sm:$0xff] }
 0x7e7   : > { %4802 = vmatpush.xpose.msra.mxu2 %v2218_v21  ;;  %4762 = vmatpush.xpose.msra.mxu0 %v2216_v25  ;;  %v2238_v21 = vld [vmem:[%s5547_s7 + $0x3e30] sm:$0xff]  ;;  %v2236_v25 = vld [vmem:[%s5547_s7 + $0x3e20] sm:$0xff] }
 0x7e8   : > { %4822 = vmatpush.xpose.msra.mxu3 %v2219_v53  ;;  %4782 = vmatpush.xpose.msra.mxu1 %v2217_v23  ;;  %v2239_v53 = vld [vmem:[%s5547_s7 + $0x3e38] sm:$0xff]  ;;  %v2237_v23 = vld [vmem:[%s5547_s7 + $0x3e28] sm:$0xff] }
 0x7eb   : > { %4803 = vmatpush.xpose.msra.mxu2 %v2210_v10  ;;  %4763 = vmatpush.xpose.msra.mxu0 %v2208_v34  ;;  %v2230_v10 = vld [vmem:[%s5547_s7 + $0x3df0] sm:$0xff]  ;;  %v2228_v34 = vld [vmem:[%s5547_s7 + $0x3de0] sm:$0xff] }
 0x7ec   : > { %4823 = vmatpush.xpose.msra.mxu3 %v2211_v40  ;;  %4783 = vmatpush.xpose.msra.mxu1 %v2209_v27  ;;  %v2231_v40 = vld [vmem:[%s5547_s7 + $0x3df8] sm:$0xff]  ;;  %v2229_v27 = vld [vmem:[%s5547_s7 + $0x3de8] sm:$0xff] }
 0x7ef   : > { %4804 = vmatpush.xpose.msra.mxu2 %v2202_v37  ;;  %4764 = vmatpush.xpose.msra.mxu0 %v2200_v45  ;;  %v2222_v37 = vld [vmem:[%s5547_s7 + $0x3db0] sm:$0xff]  ;;  %v2220_v45 = vld [vmem:[%s5547_s7 + $0x3da0] sm:$0xff] }
 0x7f0   : > { %4824 = vmatpush.xpose.msra.mxu3 %v2203_v32  ;;  %4784 = vmatpush.xpose.msra.mxu1 %v2201_v57  ;;  %v2223_v32 = vld [vmem:[%s5547_s7 + $0x3db8] sm:$0xff]  ;;  %v2221_v57 = vld [vmem:[%s5547_s7 + $0x3da8] sm:$0xff] }
 0x7f3   : > { %4805 = vmatpush.xpose.msra.mxu2 %v2194_v29  ;;  %4765 = vmatpush.xpose.msra.mxu0 %v2192_v42  ;;  %v2214_v29 = vld [vmem:[%s5547_s7 + $0x3d70] sm:$0xff]  ;;  %v2212_v42 = vld [vmem:[%s5547_s7 + $0x3d60] sm:$0xff] }
 0x7f4   : > { %4825 = vmatpush.xpose.msra.mxu3 %v2195_v47  ;;  %4785 = vmatpush.xpose.msra.mxu1 %v2193_v51  ;;  %v2215_v47 = vld [vmem:[%s5547_s7 + $0x3d78] sm:$0xff]  ;;  %v2213_v51 = vld [vmem:[%s5547_s7 + $0x3d68] sm:$0xff] }
 0x7f7   : > { %4806 = vmatpush.xpose.msra.mxu2 %v2186_v36  ;;  %4766 = vmatpush.xpose.msra.mxu0 %v2184_v62  ;;  %v2206_v36 = vld [vmem:[%s5547_s7 + $0x3d30] sm:$0xff]  ;;  %v2204_v62 = vld [vmem:[%s5547_s7 + $0x3d20] sm:$0xff] }
 0x7f8   : > { %4826 = vmatpush.xpose.msra.mxu3 %v2187_v8  ;;  %4786 = vmatpush.xpose.msra.mxu1 %v2185_v24  ;;  %v2207_v8 = vld [vmem:[%s5547_s7 + $0x3d38] sm:$0xff]  ;;  %v2205_v24 = vld [vmem:[%s5547_s7 + $0x3d28] sm:$0xff] }
 0x7fb   : > { %4807 = vmatpush.xpose.msra.mxu2 %v2178_v43  ;;  %4767 = vmatpush.xpose.msra.mxu0 %v2176_v60  ;;  %v2198_v43 = vld [vmem:[%s5547_s7 + $0x3cf0] sm:$0xff]  ;;  %v2196_v60 = vld [vmem:[%s5547_s7 + $0x3ce0] sm:$0xff] }
 0x7fc   : > { %4827 = vmatpush.xpose.msra.mxu3 %v2179_v15  ;;  %4787 = vmatpush.xpose.msra.mxu1 %v2177_v19  ;;  %v2199_v15 = vld [vmem:[%s5547_s7 + $0x3cf8] sm:$0xff]  ;;  %v2197_v19 = vld [vmem:[%s5547_s7 + $0x3ce8] sm:$0xff] }
 0x7ff   : > { %4808 = vmatpush.xpose.msra.mxu2 %v2170_v39  ;;  %4768 = vmatpush.xpose.msra.mxu0 %v2168_v22  ;;  %v2190_v39 = vld [vmem:[%s5547_s7 + $0x3cb0] sm:$0xff]  ;;  %v2191_v22 = vld [vmem:[%s5547_s7 + $0x3cb8] sm:$0xff] }
 0x800   : > { %4828 = vmatpush.xpose.msra.mxu3 %v2171_v63  ;;  %4788 = vmatpush.xpose.msra.mxu1 %v2169_v26  ;;  %v2189_v63 = vld [vmem:[%s5547_s7 + $0x3ca8] sm:$0xff]  ;;  %v2183_v26 = vld [vmem:[%s5547_s7 + $0x3c78] sm:$0xff] }
 0x802   : > { %4809 = vmatmul.f32.vlgmr.msra.gmra.mxu2 %v5223_v59  ;;  %4769 = vmatmul.f32.vlgmr.msra.gmra.mxu0 %v5224_v28  ;;  %v2173_v59 = vld [vmem:[%s5547_s7 + $0x3c28] sm:$0xff]  ;;  %v4310_v28 = vpop.f32.mrf.mxu1 }
 0x803   : > { %4873 = vmatpush.xpose.msrb.mxu2 %v2294_v16  ;;  %4833 = vmatpush.xpose.msrb.mxu0 %v2292_v54  ;;  %v2188_v16 = vld [vmem:[%s5547_s7 + $0x3ca0] sm:$0xff]  ;;  %v2182_v54 = vld [vmem:[%s5547_s7 + $0x3c70] sm:$0xff] }
 0x804   : > { %4893 = vmatpush.xpose.msrb.mxu3 %v2295_v48  ;;  %4853 = vmatpush.xpose.msrb.mxu1 %v2293_v33  ;;  %v2180_v48 = vld [vmem:[%s5547_s7 + $0x3c60] sm:$0xff]  ;;  %v2181_v33 = vld [vmem:[%s5547_s7 + $0x3c68] sm:$0xff] }
 0x805   : > { %4829 = vmatmul.f32.vlgmr.msra.gmra.mxu3 %v5225_v35  ;;  %4789 = vmatmul.f32.vlgmr.msra.gmra.mxu1 %v5226_v30 }
 0x807   : > { %4874 = vmatpush.xpose.msrb.mxu2 %v2286_v31  ;;  %4834 = vmatpush.xpose.msrb.mxu0 %v2284_v7  ;;  %v2174_v31 = vld [vmem:[%s5547_s7 + $0x3c30] sm:$0xff]  ;;  %v2172_v7 = vld [vmem:[%s5547_s7 + $0x3c20] sm:$0xff] }
 0x808   : > { %4894 = vmatpush.xpose.msrb.mxu3 %v2287_v52  ;;  %4854 = vmatpush.xpose.msrb.mxu1 %v2285_v2  ;;  %v2175_v52 = vld [vmem:[%s5547_s7 + $0x3c38] sm:$0xff]  ;;  %v4290_v2 = vpop.f32.mrf.mxu0 }
 0x80a   : > { %v4390_v30 = vpop.f32.mrf.mxu1 }
 0x80b   : > { %4875 = vmatpush.xpose.msrb.mxu2 %v2278_v12  ;;  %4835 = vmatpush.xpose.msrb.mxu0 %v2276_v11  ;;  %v4330_v12 = vpop.f32.mrf.mxu2  ;;  %v4350_v11 = vpop.f32.mrf.mxu3 }
 0x80c   : > { %4895 = vmatpush.xpose.msrb.mxu3 %v2279_v56  ;;  %4855 = vmatpush.xpose.msrb.mxu1 %v2277_v58 }
 0x80f   : > { %4876 = vmatpush.xpose.msrb.mxu2 %v2270_v20  ;;  %4836 = vmatpush.xpose.msrb.mxu0 %v2268_v61 }
 0x810   : > { %4896 = vmatpush.xpose.msrb.mxu3 %v2271_v3  ;;  %4856 = vmatpush.xpose.msrb.mxu1 %v2269_v14  ;;  %v4370_v35 = vpop.f32.mrf.mxu0 }
 0x812   : > { %v4470_v61 = vpop.f32.mrf.mxu1 }
 0x813   : > { %4877 = vmatpush.xpose.msrb.mxu2 %v2262_v38  ;;  %4837 = vmatpush.xpose.msrb.mxu0 %v2260_v50  ;;  %v4410_v56 = vpop.f32.mrf.mxu2  ;;  %v8046_v20 = vpop.f32.mrf.mxu3 }
 0x814   : > { %4897 = vmatpush.xpose.msrb.mxu3 %v2263_v9  ;;  %4857 = vmatpush.xpose.msrb.mxu1 %v2261_v44  ;;  %v5227_v9 = vld [vmem:[%s6270_s23 + $0x8] sm:$0xff] }
 0x815   : > { %v2313_v44 = vperm.slane %v5227_v9, 5 }
 0x817   : > { %4878 = vmatpush.xpose.msrb.mxu2 %v2254_v0  ;;  %4838 = vmatpush.xpose.msrb.mxu0 %v2252_v46  ;;  %v2314_v46 = vperm.slane %v5227_v9, 6 }
 0x818   : > { %4898 = vmatpush.xpose.msrb.mxu3 %v2255_v13  ;;  %4858 = vmatpush.xpose.msrb.mxu1 %v2253_v18  ;;  %v4450_v58 = vpop.f32.mrf.mxu0 }
 0x819   : > { %v4451_v18 = vadd.f32 %v4450_v58, %v2313_v44 }
 0x81b   : > { %4879 = vmatpush.xpose.msrb.mxu2 %v2246_v49  ;;  %4839 = vmatpush.xpose.msrb.mxu0 %v2244_v17  ;;  %v4510_v14 = vpop.f32.mrf.mxu3  ;;  %v2312_v17 = vperm.slane %v5227_v9, 4 }
 0x81c   : > { %4899 = vmatpush.xpose.msrb.mxu3 %v2247_v41  ;;  %4859 = vmatpush.xpose.msrb.mxu1 %v2245_v55 }
 0x81f   : > { %4880 = vmatpush.xpose.msrb.mxu2 %v2238_v21  ;;  %4840 = vmatpush.xpose.msrb.mxu0 %v2236_v25  ;;  %v4471_v21 = vadd.f32 %v4470_v61, %v4451_v18  ;;  %v2315_v25 = vperm.slane %v5227_v9, 7 }
 0x820   : > { %4900 = vmatpush.xpose.msrb.mxu3 %v2239_v53  ;;  %4860 = vmatpush.xpose.msrb.mxu1 %v2237_v23  ;;  %v4530_v3 = vpop.f32.mrf.mxu0  ;;  %v4291_v53 = vadd.f32 %v4290_v2, %v2312_v17 }
 0x823   : > { %4881 = vmatpush.xpose.msrb.mxu2 %v2230_v10  ;;  %4841 = vmatpush.xpose.msrb.mxu0 %v2228_v34  ;;  %v4590_v50 = vpop.f32.mrf.mxu3 }
 0x824   : > { %4901 = vmatpush.xpose.msrb.mxu3 %v2231_v40  ;;  %4861 = vmatpush.xpose.msrb.mxu1 %v2229_v27 }
 0x827   : > { %4882 = vmatpush.xpose.msrb.mxu2 %v2222_v37  ;;  %4842 = vmatpush.xpose.msrb.mxu0 %v2220_v45  ;;  %v4311_v37 = vadd.f32 %v4310_v28, %v4291_v53 }
 0x828   : > { %4902 = vmatpush.xpose.msrb.mxu3 %v2223_v32  ;;  %4862 = vmatpush.xpose.msrb.mxu1 %v2221_v57 }
 0x82b   : > { %4883 = vmatpush.xpose.msrb.mxu2 %v2214_v29  ;;  %4843 = vmatpush.xpose.msrb.mxu0 %v2212_v42  ;;  %v4670_v49 = vpop.f32.mrf.mxu3 }
 0x82c   : > { %4903 = vmatpush.xpose.msrb.mxu3 %v2215_v47  ;;  %4863 = vmatpush.xpose.msrb.mxu1 %v2213_v51  ;;  %v4331_v47 = vadd.f32 %v4330_v12, %v4311_v37 }
 0x82f   : > { %4884 = vmatpush.xpose.msrb.mxu2 %v2206_v36  ;;  %4844 = vmatpush.xpose.msrb.mxu0 %v2204_v62 }
 0x830   : > { %4904 = vmatpush.xpose.msrb.mxu3 %v2207_v8  ;;  %4864 = vmatpush.xpose.msrb.mxu1 %v2205_v24  ;;  %v4351_v24 = vadd.f32 %v4350_v11, %v4331_v47 }
 0x833   : > { %4885 = vmatpush.xpose.msrb.mxu2 %v2198_v43  ;;  %4845 = vmatpush.xpose.msrb.mxu0 %v2196_v60 }
 0x834   : > { %4905 = vmatpush.xpose.msrb.mxu3 %v2199_v15  ;;  %4865 = vmatpush.xpose.msrb.mxu1 %v2197_v19 }
 0x837   : > { %4886 = vmatpush.xpose.msrb.mxu2 %v2190_v39  ;;  %4846 = vmatpush.xpose.msrb.mxu0 %v2188_v16  ;;  %v4371_v39 = vadd.f32 %v4370_v35, %v4351_v24 }
 0x838   : > { %4906 = vmatpush.xpose.msrb.mxu3 %v2191_v22  ;;  %4866 = vmatpush.xpose.msrb.mxu1 %v2189_v63 }
 0x83b   : > { %4887 = vmatpush.xpose.msrb.mxu2 %v2182_v54  ;;  %4847 = vmatpush.xpose.msrb.mxu0 %v2180_v48  ;;  %v4391_v48 = vadd.f32 %v4390_v30, %v4371_v39 }
 0x83c   : > { %4907 = vmatpush.xpose.msrb.mxu3 %v2183_v26  ;;  %4867 = vmatpush.xpose.msrb.mxu1 %v2181_v33 }
 0x83f   : > { %4888 = vmatpush.xpose.msrb.mxu2 %v2174_v31  ;;  %4848 = vmatpush.xpose.msrb.mxu0 %v2172_v7 }
 0x840   : > { %4908 = vmatpush.xpose.msrb.mxu3 %v2175_v52  ;;  %4868 = vmatpush.xpose.msrb.mxu1 %v2173_v59  ;;  %v4411_v59 = vadd.f32 %v4410_v56, %v4391_v48 }
 0x842   : > { %4889 = vmatmul.f32.vlgmr.msrb.gmra.mxu2 %v7909_v6  ;;  %4849 = vmatmul.f32.vlgmr.msrb.gmra.mxu0 %v7913_v5  ;;  %v4490_v6 = vpop.f32.mrf.mxu2  ;;  %v4550_v5 = vpop.f32.mrf.mxu1  ;;  %v4431_v30 = vadd.f32 %v8046_v20, %v4411_v59 }
 0x843   : > { %4909 = vmatmul.f32.vlgmr.msrb.gmra.mxu3 %v7917_v1  ;;  %4869 = vmatmul.f32.vlgmr.msrb.gmra.mxu1 %v7921_v4  ;;  %v4610_v1 = vpop.f32.mrf.mxu0  ;;  %v4491_v40 = vadd.f32 %v4490_v6, %v4471_v21 }
 0x844   : > { %v4611_v41 = vadd.f32 %v4610_v1, %v2314_v46 }
 0x845   : > { %v4511_v29 = vadd.f32 %v4510_v14, %v4491_v40 }
 0x847   : > { %v4531_v62 = vadd.f32 %v4530_v3, %v4511_v29 }
 0x848   : > { %v4750_v32 = vpop.f32.mrf.mxu3 }
 0x849   : > { %v4551_v15 = vadd.f32 %v4550_v5, %v4531_v62 }
 0x84a   : > { %v4570_v38 = vpop.f32.mrf.mxu2  ;;  %v4630_v4 = vpop.f32.mrf.mxu1 }
 0x84b   : > { %v4690_v13 = vpop.f32.mrf.mxu0  ;;  %v4631_v23 = vadd.f32 %v4630_v4, %v4611_v41  ;;  %v4571_v22 = vadd.f32 %v4570_v38, %v4551_v15 }
 0x84d   : > { %v4591_v7 = vadd.f32 %v4590_v50, %v4571_v22 }
 0x84f   : > { %v4938_v35 = vrot.slane %v4591_v7, 6 }
 0x851   : > { %v4953_v56 = vsel %vm4941_vm0, %v4431_v30, %v4938_v35 }
 0x852   : > { %v4650_v0 = vpop.f32.mrf.mxu2  ;;  %v4710_v55 = vpop.f32.mrf.mxu1 }
 0x853   : > { %v4651_v45 = vadd.f32 %v4650_v0, %v4631_v23 }
 0x855   : > { %v4671_v51 = vadd.f32 %v4670_v49, %v4651_v45 }
 0x857   : > { %v4691_v43 = vadd.f32 %v4690_v13, %v4671_v51 }
 0x859   : > { %v4711_v16 = vadd.f32 %v4710_v55, %v4691_v43 }
 0x85a   : > { %v4730_v10 = vpop.f32.mrf.mxu2 }
 0x85b   : > { %v4731_v26 = vadd.f32 %v4730_v10, %v4711_v16 }
 0x85d   : > { %v4751_v2 = vadd.f32 %v4750_v32, %v4731_v26 }
 0x85f   : > { %v4939_v58 = vrot.slane %v4751_v2, 4 }
 0x87f   : > { %v4770_v34 = vpop.f32.mrf.mxu0 }
 0x880   : > { %v4771_v27 = vadd.f32 %v4770_v34, %v2315_v25 }
 0x882   : > { %v4790_v57 = vpop.f32.mrf.mxu1 }
 0x883   : > { %v4791_v42 = vadd.f32 %v4790_v57, %v4771_v27 }
 0x885   : > { %v4810_v36 = vpop.f32.mrf.mxu2 }
 0x886   : > { %v4811_v8 = vadd.f32 %v4810_v36, %v4791_v42 }
 0x888   : > { %v4830_v60 = vpop.f32.mrf.mxu3 }
 0x889   : > { %v4831_v19 = vadd.f32 %v4830_v60, %v4811_v8 }
 0x8bf   : > { %v4850_v63 = vpop.f32.mrf.mxu0 }
 0x8c0   : > { %v4851_v54 = vadd.f32 %v4850_v63, %v4831_v19  ;;  %v4870_v33 = vpop.f32.mrf.mxu1 }
 0x8c2   : > { %v4871_v31 = vadd.f32 %v4870_v33, %v4851_v54 }
 0x8c5   : > { %v4890_v52 = vpop.f32.mrf.mxu2 }
 0x8c6   : > { %v4891_v28 = vadd.f32 %v4890_v52, %v4871_v31  ;;  %v4910_v12 = vpop.f32.mrf.mxu3 }
 0x8c8   : > { %v4911_v11 = vadd.f32 %v4910_v12, %v4891_v28 }
 0x8ca   : > { %v4940_v61 = vrot.slane %v4911_v11, 2 }
 0x8cc   : > { %v4954_v6 = vsel %vm4943_vm1, %v4939_v58, %v4940_v61 }
 0x8cd   : > { %v4955_v3 = vsel %vm4945_vm2, %v4953_v56, %v4954_v6 }
 0x8ce   : > { %4963 = vst [vmem:[%s6363_s10 + $0x18] sm:$0xff] %v4955_v3 }
 0x8cf   : > { %5345 = shalt.err (!%p5342_p5)
}
 0x8d0   : > { %5114 = dma.vmem_to_hbm [thread:$0]  (%p5498_p11), %s4979_s26, 512, %s4981_s21, %s4965_s20  }
 0x8d1 PF: > { %s4992_s28 = sand.u32 1, %s5376_s12   ;;  %p8099_p7 = scmp.ge.s32.totalorder %s5388_s15, 2 }
 0x8d2   : > { %s4993_s7 = scalar_lea.sflag [#allocation4], %s4992_s28 }
 0x8d3   : > { %p5128_p10 = pnand %p8099_p7, %p5502_p12 }
 0x8d5   : > { %p5129_p13 = pneg %p5128_p10 }
 0x8d7   : > { %5371 = dma.done.wait (%p5129_p13), %s4993_s7, 512  }
 0x8d8   : > { %5373 = vsyncadd (%p5129_p13), %s4993_s7, 4294966784  ;;  %p17_p0 = scmp.ge.s32.totalorder %s5434_s16, 4   ;;  %s8100_s12 = smov %s5380_s13 }
 0x8d9   : > { %s8101_s13 = smov %s5384_s14  ;;  %s8102_s14 = smov %s5445_s19 }
 0x8da   : > { %s8103_s15 = smov %s5434_s16  ;;  %19 = sbr.rel (!%p17_p0) target bundleno = 8 (0x8), region = 94 }
 0x8df   :  { %4999 = vsyncpa [#allocation3], 1 }
 0x8e0   :  { %5001 = vsyncpa [#allocation3 + $0x1], 1 }
 0x8e1   :  { %5002 = vsyncpa [#allocation6], 1 }
 0x8e2   :  { %5004 = vsyncpa [#allocation6 + $0x1], 1 }
 0x8e3   :  { %5005 = vsyncpa [#allocation4], 1 }
 0x8e4   :  { %5007 = vsyncpa [#allocation4 + $0x1], 1 }

</bundles_post_ra>
